<compile_context>
chip_gen: v7x
topology: tpu7x:2x2x1
jax: 0.10.0
libtpu: 0.0.40
codegen_flags: <defaults>
</compile_context>

<pallas_src>
import math

import jax
import jax.numpy as jnp
from jax.experimental import pallas as pl
from jax.experimental.pallas import tpu as pltpu


_MXU_DTYPE = jnp.bfloat16          # matmul operand dtype; accumulation is always f32


# ---------------------------------------------------------------------------
# In-kernel building blocks (operate on traced values resident in vregs/VMEM)
# ---------------------------------------------------------------------------

def _conv_block(h, p):
    """Conv1d (valid, stride 1) -> bias -> ReLU -> BatchNorm1d(eval).  h: (L, C_in)."""
    w_ref, bss_ref = p                       # w: (K, C_in, C_out) bf16, bss: (3, C_out) f32
    K = w_ref.shape[0]
    L_out = h.shape[0] - K + 1
    hb = h.astype(_MXU_DTYPE)
    acc = None
    for k in range(K):                       # K in {1, 3}: static unroll
        d = jnp.dot(hb[k:k + L_out, :], w_ref[k].astype(_MXU_DTYPE),
                    preferred_element_type=jnp.float32)
        acc = d if acc is None else acc + d
    bss = bss_ref[...]                       # rows = [bias, bn_scale, bn_shift]
    y = jnp.maximum(acc + bss[0:1, :], 0.0)  # bias + ReLU
    return y * bss[1:2, :] + bss[2:3, :]     # folded BatchNorm (inference)


def _conv_block_cat(skip, h, p):
    """Conv block over the channel-concat [skip, h] WITHOUT materializing the concat:
    the conv weight is split along C_in and the two partial convs are summed."""
    w_ref, bss_ref = p
    K = w_ref.shape[0]
    Cs = skip.shape[1]
    L_out = h.shape[0] - K + 1
    sb = skip.astype(_MXU_DTYPE)
    hb = h.astype(_MXU_DTYPE)
    acc = None
    for k in range(K):
        wk = w_ref[k]                        # (Cs + Ch, C_out)
        d = jnp.dot(sb[k:k + L_out, :], wk[:Cs, :].astype(_MXU_DTYPE),
                    preferred_element_type=jnp.float32)
        d = d + jnp.dot(hb[k:k + L_out, :], wk[Cs:, :].astype(_MXU_DTYPE),
                        preferred_element_type=jnp.float32)
        acc = d if acc is None else acc + d
    bss = bss_ref[...]
    y = jnp.maximum(acc + bss[0:1, :], 0.0)
    return y * bss[1:2, :] + bss[2:3, :]


def _maxpool2(h):
    """MaxPool1d(kernel=2, stride=2) on (L, C): exact 0/1 even/odd row selection via
    MXU matmuls (f32 -> pure data movement), then an elementwise max."""
    L, _ = h.shape
    half = L // 2
    r = jax.lax.broadcasted_iota(jnp.int32, (half, L), 0)
    c = jax.lax.broadcasted_iota(jnp.int32, (half, L), 1)
    sel_even = (c == 2 * r).astype(jnp.float32)
    sel_odd = (c == 2 * r + 1).astype(jnp.float32)
    h_even = jnp.dot(sel_even, h, preferred_element_type=jnp.float32)
    h_odd = jnp.dot(sel_odd, h, preferred_element_type=jnp.float32)
    return jnp.maximum(h_even, h_odd)


def _deconv(h, p):
    """ConvTranspose1d with kernel_size == stride == K (non-overlapping taps):
       out[K*l + k, co] = sum_ci h[l, ci] * w[k, ci, co] + b[co].
    The tap interleave is built lane-contiguously via exact 0/1 selection matmuls."""
    w_ref, b_ref = p                         # w: (K, C_in, C_out) bf16, b: (1, C_out) f32
    K, _, C_out = w_ref.shape
    L = h.shape[0]
    hb = h.astype(_MXU_DTYPE)
    m = jax.lax.broadcasted_iota(jnp.int32, (K * L, L), 0)
    l = jax.lax.broadcasted_iota(jnp.int32, (K * L, L), 1)
    z = jnp.zeros((K * L, C_out), jnp.float32)
    for k in range(K):
        yk = jnp.dot(hb, w_ref[k].astype(_MXU_DTYPE),
                     preferred_element_type=jnp.float32)   # (L, C_out)
        sk = (m == K * l + k).astype(jnp.float32)           # (K*L, L), one 1 per row
        z = z + jnp.dot(sk, yk, preferred_element_type=jnp.float32)
    return z + b_ref[...]


def _head(h, w_ref, b_ref, total_len):
    """ConstantPad1d(to total_len) -> conv1(1x1) -> tanh -> AvgPool1d(total_len)
       -> conv1(1x1, shared weights) -> softmax(channels).
    Zero padding folded in closed form: each padded row contributes tanh(bias)."""
    F = h.shape[0]
    pad_rows = total_len - F
    w = w_ref[...].astype(_MXU_DTYPE)
    b = b_ref[...]                                           # (1, C) f32
    y = jnp.tanh(jnp.dot(h.astype(_MXU_DTYPE), w,
                         preferred_element_type=jnp.float32) + b)   # (F, C)
    total = jnp.sum(y, axis=0, keepdims=True) + pad_rows * jnp.tanh(b)
    mean = total / float(total_len)                          # AvgPool over full length
    z = jnp.dot(mean.astype(_MXU_DTYPE), w, preferred_element_type=jnp.float32) + b
    z = z - jnp.max(z, axis=-1, keepdims=True)
    e = jnp.exp(z)
    return e / jnp.sum(e, axis=-1, keepdims=True)            # (1, C)


# ---------------------------------------------------------------------------
# Fused forward pass (one pallas_call, grid over the batch)
# ---------------------------------------------------------------------------

def _cast_weights_bf16(params):
    """Cast conv / deconv / head matmul weights to bf16 once (operand dtype of the
    MXU); biases and folded BatchNorm scale/shift stay f32."""
    def c(t):
        w, other = t
        return (w.astype(_MXU_DTYPE), other)
    q = {'enc': [c(t) for t in params['enc']]}
    for k in ('d1_1', 'd1_2', 'd1_3', 'd2_1', 'd2_2', 'd2_3',
              'd3_1', 'd3_2', 'd3_3', 'd4_1', 'd4_2', 'd4_3', 'conv1'):
        q[k] = c(params[k])
    return q


def unet_forward(params, x_ncl):
    """Full UNet.forward.  x_ncl: (N, C_in, L) in PyTorch NCW layout -> (N, class_num)."""
    N, C_in, L_in = x_ncl.shape
    class_num = params['conv1'][0].shape[0]
    x_nlc = jnp.transpose(x_ncl, (0, 2, 1))                  # NCW -> NLC, once
    dev_params = _cast_weights_bf16(params)
    leaves, treedef = jax.tree_util.tree_flatten(dev_params)

    def kernel(*refs):
        x_ref, o_ref = refs[0], refs[-1]
        p = jax.tree_util.tree_unflatten(treedef, list(refs[1:-1]))

        h = x_ref[0]                                         # (L_in, C_in), this batch row
        enc = p['enc']
        saves = []
        for lvl in range(4):                                 # [conv, conv, (save), pool] x 4
            h = _conv_block(h, enc[2 * lvl])
            h = _conv_block(h, enc[2 * lvl + 1])
            saves.append(h)                                  # saved BEFORE the pooling layer
            h = _maxpool2(h)
        h = _conv_block(h, enc[8])                           # 128 -> 256
        # Dropout1d(p=0.5): identity in inference mode
        h = _conv_block(h, enc[9])                           # 256 -> 256

        # decoder (mirrors forward(); the unused self.Decoder ModuleList is not run)
        h = _deconv(h, p['d1_1'])
        h = _conv_block_cat(saves[3][4:4 + h.shape[0], :], h, p['d1_2'])
        h = _conv_block(h, p['d1_3'])

        h = _deconv(h, p['d2_1'])
        h = _conv_block_cat(saves[2][4:4 + h.shape[0], :], h, p['d2_2'])
        h = _conv_block(h, p['d2_3'])

        h = _deconv(h, p['d3_1'])
        h = _conv_block_cat(saves[1][4:4 + h.shape[0], :], h, p['d3_2'])
        h = _conv_block(h, p['d3_3'])

        h = _deconv(h, p['d4_1'])
        h = _conv_block_cat(saves[0][4:4 + h.shape[0], :], h, p['d4_2'])
        h = _conv_block(h, p['d4_3'])                        # 1x1 conv block -> class_num

        probs = _head(h, p['conv1'][0], p['conv1'][1], L_in)  # (1, class_num)
        o_ref[0] = probs.astype(o_ref.dtype)

    in_specs = [pl.BlockSpec((1, L_in, C_in), lambda n: (n, 0, 0))]
    for leaf in leaves:   # full-array weight blocks, constant index_map (VMEM-resident)
        in_specs.append(pl.BlockSpec(leaf.shape, lambda n, nd=leaf.ndim: (0,) * nd))

    out = pl.pallas_call(
        kernel,
        out_shape=jax.ShapeDtypeStruct((N, 1, class_num), jnp.float32),
        grid=(N,),
        in_specs=in_specs,
        out_specs=pl.BlockSpec((1, 1, class_num), lambda n: (n, 0, 0)),
        compiler_params=pltpu.CompilerParams(dimension_semantics=("parallel",)),
    )(x_nlc, *leaves)
    return out.reshape(N, class_num)


# ---------------------------------------------------------------------------
# Parameters (deterministic, synthetic init; f32 master copy)
# ---------------------------------------------------------------------------

def init_params(key, in_channel, class_num):
    kit = iter(jax.random.split(key, 64))
    eps = 1e-5   # BatchNorm1d eval: gamma=1, beta=0, running_mean=0, running_var=1

    def convblock_p(c_in, c_out, k):
        w = jax.random.normal(next(kit), (k, c_in, c_out), jnp.float32) / math.sqrt(c_in * k)
        b = 0.05 * jax.random.normal(next(kit), (c_out,), jnp.float32)
        scale = jnp.full((c_out,), 1.0 / math.sqrt(1.0 + eps), jnp.float32)
        shift = jnp.zeros((c_out,), jnp.float32)
        return (w, jnp.stack([b, scale, shift], axis=0))      # (K,Cin,Cout), (3,Cout)

    def deconv_p(c_in, c_out, k):
        w = jax.random.normal(next(kit), (k, c_in, c_out), jnp.float32) / math.sqrt(c_in * k)
        b = 0.05 * jax.random.normal(next(kit), (1, c_out), jnp.float32)
        return (w, b)

    p = {}
    enc_ch = [(in_channel, 16), (16, 16), (16, 32), (32, 32), (32, 64),
              (64, 64), (64, 128), (128, 128), (128, 256), (256, 256)]
    p['enc'] = [convblock_p(a, b_, 3) for a, b_ in enc_ch]
    p['d1_1'] = deconv_p(256, 128, 3)
    p['d1_2'] = convblock_p(256, 128, 3)
    p['d1_3'] = convblock_p(128, 128, 3)
    p['d2_1'] = deconv_p(128, 64, 3)
    p['d2_2'] = convblock_p(128, 64, 3)
    p['d2_3'] = convblock_p(64, 64, 3)
    p['d3_1'] = deconv_p(64, 32, 3)
    p['d3_2'] = convblock_p(64, 32, 3)
    p['d3_3'] = convblock_p(32, 32, 3)
    p['d4_1'] = deconv_p(32, 16, 3)
    p['d4_2'] = convblock_p(32, 16, 3)
    p['d4_3'] = convblock_p(16, class_num, 1)
    cw = jax.random.normal(next(kit), (class_num, class_num),
                           jnp.float32) / math.sqrt(class_num)
    cb = 0.05 * jax.random.normal(next(kit), (1, class_num), jnp.float32)
    p['conv1'] = (cw, cb)                                     # shared 1x1 conv of the head
    return p


# ---------------------------------------------------------------------------

if __name__ == "__main__":
    N, IN_CH, CLASS_NUM, L = 2, 4, 5, 156   # L=156: smallest regime where all crops line up
    key = jax.random.PRNGKey(0)
    pkey, xkey = jax.random.split(key)
    params = init_params(pkey, IN_CH, CLASS_NUM)
    x = jax.random.normal(xkey, (N, IN_CH, L), jnp.float32)   # PyTorch NCW input

    fwd = jax.jit(unet_forward)
    out = jax.block_until_ready(fwd(params, x))

    assert out.shape == (N, CLASS_NUM), out.shape
    assert bool(jnp.all(jnp.isfinite(out)))
    assert bool(jnp.allclose(out.sum(axis=-1), 1.0, atol=1e-4))   # softmax rows
    print("KERNEL_OK")
</pallas_src>

<mosaic_0001>
module attributes {stable_mosaic.version = 11 : i64} {
  func.func @kernel(%arg0: i32, %arg1: memref<1x156x4xf32, #tpu.memory_space<vmem>>, %arg2: memref<5x5xbf16, #tpu.memory_space<vmem>>, %arg3: memref<1x5xf32, #tpu.memory_space<vmem>>, %arg4: memref<3x256x128xbf16, #tpu.memory_space<vmem>>, %arg5: memref<1x128xf32, #tpu.memory_space<vmem>>, %arg6: memref<3x256x128xbf16, #tpu.memory_space<vmem>>, %arg7: memref<3x128xf32, #tpu.memory_space<vmem>>, %arg8: memref<3x128x128xbf16, #tpu.memory_space<vmem>>, %arg9: memref<3x128xf32, #tpu.memory_space<vmem>>, %arg10: memref<3x128x64xbf16, #tpu.memory_space<vmem>>, %arg11: memref<1x64xf32, #tpu.memory_space<vmem>>, %arg12: memref<3x128x64xbf16, #tpu.memory_space<vmem>>, %arg13: memref<3x64xf32, #tpu.memory_space<vmem>>, %arg14: memref<3x64x64xbf16, #tpu.memory_space<vmem>>, %arg15: memref<3x64xf32, #tpu.memory_space<vmem>>, %arg16: memref<3x64x32xbf16, #tpu.memory_space<vmem>>, %arg17: memref<1x32xf32, #tpu.memory_space<vmem>>, %arg18: memref<3x64x32xbf16, #tpu.memory_space<vmem>>, %arg19: memref<3x32xf32, #tpu.memory_space<vmem>>, %arg20: memref<3x32x32xbf16, #tpu.memory_space<vmem>>, %arg21: memref<3x32xf32, #tpu.memory_space<vmem>>, %arg22: memref<3x32x16xbf16, #tpu.memory_space<vmem>>, %arg23: memref<1x16xf32, #tpu.memory_space<vmem>>, %arg24: memref<3x32x16xbf16, #tpu.memory_space<vmem>>, %arg25: memref<3x16xf32, #tpu.memory_space<vmem>>, %arg26: memref<1x16x5xbf16, #tpu.memory_space<vmem>>, %arg27: memref<3x5xf32, #tpu.memory_space<vmem>>, %arg28: memref<3x4x16xbf16, #tpu.memory_space<vmem>>, %arg29: memref<3x16xf32, #tpu.memory_space<vmem>>, %arg30: memref<3x16x16xbf16, #tpu.memory_space<vmem>>, %arg31: memref<3x16xf32, #tpu.memory_space<vmem>>, %arg32: memref<3x16x32xbf16, #tpu.memory_space<vmem>>, %arg33: memref<3x32xf32, #tpu.memory_space<vmem>>, %arg34: memref<3x32x32xbf16, #tpu.memory_space<vmem>>, %arg35: memref<3x32xf32, #tpu.memory_space<vmem>>, %arg36: memref<3x32x64xbf16, #tpu.memory_space<vmem>>, %arg37: memref<3x64xf32, #tpu.memory_space<vmem>>, %arg38: memref<3x64x64xbf16, #tpu.memory_space<vmem>>, %arg39: memref<3x64xf32, #tpu.memory_space<vmem>>, %arg40: memref<3x64x128xbf16, #tpu.memory_space<vmem>>, %arg41: memref<3x128xf32, #tpu.memory_space<vmem>>, %arg42: memref<3x128x128xbf16, #tpu.memory_space<vmem>>, %arg43: memref<3x128xf32, #tpu.memory_space<vmem>>, %arg44: memref<3x128x256xbf16, #tpu.memory_space<vmem>>, %arg45: memref<3x256xf32, #tpu.memory_space<vmem>>, %arg46: memref<3x256x256xbf16, #tpu.memory_space<vmem>>, %arg47: memref<3x256xf32, #tpu.memory_space<vmem>>, %arg48: memref<1x1x5xf32, #tpu.memory_space<vmem>>) attributes {dimension_semantics = [#tpu.dimension_semantics<parallel>], iteration_bounds = array<i64: 2>, scalar_prefetch = 0 : i64, scratch_operands = 0 : i64, tpu.core_type = #tpu.core_type<tc>, window_params = [{transform_indices = @transform_0, window_bounds = array<i64: 1, 156, 4>}, {pipeline_mode = #tpu.pipeline_mode<synchronous>, transform_indices = @transform_1, window_bounds = array<i64: 5, 5>}, {pipeline_mode = #tpu.pipeline_mode<synchronous>, transform_indices = @transform_2, window_bounds = array<i64: 1, 5>}, {pipeline_mode = #tpu.pipeline_mode<synchronous>, transform_indices = @transform_3, window_bounds = array<i64: 3, 256, 128>}, {pipeline_mode = #tpu.pipeline_mode<synchronous>, transform_indices = @transform_4, window_bounds = array<i64: 1, 128>}, {pipeline_mode = #tpu.pipeline_mode<synchronous>, transform_indices = @transform_5, window_bounds = array<i64: 3, 256, 128>}, {pipeline_mode = #tpu.pipeline_mode<synchronous>, transform_indices = @transform_6, window_bounds = array<i64: 3, 128>}, {pipeline_mode = #tpu.pipeline_mode<synchronous>, transform_indices = @transform_7, window_bounds = array<i64: 3, 128, 128>}, {pipeline_mode = #tpu.pipeline_mode<synchronous>, transform_indices = @transform_8, window_bounds = array<i64: 3, 128>}, {pipeline_mode = #tpu.pipeline_mode<synchronous>, transform_indices = @transform_9, window_bounds = array<i64: 3, 128, 64>}, {pipeline_mode = #tpu.pipeline_mode<synchronous>, transform_indices = @transform_10, window_bounds = array<i64: 1, 64>}, {pipeline_mode = #tpu.pipeline_mode<synchronous>, transform_indices = @transform_11, window_bounds = array<i64: 3, 128, 64>}, {pipeline_mode = #tpu.pipeline_mode<synchronous>, transform_indices = @transform_12, window_bounds = array<i64: 3, 64>}, {pipeline_mode = #tpu.pipeline_mode<synchronous>, transform_indices = @transform_13, window_bounds = array<i64: 3, 64, 64>}, {pipeline_mode = #tpu.pipeline_mode<synchronous>, transform_indices = @transform_14, window_bounds = array<i64: 3, 64>}, {pipeline_mode = #tpu.pipeline_mode<synchronous>, transform_indices = @transform_15, window_bounds = array<i64: 3, 64, 32>}, {pipeline_mode = #tpu.pipeline_mode<synchronous>, transform_indices = @transform_16, window_bounds = array<i64: 1, 32>}, {pipeline_mode = #tpu.pipeline_mode<synchronous>, transform_indices = @transform_17, window_bounds = array<i64: 3, 64, 32>}, {pipeline_mode = #tpu.pipeline_mode<synchronous>, transform_indices = @transform_18, window_bounds = array<i64: 3, 32>}, {pipeline_mode = #tpu.pipeline_mode<synchronous>, transform_indices = @transform_19, window_bounds = array<i64: 3, 32, 32>}, {pipeline_mode = #tpu.pipeline_mode<synchronous>, transform_indices = @transform_20, window_bounds = array<i64: 3, 32>}, {pipeline_mode = #tpu.pipeline_mode<synchronous>, transform_indices = @transform_21, window_bounds = array<i64: 3, 32, 16>}, {pipeline_mode = #tpu.pipeline_mode<synchronous>, transform_indices = @transform_22, window_bounds = array<i64: 1, 16>}, {pipeline_mode = #tpu.pipeline_mode<synchronous>, transform_indices = @transform_23, window_bounds = array<i64: 3, 32, 16>}, {pipeline_mode = #tpu.pipeline_mode<synchronous>, transform_indices = @transform_24, window_bounds = array<i64: 3, 16>}, {pipeline_mode = #tpu.pipeline_mode<synchronous>, transform_indices = @transform_25, window_bounds = array<i64: 1, 16, 5>}, {pipeline_mode = #tpu.pipeline_mode<synchronous>, transform_indices = @transform_26, window_bounds = array<i64: 3, 5>}, {pipeline_mode = #tpu.pipeline_mode<synchronous>, transform_indices = @transform_27, window_bounds = array<i64: 3, 4, 16>}, {pipeline_mode = #tpu.pipeline_mode<synchronous>, transform_indices = @transform_28, window_bounds = array<i64: 3, 16>}, {pipeline_mode = #tpu.pipeline_mode<synchronous>, transform_indices = @transform_29, window_bounds = array<i64: 3, 16, 16>}, {pipeline_mode = #tpu.pipeline_mode<synchronous>, transform_indices = @transform_30, window_bounds = array<i64: 3, 16>}, {pipeline_mode = #tpu.pipeline_mode<synchronous>, transform_indices = @transform_31, window_bounds = array<i64: 3, 16, 32>}, {pipeline_mode = #tpu.pipeline_mode<synchronous>, transform_indices = @transform_32, window_bounds = array<i64: 3, 32>}, {pipeline_mode = #tpu.pipeline_mode<synchronous>, transform_indices = @transform_33, window_bounds = array<i64: 3, 32, 32>}, {pipeline_mode = #tpu.pipeline_mode<synchronous>, transform_indices = @transform_34, window_bounds = array<i64: 3, 32>}, {pipeline_mode = #tpu.pipeline_mode<synchronous>, transform_indices = @transform_35, window_bounds = array<i64: 3, 32, 64>}, {pipeline_mode = #tpu.pipeline_mode<synchronous>, transform_indices = @transform_36, window_bounds = array<i64: 3, 64>}, {pipeline_mode = #tpu.pipeline_mode<synchronous>, transform_indices = @transform_37, window_bounds = array<i64: 3, 64, 64>}, {pipeline_mode = #tpu.pipeline_mode<synchronous>, transform_indices = @transform_38, window_bounds = array<i64: 3, 64>}, {pipeline_mode = #tpu.pipeline_mode<synchronous>, transform_indices = @transform_39, window_bounds = array<i64: 3, 64, 128>}, {pipeline_mode = #tpu.pipeline_mode<synchronous>, transform_indices = @transform_40, window_bounds = array<i64: 3, 128>}, {pipeline_mode = #tpu.pipeline_mode<synchronous>, transform_indices = @transform_41, window_bounds = array<i64: 3, 128, 128>}, {pipeline_mode = #tpu.pipeline_mode<synchronous>, transform_indices = @transform_42, window_bounds = array<i64: 3, 128>}, {pipeline_mode = #tpu.pipeline_mode<synchronous>, transform_indices = @transform_43, window_bounds = array<i64: 3, 128, 256>}, {pipeline_mode = #tpu.pipeline_mode<synchronous>, transform_indices = @transform_44, window_bounds = array<i64: 3, 256>}, {pipeline_mode = #tpu.pipeline_mode<synchronous>, transform_indices = @transform_45, window_bounds = array<i64: 3, 256, 256>}, {pipeline_mode = #tpu.pipeline_mode<synchronous>, transform_indices = @transform_46, window_bounds = array<i64: 3, 256>}, {transform_indices = @transform_47, window_bounds = array<i64: 1, 1, 5>}]} {
    %c0 = arith.constant 0 : index
    %c0_0 = arith.constant 0 : index
    %c0_1 = arith.constant 0 : index
    %0 = vector.load %arg1[%c0, %c0_0, %c0_1] : memref<1x156x4xf32, #tpu.memory_space<vmem>>, vector<1x156x4xf32>
    %1 = vector.shape_cast %0 : vector<1x156x4xf32> to vector<156x4xf32>
    %2 = arith.truncf %1 : vector<156x4xf32> to vector<156x4xbf16>
    %3 = vector.extract_strided_slice %2 {offsets = [0, 0], sizes = [154, 4], strides = [1, 1]} : vector<156x4xbf16> to vector<154x4xbf16>
    %c0_2 = arith.constant 0 : index
    %c0_3 = arith.constant 0 : index
    %c0_4 = arith.constant 0 : index
    %4 = vector.load %arg28[%c0_2, %c0_3, %c0_4] : memref<3x4x16xbf16, #tpu.memory_space<vmem>>, vector<1x4x16xbf16>
    %5 = vector.shape_cast %4 : vector<1x4x16xbf16> to vector<4x16xbf16>
    %cst = arith.constant dense<0.000000e+00> : vector<154x16xf32>
    %6 = tpu.matmul %3, %5, %cst {dimension_numbers = #tpu.dot_dimension_numbers<[1], [0], [0], [1], [0, 0, 1, 1], [], []>} : vector<154x4xbf16>, vector<4x16xbf16>, vector<154x16xf32> -> vector<154x16xf32>
    %7 = vector.extract_strided_slice %2 {offsets = [1, 0], sizes = [154, 4], strides = [1, 1]} : vector<156x4xbf16> to vector<154x4xbf16>
    %c1 = arith.constant 1 : index
    %c0_5 = arith.constant 0 : index
    %c0_6 = arith.constant 0 : index
    %8 = vector.load %arg28[%c1, %c0_5, %c0_6] : memref<3x4x16xbf16, #tpu.memory_space<vmem>>, vector<1x4x16xbf16>
    %9 = vector.shape_cast %8 : vector<1x4x16xbf16> to vector<4x16xbf16>
    %cst_7 = arith.constant dense<0.000000e+00> : vector<154x16xf32>
    %10 = tpu.matmul %7, %9, %cst_7 {dimension_numbers = #tpu.dot_dimension_numbers<[1], [0], [0], [1], [0, 0, 1, 1], [], []>} : vector<154x4xbf16>, vector<4x16xbf16>, vector<154x16xf32> -> vector<154x16xf32>
    %11 = arith.addf %6, %10 : vector<154x16xf32>
    %12 = vector.extract_strided_slice %2 {offsets = [2, 0], sizes = [154, 4], strides = [1, 1]} : vector<156x4xbf16> to vector<154x4xbf16>
    %c2 = arith.constant 2 : index
    %c0_8 = arith.constant 0 : index
    %c0_9 = arith.constant 0 : index
    %13 = vector.load %arg28[%c2, %c0_8, %c0_9] : memref<3x4x16xbf16, #tpu.memory_space<vmem>>, vector<1x4x16xbf16>
    %14 = vector.shape_cast %13 : vector<1x4x16xbf16> to vector<4x16xbf16>
    %cst_10 = arith.constant dense<0.000000e+00> : vector<154x16xf32>
    %15 = tpu.matmul %12, %14, %cst_10 {dimension_numbers = #tpu.dot_dimension_numbers<[1], [0], [0], [1], [0, 0, 1, 1], [], []>} : vector<154x4xbf16>, vector<4x16xbf16>, vector<154x16xf32> -> vector<154x16xf32>
    %16 = arith.addf %11, %15 : vector<154x16xf32>
    %c0_11 = arith.constant 0 : index
    %c0_12 = arith.constant 0 : index
    %17 = vector.load %arg29[%c0_11, %c0_12] : memref<3x16xf32, #tpu.memory_space<vmem>>, vector<3x16xf32>
    %18 = vector.extract_strided_slice %17 {offsets = [0, 0], sizes = [1, 16], strides = [1, 1]} : vector<3x16xf32> to vector<1x16xf32>
    %19 = vector.broadcast %18 : vector<1x16xf32> to vector<154x16xf32>
    %20 = arith.addf %16, %19 : vector<154x16xf32>
    %cst_13 = arith.constant 0.000000e+00 : f32
    %21 = vector.broadcast %cst_13 : f32 to vector<154x16xf32>
    %22 = arith.maximumf %20, %21 : vector<154x16xf32>
    %23 = vector.extract_strided_slice %17 {offsets = [1, 0], sizes = [1, 16], strides = [1, 1]} : vector<3x16xf32> to vector<1x16xf32>
    %24 = vector.broadcast %23 : vector<1x16xf32> to vector<154x16xf32>
    %25 = arith.mulf %22, %24 : vector<154x16xf32>
    %26 = vector.extract_strided_slice %17 {offsets = [2, 0], sizes = [1, 16], strides = [1, 1]} : vector<3x16xf32> to vector<1x16xf32>
    %27 = vector.broadcast %26 : vector<1x16xf32> to vector<154x16xf32>
    %28 = arith.addf %25, %27 : vector<154x16xf32>
    %29 = arith.truncf %28 : vector<154x16xf32> to vector<154x16xbf16>
    %30 = vector.extract_strided_slice %29 {offsets = [0, 0], sizes = [152, 16], strides = [1, 1]} : vector<154x16xbf16> to vector<152x16xbf16>
    %c0_14 = arith.constant 0 : index
    %c0_15 = arith.constant 0 : index
    %c0_16 = arith.constant 0 : index
    %31 = vector.load %arg30[%c0_14, %c0_15, %c0_16] : memref<3x16x16xbf16, #tpu.memory_space<vmem>>, vector<1x16x16xbf16>
    %32 = vector.shape_cast %31 : vector<1x16x16xbf16> to vector<16x16xbf16>
    %cst_17 = arith.constant dense<0.000000e+00> : vector<152x16xf32>
    %33 = tpu.matmul %30, %32, %cst_17 {dimension_numbers = #tpu.dot_dimension_numbers<[1], [0], [0], [1], [0, 0, 1, 1], [], []>} : vector<152x16xbf16>, vector<16x16xbf16>, vector<152x16xf32> -> vector<152x16xf32>
    %34 = vector.extract_strided_slice %29 {offsets = [1, 0], sizes = [152, 16], strides = [1, 1]} : vector<154x16xbf16> to vector<152x16xbf16>
    %c1_18 = arith.constant 1 : index
    %c0_19 = arith.constant 0 : index
    %c0_20 = arith.constant 0 : index
    %35 = vector.load %arg30[%c1_18, %c0_19, %c0_20] : memref<3x16x16xbf16, #tpu.memory_space<vmem>>, vector<1x16x16xbf16>
    %36 = vector.shape_cast %35 : vector<1x16x16xbf16> to vector<16x16xbf16>
    %cst_21 = arith.constant dense<0.000000e+00> : vector<152x16xf32>
    %37 = tpu.matmul %34, %36, %cst_21 {dimension_numbers = #tpu.dot_dimension_numbers<[1], [0], [0], [1], [0, 0, 1, 1], [], []>} : vector<152x16xbf16>, vector<16x16xbf16>, vector<152x16xf32> -> vector<152x16xf32>
    %38 = arith.addf %33, %37 : vector<152x16xf32>
    %39 = vector.extract_strided_slice %29 {offsets = [2, 0], sizes = [152, 16], strides = [1, 1]} : vector<154x16xbf16> to vector<152x16xbf16>
    %c2_22 = arith.constant 2 : index
    %c0_23 = arith.constant 0 : index
    %c0_24 = arith.constant 0 : index
    %40 = vector.load %arg30[%c2_22, %c0_23, %c0_24] : memref<3x16x16xbf16, #tpu.memory_space<vmem>>, vector<1x16x16xbf16>
    %41 = vector.shape_cast %40 : vector<1x16x16xbf16> to vector<16x16xbf16>
    %cst_25 = arith.constant dense<0.000000e+00> : vector<152x16xf32>
    %42 = tpu.matmul %39, %41, %cst_25 {dimension_numbers = #tpu.dot_dimension_numbers<[1], [0], [0], [1], [0, 0, 1, 1], [], []>} : vector<152x16xbf16>, vector<16x16xbf16>, vector<152x16xf32> -> vector<152x16xf32>
    %43 = arith.addf %38, %42 : vector<152x16xf32>
    %c0_26 = arith.constant 0 : index
    %c0_27 = arith.constant 0 : index
    %44 = vector.load %arg31[%c0_26, %c0_27] : memref<3x16xf32, #tpu.memory_space<vmem>>, vector<3x16xf32>
    %45 = vector.extract_strided_slice %44 {offsets = [0, 0], sizes = [1, 16], strides = [1, 1]} : vector<3x16xf32> to vector<1x16xf32>
    %46 = vector.broadcast %45 : vector<1x16xf32> to vector<152x16xf32>
    %47 = arith.addf %43, %46 : vector<152x16xf32>
    %cst_28 = arith.constant 0.000000e+00 : f32
    %48 = vector.broadcast %cst_28 : f32 to vector<152x16xf32>
    %49 = arith.maximumf %47, %48 : vector<152x16xf32>
    %50 = vector.extract_strided_slice %44 {offsets = [1, 0], sizes = [1, 16], strides = [1, 1]} : vector<3x16xf32> to vector<1x16xf32>
    %51 = vector.broadcast %50 : vector<1x16xf32> to vector<152x16xf32>
    %52 = arith.mulf %49, %51 : vector<152x16xf32>
    %53 = vector.extract_strided_slice %44 {offsets = [2, 0], sizes = [1, 16], strides = [1, 1]} : vector<3x16xf32> to vector<1x16xf32>
    %54 = vector.broadcast %53 : vector<1x16xf32> to vector<152x16xf32>
    %55 = arith.addf %52, %54 : vector<152x16xf32>
    %56 = tpu.iota {dimensions = array<i32: 0>} : vector<76x152xi32>
    %57 = tpu.iota {dimensions = array<i32: 1>} : vector<76x152xi32>
    %c2_i32 = arith.constant 2 : i32
    %58 = vector.broadcast %c2_i32 : i32 to vector<76x152xi32>
    %59 = arith.muli %58, %56 : vector<76x152xi32>
    %60 = arith.cmpi eq, %57, %59 : vector<76x152xi32>
    %61 = arith.extui %60 : vector<76x152xi1> to vector<76x152xi32>
    %62 = arith.sitofp %61 : vector<76x152xi32> to vector<76x152xf32>
    %c2_i32_29 = arith.constant 2 : i32
    %63 = vector.broadcast %c2_i32_29 : i32 to vector<76x152xi32>
    %64 = arith.muli %63, %56 : vector<76x152xi32>
    %c1_i32 = arith.constant 1 : i32
    %65 = vector.broadcast %c1_i32 : i32 to vector<76x152xi32>
    %66 = arith.addi %64, %65 : vector<76x152xi32>
    %67 = arith.cmpi eq, %57, %66 : vector<76x152xi32>
    %68 = arith.extui %67 : vector<76x152xi1> to vector<76x152xi32>
    %69 = arith.sitofp %68 : vector<76x152xi32> to vector<76x152xf32>
    %cst_30 = arith.constant dense<0.000000e+00> : vector<76x16xf32>
    %70 = tpu.matmul %62, %55, %cst_30 {dimension_numbers = #tpu.dot_dimension_numbers<[1], [0], [0], [1], [0, 0, 1, 1], [], []>} : vector<76x152xf32>, vector<152x16xf32>, vector<76x16xf32> -> vector<76x16xf32>
    %cst_31 = arith.constant dense<0.000000e+00> : vector<76x16xf32>
    %71 = tpu.matmul %69, %55, %cst_31 {dimension_numbers = #tpu.dot_dimension_numbers<[1], [0], [0], [1], [0, 0, 1, 1], [], []>} : vector<76x152xf32>, vector<152x16xf32>, vector<76x16xf32> -> vector<76x16xf32>
    %72 = arith.maximumf %70, %71 : vector<76x16xf32>
    %73 = arith.truncf %72 : vector<76x16xf32> to vector<76x16xbf16>
    %74 = vector.extract_strided_slice %73 {offsets = [0, 0], sizes = [74, 16], strides = [1, 1]} : vector<76x16xbf16> to vector<74x16xbf16>
    %c0_32 = arith.constant 0 : index
    %c0_33 = arith.constant 0 : index
    %c0_34 = arith.constant 0 : index
    %75 = vector.load %arg32[%c0_32, %c0_33, %c0_34] : memref<3x16x32xbf16, #tpu.memory_space<vmem>>, vector<1x16x32xbf16>
    %76 = vector.shape_cast %75 : vector<1x16x32xbf16> to vector<16x32xbf16>
    %cst_35 = arith.constant dense<0.000000e+00> : vector<74x32xf32>
    %77 = tpu.matmul %74, %76, %cst_35 {dimension_numbers = #tpu.dot_dimension_numbers<[1], [0], [0], [1], [0, 0, 1, 1], [], []>} : vector<74x16xbf16>, vector<16x32xbf16>, vector<74x32xf32> -> vector<74x32xf32>
    %78 = vector.extract_strided_slice %73 {offsets = [1, 0], sizes = [74, 16], strides = [1, 1]} : vector<76x16xbf16> to vector<74x16xbf16>
    %c1_36 = arith.constant 1 : index
    %c0_37 = arith.constant 0 : index
    %c0_38 = arith.constant 0 : index
    %79 = vector.load %arg32[%c1_36, %c0_37, %c0_38] : memref<3x16x32xbf16, #tpu.memory_space<vmem>>, vector<1x16x32xbf16>
    %80 = vector.shape_cast %79 : vector<1x16x32xbf16> to vector<16x32xbf16>
    %cst_39 = arith.constant dense<0.000000e+00> : vector<74x32xf32>
    %81 = tpu.matmul %78, %80, %cst_39 {dimension_numbers = #tpu.dot_dimension_numbers<[1], [0], [0], [1], [0, 0, 1, 1], [], []>} : vector<74x16xbf16>, vector<16x32xbf16>, vector<74x32xf32> -> vector<74x32xf32>
    %82 = arith.addf %77, %81 : vector<74x32xf32>
    %83 = vector.extract_strided_slice %73 {offsets = [2, 0], sizes = [74, 16], strides = [1, 1]} : vector<76x16xbf16> to vector<74x16xbf16>
    %c2_40 = arith.constant 2 : index
    %c0_41 = arith.constant 0 : index
    %c0_42 = arith.constant 0 : index
    %84 = vector.load %arg32[%c2_40, %c0_41, %c0_42] : memref<3x16x32xbf16, #tpu.memory_space<vmem>>, vector<1x16x32xbf16>
    %85 = vector.shape_cast %84 : vector<1x16x32xbf16> to vector<16x32xbf16>
    %cst_43 = arith.constant dense<0.000000e+00> : vector<74x32xf32>
    %86 = tpu.matmul %83, %85, %cst_43 {dimension_numbers = #tpu.dot_dimension_numbers<[1], [0], [0], [1], [0, 0, 1, 1], [], []>} : vector<74x16xbf16>, vector<16x32xbf16>, vector<74x32xf32> -> vector<74x32xf32>
    %87 = arith.addf %82, %86 : vector<74x32xf32>
    %c0_44 = arith.constant 0 : index
    %c0_45 = arith.constant 0 : index
    %88 = vector.load %arg33[%c0_44, %c0_45] : memref<3x32xf32, #tpu.memory_space<vmem>>, vector<3x32xf32>
    %89 = vector.extract_strided_slice %88 {offsets = [0, 0], sizes = [1, 32], strides = [1, 1]} : vector<3x32xf32> to vector<1x32xf32>
    %90 = vector.broadcast %89 : vector<1x32xf32> to vector<74x32xf32>
    %91 = arith.addf %87, %90 : vector<74x32xf32>
    %cst_46 = arith.constant 0.000000e+00 : f32
    %92 = vector.broadcast %cst_46 : f32 to vector<74x32xf32>
    %93 = arith.maximumf %91, %92 : vector<74x32xf32>
    %94 = vector.extract_strided_slice %88 {offsets = [1, 0], sizes = [1, 32], strides = [1, 1]} : vector<3x32xf32> to vector<1x32xf32>
    %95 = vector.broadcast %94 : vector<1x32xf32> to vector<74x32xf32>
    %96 = arith.mulf %93, %95 : vector<74x32xf32>
    %97 = vector.extract_strided_slice %88 {offsets = [2, 0], sizes = [1, 32], strides = [1, 1]} : vector<3x32xf32> to vector<1x32xf32>
    %98 = vector.broadcast %97 : vector<1x32xf32> to vector<74x32xf32>
    %99 = arith.addf %96, %98 : vector<74x32xf32>
    %100 = arith.truncf %99 : vector<74x32xf32> to vector<74x32xbf16>
    %101 = vector.extract_strided_slice %100 {offsets = [0, 0], sizes = [72, 32], strides = [1, 1]} : vector<74x32xbf16> to vector<72x32xbf16>
    %c0_47 = arith.constant 0 : index
    %c0_48 = arith.constant 0 : index
    %c0_49 = arith.constant 0 : index
    %102 = vector.load %arg34[%c0_47, %c0_48, %c0_49] : memref<3x32x32xbf16, #tpu.memory_space<vmem>>, vector<1x32x32xbf16>
    %103 = vector.shape_cast %102 : vector<1x32x32xbf16> to vector<32x32xbf16>
    %cst_50 = arith.constant dense<0.000000e+00> : vector<72x32xf32>
    %104 = tpu.matmul %101, %103, %cst_50 {dimension_numbers = #tpu.dot_dimension_numbers<[1], [0], [0], [1], [0, 0, 1, 1], [], []>} : vector<72x32xbf16>, vector<32x32xbf16>, vector<72x32xf32> -> vector<72x32xf32>
    %105 = vector.extract_strided_slice %100 {offsets = [1, 0], sizes = [72, 32], strides = [1, 1]} : vector<74x32xbf16> to vector<72x32xbf16>
    %c1_51 = arith.constant 1 : index
    %c0_52 = arith.constant 0 : index
    %c0_53 = arith.constant 0 : index
    %106 = vector.load %arg34[%c1_51, %c0_52, %c0_53] : memref<3x32x32xbf16, #tpu.memory_space<vmem>>, vector<1x32x32xbf16>
    %107 = vector.shape_cast %106 : vector<1x32x32xbf16> to vector<32x32xbf16>
    %cst_54 = arith.constant dense<0.000000e+00> : vector<72x32xf32>
    %108 = tpu.matmul %105, %107, %cst_54 {dimension_numbers = #tpu.dot_dimension_numbers<[1], [0], [0], [1], [0, 0, 1, 1], [], []>} : vector<72x32xbf16>, vector<32x32xbf16>, vector<72x32xf32> -> vector<72x32xf32>
    %109 = arith.addf %104, %108 : vector<72x32xf32>
    %110 = vector.extract_strided_slice %100 {offsets = [2, 0], sizes = [72, 32], strides = [1, 1]} : vector<74x32xbf16> to vector<72x32xbf16>
    %c2_55 = arith.constant 2 : index
    %c0_56 = arith.constant 0 : index
    %c0_57 = arith.constant 0 : index
    %111 = vector.load %arg34[%c2_55, %c0_56, %c0_57] : memref<3x32x32xbf16, #tpu.memory_space<vmem>>, vector<1x32x32xbf16>
    %112 = vector.shape_cast %111 : vector<1x32x32xbf16> to vector<32x32xbf16>
    %cst_58 = arith.constant dense<0.000000e+00> : vector<72x32xf32>
    %113 = tpu.matmul %110, %112, %cst_58 {dimension_numbers = #tpu.dot_dimension_numbers<[1], [0], [0], [1], [0, 0, 1, 1], [], []>} : vector<72x32xbf16>, vector<32x32xbf16>, vector<72x32xf32> -> vector<72x32xf32>
    %114 = arith.addf %109, %113 : vector<72x32xf32>
    %c0_59 = arith.constant 0 : index
    %c0_60 = arith.constant 0 : index
    %115 = vector.load %arg35[%c0_59, %c0_60] : memref<3x32xf32, #tpu.memory_space<vmem>>, vector<3x32xf32>
    %116 = vector.extract_strided_slice %115 {offsets = [0, 0], sizes = [1, 32], strides = [1, 1]} : vector<3x32xf32> to vector<1x32xf32>
    %117 = vector.broadcast %116 : vector<1x32xf32> to vector<72x32xf32>
    %118 = arith.addf %114, %117 : vector<72x32xf32>
    %cst_61 = arith.constant 0.000000e+00 : f32
    %119 = vector.broadcast %cst_61 : f32 to vector<72x32xf32>
    %120 = arith.maximumf %118, %119 : vector<72x32xf32>
    %121 = vector.extract_strided_slice %115 {offsets = [1, 0], sizes = [1, 32], strides = [1, 1]} : vector<3x32xf32> to vector<1x32xf32>
    %122 = vector.broadcast %121 : vector<1x32xf32> to vector<72x32xf32>
    %123 = arith.mulf %120, %122 : vector<72x32xf32>
    %124 = vector.extract_strided_slice %115 {offsets = [2, 0], sizes = [1, 32], strides = [1, 1]} : vector<3x32xf32> to vector<1x32xf32>
    %125 = vector.broadcast %124 : vector<1x32xf32> to vector<72x32xf32>
    %126 = arith.addf %123, %125 : vector<72x32xf32>
    %127 = tpu.iota {dimensions = array<i32: 0>} : vector<36x72xi32>
    %128 = tpu.iota {dimensions = array<i32: 1>} : vector<36x72xi32>
    %c2_i32_62 = arith.constant 2 : i32
    %129 = vector.broadcast %c2_i32_62 : i32 to vector<36x72xi32>
    %130 = arith.muli %129, %127 : vector<36x72xi32>
    %131 = arith.cmpi eq, %128, %130 : vector<36x72xi32>
    %132 = arith.extui %131 : vector<36x72xi1> to vector<36x72xi32>
    %133 = arith.sitofp %132 : vector<36x72xi32> to vector<36x72xf32>
    %c2_i32_63 = arith.constant 2 : i32
    %134 = vector.broadcast %c2_i32_63 : i32 to vector<36x72xi32>
    %135 = arith.muli %134, %127 : vector<36x72xi32>
    %c1_i32_64 = arith.constant 1 : i32
    %136 = vector.broadcast %c1_i32_64 : i32 to vector<36x72xi32>
    %137 = arith.addi %135, %136 : vector<36x72xi32>
    %138 = arith.cmpi eq, %128, %137 : vector<36x72xi32>
    %139 = arith.extui %138 : vector<36x72xi1> to vector<36x72xi32>
    %140 = arith.sitofp %139 : vector<36x72xi32> to vector<36x72xf32>
    %cst_65 = arith.constant dense<0.000000e+00> : vector<36x32xf32>
    %141 = tpu.matmul %133, %126, %cst_65 {dimension_numbers = #tpu.dot_dimension_numbers<[1], [0], [0], [1], [0, 0, 1, 1], [], []>} : vector<36x72xf32>, vector<72x32xf32>, vector<36x32xf32> -> vector<36x32xf32>
    %cst_66 = arith.constant dense<0.000000e+00> : vector<36x32xf32>
    %142 = tpu.matmul %140, %126, %cst_66 {dimension_numbers = #tpu.dot_dimension_numbers<[1], [0], [0], [1], [0, 0, 1, 1], [], []>} : vector<36x72xf32>, vector<72x32xf32>, vector<36x32xf32> -> vector<36x32xf32>
    %143 = arith.maximumf %141, %142 : vector<36x32xf32>
    %144 = arith.truncf %143 : vector<36x32xf32> to vector<36x32xbf16>
    %145 = vector.extract_strided_slice %144 {offsets = [0, 0], sizes = [34, 32], strides = [1, 1]} : vector<36x32xbf16> to vector<34x32xbf16>
    %c0_67 = arith.constant 0 : index
    %c0_68 = arith.constant 0 : index
    %c0_69 = arith.constant 0 : index
    %146 = vector.load %arg36[%c0_67, %c0_68, %c0_69] : memref<3x32x64xbf16, #tpu.memory_space<vmem>>, vector<1x32x64xbf16>
    %147 = vector.shape_cast %146 : vector<1x32x64xbf16> to vector<32x64xbf16>
    %cst_70 = arith.constant dense<0.000000e+00> : vector<34x64xf32>
    %148 = tpu.matmul %145, %147, %cst_70 {dimension_numbers = #tpu.dot_dimension_numbers<[1], [0], [0], [1], [0, 0, 1, 1], [], []>} : vector<34x32xbf16>, vector<32x64xbf16>, vector<34x64xf32> -> vector<34x64xf32>
    %149 = vector.extract_strided_slice %144 {offsets = [1, 0], sizes = [34, 32], strides = [1, 1]} : vector<36x32xbf16> to vector<34x32xbf16>
    %c1_71 = arith.constant 1 : index
    %c0_72 = arith.constant 0 : index
    %c0_73 = arith.constant 0 : index
    %150 = vector.load %arg36[%c1_71, %c0_72, %c0_73] : memref<3x32x64xbf16, #tpu.memory_space<vmem>>, vector<1x32x64xbf16>
    %151 = vector.shape_cast %150 : vector<1x32x64xbf16> to vector<32x64xbf16>
    %cst_74 = arith.constant dense<0.000000e+00> : vector<34x64xf32>
    %152 = tpu.matmul %149, %151, %cst_74 {dimension_numbers = #tpu.dot_dimension_numbers<[1], [0], [0], [1], [0, 0, 1, 1], [], []>} : vector<34x32xbf16>, vector<32x64xbf16>, vector<34x64xf32> -> vector<34x64xf32>
    %153 = arith.addf %148, %152 : vector<34x64xf32>
    %154 = vector.extract_strided_slice %144 {offsets = [2, 0], sizes = [34, 32], strides = [1, 1]} : vector<36x32xbf16> to vector<34x32xbf16>
    %c2_75 = arith.constant 2 : index
    %c0_76 = arith.constant 0 : index
    %c0_77 = arith.constant 0 : index
    %155 = vector.load %arg36[%c2_75, %c0_76, %c0_77] : memref<3x32x64xbf16, #tpu.memory_space<vmem>>, vector<1x32x64xbf16>
    %156 = vector.shape_cast %155 : vector<1x32x64xbf16> to vector<32x64xbf16>
    %cst_78 = arith.constant dense<0.000000e+00> : vector<34x64xf32>
    %157 = tpu.matmul %154, %156, %cst_78 {dimension_numbers = #tpu.dot_dimension_numbers<[1], [0], [0], [1], [0, 0, 1, 1], [], []>} : vector<34x32xbf16>, vector<32x64xbf16>, vector<34x64xf32> -> vector<34x64xf32>
    %158 = arith.addf %153, %157 : vector<34x64xf32>
    %c0_79 = arith.constant 0 : index
    %c0_80 = arith.constant 0 : index
    %159 = vector.load %arg37[%c0_79, %c0_80] : memref<3x64xf32, #tpu.memory_space<vmem>>, vector<3x64xf32>
    %160 = vector.extract_strided_slice %159 {offsets = [0, 0], sizes = [1, 64], strides = [1, 1]} : vector<3x64xf32> to vector<1x64xf32>
    %161 = vector.broadcast %160 : vector<1x64xf32> to vector<34x64xf32>
    %162 = arith.addf %158, %161 : vector<34x64xf32>
    %cst_81 = arith.constant 0.000000e+00 : f32
    %163 = vector.broadcast %cst_81 : f32 to vector<34x64xf32>
    %164 = arith.maximumf %162, %163 : vector<34x64xf32>
    %165 = vector.extract_strided_slice %159 {offsets = [1, 0], sizes = [1, 64], strides = [1, 1]} : vector<3x64xf32> to vector<1x64xf32>
    %166 = vector.broadcast %165 : vector<1x64xf32> to vector<34x64xf32>
    %167 = arith.mulf %164, %166 : vector<34x64xf32>
    %168 = vector.extract_strided_slice %159 {offsets = [2, 0], sizes = [1, 64], strides = [1, 1]} : vector<3x64xf32> to vector<1x64xf32>
    %169 = vector.broadcast %168 : vector<1x64xf32> to vector<34x64xf32>
    %170 = arith.addf %167, %169 : vector<34x64xf32>
    %171 = arith.truncf %170 : vector<34x64xf32> to vector<34x64xbf16>
    %172 = vector.extract_strided_slice %171 {offsets = [0, 0], sizes = [32, 64], strides = [1, 1]} : vector<34x64xbf16> to vector<32x64xbf16>
    %c0_82 = arith.constant 0 : index
    %c0_83 = arith.constant 0 : index
    %c0_84 = arith.constant 0 : index
    %173 = vector.load %arg38[%c0_82, %c0_83, %c0_84] : memref<3x64x64xbf16, #tpu.memory_space<vmem>>, vector<1x64x64xbf16>
    %174 = vector.shape_cast %173 : vector<1x64x64xbf16> to vector<64x64xbf16>
    %cst_85 = arith.constant dense<0.000000e+00> : vector<32x64xf32>
    %175 = tpu.matmul %172, %174, %cst_85 {dimension_numbers = #tpu.dot_dimension_numbers<[1], [0], [0], [1], [0, 0, 1, 1], [], []>} : vector<32x64xbf16>, vector<64x64xbf16>, vector<32x64xf32> -> vector<32x64xf32>
    %176 = vector.extract_strided_slice %171 {offsets = [1, 0], sizes = [32, 64], strides = [1, 1]} : vector<34x64xbf16> to vector<32x64xbf16>
    %c1_86 = arith.constant 1 : index
    %c0_87 = arith.constant 0 : index
    %c0_88 = arith.constant 0 : index
    %177 = vector.load %arg38[%c1_86, %c0_87, %c0_88] : memref<3x64x64xbf16, #tpu.memory_space<vmem>>, vector<1x64x64xbf16>
    %178 = vector.shape_cast %177 : vector<1x64x64xbf16> to vector<64x64xbf16>
    %cst_89 = arith.constant dense<0.000000e+00> : vector<32x64xf32>
    %179 = tpu.matmul %176, %178, %cst_89 {dimension_numbers = #tpu.dot_dimension_numbers<[1], [0], [0], [1], [0, 0, 1, 1], [], []>} : vector<32x64xbf16>, vector<64x64xbf16>, vector<32x64xf32> -> vector<32x64xf32>
    %180 = arith.addf %175, %179 : vector<32x64xf32>
    %181 = vector.extract_strided_slice %171 {offsets = [2, 0], sizes = [32, 64], strides = [1, 1]} : vector<34x64xbf16> to vector<32x64xbf16>
    %c2_90 = arith.constant 2 : index
    %c0_91 = arith.constant 0 : index
    %c0_92 = arith.constant 0 : index
    %182 = vector.load %arg38[%c2_90, %c0_91, %c0_92] : memref<3x64x64xbf16, #tpu.memory_space<vmem>>, vector<1x64x64xbf16>
    %183 = vector.shape_cast %182 : vector<1x64x64xbf16> to vector<64x64xbf16>
    %cst_93 = arith.constant dense<0.000000e+00> : vector<32x64xf32>
    %184 = tpu.matmul %181, %183, %cst_93 {dimension_numbers = #tpu.dot_dimension_numbers<[1], [0], [0], [1], [0, 0, 1, 1], [], []>} : vector<32x64xbf16>, vector<64x64xbf16>, vector<32x64xf32> -> vector<32x64xf32>
    %185 = arith.addf %180, %184 : vector<32x64xf32>
    %c0_94 = arith.constant 0 : index
    %c0_95 = arith.constant 0 : index
    %186 = vector.load %arg39[%c0_94, %c0_95] : memref<3x64xf32, #tpu.memory_space<vmem>>, vector<3x64xf32>
    %187 = vector.extract_strided_slice %186 {offsets = [0, 0], sizes = [1, 64], strides = [1, 1]} : vector<3x64xf32> to vector<1x64xf32>
    %188 = vector.broadcast %187 : vector<1x64xf32> to vector<32x64xf32>
    %189 = arith.addf %185, %188 : vector<32x64xf32>
    %cst_96 = arith.constant 0.000000e+00 : f32
    %190 = vector.broadcast %cst_96 : f32 to vector<32x64xf32>
    %191 = arith.maximumf %189, %190 : vector<32x64xf32>
    %192 = vector.extract_strided_slice %186 {offsets = [1, 0], sizes = [1, 64], strides = [1, 1]} : vector<3x64xf32> to vector<1x64xf32>
    %193 = vector.broadcast %192 : vector<1x64xf32> to vector<32x64xf32>
    %194 = arith.mulf %191, %193 : vector<32x64xf32>
    %195 = vector.extract_strided_slice %186 {offsets = [2, 0], sizes = [1, 64], strides = [1, 1]} : vector<3x64xf32> to vector<1x64xf32>
    %196 = vector.broadcast %195 : vector<1x64xf32> to vector<32x64xf32>
    %197 = arith.addf %194, %196 : vector<32x64xf32>
    %198 = tpu.iota {dimensions = array<i32: 0>} : vector<16x32xi32>
    %199 = tpu.iota {dimensions = array<i32: 1>} : vector<16x32xi32>
    %c2_i32_97 = arith.constant 2 : i32
    %200 = vector.broadcast %c2_i32_97 : i32 to vector<16x32xi32>
    %201 = arith.muli %200, %198 : vector<16x32xi32>
    %202 = arith.cmpi eq, %199, %201 : vector<16x32xi32>
    %203 = arith.extui %202 : vector<16x32xi1> to vector<16x32xi32>
    %204 = arith.sitofp %203 : vector<16x32xi32> to vector<16x32xf32>
    %c2_i32_98 = arith.constant 2 : i32
    %205 = vector.broadcast %c2_i32_98 : i32 to vector<16x32xi32>
    %206 = arith.muli %205, %198 : vector<16x32xi32>
    %c1_i32_99 = arith.constant 1 : i32
    %207 = vector.broadcast %c1_i32_99 : i32 to vector<16x32xi32>
    %208 = arith.addi %206, %207 : vector<16x32xi32>
    %209 = arith.cmpi eq, %199, %208 : vector<16x32xi32>
    %210 = arith.extui %209 : vector<16x32xi1> to vector<16x32xi32>
    %211 = arith.sitofp %210 : vector<16x32xi32> to vector<16x32xf32>
    %cst_100 = arith.constant dense<0.000000e+00> : vector<16x64xf32>
    %212 = tpu.matmul %204, %197, %cst_100 {dimension_numbers = #tpu.dot_dimension_numbers<[1], [0], [0], [1], [0, 0, 1, 1], [], []>} : vector<16x32xf32>, vector<32x64xf32>, vector<16x64xf32> -> vector<16x64xf32>
    %cst_101 = arith.constant dense<0.000000e+00> : vector<16x64xf32>
    %213 = tpu.matmul %211, %197, %cst_101 {dimension_numbers = #tpu.dot_dimension_numbers<[1], [0], [0], [1], [0, 0, 1, 1], [], []>} : vector<16x32xf32>, vector<32x64xf32>, vector<16x64xf32> -> vector<16x64xf32>
    %214 = arith.maximumf %212, %213 : vector<16x64xf32>
    %215 = arith.truncf %214 : vector<16x64xf32> to vector<16x64xbf16>
    %216 = vector.extract_strided_slice %215 {offsets = [0, 0], sizes = [14, 64], strides = [1, 1]} : vector<16x64xbf16> to vector<14x64xbf16>
    %c0_102 = arith.constant 0 : index
    %c0_103 = arith.constant 0 : index
    %c0_104 = arith.constant 0 : index
    %217 = vector.load %arg40[%c0_102, %c0_103, %c0_104] : memref<3x64x128xbf16, #tpu.memory_space<vmem>>, vector<1x64x128xbf16>
    %218 = vector.shape_cast %217 : vector<1x64x128xbf16> to vector<64x128xbf16>
    %cst_105 = arith.constant dense<0.000000e+00> : vector<14x128xf32>
    %219 = tpu.matmul %216, %218, %cst_105 {dimension_numbers = #tpu.dot_dimension_numbers<[1], [0], [0], [1], [0, 0, 1, 1], [], []>} : vector<14x64xbf16>, vector<64x128xbf16>, vector<14x128xf32> -> vector<14x128xf32>
    %220 = vector.extract_strided_slice %215 {offsets = [1, 0], sizes = [14, 64], strides = [1, 1]} : vector<16x64xbf16> to vector<14x64xbf16>
    %c1_106 = arith.constant 1 : index
    %c0_107 = arith.constant 0 : index
    %c0_108 = arith.constant 0 : index
    %221 = vector.load %arg40[%c1_106, %c0_107, %c0_108] : memref<3x64x128xbf16, #tpu.memory_space<vmem>>, vector<1x64x128xbf16>
    %222 = vector.shape_cast %221 : vector<1x64x128xbf16> to vector<64x128xbf16>
    %cst_109 = arith.constant dense<0.000000e+00> : vector<14x128xf32>
    %223 = tpu.matmul %220, %222, %cst_109 {dimension_numbers = #tpu.dot_dimension_numbers<[1], [0], [0], [1], [0, 0, 1, 1], [], []>} : vector<14x64xbf16>, vector<64x128xbf16>, vector<14x128xf32> -> vector<14x128xf32>
    %224 = arith.addf %219, %223 : vector<14x128xf32>
    %225 = vector.extract_strided_slice %215 {offsets = [2, 0], sizes = [14, 64], strides = [1, 1]} : vector<16x64xbf16> to vector<14x64xbf16>
    %c2_110 = arith.constant 2 : index
    %c0_111 = arith.constant 0 : index
    %c0_112 = arith.constant 0 : index
    %226 = vector.load %arg40[%c2_110, %c0_111, %c0_112] : memref<3x64x128xbf16, #tpu.memory_space<vmem>>, vector<1x64x128xbf16>
    %227 = vector.shape_cast %226 : vector<1x64x128xbf16> to vector<64x128xbf16>
    %cst_113 = arith.constant dense<0.000000e+00> : vector<14x128xf32>
    %228 = tpu.matmul %225, %227, %cst_113 {dimension_numbers = #tpu.dot_dimension_numbers<[1], [0], [0], [1], [0, 0, 1, 1], [], []>} : vector<14x64xbf16>, vector<64x128xbf16>, vector<14x128xf32> -> vector<14x128xf32>
    %229 = arith.addf %224, %228 : vector<14x128xf32>
    %c0_114 = arith.constant 0 : index
    %c0_115 = arith.constant 0 : index
    %230 = vector.load %arg41[%c0_114, %c0_115] : memref<3x128xf32, #tpu.memory_space<vmem>>, vector<3x128xf32>
    %231 = vector.extract_strided_slice %230 {offsets = [0, 0], sizes = [1, 128], strides = [1, 1]} : vector<3x128xf32> to vector<1x128xf32>
    %232 = vector.broadcast %231 : vector<1x128xf32> to vector<14x128xf32>
    %233 = arith.addf %229, %232 : vector<14x128xf32>
    %cst_116 = arith.constant 0.000000e+00 : f32
    %234 = vector.broadcast %cst_116 : f32 to vector<14x128xf32>
    %235 = arith.maximumf %233, %234 : vector<14x128xf32>
    %236 = vector.extract_strided_slice %230 {offsets = [1, 0], sizes = [1, 128], strides = [1, 1]} : vector<3x128xf32> to vector<1x128xf32>
    %237 = vector.broadcast %236 : vector<1x128xf32> to vector<14x128xf32>
    %238 = arith.mulf %235, %237 : vector<14x128xf32>
    %239 = vector.extract_strided_slice %230 {offsets = [2, 0], sizes = [1, 128], strides = [1, 1]} : vector<3x128xf32> to vector<1x128xf32>
    %240 = vector.broadcast %239 : vector<1x128xf32> to vector<14x128xf32>
    %241 = arith.addf %238, %240 : vector<14x128xf32>
    %242 = arith.truncf %241 : vector<14x128xf32> to vector<14x128xbf16>
    %243 = vector.extract_strided_slice %242 {offsets = [0, 0], sizes = [12, 128], strides = [1, 1]} : vector<14x128xbf16> to vector<12x128xbf16>
    %c0_117 = arith.constant 0 : index
    %c0_118 = arith.constant 0 : index
    %c0_119 = arith.constant 0 : index
    %244 = vector.load %arg42[%c0_117, %c0_118, %c0_119] : memref<3x128x128xbf16, #tpu.memory_space<vmem>>, vector<1x128x128xbf16>
    %245 = vector.shape_cast %244 : vector<1x128x128xbf16> to vector<128x128xbf16>
    %cst_120 = arith.constant dense<0.000000e+00> : vector<12x128xf32>
    %246 = tpu.matmul %243, %245, %cst_120 {dimension_numbers = #tpu.dot_dimension_numbers<[1], [0], [0], [1], [0, 0, 1, 1], [], []>} : vector<12x128xbf16>, vector<128x128xbf16>, vector<12x128xf32> -> vector<12x128xf32>
    %247 = vector.extract_strided_slice %242 {offsets = [1, 0], sizes = [12, 128], strides = [1, 1]} : vector<14x128xbf16> to vector<12x128xbf16>
    %c1_121 = arith.constant 1 : index
    %c0_122 = arith.constant 0 : index
    %c0_123 = arith.constant 0 : index
    %248 = vector.load %arg42[%c1_121, %c0_122, %c0_123] : memref<3x128x128xbf16, #tpu.memory_space<vmem>>, vector<1x128x128xbf16>
    %249 = vector.shape_cast %248 : vector<1x128x128xbf16> to vector<128x128xbf16>
    %cst_124 = arith.constant dense<0.000000e+00> : vector<12x128xf32>
    %250 = tpu.matmul %247, %249, %cst_124 {dimension_numbers = #tpu.dot_dimension_numbers<[1], [0], [0], [1], [0, 0, 1, 1], [], []>} : vector<12x128xbf16>, vector<128x128xbf16>, vector<12x128xf32> -> vector<12x128xf32>
    %251 = arith.addf %246, %250 : vector<12x128xf32>
    %252 = vector.extract_strided_slice %242 {offsets = [2, 0], sizes = [12, 128], strides = [1, 1]} : vector<14x128xbf16> to vector<12x128xbf16>
    %c2_125 = arith.constant 2 : index
    %c0_126 = arith.constant 0 : index
    %c0_127 = arith.constant 0 : index
    %253 = vector.load %arg42[%c2_125, %c0_126, %c0_127] : memref<3x128x128xbf16, #tpu.memory_space<vmem>>, vector<1x128x128xbf16>
    %254 = vector.shape_cast %253 : vector<1x128x128xbf16> to vector<128x128xbf16>
    %cst_128 = arith.constant dense<0.000000e+00> : vector<12x128xf32>
    %255 = tpu.matmul %252, %254, %cst_128 {dimension_numbers = #tpu.dot_dimension_numbers<[1], [0], [0], [1], [0, 0, 1, 1], [], []>} : vector<12x128xbf16>, vector<128x128xbf16>, vector<12x128xf32> -> vector<12x128xf32>
    %256 = arith.addf %251, %255 : vector<12x128xf32>
    %c0_129 = arith.constant 0 : index
    %c0_130 = arith.constant 0 : index
    %257 = vector.load %arg43[%c0_129, %c0_130] : memref<3x128xf32, #tpu.memory_space<vmem>>, vector<3x128xf32>
    %258 = vector.extract_strided_slice %257 {offsets = [0, 0], sizes = [1, 128], strides = [1, 1]} : vector<3x128xf32> to vector<1x128xf32>
    %259 = vector.broadcast %258 : vector<1x128xf32> to vector<12x128xf32>
    %260 = arith.addf %256, %259 : vector<12x128xf32>
    %cst_131 = arith.constant 0.000000e+00 : f32
    %261 = vector.broadcast %cst_131 : f32 to vector<12x128xf32>
    %262 = arith.maximumf %260, %261 : vector<12x128xf32>
    %263 = vector.extract_strided_slice %257 {offsets = [1, 0], sizes = [1, 128], strides = [1, 1]} : vector<3x128xf32> to vector<1x128xf32>
    %264 = vector.broadcast %263 : vector<1x128xf32> to vector<12x128xf32>
    %265 = arith.mulf %262, %264 : vector<12x128xf32>
    %266 = vector.extract_strided_slice %257 {offsets = [2, 0], sizes = [1, 128], strides = [1, 1]} : vector<3x128xf32> to vector<1x128xf32>
    %267 = vector.broadcast %266 : vector<1x128xf32> to vector<12x128xf32>
    %268 = arith.addf %265, %267 : vector<12x128xf32>
    %269 = tpu.iota {dimensions = array<i32: 0>} : vector<6x12xi32>
    %270 = tpu.iota {dimensions = array<i32: 1>} : vector<6x12xi32>
    %c2_i32_132 = arith.constant 2 : i32
    %271 = vector.broadcast %c2_i32_132 : i32 to vector<6x12xi32>
    %272 = arith.muli %271, %269 : vector<6x12xi32>
    %273 = arith.cmpi eq, %270, %272 : vector<6x12xi32>
    %274 = arith.extui %273 : vector<6x12xi1> to vector<6x12xi32>
    %275 = arith.sitofp %274 : vector<6x12xi32> to vector<6x12xf32>
    %c2_i32_133 = arith.constant 2 : i32
    %276 = vector.broadcast %c2_i32_133 : i32 to vector<6x12xi32>
    %277 = arith.muli %276, %269 : vector<6x12xi32>
    %c1_i32_134 = arith.constant 1 : i32
    %278 = vector.broadcast %c1_i32_134 : i32 to vector<6x12xi32>
    %279 = arith.addi %277, %278 : vector<6x12xi32>
    %280 = arith.cmpi eq, %270, %279 : vector<6x12xi32>
    %281 = arith.extui %280 : vector<6x12xi1> to vector<6x12xi32>
    %282 = arith.sitofp %281 : vector<6x12xi32> to vector<6x12xf32>
    %cst_135 = arith.constant dense<0.000000e+00> : vector<6x128xf32>
    %283 = tpu.matmul %275, %268, %cst_135 {dimension_numbers = #tpu.dot_dimension_numbers<[1], [0], [0], [1], [0, 0, 1, 1], [], []>} : vector<6x12xf32>, vector<12x128xf32>, vector<6x128xf32> -> vector<6x128xf32>
    %cst_136 = arith.constant dense<0.000000e+00> : vector<6x128xf32>
    %284 = tpu.matmul %282, %268, %cst_136 {dimension_numbers = #tpu.dot_dimension_numbers<[1], [0], [0], [1], [0, 0, 1, 1], [], []>} : vector<6x12xf32>, vector<12x128xf32>, vector<6x128xf32> -> vector<6x128xf32>
    %285 = arith.maximumf %283, %284 : vector<6x128xf32>
    %286 = arith.truncf %285 : vector<6x128xf32> to vector<6x128xbf16>
    %287 = vector.extract_strided_slice %286 {offsets = [0, 0], sizes = [4, 128], strides = [1, 1]} : vector<6x128xbf16> to vector<4x128xbf16>
    %c0_137 = arith.constant 0 : index
    %c0_138 = arith.constant 0 : index
    %c0_139 = arith.constant 0 : index
    %288 = vector.load %arg44[%c0_137, %c0_138, %c0_139] : memref<3x128x256xbf16, #tpu.memory_space<vmem>>, vector<1x128x256xbf16>
    %289 = vector.shape_cast %288 : vector<1x128x256xbf16> to vector<128x256xbf16>
    %cst_140 = arith.constant dense<0.000000e+00> : vector<4x256xf32>
    %290 = tpu.matmul %287, %289, %cst_140 {dimension_numbers = #tpu.dot_dimension_numbers<[1], [0], [0], [1], [0, 0, 1, 1], [], []>} : vector<4x128xbf16>, vector<128x256xbf16>, vector<4x256xf32> -> vector<4x256xf32>
    %291 = vector.extract_strided_slice %286 {offsets = [1, 0], sizes = [4, 128], strides = [1, 1]} : vector<6x128xbf16> to vector<4x128xbf16>
    %c1_141 = arith.constant 1 : index
    %c0_142 = arith.constant 0 : index
    %c0_143 = arith.constant 0 : index
    %292 = vector.load %arg44[%c1_141, %c0_142, %c0_143] : memref<3x128x256xbf16, #tpu.memory_space<vmem>>, vector<1x128x256xbf16>
    %293 = vector.shape_cast %292 : vector<1x128x256xbf16> to vector<128x256xbf16>
    %cst_144 = arith.constant dense<0.000000e+00> : vector<4x256xf32>
    %294 = tpu.matmul %291, %293, %cst_144 {dimension_numbers = #tpu.dot_dimension_numbers<[1], [0], [0], [1], [0, 0, 1, 1], [], []>} : vector<4x128xbf16>, vector<128x256xbf16>, vector<4x256xf32> -> vector<4x256xf32>
    %295 = arith.addf %290, %294 : vector<4x256xf32>
    %296 = vector.extract_strided_slice %286 {offsets = [2, 0], sizes = [4, 128], strides = [1, 1]} : vector<6x128xbf16> to vector<4x128xbf16>
    %c2_145 = arith.constant 2 : index
    %c0_146 = arith.constant 0 : index
    %c0_147 = arith.constant 0 : index
    %297 = vector.load %arg44[%c2_145, %c0_146, %c0_147] : memref<3x128x256xbf16, #tpu.memory_space<vmem>>, vector<1x128x256xbf16>
    %298 = vector.shape_cast %297 : vector<1x128x256xbf16> to vector<128x256xbf16>
    %cst_148 = arith.constant dense<0.000000e+00> : vector<4x256xf32>
    %299 = tpu.matmul %296, %298, %cst_148 {dimension_numbers = #tpu.dot_dimension_numbers<[1], [0], [0], [1], [0, 0, 1, 1], [], []>} : vector<4x128xbf16>, vector<128x256xbf16>, vector<4x256xf32> -> vector<4x256xf32>
    %300 = arith.addf %295, %299 : vector<4x256xf32>
    %c0_149 = arith.constant 0 : index
    %c0_150 = arith.constant 0 : index
    %301 = vector.load %arg45[%c0_149, %c0_150] : memref<3x256xf32, #tpu.memory_space<vmem>>, vector<3x256xf32>
    %302 = vector.extract_strided_slice %301 {offsets = [0, 0], sizes = [1, 256], strides = [1, 1]} : vector<3x256xf32> to vector<1x256xf32>
    %303 = vector.broadcast %302 : vector<1x256xf32> to vector<4x256xf32>
    %304 = arith.addf %300, %303 : vector<4x256xf32>
    %cst_151 = arith.constant 0.000000e+00 : f32
    %305 = vector.broadcast %cst_151 : f32 to vector<4x256xf32>
    %306 = arith.maximumf %304, %305 : vector<4x256xf32>
    %307 = vector.extract_strided_slice %301 {offsets = [1, 0], sizes = [1, 256], strides = [1, 1]} : vector<3x256xf32> to vector<1x256xf32>
    %308 = vector.broadcast %307 : vector<1x256xf32> to vector<4x256xf32>
    %309 = arith.mulf %306, %308 : vector<4x256xf32>
    %310 = vector.extract_strided_slice %301 {offsets = [2, 0], sizes = [1, 256], strides = [1, 1]} : vector<3x256xf32> to vector<1x256xf32>
    %311 = vector.broadcast %310 : vector<1x256xf32> to vector<4x256xf32>
    %312 = arith.addf %309, %311 : vector<4x256xf32>
    %313 = arith.truncf %312 : vector<4x256xf32> to vector<4x256xbf16>
    %314 = vector.extract_strided_slice %313 {offsets = [0, 0], sizes = [2, 256], strides = [1, 1]} : vector<4x256xbf16> to vector<2x256xbf16>
    %c0_152 = arith.constant 0 : index
    %c0_153 = arith.constant 0 : index
    %c0_154 = arith.constant 0 : index
    %315 = vector.load %arg46[%c0_152, %c0_153, %c0_154] : memref<3x256x256xbf16, #tpu.memory_space<vmem>>, vector<1x256x256xbf16>
    %316 = vector.shape_cast %315 : vector<1x256x256xbf16> to vector<256x256xbf16>
    %cst_155 = arith.constant dense<0.000000e+00> : vector<2x256xf32>
    %317 = tpu.matmul %314, %316, %cst_155 {dimension_numbers = #tpu.dot_dimension_numbers<[1], [0], [0], [1], [0, 0, 1, 1], [], []>} : vector<2x256xbf16>, vector<256x256xbf16>, vector<2x256xf32> -> vector<2x256xf32>
    %318 = vector.extract_strided_slice %313 {offsets = [1, 0], sizes = [2, 256], strides = [1, 1]} : vector<4x256xbf16> to vector<2x256xbf16>
    %c1_156 = arith.constant 1 : index
    %c0_157 = arith.constant 0 : index
    %c0_158 = arith.constant 0 : index
    %319 = vector.load %arg46[%c1_156, %c0_157, %c0_158] : memref<3x256x256xbf16, #tpu.memory_space<vmem>>, vector<1x256x256xbf16>
    %320 = vector.shape_cast %319 : vector<1x256x256xbf16> to vector<256x256xbf16>
    %cst_159 = arith.constant dense<0.000000e+00> : vector<2x256xf32>
    %321 = tpu.matmul %318, %320, %cst_159 {dimension_numbers = #tpu.dot_dimension_numbers<[1], [0], [0], [1], [0, 0, 1, 1], [], []>} : vector<2x256xbf16>, vector<256x256xbf16>, vector<2x256xf32> -> vector<2x256xf32>
    %322 = arith.addf %317, %321 : vector<2x256xf32>
    %323 = vector.extract_strided_slice %313 {offsets = [2, 0], sizes = [2, 256], strides = [1, 1]} : vector<4x256xbf16> to vector<2x256xbf16>
    %c2_160 = arith.constant 2 : index
    %c0_161 = arith.constant 0 : index
    %c0_162 = arith.constant 0 : index
    %324 = vector.load %arg46[%c2_160, %c0_161, %c0_162] : memref<3x256x256xbf16, #tpu.memory_space<vmem>>, vector<1x256x256xbf16>
    %325 = vector.shape_cast %324 : vector<1x256x256xbf16> to vector<256x256xbf16>
    %cst_163 = arith.constant dense<0.000000e+00> : vector<2x256xf32>
    %326 = tpu.matmul %323, %325, %cst_163 {dimension_numbers = #tpu.dot_dimension_numbers<[1], [0], [0], [1], [0, 0, 1, 1], [], []>} : vector<2x256xbf16>, vector<256x256xbf16>, vector<2x256xf32> -> vector<2x256xf32>
    %327 = arith.addf %322, %326 : vector<2x256xf32>
    %c0_164 = arith.constant 0 : index
    %c0_165 = arith.constant 0 : index
    %328 = vector.load %arg47[%c0_164, %c0_165] : memref<3x256xf32, #tpu.memory_space<vmem>>, vector<3x256xf32>
    %329 = vector.extract_strided_slice %328 {offsets = [0, 0], sizes = [1, 256], strides = [1, 1]} : vector<3x256xf32> to vector<1x256xf32>
    %330 = vector.broadcast %329 : vector<1x256xf32> to vector<2x256xf32>
    %331 = arith.addf %327, %330 : vector<2x256xf32>
    %cst_166 = arith.constant 0.000000e+00 : f32
    %332 = vector.broadcast %cst_166 : f32 to vector<2x256xf32>
    %333 = arith.maximumf %331, %332 : vector<2x256xf32>
    %334 = vector.extract_strided_slice %328 {offsets = [1, 0], sizes = [1, 256], strides = [1, 1]} : vector<3x256xf32> to vector<1x256xf32>
    %335 = vector.broadcast %334 : vector<1x256xf32> to vector<2x256xf32>
    %336 = arith.mulf %333, %335 : vector<2x256xf32>
    %337 = vector.extract_strided_slice %328 {offsets = [2, 0], sizes = [1, 256], strides = [1, 1]} : vector<3x256xf32> to vector<1x256xf32>
    %338 = vector.broadcast %337 : vector<1x256xf32> to vector<2x256xf32>
    %339 = arith.addf %336, %338 : vector<2x256xf32>
    %340 = arith.truncf %339 : vector<2x256xf32> to vector<2x256xbf16>
    %341 = tpu.iota {dimensions = array<i32: 0>} : vector<6x2xi32>
    %342 = tpu.iota {dimensions = array<i32: 1>} : vector<6x2xi32>
    %cst_167 = arith.constant 0.000000e+00 : f32
    %343 = vector.broadcast %cst_167 : f32 to vector<6x128xf32>
    %c0_168 = arith.constant 0 : index
    %c0_169 = arith.constant 0 : index
    %c0_170 = arith.constant 0 : index
    %344 = vector.load %arg4[%c0_168, %c0_169, %c0_170] : memref<3x256x128xbf16, #tpu.memory_space<vmem>>, vector<1x256x128xbf16>
    %345 = vector.shape_cast %344 : vector<1x256x128xbf16> to vector<256x128xbf16>
    %cst_171 = arith.constant dense<0.000000e+00> : vector<2x128xf32>
    %346 = tpu.matmul %340, %345, %cst_171 {dimension_numbers = #tpu.dot_dimension_numbers<[1], [0], [0], [1], [0, 0, 1, 1], [], []>} : vector<2x256xbf16>, vector<256x128xbf16>, vector<2x128xf32> -> vector<2x128xf32>
    %c3_i32 = arith.constant 3 : i32
    %347 = vector.broadcast %c3_i32 : i32 to vector<6x2xi32>
    %348 = arith.muli %347, %342 : vector<6x2xi32>
    %c0_i32 = arith.constant 0 : i32
    %349 = vector.broadcast %c0_i32 : i32 to vector<6x2xi32>
    %350 = arith.addi %348, %349 : vector<6x2xi32>
    %351 = arith.cmpi eq, %341, %350 : vector<6x2xi32>
    %352 = arith.extui %351 : vector<6x2xi1> to vector<6x2xi32>
    %353 = arith.sitofp %352 : vector<6x2xi32> to vector<6x2xf32>
    %cst_172 = arith.constant dense<0.000000e+00> : vector<6x128xf32>
    %354 = tpu.matmul %353, %346, %cst_172 {dimension_numbers = #tpu.dot_dimension_numbers<[1], [0], [0], [1], [0, 0, 1, 1], [], []>} : vector<6x2xf32>, vector<2x128xf32>, vector<6x128xf32> -> vector<6x128xf32>
    %355 = arith.addf %343, %354 : vector<6x128xf32>
    %c1_173 = arith.constant 1 : index
    %c0_174 = arith.constant 0 : index
    %c0_175 = arith.constant 0 : index
    %356 = vector.load %arg4[%c1_173, %c0_174, %c0_175] : memref<3x256x128xbf16, #tpu.memory_space<vmem>>, vector<1x256x128xbf16>
    %357 = vector.shape_cast %356 : vector<1x256x128xbf16> to vector<256x128xbf16>
    %cst_176 = arith.constant dense<0.000000e+00> : vector<2x128xf32>
    %358 = tpu.matmul %340, %357, %cst_176 {dimension_numbers = #tpu.dot_dimension_numbers<[1], [0], [0], [1], [0, 0, 1, 1], [], []>} : vector<2x256xbf16>, vector<256x128xbf16>, vector<2x128xf32> -> vector<2x128xf32>
    %c3_i32_177 = arith.constant 3 : i32
    %359 = vector.broadcast %c3_i32_177 : i32 to vector<6x2xi32>
    %360 = arith.muli %359, %342 : vector<6x2xi32>
    %c1_i32_178 = arith.constant 1 : i32
    %361 = vector.broadcast %c1_i32_178 : i32 to vector<6x2xi32>
    %362 = arith.addi %360, %361 : vector<6x2xi32>
    %363 = arith.cmpi eq, %341, %362 : vector<6x2xi32>
    %364 = arith.extui %363 : vector<6x2xi1> to vector<6x2xi32>
    %365 = arith.sitofp %364 : vector<6x2xi32> to vector<6x2xf32>
    %cst_179 = arith.constant dense<0.000000e+00> : vector<6x128xf32>
    %366 = tpu.matmul %365, %358, %cst_179 {dimension_numbers = #tpu.dot_dimension_numbers<[1], [0], [0], [1], [0, 0, 1, 1], [], []>} : vector<6x2xf32>, vector<2x128xf32>, vector<6x128xf32> -> vector<6x128xf32>
    %367 = arith.addf %355, %366 : vector<6x128xf32>
    %c2_180 = arith.constant 2 : index
    %c0_181 = arith.constant 0 : index
    %c0_182 = arith.constant 0 : index
    %368 = vector.load %arg4[%c2_180, %c0_181, %c0_182] : memref<3x256x128xbf16, #tpu.memory_space<vmem>>, vector<1x256x128xbf16>
    %369 = vector.shape_cast %368 : vector<1x256x128xbf16> to vector<256x128xbf16>
    %cst_183 = arith.constant dense<0.000000e+00> : vector<2x128xf32>
    %370 = tpu.matmul %340, %369, %cst_183 {dimension_numbers = #tpu.dot_dimension_numbers<[1], [0], [0], [1], [0, 0, 1, 1], [], []>} : vector<2x256xbf16>, vector<256x128xbf16>, vector<2x128xf32> -> vector<2x128xf32>
    %c3_i32_184 = arith.constant 3 : i32
    %371 = vector.broadcast %c3_i32_184 : i32 to vector<6x2xi32>
    %372 = arith.muli %371, %342 : vector<6x2xi32>
    %c2_i32_185 = arith.constant 2 : i32
    %373 = vector.broadcast %c2_i32_185 : i32 to vector<6x2xi32>
    %374 = arith.addi %372, %373 : vector<6x2xi32>
    %375 = arith.cmpi eq, %341, %374 : vector<6x2xi32>
    %376 = arith.extui %375 : vector<6x2xi1> to vector<6x2xi32>
    %377 = arith.sitofp %376 : vector<6x2xi32> to vector<6x2xf32>
    %cst_186 = arith.constant dense<0.000000e+00> : vector<6x128xf32>
    %378 = tpu.matmul %377, %370, %cst_186 {dimension_numbers = #tpu.dot_dimension_numbers<[1], [0], [0], [1], [0, 0, 1, 1], [], []>} : vector<6x2xf32>, vector<2x128xf32>, vector<6x128xf32> -> vector<6x128xf32>
    %379 = arith.addf %367, %378 : vector<6x128xf32>
    %c0_187 = arith.constant 0 : index
    %c0_188 = arith.constant 0 : index
    %380 = vector.load %arg5[%c0_187, %c0_188] : memref<1x128xf32, #tpu.memory_space<vmem>>, vector<1x128xf32>
    %381 = vector.broadcast %380 : vector<1x128xf32> to vector<6x128xf32>
    %382 = arith.addf %379, %381 : vector<6x128xf32>
    %383 = vector.extract_strided_slice %268 {offsets = [4, 0], sizes = [6, 128], strides = [1, 1]} : vector<12x128xf32> to vector<6x128xf32>
    %384 = arith.truncf %383 : vector<6x128xf32> to vector<6x128xbf16>
    %385 = arith.truncf %382 : vector<6x128xf32> to vector<6x128xbf16>
    %c0_189 = arith.constant 0 : index
    %c0_190 = arith.constant 0 : index
    %c0_191 = arith.constant 0 : index
    %386 = vector.load %arg6[%c0_189, %c0_190, %c0_191] : memref<3x256x128xbf16, #tpu.memory_space<vmem>>, vector<1x256x128xbf16>
    %387 = vector.shape_cast %386 : vector<1x256x128xbf16> to vector<256x128xbf16>
    %388 = vector.extract_strided_slice %384 {offsets = [0, 0], sizes = [4, 128], strides = [1, 1]} : vector<6x128xbf16> to vector<4x128xbf16>
    %389 = vector.extract_strided_slice %387 {offsets = [0, 0], sizes = [128, 128], strides = [1, 1]} : vector<256x128xbf16> to vector<128x128xbf16>
    %cst_192 = arith.constant dense<0.000000e+00> : vector<4x128xf32>
    %390 = tpu.matmul %388, %389, %cst_192 {dimension_numbers = #tpu.dot_dimension_numbers<[1], [0], [0], [1], [0, 0, 1, 1], [], []>} : vector<4x128xbf16>, vector<128x128xbf16>, vector<4x128xf32> -> vector<4x128xf32>
    %391 = vector.extract_strided_slice %385 {offsets = [0, 0], sizes = [4, 128], strides = [1, 1]} : vector<6x128xbf16> to vector<4x128xbf16>
    %392 = vector.extract_strided_slice %387 {offsets = [128, 0], sizes = [128, 128], strides = [1, 1]} : vector<256x128xbf16> to vector<128x128xbf16>
    %cst_193 = arith.constant dense<0.000000e+00> : vector<4x128xf32>
    %393 = tpu.matmul %391, %392, %cst_193 {dimension_numbers = #tpu.dot_dimension_numbers<[1], [0], [0], [1], [0, 0, 1, 1], [], []>} : vector<4x128xbf16>, vector<128x128xbf16>, vector<4x128xf32> -> vector<4x128xf32>
    %394 = arith.addf %390, %393 : vector<4x128xf32>
    %c1_194 = arith.constant 1 : index
    %c0_195 = arith.constant 0 : index
    %c0_196 = arith.constant 0 : index
    %395 = vector.load %arg6[%c1_194, %c0_195, %c0_196] : memref<3x256x128xbf16, #tpu.memory_space<vmem>>, vector<1x256x128xbf16>
    %396 = vector.shape_cast %395 : vector<1x256x128xbf16> to vector<256x128xbf16>
    %397 = vector.extract_strided_slice %384 {offsets = [1, 0], sizes = [4, 128], strides = [1, 1]} : vector<6x128xbf16> to vector<4x128xbf16>
    %398 = vector.extract_strided_slice %396 {offsets = [0, 0], sizes = [128, 128], strides = [1, 1]} : vector<256x128xbf16> to vector<128x128xbf16>
    %cst_197 = arith.constant dense<0.000000e+00> : vector<4x128xf32>
    %399 = tpu.matmul %397, %398, %cst_197 {dimension_numbers = #tpu.dot_dimension_numbers<[1], [0], [0], [1], [0, 0, 1, 1], [], []>} : vector<4x128xbf16>, vector<128x128xbf16>, vector<4x128xf32> -> vector<4x128xf32>
    %400 = vector.extract_strided_slice %385 {offsets = [1, 0], sizes = [4, 128], strides = [1, 1]} : vector<6x128xbf16> to vector<4x128xbf16>
    %401 = vector.extract_strided_slice %396 {offsets = [128, 0], sizes = [128, 128], strides = [1, 1]} : vector<256x128xbf16> to vector<128x128xbf16>
    %cst_198 = arith.constant dense<0.000000e+00> : vector<4x128xf32>
    %402 = tpu.matmul %400, %401, %cst_198 {dimension_numbers = #tpu.dot_dimension_numbers<[1], [0], [0], [1], [0, 0, 1, 1], [], []>} : vector<4x128xbf16>, vector<128x128xbf16>, vector<4x128xf32> -> vector<4x128xf32>
    %403 = arith.addf %399, %402 : vector<4x128xf32>
    %404 = arith.addf %394, %403 : vector<4x128xf32>
    %c2_199 = arith.constant 2 : index
    %c0_200 = arith.constant 0 : index
    %c0_201 = arith.constant 0 : index
    %405 = vector.load %arg6[%c2_199, %c0_200, %c0_201] : memref<3x256x128xbf16, #tpu.memory_space<vmem>>, vector<1x256x128xbf16>
    %406 = vector.shape_cast %405 : vector<1x256x128xbf16> to vector<256x128xbf16>
    %407 = vector.extract_strided_slice %384 {offsets = [2, 0], sizes = [4, 128], strides = [1, 1]} : vector<6x128xbf16> to vector<4x128xbf16>
    %408 = vector.extract_strided_slice %406 {offsets = [0, 0], sizes = [128, 128], strides = [1, 1]} : vector<256x128xbf16> to vector<128x128xbf16>
    %cst_202 = arith.constant dense<0.000000e+00> : vector<4x128xf32>
    %409 = tpu.matmul %407, %408, %cst_202 {dimension_numbers = #tpu.dot_dimension_numbers<[1], [0], [0], [1], [0, 0, 1, 1], [], []>} : vector<4x128xbf16>, vector<128x128xbf16>, vector<4x128xf32> -> vector<4x128xf32>
    %410 = vector.extract_strided_slice %385 {offsets = [2, 0], sizes = [4, 128], strides = [1, 1]} : vector<6x128xbf16> to vector<4x128xbf16>
    %411 = vector.extract_strided_slice %406 {offsets = [128, 0], sizes = [128, 128], strides = [1, 1]} : vector<256x128xbf16> to vector<128x128xbf16>
    %cst_203 = arith.constant dense<0.000000e+00> : vector<4x128xf32>
    %412 = tpu.matmul %410, %411, %cst_203 {dimension_numbers = #tpu.dot_dimension_numbers<[1], [0], [0], [1], [0, 0, 1, 1], [], []>} : vector<4x128xbf16>, vector<128x128xbf16>, vector<4x128xf32> -> vector<4x128xf32>
    %413 = arith.addf %409, %412 : vector<4x128xf32>
    %414 = arith.addf %404, %413 : vector<4x128xf32>
    %c0_204 = arith.constant 0 : index
    %c0_205 = arith.constant 0 : index
    %415 = vector.load %arg7[%c0_204, %c0_205] : memref<3x128xf32, #tpu.memory_space<vmem>>, vector<3x128xf32>
    %416 = vector.extract_strided_slice %415 {offsets = [0, 0], sizes = [1, 128], strides = [1, 1]} : vector<3x128xf32> to vector<1x128xf32>
    %417 = vector.broadcast %416 : vector<1x128xf32> to vector<4x128xf32>
    %418 = arith.addf %414, %417 : vector<4x128xf32>
    %cst_206 = arith.constant 0.000000e+00 : f32
    %419 = vector.broadcast %cst_206 : f32 to vector<4x128xf32>
    %420 = arith.maximumf %418, %419 : vector<4x128xf32>
    %421 = vector.extract_strided_slice %415 {offsets = [1, 0], sizes = [1, 128], strides = [1, 1]} : vector<3x128xf32> to vector<1x128xf32>
    %422 = vector.broadcast %421 : vector<1x128xf32> to vector<4x128xf32>
    %423 = arith.mulf %420, %422 : vector<4x128xf32>
    %424 = vector.extract_strided_slice %415 {offsets = [2, 0], sizes = [1, 128], strides = [1, 1]} : vector<3x128xf32> to vector<1x128xf32>
    %425 = vector.broadcast %424 : vector<1x128xf32> to vector<4x128xf32>
    %426 = arith.addf %423, %425 : vector<4x128xf32>
    %427 = arith.truncf %426 : vector<4x128xf32> to vector<4x128xbf16>
    %428 = vector.extract_strided_slice %427 {offsets = [0, 0], sizes = [2, 128], strides = [1, 1]} : vector<4x128xbf16> to vector<2x128xbf16>
    %c0_207 = arith.constant 0 : index
    %c0_208 = arith.constant 0 : index
    %c0_209 = arith.constant 0 : index
    %429 = vector.load %arg8[%c0_207, %c0_208, %c0_209] : memref<3x128x128xbf16, #tpu.memory_space<vmem>>, vector<1x128x128xbf16>
    %430 = vector.shape_cast %429 : vector<1x128x128xbf16> to vector<128x128xbf16>
    %cst_210 = arith.constant dense<0.000000e+00> : vector<2x128xf32>
    %431 = tpu.matmul %428, %430, %cst_210 {dimension_numbers = #tpu.dot_dimension_numbers<[1], [0], [0], [1], [0, 0, 1, 1], [], []>} : vector<2x128xbf16>, vector<128x128xbf16>, vector<2x128xf32> -> vector<2x128xf32>
    %432 = vector.extract_strided_slice %427 {offsets = [1, 0], sizes = [2, 128], strides = [1, 1]} : vector<4x128xbf16> to vector<2x128xbf16>
    %c1_211 = arith.constant 1 : index
    %c0_212 = arith.constant 0 : index
    %c0_213 = arith.constant 0 : index
    %433 = vector.load %arg8[%c1_211, %c0_212, %c0_213] : memref<3x128x128xbf16, #tpu.memory_space<vmem>>, vector<1x128x128xbf16>
    %434 = vector.shape_cast %433 : vector<1x128x128xbf16> to vector<128x128xbf16>
    %cst_214 = arith.constant dense<0.000000e+00> : vector<2x128xf32>
    %435 = tpu.matmul %432, %434, %cst_214 {dimension_numbers = #tpu.dot_dimension_numbers<[1], [0], [0], [1], [0, 0, 1, 1], [], []>} : vector<2x128xbf16>, vector<128x128xbf16>, vector<2x128xf32> -> vector<2x128xf32>
    %436 = arith.addf %431, %435 : vector<2x128xf32>
    %437 = vector.extract_strided_slice %427 {offsets = [2, 0], sizes = [2, 128], strides = [1, 1]} : vector<4x128xbf16> to vector<2x128xbf16>
    %c2_215 = arith.constant 2 : index
    %c0_216 = arith.constant 0 : index
    %c0_217 = arith.constant 0 : index
    %438 = vector.load %arg8[%c2_215, %c0_216, %c0_217] : memref<3x128x128xbf16, #tpu.memory_space<vmem>>, vector<1x128x128xbf16>
    %439 = vector.shape_cast %438 : vector<1x128x128xbf16> to vector<128x128xbf16>
    %cst_218 = arith.constant dense<0.000000e+00> : vector<2x128xf32>
    %440 = tpu.matmul %437, %439, %cst_218 {dimension_numbers = #tpu.dot_dimension_numbers<[1], [0], [0], [1], [0, 0, 1, 1], [], []>} : vector<2x128xbf16>, vector<128x128xbf16>, vector<2x128xf32> -> vector<2x128xf32>
    %441 = arith.addf %436, %440 : vector<2x128xf32>
    %c0_219 = arith.constant 0 : index
    %c0_220 = arith.constant 0 : index
    %442 = vector.load %arg9[%c0_219, %c0_220] : memref<3x128xf32, #tpu.memory_space<vmem>>, vector<3x128xf32>
    %443 = vector.extract_strided_slice %442 {offsets = [0, 0], sizes = [1, 128], strides = [1, 1]} : vector<3x128xf32> to vector<1x128xf32>
    %444 = vector.broadcast %443 : vector<1x128xf32> to vector<2x128xf32>
    %445 = arith.addf %441, %444 : vector<2x128xf32>
    %cst_221 = arith.constant 0.000000e+00 : f32
    %446 = vector.broadcast %cst_221 : f32 to vector<2x128xf32>
    %447 = arith.maximumf %445, %446 : vector<2x128xf32>
    %448 = vector.extract_strided_slice %442 {offsets = [1, 0], sizes = [1, 128], strides = [1, 1]} : vector<3x128xf32> to vector<1x128xf32>
    %449 = vector.broadcast %448 : vector<1x128xf32> to vector<2x128xf32>
    %450 = arith.mulf %447, %449 : vector<2x128xf32>
    %451 = vector.extract_strided_slice %442 {offsets = [2, 0], sizes = [1, 128], strides = [1, 1]} : vector<3x128xf32> to vector<1x128xf32>
    %452 = vector.broadcast %451 : vector<1x128xf32> to vector<2x128xf32>
    %453 = arith.addf %450, %452 : vector<2x128xf32>
    %454 = arith.truncf %453 : vector<2x128xf32> to vector<2x128xbf16>
    %455 = tpu.iota {dimensions = array<i32: 0>} : vector<6x2xi32>
    %456 = tpu.iota {dimensions = array<i32: 1>} : vector<6x2xi32>
    %cst_222 = arith.constant 0.000000e+00 : f32
    %457 = vector.broadcast %cst_222 : f32 to vector<6x64xf32>
    %c0_223 = arith.constant 0 : index
    %c0_224 = arith.constant 0 : index
    %c0_225 = arith.constant 0 : index
    %458 = vector.load %arg10[%c0_223, %c0_224, %c0_225] : memref<3x128x64xbf16, #tpu.memory_space<vmem>>, vector<1x128x64xbf16>
    %459 = vector.shape_cast %458 : vector<1x128x64xbf16> to vector<128x64xbf16>
    %cst_226 = arith.constant dense<0.000000e+00> : vector<2x64xf32>
    %460 = tpu.matmul %454, %459, %cst_226 {dimension_numbers = #tpu.dot_dimension_numbers<[1], [0], [0], [1], [0, 0, 1, 1], [], []>} : vector<2x128xbf16>, vector<128x64xbf16>, vector<2x64xf32> -> vector<2x64xf32>
    %c3_i32_227 = arith.constant 3 : i32
    %461 = vector.broadcast %c3_i32_227 : i32 to vector<6x2xi32>
    %462 = arith.muli %461, %456 : vector<6x2xi32>
    %c0_i32_228 = arith.constant 0 : i32
    %463 = vector.broadcast %c0_i32_228 : i32 to vector<6x2xi32>
    %464 = arith.addi %462, %463 : vector<6x2xi32>
    %465 = arith.cmpi eq, %455, %464 : vector<6x2xi32>
    %466 = arith.extui %465 : vector<6x2xi1> to vector<6x2xi32>
    %467 = arith.sitofp %466 : vector<6x2xi32> to vector<6x2xf32>
    %cst_229 = arith.constant dense<0.000000e+00> : vector<6x64xf32>
    %468 = tpu.matmul %467, %460, %cst_229 {dimension_numbers = #tpu.dot_dimension_numbers<[1], [0], [0], [1], [0, 0, 1, 1], [], []>} : vector<6x2xf32>, vector<2x64xf32>, vector<6x64xf32> -> vector<6x64xf32>
    %469 = arith.addf %457, %468 : vector<6x64xf32>
    %c1_230 = arith.constant 1 : index
    %c0_231 = arith.constant 0 : index
    %c0_232 = arith.constant 0 : index
    %470 = vector.load %arg10[%c1_230, %c0_231, %c0_232] : memref<3x128x64xbf16, #tpu.memory_space<vmem>>, vector<1x128x64xbf16>
    %471 = vector.shape_cast %470 : vector<1x128x64xbf16> to vector<128x64xbf16>
    %cst_233 = arith.constant dense<0.000000e+00> : vector<2x64xf32>
    %472 = tpu.matmul %454, %471, %cst_233 {dimension_numbers = #tpu.dot_dimension_numbers<[1], [0], [0], [1], [0, 0, 1, 1], [], []>} : vector<2x128xbf16>, vector<128x64xbf16>, vector<2x64xf32> -> vector<2x64xf32>
    %c3_i32_234 = arith.constant 3 : i32
    %473 = vector.broadcast %c3_i32_234 : i32 to vector<6x2xi32>
    %474 = arith.muli %473, %456 : vector<6x2xi32>
    %c1_i32_235 = arith.constant 1 : i32
    %475 = vector.broadcast %c1_i32_235 : i32 to vector<6x2xi32>
    %476 = arith.addi %474, %475 : vector<6x2xi32>
    %477 = arith.cmpi eq, %455, %476 : vector<6x2xi32>
    %478 = arith.extui %477 : vector<6x2xi1> to vector<6x2xi32>
    %479 = arith.sitofp %478 : vector<6x2xi32> to vector<6x2xf32>
    %cst_236 = arith.constant dense<0.000000e+00> : vector<6x64xf32>
    %480 = tpu.matmul %479, %472, %cst_236 {dimension_numbers = #tpu.dot_dimension_numbers<[1], [0], [0], [1], [0, 0, 1, 1], [], []>} : vector<6x2xf32>, vector<2x64xf32>, vector<6x64xf32> -> vector<6x64xf32>
    %481 = arith.addf %469, %480 : vector<6x64xf32>
    %c2_237 = arith.constant 2 : index
    %c0_238 = arith.constant 0 : index
    %c0_239 = arith.constant 0 : index
    %482 = vector.load %arg10[%c2_237, %c0_238, %c0_239] : memref<3x128x64xbf16, #tpu.memory_space<vmem>>, vector<1x128x64xbf16>
    %483 = vector.shape_cast %482 : vector<1x128x64xbf16> to vector<128x64xbf16>
    %cst_240 = arith.constant dense<0.000000e+00> : vector<2x64xf32>
    %484 = tpu.matmul %454, %483, %cst_240 {dimension_numbers = #tpu.dot_dimension_numbers<[1], [0], [0], [1], [0, 0, 1, 1], [], []>} : vector<2x128xbf16>, vector<128x64xbf16>, vector<2x64xf32> -> vector<2x64xf32>
    %c3_i32_241 = arith.constant 3 : i32
    %485 = vector.broadcast %c3_i32_241 : i32 to vector<6x2xi32>
    %486 = arith.muli %485, %456 : vector<6x2xi32>
    %c2_i32_242 = arith.constant 2 : i32
    %487 = vector.broadcast %c2_i32_242 : i32 to vector<6x2xi32>
    %488 = arith.addi %486, %487 : vector<6x2xi32>
    %489 = arith.cmpi eq, %455, %488 : vector<6x2xi32>
    %490 = arith.extui %489 : vector<6x2xi1> to vector<6x2xi32>
    %491 = arith.sitofp %490 : vector<6x2xi32> to vector<6x2xf32>
    %cst_243 = arith.constant dense<0.000000e+00> : vector<6x64xf32>
    %492 = tpu.matmul %491, %484, %cst_243 {dimension_numbers = #tpu.dot_dimension_numbers<[1], [0], [0], [1], [0, 0, 1, 1], [], []>} : vector<6x2xf32>, vector<2x64xf32>, vector<6x64xf32> -> vector<6x64xf32>
    %493 = arith.addf %481, %492 : vector<6x64xf32>
    %c0_244 = arith.constant 0 : index
    %c0_245 = arith.constant 0 : index
    %494 = vector.load %arg11[%c0_244, %c0_245] : memref<1x64xf32, #tpu.memory_space<vmem>>, vector<1x64xf32>
    %495 = vector.broadcast %494 : vector<1x64xf32> to vector<6x64xf32>
    %496 = arith.addf %493, %495 : vector<6x64xf32>
    %497 = vector.extract_strided_slice %197 {offsets = [4, 0], sizes = [6, 64], strides = [1, 1]} : vector<32x64xf32> to vector<6x64xf32>
    %498 = arith.truncf %497 : vector<6x64xf32> to vector<6x64xbf16>
    %499 = arith.truncf %496 : vector<6x64xf32> to vector<6x64xbf16>
    %c0_246 = arith.constant 0 : index
    %c0_247 = arith.constant 0 : index
    %c0_248 = arith.constant 0 : index
    %500 = vector.load %arg12[%c0_246, %c0_247, %c0_248] : memref<3x128x64xbf16, #tpu.memory_space<vmem>>, vector<1x128x64xbf16>
    %501 = vector.shape_cast %500 : vector<1x128x64xbf16> to vector<128x64xbf16>
    %502 = vector.extract_strided_slice %498 {offsets = [0, 0], sizes = [4, 64], strides = [1, 1]} : vector<6x64xbf16> to vector<4x64xbf16>
    %503 = vector.extract_strided_slice %501 {offsets = [0, 0], sizes = [64, 64], strides = [1, 1]} : vector<128x64xbf16> to vector<64x64xbf16>
    %cst_249 = arith.constant dense<0.000000e+00> : vector<4x64xf32>
    %504 = tpu.matmul %502, %503, %cst_249 {dimension_numbers = #tpu.dot_dimension_numbers<[1], [0], [0], [1], [0, 0, 1, 1], [], []>} : vector<4x64xbf16>, vector<64x64xbf16>, vector<4x64xf32> -> vector<4x64xf32>
    %505 = vector.extract_strided_slice %499 {offsets = [0, 0], sizes = [4, 64], strides = [1, 1]} : vector<6x64xbf16> to vector<4x64xbf16>
    %506 = vector.extract_strided_slice %501 {offsets = [64, 0], sizes = [64, 64], strides = [1, 1]} : vector<128x64xbf16> to vector<64x64xbf16>
    %cst_250 = arith.constant dense<0.000000e+00> : vector<4x64xf32>
    %507 = tpu.matmul %505, %506, %cst_250 {dimension_numbers = #tpu.dot_dimension_numbers<[1], [0], [0], [1], [0, 0, 1, 1], [], []>} : vector<4x64xbf16>, vector<64x64xbf16>, vector<4x64xf32> -> vector<4x64xf32>
    %508 = arith.addf %504, %507 : vector<4x64xf32>
    %c1_251 = arith.constant 1 : index
    %c0_252 = arith.constant 0 : index
    %c0_253 = arith.constant 0 : index
    %509 = vector.load %arg12[%c1_251, %c0_252, %c0_253] : memref<3x128x64xbf16, #tpu.memory_space<vmem>>, vector<1x128x64xbf16>
    %510 = vector.shape_cast %509 : vector<1x128x64xbf16> to vector<128x64xbf16>
    %511 = vector.extract_strided_slice %498 {offsets = [1, 0], sizes = [4, 64], strides = [1, 1]} : vector<6x64xbf16> to vector<4x64xbf16>
    %512 = vector.extract_strided_slice %510 {offsets = [0, 0], sizes = [64, 64], strides = [1, 1]} : vector<128x64xbf16> to vector<64x64xbf16>
    %cst_254 = arith.constant dense<0.000000e+00> : vector<4x64xf32>
    %513 = tpu.matmul %511, %512, %cst_254 {dimension_numbers = #tpu.dot_dimension_numbers<[1], [0], [0], [1], [0, 0, 1, 1], [], []>} : vector<4x64xbf16>, vector<64x64xbf16>, vector<4x64xf32> -> vector<4x64xf32>
    %514 = vector.extract_strided_slice %499 {offsets = [1, 0], sizes = [4, 64], strides = [1, 1]} : vector<6x64xbf16> to vector<4x64xbf16>
    %515 = vector.extract_strided_slice %510 {offsets = [64, 0], sizes = [64, 64], strides = [1, 1]} : vector<128x64xbf16> to vector<64x64xbf16>
    %cst_255 = arith.constant dense<0.000000e+00> : vector<4x64xf32>
    %516 = tpu.matmul %514, %515, %cst_255 {dimension_numbers = #tpu.dot_dimension_numbers<[1], [0], [0], [1], [0, 0, 1, 1], [], []>} : vector<4x64xbf16>, vector<64x64xbf16>, vector<4x64xf32> -> vector<4x64xf32>
    %517 = arith.addf %513, %516 : vector<4x64xf32>
    %518 = arith.addf %508, %517 : vector<4x64xf32>
    %c2_256 = arith.constant 2 : index
    %c0_257 = arith.constant 0 : index
    %c0_258 = arith.constant 0 : index
    %519 = vector.load %arg12[%c2_256, %c0_257, %c0_258] : memref<3x128x64xbf16, #tpu.memory_space<vmem>>, vector<1x128x64xbf16>
    %520 = vector.shape_cast %519 : vector<1x128x64xbf16> to vector<128x64xbf16>
    %521 = vector.extract_strided_slice %498 {offsets = [2, 0], sizes = [4, 64], strides = [1, 1]} : vector<6x64xbf16> to vector<4x64xbf16>
    %522 = vector.extract_strided_slice %520 {offsets = [0, 0], sizes = [64, 64], strides = [1, 1]} : vector<128x64xbf16> to vector<64x64xbf16>
    %cst_259 = arith.constant dense<0.000000e+00> : vector<4x64xf32>
    %523 = tpu.matmul %521, %522, %cst_259 {dimension_numbers = #tpu.dot_dimension_numbers<[1], [0], [0], [1], [0, 0, 1, 1], [], []>} : vector<4x64xbf16>, vector<64x64xbf16>, vector<4x64xf32> -> vector<4x64xf32>
    %524 = vector.extract_strided_slice %499 {offsets = [2, 0], sizes = [4, 64], strides = [1, 1]} : vector<6x64xbf16> to vector<4x64xbf16>
    %525 = vector.extract_strided_slice %520 {offsets = [64, 0], sizes = [64, 64], strides = [1, 1]} : vector<128x64xbf16> to vector<64x64xbf16>
    %cst_260 = arith.constant dense<0.000000e+00> : vector<4x64xf32>
    %526 = tpu.matmul %524, %525, %cst_260 {dimension_numbers = #tpu.dot_dimension_numbers<[1], [0], [0], [1], [0, 0, 1, 1], [], []>} : vector<4x64xbf16>, vector<64x64xbf16>, vector<4x64xf32> -> vector<4x64xf32>
    %527 = arith.addf %523, %526 : vector<4x64xf32>
    %528 = arith.addf %518, %527 : vector<4x64xf32>
    %c0_261 = arith.constant 0 : index
    %c0_262 = arith.constant 0 : index
    %529 = vector.load %arg13[%c0_261, %c0_262] : memref<3x64xf32, #tpu.memory_space<vmem>>, vector<3x64xf32>
    %530 = vector.extract_strided_slice %529 {offsets = [0, 0], sizes = [1, 64], strides = [1, 1]} : vector<3x64xf32> to vector<1x64xf32>
    %531 = vector.broadcast %530 : vector<1x64xf32> to vector<4x64xf32>
    %532 = arith.addf %528, %531 : vector<4x64xf32>
    %cst_263 = arith.constant 0.000000e+00 : f32
    %533 = vector.broadcast %cst_263 : f32 to vector<4x64xf32>
    %534 = arith.maximumf %532, %533 : vector<4x64xf32>
    %535 = vector.extract_strided_slice %529 {offsets = [1, 0], sizes = [1, 64], strides = [1, 1]} : vector<3x64xf32> to vector<1x64xf32>
    %536 = vector.broadcast %535 : vector<1x64xf32> to vector<4x64xf32>
    %537 = arith.mulf %534, %536 : vector<4x64xf32>
    %538 = vector.extract_strided_slice %529 {offsets = [2, 0], sizes = [1, 64], strides = [1, 1]} : vector<3x64xf32> to vector<1x64xf32>
    %539 = vector.broadcast %538 : vector<1x64xf32> to vector<4x64xf32>
    %540 = arith.addf %537, %539 : vector<4x64xf32>
    %541 = arith.truncf %540 : vector<4x64xf32> to vector<4x64xbf16>
    %542 = vector.extract_strided_slice %541 {offsets = [0, 0], sizes = [2, 64], strides = [1, 1]} : vector<4x64xbf16> to vector<2x64xbf16>
    %c0_264 = arith.constant 0 : index
    %c0_265 = arith.constant 0 : index
    %c0_266 = arith.constant 0 : index
    %543 = vector.load %arg14[%c0_264, %c0_265, %c0_266] : memref<3x64x64xbf16, #tpu.memory_space<vmem>>, vector<1x64x64xbf16>
    %544 = vector.shape_cast %543 : vector<1x64x64xbf16> to vector<64x64xbf16>
    %cst_267 = arith.constant dense<0.000000e+00> : vector<2x64xf32>
    %545 = tpu.matmul %542, %544, %cst_267 {dimension_numbers = #tpu.dot_dimension_numbers<[1], [0], [0], [1], [0, 0, 1, 1], [], []>} : vector<2x64xbf16>, vector<64x64xbf16>, vector<2x64xf32> -> vector<2x64xf32>
    %546 = vector.extract_strided_slice %541 {offsets = [1, 0], sizes = [2, 64], strides = [1, 1]} : vector<4x64xbf16> to vector<2x64xbf16>
    %c1_268 = arith.constant 1 : index
    %c0_269 = arith.constant 0 : index
    %c0_270 = arith.constant 0 : index
    %547 = vector.load %arg14[%c1_268, %c0_269, %c0_270] : memref<3x64x64xbf16, #tpu.memory_space<vmem>>, vector<1x64x64xbf16>
    %548 = vector.shape_cast %547 : vector<1x64x64xbf16> to vector<64x64xbf16>
    %cst_271 = arith.constant dense<0.000000e+00> : vector<2x64xf32>
    %549 = tpu.matmul %546, %548, %cst_271 {dimension_numbers = #tpu.dot_dimension_numbers<[1], [0], [0], [1], [0, 0, 1, 1], [], []>} : vector<2x64xbf16>, vector<64x64xbf16>, vector<2x64xf32> -> vector<2x64xf32>
    %550 = arith.addf %545, %549 : vector<2x64xf32>
    %551 = vector.extract_strided_slice %541 {offsets = [2, 0], sizes = [2, 64], strides = [1, 1]} : vector<4x64xbf16> to vector<2x64xbf16>
    %c2_272 = arith.constant 2 : index
    %c0_273 = arith.constant 0 : index
    %c0_274 = arith.constant 0 : index
    %552 = vector.load %arg14[%c2_272, %c0_273, %c0_274] : memref<3x64x64xbf16, #tpu.memory_space<vmem>>, vector<1x64x64xbf16>
    %553 = vector.shape_cast %552 : vector<1x64x64xbf16> to vector<64x64xbf16>
    %cst_275 = arith.constant dense<0.000000e+00> : vector<2x64xf32>
    %554 = tpu.matmul %551, %553, %cst_275 {dimension_numbers = #tpu.dot_dimension_numbers<[1], [0], [0], [1], [0, 0, 1, 1], [], []>} : vector<2x64xbf16>, vector<64x64xbf16>, vector<2x64xf32> -> vector<2x64xf32>
    %555 = arith.addf %550, %554 : vector<2x64xf32>
    %c0_276 = arith.constant 0 : index
    %c0_277 = arith.constant 0 : index
    %556 = vector.load %arg15[%c0_276, %c0_277] : memref<3x64xf32, #tpu.memory_space<vmem>>, vector<3x64xf32>
    %557 = vector.extract_strided_slice %556 {offsets = [0, 0], sizes = [1, 64], strides = [1, 1]} : vector<3x64xf32> to vector<1x64xf32>
    %558 = vector.broadcast %557 : vector<1x64xf32> to vector<2x64xf32>
    %559 = arith.addf %555, %558 : vector<2x64xf32>
    %cst_278 = arith.constant 0.000000e+00 : f32
    %560 = vector.broadcast %cst_278 : f32 to vector<2x64xf32>
    %561 = arith.maximumf %559, %560 : vector<2x64xf32>
    %562 = vector.extract_strided_slice %556 {offsets = [1, 0], sizes = [1, 64], strides = [1, 1]} : vector<3x64xf32> to vector<1x64xf32>
    %563 = vector.broadcast %562 : vector<1x64xf32> to vector<2x64xf32>
    %564 = arith.mulf %561, %563 : vector<2x64xf32>
    %565 = vector.extract_strided_slice %556 {offsets = [2, 0], sizes = [1, 64], strides = [1, 1]} : vector<3x64xf32> to vector<1x64xf32>
    %566 = vector.broadcast %565 : vector<1x64xf32> to vector<2x64xf32>
    %567 = arith.addf %564, %566 : vector<2x64xf32>
    %568 = arith.truncf %567 : vector<2x64xf32> to vector<2x64xbf16>
    %569 = tpu.iota {dimensions = array<i32: 0>} : vector<6x2xi32>
    %570 = tpu.iota {dimensions = array<i32: 1>} : vector<6x2xi32>
    %cst_279 = arith.constant 0.000000e+00 : f32
    %571 = vector.broadcast %cst_279 : f32 to vector<6x32xf32>
    %c0_280 = arith.constant 0 : index
    %c0_281 = arith.constant 0 : index
    %c0_282 = arith.constant 0 : index
    %572 = vector.load %arg16[%c0_280, %c0_281, %c0_282] : memref<3x64x32xbf16, #tpu.memory_space<vmem>>, vector<1x64x32xbf16>
    %573 = vector.shape_cast %572 : vector<1x64x32xbf16> to vector<64x32xbf16>
    %cst_283 = arith.constant dense<0.000000e+00> : vector<2x32xf32>
    %574 = tpu.matmul %568, %573, %cst_283 {dimension_numbers = #tpu.dot_dimension_numbers<[1], [0], [0], [1], [0, 0, 1, 1], [], []>} : vector<2x64xbf16>, vector<64x32xbf16>, vector<2x32xf32> -> vector<2x32xf32>
    %c3_i32_284 = arith.constant 3 : i32
    %575 = vector.broadcast %c3_i32_284 : i32 to vector<6x2xi32>
    %576 = arith.muli %575, %570 : vector<6x2xi32>
    %c0_i32_285 = arith.constant 0 : i32
    %577 = vector.broadcast %c0_i32_285 : i32 to vector<6x2xi32>
    %578 = arith.addi %576, %577 : vector<6x2xi32>
    %579 = arith.cmpi eq, %569, %578 : vector<6x2xi32>
    %580 = arith.extui %579 : vector<6x2xi1> to vector<6x2xi32>
    %581 = arith.sitofp %580 : vector<6x2xi32> to vector<6x2xf32>
    %cst_286 = arith.constant dense<0.000000e+00> : vector<6x32xf32>
    %582 = tpu.matmul %581, %574, %cst_286 {dimension_numbers = #tpu.dot_dimension_numbers<[1], [0], [0], [1], [0, 0, 1, 1], [], []>} : vector<6x2xf32>, vector<2x32xf32>, vector<6x32xf32> -> vector<6x32xf32>
    %583 = arith.addf %571, %582 : vector<6x32xf32>
    %c1_287 = arith.constant 1 : index
    %c0_288 = arith.constant 0 : index
    %c0_289 = arith.constant 0 : index
    %584 = vector.load %arg16[%c1_287, %c0_288, %c0_289] : memref<3x64x32xbf16, #tpu.memory_space<vmem>>, vector<1x64x32xbf16>
    %585 = vector.shape_cast %584 : vector<1x64x32xbf16> to vector<64x32xbf16>
    %cst_290 = arith.constant dense<0.000000e+00> : vector<2x32xf32>
    %586 = tpu.matmul %568, %585, %cst_290 {dimension_numbers = #tpu.dot_dimension_numbers<[1], [0], [0], [1], [0, 0, 1, 1], [], []>} : vector<2x64xbf16>, vector<64x32xbf16>, vector<2x32xf32> -> vector<2x32xf32>
    %c3_i32_291 = arith.constant 3 : i32
    %587 = vector.broadcast %c3_i32_291 : i32 to vector<6x2xi32>
    %588 = arith.muli %587, %570 : vector<6x2xi32>
    %c1_i32_292 = arith.constant 1 : i32
    %589 = vector.broadcast %c1_i32_292 : i32 to vector<6x2xi32>
    %590 = arith.addi %588, %589 : vector<6x2xi32>
    %591 = arith.cmpi eq, %569, %590 : vector<6x2xi32>
    %592 = arith.extui %591 : vector<6x2xi1> to vector<6x2xi32>
    %593 = arith.sitofp %592 : vector<6x2xi32> to vector<6x2xf32>
    %cst_293 = arith.constant dense<0.000000e+00> : vector<6x32xf32>
    %594 = tpu.matmul %593, %586, %cst_293 {dimension_numbers = #tpu.dot_dimension_numbers<[1], [0], [0], [1], [0, 0, 1, 1], [], []>} : vector<6x2xf32>, vector<2x32xf32>, vector<6x32xf32> -> vector<6x32xf32>
    %595 = arith.addf %583, %594 : vector<6x32xf32>
    %c2_294 = arith.constant 2 : index
    %c0_295 = arith.constant 0 : index
    %c0_296 = arith.constant 0 : index
    %596 = vector.load %arg16[%c2_294, %c0_295, %c0_296] : memref<3x64x32xbf16, #tpu.memory_space<vmem>>, vector<1x64x32xbf16>
    %597 = vector.shape_cast %596 : vector<1x64x32xbf16> to vector<64x32xbf16>
    %cst_297 = arith.constant dense<0.000000e+00> : vector<2x32xf32>
    %598 = tpu.matmul %568, %597, %cst_297 {dimension_numbers = #tpu.dot_dimension_numbers<[1], [0], [0], [1], [0, 0, 1, 1], [], []>} : vector<2x64xbf16>, vector<64x32xbf16>, vector<2x32xf32> -> vector<2x32xf32>
    %c3_i32_298 = arith.constant 3 : i32
    %599 = vector.broadcast %c3_i32_298 : i32 to vector<6x2xi32>
    %600 = arith.muli %599, %570 : vector<6x2xi32>
    %c2_i32_299 = arith.constant 2 : i32
    %601 = vector.broadcast %c2_i32_299 : i32 to vector<6x2xi32>
    %602 = arith.addi %600, %601 : vector<6x2xi32>
    %603 = arith.cmpi eq, %569, %602 : vector<6x2xi32>
    %604 = arith.extui %603 : vector<6x2xi1> to vector<6x2xi32>
    %605 = arith.sitofp %604 : vector<6x2xi32> to vector<6x2xf32>
    %cst_300 = arith.constant dense<0.000000e+00> : vector<6x32xf32>
    %606 = tpu.matmul %605, %598, %cst_300 {dimension_numbers = #tpu.dot_dimension_numbers<[1], [0], [0], [1], [0, 0, 1, 1], [], []>} : vector<6x2xf32>, vector<2x32xf32>, vector<6x32xf32> -> vector<6x32xf32>
    %607 = arith.addf %595, %606 : vector<6x32xf32>
    %c0_301 = arith.constant 0 : index
    %c0_302 = arith.constant 0 : index
    %608 = vector.load %arg17[%c0_301, %c0_302] : memref<1x32xf32, #tpu.memory_space<vmem>>, vector<1x32xf32>
    %609 = vector.broadcast %608 : vector<1x32xf32> to vector<6x32xf32>
    %610 = arith.addf %607, %609 : vector<6x32xf32>
    %611 = vector.extract_strided_slice %126 {offsets = [4, 0], sizes = [6, 32], strides = [1, 1]} : vector<72x32xf32> to vector<6x32xf32>
    %612 = arith.truncf %611 : vector<6x32xf32> to vector<6x32xbf16>
    %613 = arith.truncf %610 : vector<6x32xf32> to vector<6x32xbf16>
    %c0_303 = arith.constant 0 : index
    %c0_304 = arith.constant 0 : index
    %c0_305 = arith.constant 0 : index
    %614 = vector.load %arg18[%c0_303, %c0_304, %c0_305] : memref<3x64x32xbf16, #tpu.memory_space<vmem>>, vector<1x64x32xbf16>
    %615 = vector.shape_cast %614 : vector<1x64x32xbf16> to vector<64x32xbf16>
    %616 = vector.extract_strided_slice %612 {offsets = [0, 0], sizes = [4, 32], strides = [1, 1]} : vector<6x32xbf16> to vector<4x32xbf16>
    %617 = vector.extract_strided_slice %615 {offsets = [0, 0], sizes = [32, 32], strides = [1, 1]} : vector<64x32xbf16> to vector<32x32xbf16>
    %cst_306 = arith.constant dense<0.000000e+00> : vector<4x32xf32>
    %618 = tpu.matmul %616, %617, %cst_306 {dimension_numbers = #tpu.dot_dimension_numbers<[1], [0], [0], [1], [0, 0, 1, 1], [], []>} : vector<4x32xbf16>, vector<32x32xbf16>, vector<4x32xf32> -> vector<4x32xf32>
    %619 = vector.extract_strided_slice %613 {offsets = [0, 0], sizes = [4, 32], strides = [1, 1]} : vector<6x32xbf16> to vector<4x32xbf16>
    %620 = vector.extract_strided_slice %615 {offsets = [32, 0], sizes = [32, 32], strides = [1, 1]} : vector<64x32xbf16> to vector<32x32xbf16>
    %cst_307 = arith.constant dense<0.000000e+00> : vector<4x32xf32>
    %621 = tpu.matmul %619, %620, %cst_307 {dimension_numbers = #tpu.dot_dimension_numbers<[1], [0], [0], [1], [0, 0, 1, 1], [], []>} : vector<4x32xbf16>, vector<32x32xbf16>, vector<4x32xf32> -> vector<4x32xf32>
    %622 = arith.addf %618, %621 : vector<4x32xf32>
    %c1_308 = arith.constant 1 : index
    %c0_309 = arith.constant 0 : index
    %c0_310 = arith.constant 0 : index
    %623 = vector.load %arg18[%c1_308, %c0_309, %c0_310] : memref<3x64x32xbf16, #tpu.memory_space<vmem>>, vector<1x64x32xbf16>
    %624 = vector.shape_cast %623 : vector<1x64x32xbf16> to vector<64x32xbf16>
    %625 = vector.extract_strided_slice %612 {offsets = [1, 0], sizes = [4, 32], strides = [1, 1]} : vector<6x32xbf16> to vector<4x32xbf16>
    %626 = vector.extract_strided_slice %624 {offsets = [0, 0], sizes = [32, 32], strides = [1, 1]} : vector<64x32xbf16> to vector<32x32xbf16>
    %cst_311 = arith.constant dense<0.000000e+00> : vector<4x32xf32>
    %627 = tpu.matmul %625, %626, %cst_311 {dimension_numbers = #tpu.dot_dimension_numbers<[1], [0], [0], [1], [0, 0, 1, 1], [], []>} : vector<4x32xbf16>, vector<32x32xbf16>, vector<4x32xf32> -> vector<4x32xf32>
    %628 = vector.extract_strided_slice %613 {offsets = [1, 0], sizes = [4, 32], strides = [1, 1]} : vector<6x32xbf16> to vector<4x32xbf16>
    %629 = vector.extract_strided_slice %624 {offsets = [32, 0], sizes = [32, 32], strides = [1, 1]} : vector<64x32xbf16> to vector<32x32xbf16>
    %cst_312 = arith.constant dense<0.000000e+00> : vector<4x32xf32>
    %630 = tpu.matmul %628, %629, %cst_312 {dimension_numbers = #tpu.dot_dimension_numbers<[1], [0], [0], [1], [0, 0, 1, 1], [], []>} : vector<4x32xbf16>, vector<32x32xbf16>, vector<4x32xf32> -> vector<4x32xf32>
    %631 = arith.addf %627, %630 : vector<4x32xf32>
    %632 = arith.addf %622, %631 : vector<4x32xf32>
    %c2_313 = arith.constant 2 : index
    %c0_314 = arith.constant 0 : index
    %c0_315 = arith.constant 0 : index
    %633 = vector.load %arg18[%c2_313, %c0_314, %c0_315] : memref<3x64x32xbf16, #tpu.memory_space<vmem>>, vector<1x64x32xbf16>
    %634 = vector.shape_cast %633 : vector<1x64x32xbf16> to vector<64x32xbf16>
    %635 = vector.extract_strided_slice %612 {offsets = [2, 0], sizes = [4, 32], strides = [1, 1]} : vector<6x32xbf16> to vector<4x32xbf16>
    %636 = vector.extract_strided_slice %634 {offsets = [0, 0], sizes = [32, 32], strides = [1, 1]} : vector<64x32xbf16> to vector<32x32xbf16>
    %cst_316 = arith.constant dense<0.000000e+00> : vector<4x32xf32>
    %637 = tpu.matmul %635, %636, %cst_316 {dimension_numbers = #tpu.dot_dimension_numbers<[1], [0], [0], [1], [0, 0, 1, 1], [], []>} : vector<4x32xbf16>, vector<32x32xbf16>, vector<4x32xf32> -> vector<4x32xf32>
    %638 = vector.extract_strided_slice %613 {offsets = [2, 0], sizes = [4, 32], strides = [1, 1]} : vector<6x32xbf16> to vector<4x32xbf16>
    %639 = vector.extract_strided_slice %634 {offsets = [32, 0], sizes = [32, 32], strides = [1, 1]} : vector<64x32xbf16> to vector<32x32xbf16>
    %cst_317 = arith.constant dense<0.000000e+00> : vector<4x32xf32>
    %640 = tpu.matmul %638, %639, %cst_317 {dimension_numbers = #tpu.dot_dimension_numbers<[1], [0], [0], [1], [0, 0, 1, 1], [], []>} : vector<4x32xbf16>, vector<32x32xbf16>, vector<4x32xf32> -> vector<4x32xf32>
    %641 = arith.addf %637, %640 : vector<4x32xf32>
    %642 = arith.addf %632, %641 : vector<4x32xf32>
    %c0_318 = arith.constant 0 : index
    %c0_319 = arith.constant 0 : index
    %643 = vector.load %arg19[%c0_318, %c0_319] : memref<3x32xf32, #tpu.memory_space<vmem>>, vector<3x32xf32>
    %644 = vector.extract_strided_slice %643 {offsets = [0, 0], sizes = [1, 32], strides = [1, 1]} : vector<3x32xf32> to vector<1x32xf32>
    %645 = vector.broadcast %644 : vector<1x32xf32> to vector<4x32xf32>
    %646 = arith.addf %642, %645 : vector<4x32xf32>
    %cst_320 = arith.constant 0.000000e+00 : f32
    %647 = vector.broadcast %cst_320 : f32 to vector<4x32xf32>
    %648 = arith.maximumf %646, %647 : vector<4x32xf32>
    %649 = vector.extract_strided_slice %643 {offsets = [1, 0], sizes = [1, 32], strides = [1, 1]} : vector<3x32xf32> to vector<1x32xf32>
    %650 = vector.broadcast %649 : vector<1x32xf32> to vector<4x32xf32>
    %651 = arith.mulf %648, %650 : vector<4x32xf32>
    %652 = vector.extract_strided_slice %643 {offsets = [2, 0], sizes = [1, 32], strides = [1, 1]} : vector<3x32xf32> to vector<1x32xf32>
    %653 = vector.broadcast %652 : vector<1x32xf32> to vector<4x32xf32>
    %654 = arith.addf %651, %653 : vector<4x32xf32>
    %655 = arith.truncf %654 : vector<4x32xf32> to vector<4x32xbf16>
    %656 = vector.extract_strided_slice %655 {offsets = [0, 0], sizes = [2, 32], strides = [1, 1]} : vector<4x32xbf16> to vector<2x32xbf16>
    %c0_321 = arith.constant 0 : index
    %c0_322 = arith.constant 0 : index
    %c0_323 = arith.constant 0 : index
    %657 = vector.load %arg20[%c0_321, %c0_322, %c0_323] : memref<3x32x32xbf16, #tpu.memory_space<vmem>>, vector<1x32x32xbf16>
    %658 = vector.shape_cast %657 : vector<1x32x32xbf16> to vector<32x32xbf16>
    %cst_324 = arith.constant dense<0.000000e+00> : vector<2x32xf32>
    %659 = tpu.matmul %656, %658, %cst_324 {dimension_numbers = #tpu.dot_dimension_numbers<[1], [0], [0], [1], [0, 0, 1, 1], [], []>} : vector<2x32xbf16>, vector<32x32xbf16>, vector<2x32xf32> -> vector<2x32xf32>
    %660 = vector.extract_strided_slice %655 {offsets = [1, 0], sizes = [2, 32], strides = [1, 1]} : vector<4x32xbf16> to vector<2x32xbf16>
    %c1_325 = arith.constant 1 : index
    %c0_326 = arith.constant 0 : index
    %c0_327 = arith.constant 0 : index
    %661 = vector.load %arg20[%c1_325, %c0_326, %c0_327] : memref<3x32x32xbf16, #tpu.memory_space<vmem>>, vector<1x32x32xbf16>
    %662 = vector.shape_cast %661 : vector<1x32x32xbf16> to vector<32x32xbf16>
    %cst_328 = arith.constant dense<0.000000e+00> : vector<2x32xf32>
    %663 = tpu.matmul %660, %662, %cst_328 {dimension_numbers = #tpu.dot_dimension_numbers<[1], [0], [0], [1], [0, 0, 1, 1], [], []>} : vector<2x32xbf16>, vector<32x32xbf16>, vector<2x32xf32> -> vector<2x32xf32>
    %664 = arith.addf %659, %663 : vector<2x32xf32>
    %665 = vector.extract_strided_slice %655 {offsets = [2, 0], sizes = [2, 32], strides = [1, 1]} : vector<4x32xbf16> to vector<2x32xbf16>
    %c2_329 = arith.constant 2 : index
    %c0_330 = arith.constant 0 : index
    %c0_331 = arith.constant 0 : index
    %666 = vector.load %arg20[%c2_329, %c0_330, %c0_331] : memref<3x32x32xbf16, #tpu.memory_space<vmem>>, vector<1x32x32xbf16>
    %667 = vector.shape_cast %666 : vector<1x32x32xbf16> to vector<32x32xbf16>
    %cst_332 = arith.constant dense<0.000000e+00> : vector<2x32xf32>
    %668 = tpu.matmul %665, %667, %cst_332 {dimension_numbers = #tpu.dot_dimension_numbers<[1], [0], [0], [1], [0, 0, 1, 1], [], []>} : vector<2x32xbf16>, vector<32x32xbf16>, vector<2x32xf32> -> vector<2x32xf32>
    %669 = arith.addf %664, %668 : vector<2x32xf32>
    %c0_333 = arith.constant 0 : index
    %c0_334 = arith.constant 0 : index
    %670 = vector.load %arg21[%c0_333, %c0_334] : memref<3x32xf32, #tpu.memory_space<vmem>>, vector<3x32xf32>
    %671 = vector.extract_strided_slice %670 {offsets = [0, 0], sizes = [1, 32], strides = [1, 1]} : vector<3x32xf32> to vector<1x32xf32>
    %672 = vector.broadcast %671 : vector<1x32xf32> to vector<2x32xf32>
    %673 = arith.addf %669, %672 : vector<2x32xf32>
    %cst_335 = arith.constant 0.000000e+00 : f32
    %674 = vector.broadcast %cst_335 : f32 to vector<2x32xf32>
    %675 = arith.maximumf %673, %674 : vector<2x32xf32>
    %676 = vector.extract_strided_slice %670 {offsets = [1, 0], sizes = [1, 32], strides = [1, 1]} : vector<3x32xf32> to vector<1x32xf32>
    %677 = vector.broadcast %676 : vector<1x32xf32> to vector<2x32xf32>
    %678 = arith.mulf %675, %677 : vector<2x32xf32>
    %679 = vector.extract_strided_slice %670 {offsets = [2, 0], sizes = [1, 32], strides = [1, 1]} : vector<3x32xf32> to vector<1x32xf32>
    %680 = vector.broadcast %679 : vector<1x32xf32> to vector<2x32xf32>
    %681 = arith.addf %678, %680 : vector<2x32xf32>
    %682 = arith.truncf %681 : vector<2x32xf32> to vector<2x32xbf16>
    %683 = tpu.iota {dimensions = array<i32: 0>} : vector<6x2xi32>
    %684 = tpu.iota {dimensions = array<i32: 1>} : vector<6x2xi32>
    %cst_336 = arith.constant 0.000000e+00 : f32
    %685 = vector.broadcast %cst_336 : f32 to vector<6x16xf32>
    %c0_337 = arith.constant 0 : index
    %c0_338 = arith.constant 0 : index
    %c0_339 = arith.constant 0 : index
    %686 = vector.load %arg22[%c0_337, %c0_338, %c0_339] : memref<3x32x16xbf16, #tpu.memory_space<vmem>>, vector<1x32x16xbf16>
    %687 = vector.shape_cast %686 : vector<1x32x16xbf16> to vector<32x16xbf16>
    %cst_340 = arith.constant dense<0.000000e+00> : vector<2x16xf32>
    %688 = tpu.matmul %682, %687, %cst_340 {dimension_numbers = #tpu.dot_dimension_numbers<[1], [0], [0], [1], [0, 0, 1, 1], [], []>} : vector<2x32xbf16>, vector<32x16xbf16>, vector<2x16xf32> -> vector<2x16xf32>
    %c3_i32_341 = arith.constant 3 : i32
    %689 = vector.broadcast %c3_i32_341 : i32 to vector<6x2xi32>
    %690 = arith.muli %689, %684 : vector<6x2xi32>
    %c0_i32_342 = arith.constant 0 : i32
    %691 = vector.broadcast %c0_i32_342 : i32 to vector<6x2xi32>
    %692 = arith.addi %690, %691 : vector<6x2xi32>
    %693 = arith.cmpi eq, %683, %692 : vector<6x2xi32>
    %694 = arith.extui %693 : vector<6x2xi1> to vector<6x2xi32>
    %695 = arith.sitofp %694 : vector<6x2xi32> to vector<6x2xf32>
    %cst_343 = arith.constant dense<0.000000e+00> : vector<6x16xf32>
    %696 = tpu.matmul %695, %688, %cst_343 {dimension_numbers = #tpu.dot_dimension_numbers<[1], [0], [0], [1], [0, 0, 1, 1], [], []>} : vector<6x2xf32>, vector<2x16xf32>, vector<6x16xf32> -> vector<6x16xf32>
    %697 = arith.addf %685, %696 : vector<6x16xf32>
    %c1_344 = arith.constant 1 : index
    %c0_345 = arith.constant 0 : index
    %c0_346 = arith.constant 0 : index
    %698 = vector.load %arg22[%c1_344, %c0_345, %c0_346] : memref<3x32x16xbf16, #tpu.memory_space<vmem>>, vector<1x32x16xbf16>
    %699 = vector.shape_cast %698 : vector<1x32x16xbf16> to vector<32x16xbf16>
    %cst_347 = arith.constant dense<0.000000e+00> : vector<2x16xf32>
    %700 = tpu.matmul %682, %699, %cst_347 {dimension_numbers = #tpu.dot_dimension_numbers<[1], [0], [0], [1], [0, 0, 1, 1], [], []>} : vector<2x32xbf16>, vector<32x16xbf16>, vector<2x16xf32> -> vector<2x16xf32>
    %c3_i32_348 = arith.constant 3 : i32
    %701 = vector.broadcast %c3_i32_348 : i32 to vector<6x2xi32>
    %702 = arith.muli %701, %684 : vector<6x2xi32>
    %c1_i32_349 = arith.constant 1 : i32
    %703 = vector.broadcast %c1_i32_349 : i32 to vector<6x2xi32>
    %704 = arith.addi %702, %703 : vector<6x2xi32>
    %705 = arith.cmpi eq, %683, %704 : vector<6x2xi32>
    %706 = arith.extui %705 : vector<6x2xi1> to vector<6x2xi32>
    %707 = arith.sitofp %706 : vector<6x2xi32> to vector<6x2xf32>
    %cst_350 = arith.constant dense<0.000000e+00> : vector<6x16xf32>
    %708 = tpu.matmul %707, %700, %cst_350 {dimension_numbers = #tpu.dot_dimension_numbers<[1], [0], [0], [1], [0, 0, 1, 1], [], []>} : vector<6x2xf32>, vector<2x16xf32>, vector<6x16xf32> -> vector<6x16xf32>
    %709 = arith.addf %697, %708 : vector<6x16xf32>
    %c2_351 = arith.constant 2 : index
    %c0_352 = arith.constant 0 : index
    %c0_353 = arith.constant 0 : index
    %710 = vector.load %arg22[%c2_351, %c0_352, %c0_353] : memref<3x32x16xbf16, #tpu.memory_space<vmem>>, vector<1x32x16xbf16>
    %711 = vector.shape_cast %710 : vector<1x32x16xbf16> to vector<32x16xbf16>
    %cst_354 = arith.constant dense<0.000000e+00> : vector<2x16xf32>
    %712 = tpu.matmul %682, %711, %cst_354 {dimension_numbers = #tpu.dot_dimension_numbers<[1], [0], [0], [1], [0, 0, 1, 1], [], []>} : vector<2x32xbf16>, vector<32x16xbf16>, vector<2x16xf32> -> vector<2x16xf32>
    %c3_i32_355 = arith.constant 3 : i32
    %713 = vector.broadcast %c3_i32_355 : i32 to vector<6x2xi32>
    %714 = arith.muli %713, %684 : vector<6x2xi32>
    %c2_i32_356 = arith.constant 2 : i32
    %715 = vector.broadcast %c2_i32_356 : i32 to vector<6x2xi32>
    %716 = arith.addi %714, %715 : vector<6x2xi32>
    %717 = arith.cmpi eq, %683, %716 : vector<6x2xi32>
    %718 = arith.extui %717 : vector<6x2xi1> to vector<6x2xi32>
    %719 = arith.sitofp %718 : vector<6x2xi32> to vector<6x2xf32>
    %cst_357 = arith.constant dense<0.000000e+00> : vector<6x16xf32>
    %720 = tpu.matmul %719, %712, %cst_357 {dimension_numbers = #tpu.dot_dimension_numbers<[1], [0], [0], [1], [0, 0, 1, 1], [], []>} : vector<6x2xf32>, vector<2x16xf32>, vector<6x16xf32> -> vector<6x16xf32>
    %721 = arith.addf %709, %720 : vector<6x16xf32>
    %c0_358 = arith.constant 0 : index
    %c0_359 = arith.constant 0 : index
    %722 = vector.load %arg23[%c0_358, %c0_359] : memref<1x16xf32, #tpu.memory_space<vmem>>, vector<1x16xf32>
    %723 = vector.broadcast %722 : vector<1x16xf32> to vector<6x16xf32>
    %724 = arith.addf %721, %723 : vector<6x16xf32>
    %725 = vector.extract_strided_slice %55 {offsets = [4, 0], sizes = [6, 16], strides = [1, 1]} : vector<152x16xf32> to vector<6x16xf32>
    %726 = arith.truncf %725 : vector<6x16xf32> to vector<6x16xbf16>
    %727 = arith.truncf %724 : vector<6x16xf32> to vector<6x16xbf16>
    %c0_360 = arith.constant 0 : index
    %c0_361 = arith.constant 0 : index
    %c0_362 = arith.constant 0 : index
    %728 = vector.load %arg24[%c0_360, %c0_361, %c0_362] : memref<3x32x16xbf16, #tpu.memory_space<vmem>>, vector<1x32x16xbf16>
    %729 = vector.shape_cast %728 : vector<1x32x16xbf16> to vector<32x16xbf16>
    %730 = vector.extract_strided_slice %726 {offsets = [0, 0], sizes = [4, 16], strides = [1, 1]} : vector<6x16xbf16> to vector<4x16xbf16>
    %731 = vector.extract_strided_slice %729 {offsets = [0, 0], sizes = [16, 16], strides = [1, 1]} : vector<32x16xbf16> to vector<16x16xbf16>
    %cst_363 = arith.constant dense<0.000000e+00> : vector<4x16xf32>
    %732 = tpu.matmul %730, %731, %cst_363 {dimension_numbers = #tpu.dot_dimension_numbers<[1], [0], [0], [1], [0, 0, 1, 1], [], []>} : vector<4x16xbf16>, vector<16x16xbf16>, vector<4x16xf32> -> vector<4x16xf32>
    %733 = vector.extract_strided_slice %727 {offsets = [0, 0], sizes = [4, 16], strides = [1, 1]} : vector<6x16xbf16> to vector<4x16xbf16>
    %734 = vector.extract_strided_slice %729 {offsets = [16, 0], sizes = [16, 16], strides = [1, 1]} : vector<32x16xbf16> to vector<16x16xbf16>
    %cst_364 = arith.constant dense<0.000000e+00> : vector<4x16xf32>
    %735 = tpu.matmul %733, %734, %cst_364 {dimension_numbers = #tpu.dot_dimension_numbers<[1], [0], [0], [1], [0, 0, 1, 1], [], []>} : vector<4x16xbf16>, vector<16x16xbf16>, vector<4x16xf32> -> vector<4x16xf32>
    %736 = arith.addf %732, %735 : vector<4x16xf32>
    %c1_365 = arith.constant 1 : index
    %c0_366 = arith.constant 0 : index
    %c0_367 = arith.constant 0 : index
    %737 = vector.load %arg24[%c1_365, %c0_366, %c0_367] : memref<3x32x16xbf16, #tpu.memory_space<vmem>>, vector<1x32x16xbf16>
    %738 = vector.shape_cast %737 : vector<1x32x16xbf16> to vector<32x16xbf16>
    %739 = vector.extract_strided_slice %726 {offsets = [1, 0], sizes = [4, 16], strides = [1, 1]} : vector<6x16xbf16> to vector<4x16xbf16>
    %740 = vector.extract_strided_slice %738 {offsets = [0, 0], sizes = [16, 16], strides = [1, 1]} : vector<32x16xbf16> to vector<16x16xbf16>
    %cst_368 = arith.constant dense<0.000000e+00> : vector<4x16xf32>
    %741 = tpu.matmul %739, %740, %cst_368 {dimension_numbers = #tpu.dot_dimension_numbers<[1], [0], [0], [1], [0, 0, 1, 1], [], []>} : vector<4x16xbf16>, vector<16x16xbf16>, vector<4x16xf32> -> vector<4x16xf32>
    %742 = vector.extract_strided_slice %727 {offsets = [1, 0], sizes = [4, 16], strides = [1, 1]} : vector<6x16xbf16> to vector<4x16xbf16>
    %743 = vector.extract_strided_slice %738 {offsets = [16, 0], sizes = [16, 16], strides = [1, 1]} : vector<32x16xbf16> to vector<16x16xbf16>
    %cst_369 = arith.constant dense<0.000000e+00> : vector<4x16xf32>
    %744 = tpu.matmul %742, %743, %cst_369 {dimension_numbers = #tpu.dot_dimension_numbers<[1], [0], [0], [1], [0, 0, 1, 1], [], []>} : vector<4x16xbf16>, vector<16x16xbf16>, vector<4x16xf32> -> vector<4x16xf32>
    %745 = arith.addf %741, %744 : vector<4x16xf32>
    %746 = arith.addf %736, %745 : vector<4x16xf32>
    %c2_370 = arith.constant 2 : index
    %c0_371 = arith.constant 0 : index
    %c0_372 = arith.constant 0 : index
    %747 = vector.load %arg24[%c2_370, %c0_371, %c0_372] : memref<3x32x16xbf16, #tpu.memory_space<vmem>>, vector<1x32x16xbf16>
    %748 = vector.shape_cast %747 : vector<1x32x16xbf16> to vector<32x16xbf16>
    %749 = vector.extract_strided_slice %726 {offsets = [2, 0], sizes = [4, 16], strides = [1, 1]} : vector<6x16xbf16> to vector<4x16xbf16>
    %750 = vector.extract_strided_slice %748 {offsets = [0, 0], sizes = [16, 16], strides = [1, 1]} : vector<32x16xbf16> to vector<16x16xbf16>
    %cst_373 = arith.constant dense<0.000000e+00> : vector<4x16xf32>
    %751 = tpu.matmul %749, %750, %cst_373 {dimension_numbers = #tpu.dot_dimension_numbers<[1], [0], [0], [1], [0, 0, 1, 1], [], []>} : vector<4x16xbf16>, vector<16x16xbf16>, vector<4x16xf32> -> vector<4x16xf32>
    %752 = vector.extract_strided_slice %727 {offsets = [2, 0], sizes = [4, 16], strides = [1, 1]} : vector<6x16xbf16> to vector<4x16xbf16>
    %753 = vector.extract_strided_slice %748 {offsets = [16, 0], sizes = [16, 16], strides = [1, 1]} : vector<32x16xbf16> to vector<16x16xbf16>
    %cst_374 = arith.constant dense<0.000000e+00> : vector<4x16xf32>
    %754 = tpu.matmul %752, %753, %cst_374 {dimension_numbers = #tpu.dot_dimension_numbers<[1], [0], [0], [1], [0, 0, 1, 1], [], []>} : vector<4x16xbf16>, vector<16x16xbf16>, vector<4x16xf32> -> vector<4x16xf32>
    %755 = arith.addf %751, %754 : vector<4x16xf32>
    %756 = arith.addf %746, %755 : vector<4x16xf32>
    %c0_375 = arith.constant 0 : index
    %c0_376 = arith.constant 0 : index
    %757 = vector.load %arg25[%c0_375, %c0_376] : memref<3x16xf32, #tpu.memory_space<vmem>>, vector<3x16xf32>
    %758 = vector.extract_strided_slice %757 {offsets = [0, 0], sizes = [1, 16], strides = [1, 1]} : vector<3x16xf32> to vector<1x16xf32>
    %759 = vector.broadcast %758 : vector<1x16xf32> to vector<4x16xf32>
    %760 = arith.addf %756, %759 : vector<4x16xf32>
    %cst_377 = arith.constant 0.000000e+00 : f32
    %761 = vector.broadcast %cst_377 : f32 to vector<4x16xf32>
    %762 = arith.maximumf %760, %761 : vector<4x16xf32>
    %763 = vector.extract_strided_slice %757 {offsets = [1, 0], sizes = [1, 16], strides = [1, 1]} : vector<3x16xf32> to vector<1x16xf32>
    %764 = vector.broadcast %763 : vector<1x16xf32> to vector<4x16xf32>
    %765 = arith.mulf %762, %764 : vector<4x16xf32>
    %766 = vector.extract_strided_slice %757 {offsets = [2, 0], sizes = [1, 16], strides = [1, 1]} : vector<3x16xf32> to vector<1x16xf32>
    %767 = vector.broadcast %766 : vector<1x16xf32> to vector<4x16xf32>
    %768 = arith.addf %765, %767 : vector<4x16xf32>
    %769 = arith.truncf %768 : vector<4x16xf32> to vector<4x16xbf16>
    %c0_378 = arith.constant 0 : index
    %c0_379 = arith.constant 0 : index
    %c0_380 = arith.constant 0 : index
    %770 = vector.load %arg26[%c0_378, %c0_379, %c0_380] : memref<1x16x5xbf16, #tpu.memory_space<vmem>>, vector<1x16x5xbf16>
    %771 = vector.shape_cast %770 : vector<1x16x5xbf16> to vector<16x5xbf16>
    %cst_381 = arith.constant dense<0.000000e+00> : vector<4x5xf32>
    %772 = tpu.matmul %769, %771, %cst_381 {dimension_numbers = #tpu.dot_dimension_numbers<[1], [0], [0], [1], [0, 0, 1, 1], [], []>} : vector<4x16xbf16>, vector<16x5xbf16>, vector<4x5xf32> -> vector<4x5xf32>
    %c0_382 = arith.constant 0 : index
    %c0_383 = arith.constant 0 : index
    %773 = vector.load %arg27[%c0_382, %c0_383] : memref<3x5xf32, #tpu.memory_space<vmem>>, vector<3x5xf32>
    %774 = vector.extract_strided_slice %773 {offsets = [0, 0], sizes = [1, 5], strides = [1, 1]} : vector<3x5xf32> to vector<1x5xf32>
    %775 = vector.broadcast %774 : vector<1x5xf32> to vector<4x5xf32>
    %776 = arith.addf %772, %775 : vector<4x5xf32>
    %cst_384 = arith.constant 0.000000e+00 : f32
    %777 = vector.broadcast %cst_384 : f32 to vector<4x5xf32>
    %778 = arith.maximumf %776, %777 : vector<4x5xf32>
    %779 = vector.extract_strided_slice %773 {offsets = [1, 0], sizes = [1, 5], strides = [1, 1]} : vector<3x5xf32> to vector<1x5xf32>
    %780 = vector.broadcast %779 : vector<1x5xf32> to vector<4x5xf32>
    %781 = arith.mulf %778, %780 : vector<4x5xf32>
    %782 = vector.extract_strided_slice %773 {offsets = [2, 0], sizes = [1, 5], strides = [1, 1]} : vector<3x5xf32> to vector<1x5xf32>
    %783 = vector.broadcast %782 : vector<1x5xf32> to vector<4x5xf32>
    %784 = arith.addf %781, %783 : vector<4x5xf32>
    %c0_385 = arith.constant 0 : index
    %c0_386 = arith.constant 0 : index
    %785 = vector.load %arg2[%c0_385, %c0_386] : memref<5x5xbf16, #tpu.memory_space<vmem>>, vector<5x5xbf16>
    %c0_387 = arith.constant 0 : index
    %c0_388 = arith.constant 0 : index
    %786 = vector.load %arg3[%c0_387, %c0_388] : memref<1x5xf32, #tpu.memory_space<vmem>>, vector<1x5xf32>
    %787 = arith.truncf %784 : vector<4x5xf32> to vector<4x5xbf16>
    %cst_389 = arith.constant dense<0.000000e+00> : vector<4x5xf32>
    %788 = tpu.matmul %787, %785, %cst_389 {dimension_numbers = #tpu.dot_dimension_numbers<[1], [0], [0], [1], [0, 0, 1, 1], [], []>} : vector<4x5xbf16>, vector<5x5xbf16>, vector<4x5xf32> -> vector<4x5xf32>
    %789 = vector.broadcast %786 : vector<1x5xf32> to vector<4x5xf32>
    %790 = arith.addf %788, %789 : vector<4x5xf32>
    %791 = math.tanh %790 : vector<4x5xf32>
    %cst_390 = arith.constant dense<0.000000e+00> : vector<5xf32>
    %792 = vector.multi_reduction <add>, %791, %cst_390 [0] : vector<4x5xf32> to vector<5xf32>
    %793 = vector.shape_cast %792 : vector<5xf32> to vector<1x5xf32>
    %794 = math.tanh %786 : vector<1x5xf32>
    %cst_391 = arith.constant 1.520000e+02 : f32
    %795 = vector.broadcast %cst_391 : f32 to vector<1x5xf32>
    %796 = arith.mulf %795, %794 : vector<1x5xf32>
    %797 = arith.addf %793, %796 : vector<1x5xf32>
    %cst_392 = arith.constant 1.560000e+02 : f32
    %798 = vector.broadcast %cst_392 : f32 to vector<1x5xf32>
    %799 = arith.divf %797, %798 : vector<1x5xf32>
    %800 = arith.truncf %799 : vector<1x5xf32> to vector<1x5xbf16>
    %cst_393 = arith.constant dense<0.000000e+00> : vector<1x5xf32>
    %801 = tpu.matmul %800, %785, %cst_393 {dimension_numbers = #tpu.dot_dimension_numbers<[1], [0], [0], [1], [0, 0, 1, 1], [], []>} : vector<1x5xbf16>, vector<5x5xbf16>, vector<1x5xf32> -> vector<1x5xf32>
    %802 = arith.addf %801, %786 : vector<1x5xf32>
    %cst_394 = arith.constant dense<0xFF800000> : vector<1xf32>
    %803 = vector.multi_reduction <maximumf>, %802, %cst_394 [1] : vector<1x5xf32> to vector<1xf32>
    %804 = vector.shape_cast %803 : vector<1xf32> to vector<1x1xf32>
    %805 = vector.broadcast %804 : vector<1x1xf32> to vector<1x5xf32>
    %806 = arith.subf %802, %805 : vector<1x5xf32>
    %807 = math.exp %806 : vector<1x5xf32>
    %cst_395 = arith.constant dense<0.000000e+00> : vector<1xf32>
    %808 = vector.multi_reduction <add>, %807, %cst_395 [1] : vector<1x5xf32> to vector<1xf32>
    %809 = vector.shape_cast %808 : vector<1xf32> to vector<1x1xf32>
    %810 = vector.broadcast %809 : vector<1x1xf32> to vector<1x5xf32>
    %811 = arith.divf %807, %810 : vector<1x5xf32>
    %c0_396 = arith.constant 0 : index
    %c0_397 = arith.constant 0 : index
    %c0_398 = arith.constant 0 : index
    %812 = vector.load %arg48[%c0_396, %c0_397, %c0_398] : memref<1x1x5xf32, #tpu.memory_space<vmem>>, vector<1x1x5xf32>
    %813 = vector.shape_cast %812 : vector<1x1x5xf32> to vector<1x5xf32>
    %814 = vector.shape_cast %811 : vector<1x5xf32> to vector<1x1x5xf32>
    tpu.vector_store %arg48[%c0_396, %c0_397, %c0_398], %814 {strides = array<i32>} : memref<1x1x5xf32, #tpu.memory_space<vmem>>, vector<1x1x5xf32>,
    return
  }
  func.func @transform_0(%arg0: i32) -> (i32, i32, i32) {
    %c0_i32 = arith.constant 0 : i32
    %c0_i32_0 = arith.constant 0 : i32
    %c0_i32_1 = arith.constant 0 : i32
    return %arg0, %c0_i32, %c0_i32_0 : i32, i32, i32
  }
  func.func @transform_1(%arg0: i32) -> (i32, i32) {
    %c0_i32 = arith.constant 0 : i32
    %c0_i32_0 = arith.constant 0 : i32
    %c0_i32_1 = arith.constant 0 : i32
    return %c0_i32, %c0_i32_0 : i32, i32
  }
  func.func @transform_2(%arg0: i32) -> (i32, i32) {
    %c0_i32 = arith.constant 0 : i32
    %c0_i32_0 = arith.constant 0 : i32
    %c0_i32_1 = arith.constant 0 : i32
    return %c0_i32, %c0_i32_0 : i32, i32
  }
  func.func @transform_3(%arg0: i32) -> (i32, i32, i32) {
    %c0_i32 = arith.constant 0 : i32
    %c0_i32_0 = arith.constant 0 : i32
    %c0_i32_1 = arith.constant 0 : i32
    %c0_i32_2 = arith.constant 0 : i32
    return %c0_i32, %c0_i32_0, %c0_i32_1 : i32, i32, i32
  }
  func.func @transform_4(%arg0: i32) -> (i32, i32) {
    %c0_i32 = arith.constant 0 : i32
    %c0_i32_0 = arith.constant 0 : i32
    %c0_i32_1 = arith.constant 0 : i32
    return %c0_i32, %c0_i32_0 : i32, i32
  }
  func.func @transform_5(%arg0: i32) -> (i32, i32, i32) {
    %c0_i32 = arith.constant 0 : i32
    %c0_i32_0 = arith.constant 0 : i32
    %c0_i32_1 = arith.constant 0 : i32
    %c0_i32_2 = arith.constant 0 : i32
    return %c0_i32, %c0_i32_0, %c0_i32_1 : i32, i32, i32
  }
  func.func @transform_6(%arg0: i32) -> (i32, i32) {
    %c0_i32 = arith.constant 0 : i32
    %c0_i32_0 = arith.constant 0 : i32
    %c0_i32_1 = arith.constant 0 : i32
    return %c0_i32, %c0_i32_0 : i32, i32
  }
  func.func @transform_7(%arg0: i32) -> (i32, i32, i32) {
    %c0_i32 = arith.constant 0 : i32
    %c0_i32_0 = arith.constant 0 : i32
    %c0_i32_1 = arith.constant 0 : i32
    %c0_i32_2 = arith.constant 0 : i32
    return %c0_i32, %c0_i32_0, %c0_i32_1 : i32, i32, i32
  }
  func.func @transform_8(%arg0: i32) -> (i32, i32) {
    %c0_i32 = arith.constant 0 : i32
    %c0_i32_0 = arith.constant 0 : i32
    %c0_i32_1 = arith.constant 0 : i32
    return %c0_i32, %c0_i32_0 : i32, i32
  }
  func.func @transform_9(%arg0: i32) -> (i32, i32, i32) {
    %c0_i32 = arith.constant 0 : i32
    %c0_i32_0 = arith.constant 0 : i32
    %c0_i32_1 = arith.constant 0 : i32
    %c0_i32_2 = arith.constant 0 : i32
    return %c0_i32, %c0_i32_0, %c0_i32_1 : i32, i32, i32
  }
  func.func @transform_10(%arg0: i32) -> (i32, i32) {
    %c0_i32 = arith.constant 0 : i32
    %c0_i32_0 = arith.constant 0 : i32
    %c0_i32_1 = arith.constant 0 : i32
    return %c0_i32, %c0_i32_0 : i32, i32
  }
  func.func @transform_11(%arg0: i32) -> (i32, i32, i32) {
    %c0_i32 = arith.constant 0 : i32
    %c0_i32_0 = arith.constant 0 : i32
    %c0_i32_1 = arith.constant 0 : i32
    %c0_i32_2 = arith.constant 0 : i32
    return %c0_i32, %c0_i32_0, %c0_i32_1 : i32, i32, i32
  }
  func.func @transform_12(%arg0: i32) -> (i32, i32) {
    %c0_i32 = arith.constant 0 : i32
    %c0_i32_0 = arith.constant 0 : i32
    %c0_i32_1 = arith.constant 0 : i32
    return %c0_i32, %c0_i32_0 : i32, i32
  }
  func.func @transform_13(%arg0: i32) -> (i32, i32, i32) {
    %c0_i32 = arith.constant 0 : i32
    %c0_i32_0 = arith.constant 0 : i32
    %c0_i32_1 = arith.constant 0 : i32
    %c0_i32_2 = arith.constant 0 : i32
    return %c0_i32, %c0_i32_0, %c0_i32_1 : i32, i32, i32
  }
  func.func @transform_14(%arg0: i32) -> (i32, i32) {
    %c0_i32 = arith.constant 0 : i32
    %c0_i32_0 = arith.constant 0 : i32
    %c0_i32_1 = arith.constant 0 : i32
    return %c0_i32, %c0_i32_0 : i32, i32
  }
  func.func @transform_15(%arg0: i32) -> (i32, i32, i32) {
    %c0_i32 = arith.constant 0 : i32
    %c0_i32_0 = arith.constant 0 : i32
    %c0_i32_1 = arith.constant 0 : i32
    %c0_i32_2 = arith.constant 0 : i32
    return %c0_i32, %c0_i32_0, %c0_i32_1 : i32, i32, i32
  }
  func.func @transform_16(%arg0: i32) -> (i32, i32) {
    %c0_i32 = arith.constant 0 : i32
    %c0_i32_0 = arith.constant 0 : i32
    %c0_i32_1 = arith.constant 0 : i32
    return %c0_i32, %c0_i32_0 : i32, i32
  }
  func.func @transform_17(%arg0: i32) -> (i32, i32, i32) {
    %c0_i32 = arith.constant 0 : i32
    %c0_i32_0 = arith.constant 0 : i32
    %c0_i32_1 = arith.constant 0 : i32
    %c0_i32_2 = arith.constant 0 : i32
    return %c0_i32, %c0_i32_0, %c0_i32_1 : i32, i32, i32
  }
  func.func @transform_18(%arg0: i32) -> (i32, i32) {
    %c0_i32 = arith.constant 0 : i32
    %c0_i32_0 = arith.constant 0 : i32
    %c0_i32_1 = arith.constant 0 : i32
    return %c0_i32, %c0_i32_0 : i32, i32
  }
  func.func @transform_19(%arg0: i32) -> (i32, i32, i32) {
    %c0_i32 = arith.constant 0 : i32
    %c0_i32_0 = arith.constant 0 : i32
    %c0_i32_1 = arith.constant 0 : i32
    %c0_i32_2 = arith.constant 0 : i32
    return %c0_i32, %c0_i32_0, %c0_i32_1 : i32, i32, i32
  }
  func.func @transform_20(%arg0: i32) -> (i32, i32) {
    %c0_i32 = arith.constant 0 : i32
    %c0_i32_0 = arith.constant 0 : i32
    %c0_i32_1 = arith.constant 0 : i32
    return %c0_i32, %c0_i32_0 : i32, i32
  }
  func.func @transform_21(%arg0: i32) -> (i32, i32, i32) {
    %c0_i32 = arith.constant 0 : i32
    %c0_i32_0 = arith.constant 0 : i32
    %c0_i32_1 = arith.constant 0 : i32
    %c0_i32_2 = arith.constant 0 : i32
    return %c0_i32, %c0_i32_0, %c0_i32_1 : i32, i32, i32
  }
  func.func @transform_22(%arg0: i32) -> (i32, i32) {
    %c0_i32 = arith.constant 0 : i32
    %c0_i32_0 = arith.constant 0 : i32
    %c0_i32_1 = arith.constant 0 : i32
    return %c0_i32, %c0_i32_0 : i32, i32
  }
  func.func @transform_23(%arg0: i32) -> (i32, i32, i32) {
    %c0_i32 = arith.constant 0 : i32
    %c0_i32_0 = arith.constant 0 : i32
    %c0_i32_1 = arith.constant 0 : i32
    %c0_i32_2 = arith.constant 0 : i32
    return %c0_i32, %c0_i32_0, %c0_i32_1 : i32, i32, i32
  }
  func.func @transform_24(%arg0: i32) -> (i32, i32) {
    %c0_i32 = arith.constant 0 : i32
    %c0_i32_0 = arith.constant 0 : i32
    %c0_i32_1 = arith.constant 0 : i32
    return %c0_i32, %c0_i32_0 : i32, i32
  }
  func.func @transform_25(%arg0: i32) -> (i32, i32, i32) {
    %c0_i32 = arith.constant 0 : i32
    %c0_i32_0 = arith.constant 0 : i32
    %c0_i32_1 = arith.constant 0 : i32
    %c0_i32_2 = arith.constant 0 : i32
    return %c0_i32, %c0_i32_0, %c0_i32_1 : i32, i32, i32
  }
  func.func @transform_26(%arg0: i32) -> (i32, i32) {
    %c0_i32 = arith.constant 0 : i32
    %c0_i32_0 = arith.constant 0 : i32
    %c0_i32_1 = arith.constant 0 : i32
    return %c0_i32, %c0_i32_0 : i32, i32
  }
  func.func @transform_27(%arg0: i32) -> (i32, i32, i32) {
    %c0_i32 = arith.constant 0 : i32
    %c0_i32_0 = arith.constant 0 : i32
    %c0_i32_1 = arith.constant 0 : i32
    %c0_i32_2 = arith.constant 0 : i32
    return %c0_i32, %c0_i32_0, %c0_i32_1 : i32, i32, i32
  }
  func.func @transform_28(%arg0: i32) -> (i32, i32) {
    %c0_i32 = arith.constant 0 : i32
    %c0_i32_0 = arith.constant 0 : i32
    %c0_i32_1 = arith.constant 0 : i32
    return %c0_i32, %c0_i32_0 : i32, i32
  }
  func.func @transform_29(%arg0: i32) -> (i32, i32, i32) {
    %c0_i32 = arith.constant 0 : i32
    %c0_i32_0 = arith.constant 0 : i32
    %c0_i32_1 = arith.constant 0 : i32
    %c0_i32_2 = arith.constant 0 : i32
    return %c0_i32, %c0_i32_0, %c0_i32_1 : i32, i32, i32
  }
  func.func @transform_30(%arg0: i32) -> (i32, i32) {
    %c0_i32 = arith.constant 0 : i32
    %c0_i32_0 = arith.constant 0 : i32
    %c0_i32_1 = arith.constant 0 : i32
    return %c0_i32, %c0_i32_0 : i32, i32
  }
  func.func @transform_31(%arg0: i32) -> (i32, i32, i32) {
    %c0_i32 = arith.constant 0 : i32
    %c0_i32_0 = arith.constant 0 : i32
    %c0_i32_1 = arith.constant 0 : i32
    %c0_i32_2 = arith.constant 0 : i32
    return %c0_i32, %c0_i32_0, %c0_i32_1 : i32, i32, i32
  }
  func.func @transform_32(%arg0: i32) -> (i32, i32) {
    %c0_i32 = arith.constant 0 : i32
    %c0_i32_0 = arith.constant 0 : i32
    %c0_i32_1 = arith.constant 0 : i32
    return %c0_i32, %c0_i32_0 : i32, i32
  }
  func.func @transform_33(%arg0: i32) -> (i32, i32, i32) {
    %c0_i32 = arith.constant 0 : i32
    %c0_i32_0 = arith.constant 0 : i32
    %c0_i32_1 = arith.constant 0 : i32
    %c0_i32_2 = arith.constant 0 : i32
    return %c0_i32, %c0_i32_0, %c0_i32_1 : i32, i32, i32
  }
  func.func @transform_34(%arg0: i32) -> (i32, i32) {
    %c0_i32 = arith.constant 0 : i32
    %c0_i32_0 = arith.constant 0 : i32
    %c0_i32_1 = arith.constant 0 : i32
    return %c0_i32, %c0_i32_0 : i32, i32
  }
  func.func @transform_35(%arg0: i32) -> (i32, i32, i32) {
    %c0_i32 = arith.constant 0 : i32
    %c0_i32_0 = arith.constant 0 : i32
    %c0_i32_1 = arith.constant 0 : i32
    %c0_i32_2 = arith.constant 0 : i32
    return %c0_i32, %c0_i32_0, %c0_i32_1 : i32, i32, i32
  }
  func.func @transform_36(%arg0: i32) -> (i32, i32) {
    %c0_i32 = arith.constant 0 : i32
    %c0_i32_0 = arith.constant 0 : i32
    %c0_i32_1 = arith.constant 0 : i32
    return %c0_i32, %c0_i32_0 : i32, i32
  }
  func.func @transform_37(%arg0: i32) -> (i32, i32, i32) {
    %c0_i32 = arith.constant 0 : i32
    %c0_i32_0 = arith.constant 0 : i32
    %c0_i32_1 = arith.constant 0 : i32
    %c0_i32_2 = arith.constant 0 : i32
    return %c0_i32, %c0_i32_0, %c0_i32_1 : i32, i32, i32
  }
  func.func @transform_38(%arg0: i32) -> (i32, i32) {
    %c0_i32 = arith.constant 0 : i32
    %c0_i32_0 = arith.constant 0 : i32
    %c0_i32_1 = arith.constant 0 : i32
    return %c0_i32, %c0_i32_0 : i32, i32
  }
  func.func @transform_39(%arg0: i32) -> (i32, i32, i32) {
    %c0_i32 = arith.constant 0 : i32
    %c0_i32_0 = arith.constant 0 : i32
    %c0_i32_1 = arith.constant 0 : i32
    %c0_i32_2 = arith.constant 0 : i32
    return %c0_i32, %c0_i32_0, %c0_i32_1 : i32, i32, i32
  }
  func.func @transform_40(%arg0: i32) -> (i32, i32) {
    %c0_i32 = arith.constant 0 : i32
    %c0_i32_0 = arith.constant 0 : i32
    %c0_i32_1 = arith.constant 0 : i32
    return %c0_i32, %c0_i32_0 : i32, i32
  }
  func.func @transform_41(%arg0: i32) -> (i32, i32, i32) {
    %c0_i32 = arith.constant 0 : i32
    %c0_i32_0 = arith.constant 0 : i32
    %c0_i32_1 = arith.constant 0 : i32
    %c0_i32_2 = arith.constant 0 : i32
    return %c0_i32, %c0_i32_0, %c0_i32_1 : i32, i32, i32
  }
  func.func @transform_42(%arg0: i32) -> (i32, i32) {
    %c0_i32 = arith.constant 0 : i32
    %c0_i32_0 = arith.constant 0 : i32
    %c0_i32_1 = arith.constant 0 : i32
    return %c0_i32, %c0_i32_0 : i32, i32
  }
  func.func @transform_43(%arg0: i32) -> (i32, i32, i32) {
    %c0_i32 = arith.constant 0 : i32
    %c0_i32_0 = arith.constant 0 : i32
    %c0_i32_1 = arith.constant 0 : i32
    %c0_i32_2 = arith.constant 0 : i32
    return %c0_i32, %c0_i32_0, %c0_i32_1 : i32, i32, i32
  }
  func.func @transform_44(%arg0: i32) -> (i32, i32) {
    %c0_i32 = arith.constant 0 : i32
    %c0_i32_0 = arith.constant 0 : i32
    %c0_i32_1 = arith.constant 0 : i32
    return %c0_i32, %c0_i32_0 : i32, i32
  }
  func.func @transform_45(%arg0: i32) -> (i32, i32, i32) {
    %c0_i32 = arith.constant 0 : i32
    %c0_i32_0 = arith.constant 0 : i32
    %c0_i32_1 = arith.constant 0 : i32
    %c0_i32_2 = arith.constant 0 : i32
    return %c0_i32, %c0_i32_0, %c0_i32_1 : i32, i32, i32
  }
  func.func @transform_46(%arg0: i32) -> (i32, i32) {
    %c0_i32 = arith.constant 0 : i32
    %c0_i32_0 = arith.constant 0 : i32
    %c0_i32_1 = arith.constant 0 : i32
    return %c0_i32, %c0_i32_0 : i32, i32
  }
  func.func @transform_47(%arg0: i32) -> (i32, i32, i32) {
    %c0_i32 = arith.constant 0 : i32
    %c0_i32_0 = arith.constant 0 : i32
    %c0_i32_1 = arith.constant 0 : i32
    return %arg0, %c0_i32, %c0_i32_0 : i32, i32, i32
  }
}

</mosaic_0001>

<bundles_post_ra>
// kernel: unet_forward.1
= control target key start
LH: loop header
LB: loop body
LE: loop exit
PB: predicated region body
PF: predicated region fallthrough
CT: control target
= control target key end

     0   :  { %s16019_s6 = smov 1   ;;  %s16020_s10 = smov 2   ;;  %s18453_s0 = inlined_call_operand.smem [shape: u32[48], index: -1, kind: input, shape index: {}] }
   0x1   :  { %s16082_s5 = sld [smem:[%s18453_s0]]   ;;  %s16021_s14 = smov 3  }
   0x2   :  { %s16087_s9 = sld [smem:[%s18453_s0 + %s16019_s6]]   ;;  %s16022_s18 = smov 4  }
   0x3   :  { %s16092_s13 = sld [smem:[%s18453_s0 + %s16020_s10]]   ;;  %s16023_s22 = smov 5  }
   0x4   :  { %s16097_s17 = sld [smem:[%s18453_s0 + %s16021_s14]]   ;;  %s16024_s26 = smov 6  }
   0x5   :  { %s16102_s21 = sld [smem:[%s18453_s0 + %s16022_s18]]   ;;  %s16025_s30 = smov 7  }
   0x6   :  { %s16107_s25 = sld [smem:[%s18453_s0 + %s16023_s22]]   ;;  %s16026_s4 = smov 8  }
   0x7   :  { %18489 = sst [smem:[#allocation5_spill]] %s16082_s5  ;;  %s16027_s10 = smov 9  }
   0x8   :  { %18490 = sst [smem:[#allocation6_spill]] %s16087_s9  ;;  %s16028_s15 = smov 10  }
   0x9   :  { %18491 = sst [smem:[#allocation7_spill]] %s16092_s13  ;;  %s16029_s20 = smov 11  }
   0xa   :  { %18492 = sst [smem:[#allocation8_spill]] %s16097_s17  ;;  %s16031_s1 = smov 13  }
   0xb   :  { %18493 = sst [smem:[#allocation9_spill]] %s16102_s21  ;;  %s16032_s7 = smov 14  }
   0xc   :  { %18494 = sst [smem:[#allocation10_spill]] %s16107_s25  ;;  %s16034_s22 = smov 16  }
   0xd   :  { %s16112_s29 = sld [smem:[%s18453_s0 + %s16024_s26]]   ;;  %s16030_s26 = smov 12  }
   0xe   :  { %s16117_s3 = sld [smem:[%s18453_s0 + %s16025_s30]]   ;;  %s16035_s28 = smov 17  }
   0xf   :  { %s16122_s8 = sld [smem:[%s18453_s0 + %s16026_s4]]  }
  0x10   :  { %s16127_s14 = sld [smem:[%s18453_s0 + %s16027_s10]]  }
  0x11   :  { %s16132_s19 = sld [smem:[%s18453_s0 + %s16028_s15]]   ;;  %s16033_s15 = smov 15  }
  0x12   :  { %s16137_s24 = sld [smem:[%s18453_s0 + %s16029_s20]]  }
  0x13   :  { %18495 = sst [smem:[#allocation11_spill]] %s16112_s29 }
  0x14   :  { %18496 = sst [smem:[#allocation12_spill]] %s16117_s3 }
  0x15   :  { %18497 = sst [smem:[#allocation13_spill]] %s16122_s8 }
  0x16   :  { %18498 = sst [smem:[#allocation14_spill]] %s16127_s14 }
  0x17   :  { %18499 = sst [smem:[#allocation15_spill]] %s16132_s19 }
  0x18   :  { %18500 = sst [smem:[#allocation16_spill]] %s16137_s24 }
  0x19   :  { %s16142_s30 = sld [smem:[%s18453_s0 + %s16030_s26]]  }
  0x1a   :  { %s16147_s6 = sld [smem:[%s18453_s0 + %s16031_s1]]  }
  0x1b   :  { %s16152_s12 = sld [smem:[%s18453_s0 + %s16032_s7]]   ;;  %s16036_s7 = smov 18  }
  0x1c   :  { %s16157_s20 = sld [smem:[%s18453_s0 + %s16033_s15]]   ;;  %s16037_s15 = smov 19  }
  0x1d   :  { %s16162_s27 = sld [smem:[%s18453_s0 + %s16034_s22]]   ;;  %s16038_s22 = smov 20  }
  0x1e   :  { %s16167_s4 = sld [smem:[%s18453_s0 + %s16035_s28]]   ;;  %s16039_s28 = smov 21  }
  0x1f   :  { %18501 = sst [smem:[#allocation17_spill]] %s16142_s30 }
  0x20   :  { %18502 = sst [smem:[#allocation18_spill]] %s16147_s6 }
  0x21   :  { %18503 = sst [smem:[#allocation19_spill]] %s16152_s12 }
  0x22   :  { %18504 = sst [smem:[#allocation20_spill]] %s16157_s20 }
  0x23   :  { %18505 = sst [smem:[#allocation21_spill]] %s16162_s27 }
  0x24   :  { %18506 = sst [smem:[#allocation22_spill]] %s16167_s4 }
  0x25   :  { %s16172_s13 = sld [smem:[%s18453_s0 + %s16036_s7]]   ;;  %s16040_s7 = smov 22  }
  0x26   :  { %s16177_s9 = sld [smem:[%s18453_s0 + %s16037_s15]]   ;;  %s16041_s15 = smov 23  }
  0x27   :  { %s16182_s27 = sld [smem:[%s18453_s0 + %s16038_s22]]   ;;  %s16042_s22 = smov 24  }
  0x28   :  { %s16187_s4 = sld [smem:[%s18453_s0 + %s16039_s28]]   ;;  %s16043_s28 = smov 25  }
  0x2b   :  { %18507 = sst [smem:[#allocation23_spill]] %s16172_s13 }
  0x2c   :  { %18508 = sst [smem:[#allocation24_spill]] %s16177_s9 }
  0x2d   :  { %18509 = sst [smem:[#allocation25_spill]] %s16182_s27 }
  0x2e   :  { %18510 = sst [smem:[#allocation26_spill]] %s16187_s4 }
  0x2f   :  { %s16192_s13 = sld [smem:[%s18453_s0 + %s16040_s7]]   ;;  %s16044_s7 = smov 26  }
  0x30   :  { %s16197_s9 = sld [smem:[%s18453_s0 + %s16041_s15]]   ;;  %s16045_s15 = smov 27  }
  0x31   :  { %s16202_s27 = sld [smem:[%s18453_s0 + %s16042_s22]]   ;;  %s16046_s22 = smov 28  }
  0x32   :  { %s16207_s4 = sld [smem:[%s18453_s0 + %s16043_s28]]   ;;  %s16047_s28 = smov 29  }
  0x35   :  { %18511 = sst [smem:[#allocation27_spill]] %s16192_s13 }
  0x36   :  { %18512 = sst [smem:[#allocation28_spill]] %s16197_s9 }
  0x37   :  { %18513 = sst [smem:[#allocation29_spill]] %s16202_s27 }
  0x38   :  { %18514 = sst [smem:[#allocation30_spill]] %s16207_s4 }
  0x39   :  { %s16212_s13 = sld [smem:[%s18453_s0 + %s16044_s7]]   ;;  %s16048_s7 = smov 30  }
  0x3a   :  { %s16217_s9 = sld [smem:[%s18453_s0 + %s16045_s15]]   ;;  %s16049_s15 = smov 31  }
  0x3b   :  { %s16222_s27 = sld [smem:[%s18453_s0 + %s16046_s22]]   ;;  %s16050_s22 = smov 32  }
  0x3c   :  { %s16227_s4 = sld [smem:[%s18453_s0 + %s16047_s28]]   ;;  %s16051_s28 = smov 33  }
  0x3d   :  { %s16237_s12 = sld [smem:[%s18453_s0 + %s16049_s15]]   ;;  %s16053_s15 = smov 35  }
  0x3e   :  { %s16242_s20 = sld [smem:[%s18453_s0 + %s16050_s22]]   ;;  %s16054_s22 = smov 36  }
  0x3f   :  { %18515 = sst [smem:[#allocation31_spill]] %s16212_s13 }
  0x40   :  { %18516 = sst [smem:[#allocation32_spill]] %s16217_s9 }
  0x41   :  { %s16232_s13 = sld [smem:[%s18453_s0 + %s16048_s7]]   ;;  %s16052_s7 = smov 34  }
  0x42   :  { %18517 = sst [smem:[#allocation33_spill]] %s16227_s4 }
  0x43   :  { %s16247_s30 = sld [smem:[%s18453_s0 + %s16051_s28]]   ;;  %s16055_s28 = smov 37  }
  0x44   :  { %s16252_s6 = sld [smem:[%s18453_s0 + %s16052_s7]]   ;;  %s16056_s7 = smov 38  }
  0x45   :  { %s16257_s19 = sld [smem:[%s18453_s0 + %s16053_s15]]   ;;  %s16057_s15 = smov 39  }
  0x46   :  { %s16262_s24 = sld [smem:[%s18453_s0 + %s16054_s22]]   ;;  %s16058_s22 = smov 40  }
  0x47   :  { %s16267_s8 = sld [smem:[%s18453_s0 + %s16055_s28]]   ;;  %s16059_s28 = smov 41  }
  0x48   :  { %s16272_s14 = sld [smem:[%s18453_s0 + %s16056_s7]]   ;;  %s16060_s7 = smov 42  }
  0x49   :  { %s16277_s29 = sld [smem:[%s18453_s0 + %s16057_s15]]   ;;  %s16061_s15 = smov 43  }
  0x4a   :  { %18518 = sst [smem:[#allocation34_spill]] %s16252_s6 }
  0x4b   :  { %s16282_s3 = sld [smem:[%s18453_s0 + %s16058_s22]]   ;;  %s16062_s22 = smov 44  }
  0x4c   :  { %s16287_s21 = sld [smem:[%s18453_s0 + %s16059_s28]]   ;;  %s16063_s28 = smov 45  }
  0x4d   :  { %18519 = sst [smem:[#allocation35_spill]] %s16267_s8 }
  0x4e   :  { %s16292_s25 = sld [smem:[%s18453_s0 + %s16060_s7]]   ;;  %s16064_s7 = smov 46  }
  0x4f   :  { %s16297_s17 = sld [smem:[%s18453_s0 + %s16061_s15]]   ;;  %s16065_s15 = smov 47  }
  0x51   :  { %18520 = sst [smem:[#allocation36_spill]] %s16282_s3 }
  0x52   :  { %18521 = sst [smem:[#allocation37_spill]] %s16287_s21 }
  0x53   :  { %s16302_s3 = sld [smem:[%s18453_s0 + %s16062_s22]]  }
  0x54   :  { %18522 = sst [smem:[#allocation38_spill]] %s16292_s25 }
  0x55   :  { %18523 = sst [smem:[#allocation39_spill]] %s16297_s17 }
  0x56   :  { %s16307_s21 = sld [smem:[%s18453_s0 + %s16063_s28]]  }
  0x57   :  { %s16312_s25 = sld [smem:[%s18453_s0 + %s16064_s7]]  }
  0x58   :  { %s16317_s17 = sld [smem:[%s18453_s0 + %s16065_s15]]  }
  0x59   :  { %18524 = sst [smem:[#allocation40_spill]] %s16302_s3 }
  0x5a   :  { %100 = vsyncpa [#allocation3], 0 }
  0x5b   :  { %102 = vsyncpa [#allocation3 + $0x1], 0  ;;  %s16319_s22 = smov 0   ;;  %s16321_s23 = smov 0  }
  0x5c   :  { %s16323_s26 = smov 0   ;;  %s16325_s28 = smov 0  }
  0x5d LB: > { %s18525_s9 = sld [smem:[#allocation32_spill]]  ;;  %s18526_s8 = sld [smem:[#allocation35_spill]]  ;;  %s16013_s26 = sphi %s16323_s26, %s18584_s26   ;;  %s16009_s23 = sphi %s16321_s23, %s18583_s23   ;;  %s16005_s22 = sphi %s16319_s22, %s18582_s22   ;;  %s16017_s28 = sphi %s16325_s28, %s18585_s28  }
  0x5e   : > { %s18527_s4 = sld [smem:[#allocation33_spill]]  ;;  %s16340_s0 = sadd.s32 4294967295, %s16017_s28  }
  0x5f   : > { %s12286_s1 = sadd.s32 4294967294, %s16017_s28   ;;  %s16344_s2 = sadd.s32 1, %s16017_s28  }
  0x60   : > { %s1107_s7 = sadd.s32 1, %s16013_s26  ;;  %s1104_s10 = ssub.s32 %s16017_s28, %s16344_s2 }
  0x61   : > { %p1117_p0 = scmp.ne.s32.totalorder %s16013_s26, %s16009_s23  ;;  %p1105_p1 = scmp.eq.s32.totalorder %s1104_s10, 0 }
  0x62   : > { %p1118_p2 = scmp.eq.s32.totalorder %s16340_s0, 1  ;;  %p1123_p3 = scmp.ne.s32.totalorder %s16009_s23, %s16005_s22 }
  0x63   : > { %p1124_p4 = scmp.eq.s32.totalorder %s12286_s1, 1  ;;  %p12289_p7 = scmp.ge.s32.totalorder %s16017_s28, 1 }
  0x64   : > { %s16355_s11 = scalar_select %p1105_p1, %s16013_s26, %s1107_s7  }
  0x65   : > { %p16357_p5 = por %p1118_p2, %p1117_p0  ;;  %p16361_p6 = por %p1124_p4, %p1123_p3 }
  0x66   : > { %p1288_p8 = scmp.lt.s32.totalorder %s16017_s28, 3 }
  0x68   : > { %p1289_p9 = pnand %p12289_p7, %p1288_p8 }
  0x69   : > { %s18530_s5 = sld [smem:[#allocation5_spill]] (!%p1289_p9)  ;;  %v12291_v0 = vld [vmem:[%s18525_s9 + $0x2] sm:$0x3] (!%p1289_p9)  ;;  %vm18467_vm0 = vcmask (!%p1289_p9), 1041408   ;;  %p1399_p10 = scmp.lt.s32.totalorder (!%p1289_p9), %s16340_s0, 1  ;;  %vm1518_vm2 = vcmask (!%p1289_p9), 31744  }
  0x6a   : > { %1292 = sbr.rel (%p1289_p9) target bundleno = 9389 (0x24ad), region = 208  ;;  %15345 = vmatprep.subr.msk.bf16.mxu0 (!%p1289_p9), %vm18467_vm0, %v12291_v0  ;;  %v1551_v1 = vsel (!%p1289_p9), %vm18467_vm0, %v12291_v0, 0  ;;  %v1435_v2 = vld [vmem:[%s18525_s9] sm:$0x3] (!%p1289_p9)  ;;  %v16375_v3 = vld [vmem:[%s18525_s9 + $0x4] sm:$0x3] (!%p1289_p9) }
  0x6b   : > { %14018 = vmatpush3.bf16.msra.mxu0 (!%p1289_p9), %v1551_v1  ;;  %vm1438_vm1 = vsmask.f32 (!%p1289_p9), 7424  ;;  %v1687_v16 = vsel (!%p1289_p9), %vm18467_vm0, %v1435_v2, 0  ;;  %v16398_v17 = vsel (!%p1289_p9), %vm18467_vm0, %v16375_v3, 0  ;;  %vm1814_vm3 = vcmask (!%p1289_p9), 1046528   ;;  %s18531_s6 = sld [smem:[#allocation34_spill]] (!%p1289_p9) }
  0x6c   : > { %15346 = vmatprep.subr.msk.bf16.mxu0 (!%p1289_p9), %vm18467_vm0, %v1435_v2  ;;  %vm2193_vm4 = vcmask (!%p1289_p9), 130048   ;;  %vm2916_vm5 = vcmask (!%p1289_p9), 195584   ;;  %s18538_s10 = sld [smem:[#allocation37_spill]] (!%p1289_p9)  ;;  %s18542_s3 = sld [smem:[#allocation40_spill]] (!%p1289_p9) }
  0x71   : > { %s1400_s18 = scalar_select %p1399_p10, %s16340_s0, 1 }
  0x73   : > { %s15348_s1 = smul.u32 160, %s1400_s18  ;;  %s18539_s18 = sld [smem:[#allocation36_spill]] }
  0x75   : > { %s16378_s7 = scalar_lea.vmem %s18530_s5, %s15348_s1  ;;  %s18540_s1 = sld [smem:[#allocation39_spill]] }
  0x76   : > { %v1405_v4 = vld [vmem:[%s16378_s7] sm:$0xff]  ;;  %v1406_v5 = vld [vmem:[%s16378_s7 + $0x8] sm:$0xff]  ;;  %v1407_v6 = vld [vmem:[%s16378_s7 + $0x10] sm:$0xff] }
  0x77   : > { %v1408_v7 = vld [vmem:[%s16378_s7 + $0x18] sm:$0xff]  ;;  %v16384_v8 = vpack.c.bf16 %v1406_v5, %v1405_v4  ;;  %v1409_v9 = vld [vmem:[%s16378_s7 + $0x20] sm:$0xff]  ;;  %v1410_v10 = vld [vmem:[%s16378_s7 + $0x28] sm:$0xff] }
  0x78   : > { %v16388_v11 = vpack.c.bf16 %v1408_v7, %v1407_v6  ;;  %v16390_v12 = vpack.c.bf16 %v1410_v10, %v1409_v9  ;;  %v1411_v13 = vld [vmem:[%s16378_s7 + $0x30] sm:$0xff]  ;;  %v1412_v14 = vld [vmem:[%s16378_s7 + $0x38] sm:$0xff]  ;;  %v1413_v15 = vld [vmem:[%s16378_s7 + $0x40] sm:$0xff] }
  0x79   : > { %v1440_v18 = vshrl.u32 %v16384_v8, 16  ;;  %v1442_v19 = vshll.u32 %v16384_v8, 16  ;;  %v16402_v20 = vpack.c.bf16 %v1412_v14, %v1411_v13  ;;  %v1414_v21 = vld [vmem:[%s16378_s7 + $0x48] sm:$0xff]  ;;  %v1415_v22 = vld [vmem:[%s16378_s7 + $0x50] sm:$0xff]  ;;  %v1416_v23 = vld [vmem:[%s16378_s7 + $0x58] sm:$0xff]  ;;  %v1815_v24 = vrot.slane %v16384_v8, 1 }
  0x7a   : > { %v1447_v25 = vshll.u32 %v16388_v11, 16  ;;  %v1451_v26 = vshrl.u32 %v16388_v11, 16  ;;  %v1455_v27 = vshll.u32 %v16390_v12, 16  ;;  %v1459_v28 = vshrl.u32 %v16390_v12, 16  ;;  %v1417_v29 = vld [vmem:[%s16378_s7 + $0x60] sm:$0xff]  ;;  %v1418_v30 = vld [vmem:[%s16378_s7 + $0x68] sm:$0xff] }
  0x7b   : > { %v1444_v31 = vrot.slane %v1442_v19, 1  ;;  %v1463_v32 = vshll.u32 %v16402_v20, 16  ;;  %v16415_v33 = vpack.c.bf16 %v1414_v21, %v1413_v15  ;;  %v1467_v34 = vshrl.u32 %v16402_v20, 16  ;;  %v1419_v39 = vld [vmem:[%s16378_s7 + $0x70] sm:$0xff]  ;;  %v1420_v40 = vld [vmem:[%s16378_s7 + $0x78] sm:$0xff]  ;;  %v1421_v44 = vld [vmem:[%s16378_s7 + $0x80] sm:$0xff] }
  0x7c   : > { %v1449_v35 = vrot.slane %v1447_v25, 1  ;;  %v1457_v36 = vrot.slane %v1455_v27, 1  ;;  %v16418_v37 = vpack.c.bf16 %v1416_v23, %v1415_v22  ;;  %v16420_v38 = vpack.c.bf16 %v1418_v30, %v1417_v29  ;;  %v1422_v45 = vld [vmem:[%s16378_s7 + $0x88] sm:$0xff]  ;;  %v1423_v50 = vld [vmem:[%s16378_s7 + $0x90] sm:$0xff]  ;;  %v1424_v51 = vld [vmem:[%s16378_s7 + $0x98] sm:$0xf] }
  0x7d   : > { %v1445_v41 = vor.u32 %v1444_v31, %v1440_v18  ;;  %v1465_v42 = vrot.slane %v1463_v32, 1  ;;  %v1471_v43 = vshll.u32 %v16415_v33, 16  ;;  %v1475_v48 = vshrl.u32 %v16415_v33, 16  ;;  %s18541_s7 = sld [smem:[#allocation38_spill]] }
  0x7e   : > { %v1453_v46 = vor.u32 %v1451_v26, %v1449_v35  ;;  %v1461_v47 = vor.u32 %v1459_v28, %v1457_v36  ;;  %v1479_v49 = vshll.u32 %v16418_v37, 16  ;;  %v1483_v53 = vshrl.u32 %v16418_v37, 16 }
  0x7f   : > { %v1450_v52 = vsel %vm1438_vm1, %v1445_v41, %v1449_v35  ;;  %v1487_v54 = vshll.u32 %v16420_v38, 16  ;;  %v1473_v57 = vrot.slane %v1471_v43, 1  ;;  %v16437_v58 = vpack.c.bf16 %v1420_v40, %v1419_v39 }
  0x80   : > { %14019 = vmatprep.mubr.msk.bf16.mxu0 %vm1518_vm2, %v1450_v52  ;;  %v1458_v55 = vsel %vm1438_vm1, %v1453_v46, %v1457_v36  ;;  %v1466_v56 = vsel %vm1438_vm1, %v1461_v47, %v1465_v42  ;;  %v1469_v59 = vor.u32 %v1467_v34, %v1465_v42  ;;  %v1481_v60 = vrot.slane %v1479_v49, 1 }
  0x81   : > { %14020 = vmatmul.mubr.msk.bf16.vlgmr.msra.gmra.mrb[0].mxu0 %vm1518_vm2, %v1458_v55  ;;  %v1489_v61 = vrot.slane %v1487_v54, 1  ;;  %v1477_v62 = vor.u32 %v1475_v48, %v1473_v57  ;;  %v1491_v63 = vshrl.u32 %v16420_v38, 16  ;;  %v1495_v0 = vshll.u32 %v16437_v58, 16 }
  0x82   : > { %14023 = vmatprep.mubr.msk.bf16.mxu0 %vm1518_vm2, %v1466_v56  ;;  %14040 = vmatpush3.bf16.msra.mxu0 %v1687_v16  ;;  %v16443_v1 = vpack.c.bf16 %v1422_v45, %v1421_v44  ;;  %v16445_v2 = vpack.c.bf16 %v1424_v51, %v1423_v50  ;;  %v1816_v4 = vrot.slane %v16388_v11, 1  ;;  %v1499_v6 = vshrl.u32 %v16437_v58, 16 }
  0x83   : > { %15347 = vmatprep.subr.msk.bf16.mxu0 %vm18467_vm0, %v16375_v3  ;;  %v1497_v5 = vrot.slane %v1495_v0, 1  ;;  %v1818_v14 = vrot.slane %v16390_v12, 1  ;;  %v1474_v15 = vsel %vm1438_vm1, %v1469_v59, %v1473_v57  ;;  %v1482_v16 = vsel %vm1438_vm1, %v1477_v62, %v1481_v60 }
  0x84   : > { %v1503_v7 = vshll.u32 %v16443_v1, 16  ;;  %v1507_v9 = vshrl.u32 %v16443_v1, 16  ;;  %v1511_v10 = vshll.u32 %v16445_v2, 16  ;;  %v1817_v13 = vsel %vm1814_vm3, %v1815_v24, %v1816_v4 }
  0x85   : > { %v1515_v3 = vshrl.u32 %v16445_v2, 16  ;;  %v1820_v18 = vrot.slane %v16402_v20, 1  ;;  %v1819_v21 = vsel %vm1814_vm3, %v1816_v4, %v1818_v14  ;;  %v1822_v22 = vrot.slane %v16415_v33, 1 }
  0x86   : > { %v1505_v19 = vrot.slane %v1503_v7, 1  ;;  %v1824_v23 = vrot.slane %v16418_v37, 1  ;;  %v1826_v24 = vrot.slane %v16420_v38, 1  ;;  %v1828_v28 = vrot.slane %v16437_v58, 1 }
  0x87   : > { %v1821_v25 = vsel %vm1814_vm3, %v1818_v14, %v1820_v18  ;;  %v1823_v26 = vsel %vm1814_vm3, %v1820_v18, %v1822_v22  ;;  %v1485_v29 = vor.u32 %v1483_v53, %v1481_v60  ;;  %v1513_v30 = vrot.slane %v1511_v10, 1 }
  0x88   : > { %v1825_v27 = vsel %vm1814_vm3, %v1822_v22, %v1824_v23  ;;  %v1827_v31 = vsel %vm1814_vm3, %v1824_v23, %v1826_v24  ;;  %v1830_v32 = vrot.slane %v16443_v1, 1  ;;  %v1493_v34 = vor.u32 %v1491_v63, %v1489_v61 }
  0x89   : > { %14024 = vmatmul.mubr.msk.bf16.gmra.mrb[4].mxu0 %vm1518_vm2, %v1474_v15  ;;  %v1829_v35 = vsel %vm1814_vm3, %v1826_v24, %v1828_v28  ;;  %v1490_v39 = vsel %vm1438_vm1, %v1485_v29, %v1489_v61  ;;  %v1501_v41 = vor.u32 %v1499_v6, %v1497_v5  ;;  %v1509_v42 = vor.u32 %v1507_v9, %v1505_v19 }
  0x8a   : > { %14027 = vmatprep.mubr.msk.bf16.mxu0 %vm1518_vm2, %v1482_v16  ;;  %v1831_v36 = vsel %vm1814_vm3, %v1828_v28, %v1830_v32  ;;  %v1498_v40 = vsel %vm1438_vm1, %v1493_v34, %v1497_v5  ;;  %v1517_v45 = vor.u32 %v1515_v3, %v1513_v30 }
  0x8b   : > { %v1506_v43 = vsel %vm1438_vm1, %v1501_v41, %v1505_v19  ;;  %v1514_v44 = vsel %vm1438_vm1, %v1509_v42, %v1513_v30 }
  0x91   : > { %14028 = vmatmul.mubr.msk.bf16.gmra.mrb[8].mxu0 %vm1518_vm2, %v1490_v39 }
  0x92   : > { %14031 = vmatprep.mubr.msk.bf16.mxu0 %vm1518_vm2, %v1498_v40 }
  0x99   : > { %14032 = vmatmul.mubr.msk.bf16.gmra.mrb[12].mxu0 %vm1518_vm2, %v1506_v43 }
  0x9a   : > { %14035 = vmatprep.mubr.msk.bf16.mxu0 %vm1518_vm2, %v1514_v44 }
  0xa1   : > { %14036 = vmatmul.mubr.msk.bf16.gmra.mrb[16].mxu0 %vm1518_vm2, %v1517_v45 }
  0xa2   : > { %14041 = vmatprep.mubr.msk.bf16.mxu0 %vm1518_vm2, %v16384_v8  ;;  %v1832_v8 = vrot.slane %v16445_v2, 1 }
  0xa9   : > { %14042 = vmatmul.mubr.msk.bf16.vlgmr.msra.gmra.mrb[0].mxu0 %vm1518_vm2, %v16388_v11  ;;  %v1833_v11 = vsel %vm1814_vm3, %v1830_v32, %v1832_v8 }
  0xaa   : > { %14045 = vmatprep.mubr.msk.bf16.mxu0 %vm1518_vm2, %v16390_v12  ;;  %14062 = vmatpush3.bf16.msra.mxu0 %v16398_v17  ;;  %v15442_v12 = vld [vmem:[%s18527_s4 + $0x8] sm:$0xff]   ;;  %v16518_v17 = vld [vmem:[%s18527_s4] sm:$0xff]  }
  0xab   : > { %14083 = vmatprep.subr.bf16.mxu1 %v15442_v12 }
  0xac   : > { %14084 = vmatpush3.bf16.msra.mxu1 %v15442_v12 }
  0xad   : > { %14105 = vmatprep.subr.bf16.mxu1 %v16518_v17 }
  0xb1   : > { %14046 = vmatmul.mubr.msk.bf16.gmra.mrb[4].mxu0 %vm1518_vm2, %v16402_v20  ;;  %v2001_v20 = vlaneseq }
  0xb2   : > { %14049 = vmatprep.mubr.msk.bf16.mxu0 %vm1518_vm2, %v16415_v33 }
  0xb3   : > { %v16522_v33 = vshrl.u32 %v2001_v20, 7 }
  0xb5   : > { %v16532_v47 = vsub.s32 1, %v16522_v33  ;;  %v16539_v51 = vsub.s32 2, %v16522_v33 }
  0xb9   : > { %14050 = vmatmul.mubr.msk.bf16.gmra.mrb[8].mxu0 %vm1518_vm2, %v16418_v37  ;;  %v16525_v37 = vsub.s32 0, %v16522_v33 }
  0xba   : > { %14053 = vmatprep.mubr.msk.bf16.mxu0 %vm1518_vm2, %v16420_v38  ;;  %v2000_v38 = vld [vmem:[%s16222_s27] sm:$0x7] }
  0xbb   : > { %v16529_v46 = vrot.slane %v2000_v38, %v16525_v37  ;;  %v16536_v50 = vrot.slane %v2000_v38, %v16532_v47  ;;  %v16546_v61 = vrot.slane %v2000_v38, %v16539_v51 }
  0xc1   : > { %14054 = vmatmul.mubr.msk.bf16.gmra.mrb[12].mxu0 %vm1518_vm2, %v16437_v58 }
  0xc2   : > { %14057 = vmatprep.mubr.msk.bf16.mxu0 %vm1518_vm2, %v16443_v1 }
  0xc9   : > { %14058 = vmatmul.mubr.msk.bf16.gmra.mrb[16].mxu0 %vm1518_vm2, %v16445_v2 }
  0xca   : > { %14063 = vmatprep.mubr.msk.bf16.mxu0 %vm1518_vm2, %v1817_v13 }
  0xd1   : > { %14064 = vmatmul.mubr.msk.bf16.vlgmr.msra.gmra.mrb[0].mxu0 %vm1518_vm2, %v1819_v21 }
  0xd2   : > { %14067 = vmatprep.mubr.msk.bf16.mxu0 %vm1518_vm2, %v1821_v25 }
  0xd9   : > { %14068 = vmatmul.mubr.msk.bf16.gmra.mrb[4].mxu0 %vm1518_vm2, %v1823_v26 }
  0xda   : > { %14071 = vmatprep.mubr.msk.bf16.mxu0 %vm1518_vm2, %v1825_v27 }
  0xe1   : > { %14072 = vmatmul.mubr.msk.bf16.gmra.mrb[8].mxu0 %vm1518_vm2, %v1827_v31 }
  0xe2   : > { %14075 = vmatprep.mubr.msk.bf16.mxu0 %vm1518_vm2, %v1829_v35 }
  0xe9   : > { %14076 = vmatmul.mubr.msk.bf16.gmra.mrb[12].mxu0 %vm1518_vm2, %v1831_v36 }
  0xea   : > { %14079 = vmatprep.mubr.msk.bf16.mxu0 %vm1518_vm2, %v1833_v11 }
  0xf1   : > { %14080 = vmatmul.mubr.msk.bf16.gmra.mrb[16].mxu0 %vm1518_vm2, %v1832_v8 }
 0x1a4   : > { %v14065_v48 = vpop.f32.mrb[0].mxu0 }
 0x1a5   : > { %v2007_v49 = vadd.f32 %v14065_v48, %v16529_v46  ;;  %v1901_v52 = vpop.f32.mrb[1].mxu0 }
 0x1a6   : > { %v2005_v53 = vadd.f32 %v16529_v46, %v1901_v52  ;;  %v14066_v54 = vpop.f32.mrb[2].mxu0 }
 0x1a7   : > { %v2027_v55 = vmax.f32 %v2007_v49, 0.0  ;;  %v2008_v56 = vadd.f32 %v14066_v54, %v16529_v46  ;;  %v1904_v57 = vpop.f32.mrb[3].mxu0 }
 0x1a8   : > { %v2025_v58 = vmax.f32 %v2005_v53, 0.0  ;;  %v2006_v59 = vadd.f32 %v16529_v46, %v1904_v57 }
 0x1a9   : > { %v2051_v60 = vmul.f32 %v16536_v50, %v2027_v55  ;;  %v2028_v62 = vmax.f32 %v2008_v56, 0.0 }
 0x1aa   : > { %v2049_v63 = vmul.f32 %v16536_v50, %v2025_v58  ;;  %v2026_v0 = vmax.f32 %v2006_v59, 0.0 }
 0x1ab   : > { %v2052_v1 = vmul.f32 %v16536_v50, %v2028_v62  ;;  %v2075_v5 = vadd.f32 %v16546_v61, %v2051_v60 }
 0x1ac   : > { %v2050_v2 = vmul.f32 %v16536_v50, %v2026_v0  ;;  %v14069_v4 = vpop.f32.mrb[4].mxu0  ;;  %v2073_v10 = vadd.f32 %v16546_v61, %v2049_v63 }
 0x1ad   : > { %v2076_v6 = vadd.f32 %v16546_v61, %v2052_v1  ;;  %v2011_v7 = vadd.f32 %v14069_v4, %v16529_v46  ;;  %v1917_v9 = vpop.f32.mrb[5].mxu0 }
 0x1ae   : > { %v2074_v13 = vadd.f32 %v16546_v61, %v2050_v2  ;;  %v2009_v14 = vadd.f32 %v16529_v46, %v1917_v9  ;;  %v14070_v15 = vpop.f32.mrb[6].mxu0 }
 0x1af   : > { %v16557_v16 = vpack.c.bf16 %v2076_v6, %v2075_v5  ;;  %v2031_v3 = vmax.f32 %v2011_v7, 0.0  ;;  %v2012_v18 = vadd.f32 %v14070_v15, %v16529_v46  ;;  %v1920_v19 = vpop.f32.mrb[7].mxu0 }
 0x1b0   : > { %v16560_v21 = vpack.c.bf16 %v2074_v13, %v2073_v10  ;;  %v2029_v22 = vmax.f32 %v2009_v14, 0.0  ;;  %v2010_v23 = vadd.f32 %v16529_v46, %v1920_v19 }
 0x1b1   : > { %v2055_v25 = vmul.f32 %v16536_v50, %v2031_v3  ;;  %v2032_v24 = vmax.f32 %v2012_v18, 0.0  ;;  %v2116_v26 = vshll.u32 %v16557_v16, 16  ;;  %v2488_v40 = vrot.slane %v16557_v16, 1 }
 0x1b2   : > { %v2053_v27 = vmul.f32 %v16536_v50, %v2029_v22  ;;  %v2030_v28 = vmax.f32 %v2010_v23, 0.0  ;;  %v2111_v29 = vshll.u32 %v16560_v21, 16  ;;  %v2109_v31 = vshrl.u32 %v16560_v21, 16 }
 0x1b3   : > { %v2056_v30 = vmul.f32 %v16536_v50, %v2032_v24  ;;  %v2487_v32 = vrot.slane %v16560_v21, 1  ;;  %v2079_v34 = vadd.f32 %v16546_v61, %v2055_v25  ;;  %v2118_v45 = vrot.slane %v2116_v26, 1  ;;  %v16605_v24 = vld [vmem:[%s18527_s4 + $0x10] sm:$0xff]   ;;  %s18576_s4 = sld [smem:[#allocation30_spill]] }
 0x1b4   : > { %v2054_v35 = vmul.f32 %v16536_v50, %v2030_v28  ;;  %v14073_v36 = vpop.f32.mrb[8].mxu0  ;;  %v2113_v39 = vrot.slane %v2111_v29, 1  ;;  %v2077_v41 = vadd.f32 %v16546_v61, %v2053_v27  ;;  %v2120_v55 = vshrl.u32 %v16557_v16, 16 }
 0x1b5   : > { %v2080_v42 = vadd.f32 %v16546_v61, %v2056_v30  ;;  %v2015_v43 = vadd.f32 %v14073_v36, %v16529_v46  ;;  %v1933_v44 = vpop.f32.mrb[9].mxu0  ;;  %v16579_v48 = vsel %vm1814_vm3, %v2487_v32, %v2488_v40 }
 0x1b6   : > { %v2078_v8 = vadd.f32 %v16546_v61, %v2054_v35  ;;  %v2013_v11 = vadd.f32 %v16529_v46, %v1933_v44  ;;  %v14074_v12 = vpop.f32.mrb[10].mxu0  ;;  %v2114_v38 = vor.u32 %v2113_v39, %v2109_v31  ;;  %v2122_v63 = vor.u32 %v2120_v55, %v2118_v45 }
 0x1b7   : > { %v16581_v49 = vpack.c.bf16 %v2080_v42, %v2079_v34  ;;  %v2035_v52 = vmax.f32 %v2015_v43, 0.0  ;;  %v2016_v53 = vadd.f32 %v14074_v12, %v16529_v46  ;;  %v1936_v54 = vpop.f32.mrb[11].mxu0 }
 0x1b8   : > { %v16585_v56 = vpack.c.bf16 %v2078_v8, %v2077_v41  ;;  %v2033_v57 = vmax.f32 %v2013_v11, 0.0  ;;  %v2014_v58 = vadd.f32 %v16529_v46, %v1936_v54  ;;  %v2119_v59 = vsel %vm1438_vm1, %v2114_v38, %v2118_v45 }
 0x1b9   : > { %v2059_v60 = vmul.f32 %v16536_v50, %v2035_v52  ;;  %v2036_v62 = vmax.f32 %v2016_v53, 0.0  ;;  %14085 = vmatprep.mubr.msk.bf16.mxu1 %vm2193_vm4, %v2119_v59  ;;  %v2132_v0 = vshll.u32 %v16581_v49, 16  ;;  %v2136_v5 = vshrl.u32 %v16581_v49, 16 }
 0x1ba   : > { %v2057_v1 = vmul.f32 %v16536_v50, %v2033_v57  ;;  %v2034_v2 = vmax.f32 %v2014_v58, 0.0  ;;  %v2124_v4 = vshll.u32 %v16585_v56, 16  ;;  %v2128_v9 = vshrl.u32 %v16585_v56, 16 }
 0x1bb   : > { %v2083_v6 = vadd.f32 %v16546_v61, %v2059_v60  ;;  %v2060_v7 = vmul.f32 %v16536_v50, %v2036_v62  ;;  %v2490_v10 = vrot.slane %v16585_v56, 1  ;;  %v2134_v3 = vrot.slane %v2132_v0, 1 }
 0x1bc   : > { %v2058_v13 = vmul.f32 %v16536_v50, %v2034_v2  ;;  %v14077_v14 = vpop.f32.mrb[12].mxu0  ;;  %v2126_v15 = vrot.slane %v2124_v4, 1  ;;  %v2492_v18 = vrot.slane %v16581_v49, 1  ;;  %v2081_v19 = vadd.f32 %v16546_v61, %v2057_v1 }
 0x1bd   : > { %v2084_v22 = vadd.f32 %v16546_v61, %v2060_v7  ;;  %v2019_v23 = vadd.f32 %v14077_v14, %v16529_v46  ;;  %v1949_v25 = vpop.f32.mrb[13].mxu0  ;;  %v16608_v26 = vsel %vm1814_vm3, %v2488_v40, %v2490_v10  ;;  %v2138_v38 = vor.u32 %v2136_v5, %v2134_v3 }
 0x1be   : > { %v2082_v27 = vadd.f32 %v16546_v61, %v2058_v13  ;;  %v2017_v28 = vadd.f32 %v16529_v46, %v1949_v25  ;;  %v14078_v29 = vpop.f32.mrb[14].mxu0  ;;  %v2127_v30 = vsel %vm1438_vm1, %v2122_v63, %v2126_v15  ;;  %v2130_v31 = vor.u32 %v2128_v9, %v2126_v15 }
 0x1bf   : > { %v16613_v32 = vpack.c.bf16 %v2084_v22, %v2083_v6  ;;  %v2039_v34 = vmax.f32 %v2019_v23, 0.0  ;;  %v2020_v35 = vadd.f32 %v14078_v29, %v16529_v46  ;;  %v1952_v36 = vpop.f32.mrb[15].mxu0  ;;  %14086 = vmatmul.mubr.msk.bf16.vlgmr.msra.gmra.mrb[0].mxu1 %vm2193_vm4, %v2127_v30  ;;  %v16618_v39 = vsel %vm1814_vm3, %v2490_v10, %v2492_v18 }
 0x1c0   : > { %v16620_v40 = vpack.c.bf16 %v2082_v27, %v2081_v19  ;;  %v2037_v41 = vmax.f32 %v2017_v28, 0.0  ;;  %v2018_v42 = vadd.f32 %v16529_v46, %v1952_v36  ;;  %v2135_v43 = vsel %vm1438_vm1, %v2130_v31, %v2134_v3  ;;  %14106 = vmatpush3.bf16.msra.mxu1 %v16518_v17 }
 0x1c1   : > { %v2063_v44 = vmul.f32 %v16536_v50, %v2039_v34  ;;  %v2040_v45 = vmax.f32 %v2020_v35, 0.0  ;;  %14089 = vmatprep.mubr.msk.bf16.mxu1 %vm2193_vm4, %v2135_v43  ;;  %v2148_v8 = vshll.u32 %v16613_v32, 16  ;;  %14127 = vmatprep.subr.bf16.mxu1 %v16605_v24  ;;  %v2496_v62 = vrot.slane %v16613_v32, 1 }
 0x1c2   : > { %v2061_v11 = vmul.f32 %v16536_v50, %v2037_v41  ;;  %v2038_v12 = vmax.f32 %v2018_v42, 0.0  ;;  %v2140_v52 = vshll.u32 %v16620_v40, 16  ;;  %v2144_v17 = vshrl.u32 %v16620_v40, 16 }
 0x1c3   : > { %v2087_v53 = vadd.f32 %v16546_v61, %v2063_v44  ;;  %v2064_v54 = vmul.f32 %v16536_v50, %v2040_v45  ;;  %v2494_v55 = vrot.slane %v16620_v40, 1  ;;  %v2150_v60 = vrot.slane %v2148_v8, 1 }
 0x1c4   : > { %v2062_v57 = vmul.f32 %v16536_v50, %v2038_v12  ;;  %v14081_v58 = vpop.f32.mrb[16].mxu0  ;;  %v2142_v59 = vrot.slane %v2140_v52, 1  ;;  %v2085_v63 = vadd.f32 %v16546_v61, %v2061_v11  ;;  %v2152_v29 = vshrl.u32 %v16613_v32, 16 }
 0x1c5   : > { %v2088_v0 = vadd.f32 %v16546_v61, %v2064_v54  ;;  %v2023_v1 = vadd.f32 %v14081_v58, %v16529_v46  ;;  %v1965_v2 = vpop.f32.mrb[17].mxu0  ;;  %v16641_v4 = vsel %vm1814_vm3, %v2492_v18, %v2494_v55  ;;  %v16651_v19 = vsel %vm1814_vm3, %v2494_v55, %v2496_v62 }
 0x1c6   : > { %v2086_v5 = vadd.f32 %v16546_v61, %v2062_v57  ;;  %v2021_v6 = vadd.f32 %v16529_v46, %v1965_v2  ;;  %v14082_v7 = vpop.f32.mrb[18].mxu0  ;;  %v2143_v9 = vsel %vm1438_vm1, %v2138_v38, %v2142_v59  ;;  %v2146_v10 = vor.u32 %v2144_v17, %v2142_v59 }
 0x1c7   : > { %v16646_v13 = vpack.c.bf16 %v2088_v0, %v2087_v53  ;;  %v2043_v14 = vmax.f32 %v2023_v1, 0.0  ;;  %v2024_v15 = vadd.f32 %v14082_v7, %v16529_v46  ;;  %v1968_v3 = vpop.f32.mrb[19].mxu0  ;;  %14090 = vmatmul.mubr.msk.bf16.gmra.mrb[4].mxu1 %vm2193_vm4, %v2143_v9  ;;  %v2154_v41 = vor.u32 %v2152_v29, %v2150_v60 }
 0x1c8   : > { %v2099_v18 = vpack.c.bf16 %v2086_v5, %v2085_v63  ;;  %v2041_v22 = vmax.f32 %v2021_v6, 0.0  ;;  %v2022_v23 = vadd.f32 %v16529_v46, %v1968_v3  ;;  %v2151_v25 = vsel %vm1438_vm1, %v2146_v10, %v2150_v60 }
 0x1c9   : > { %v2067_v27 = vmul.f32 %v16536_v50, %v2043_v14  ;;  %v2044_v28 = vmax.f32 %v2024_v15, 0.0  ;;  %14093 = vmatprep.mubr.msk.bf16.mxu1 %vm2193_vm4, %v2151_v25  ;;  %v2164_v30 = vshll.u32 %v16646_v13, 16  ;;  %v2500_v8 = vrot.slane %v16646_v13, 1 }
 0x1ca   : > { %v2065_v31 = vmul.f32 %v16536_v50, %v2041_v22  ;;  %v2042_v34 = vmax.f32 %v2022_v23, 0.0  ;;  %v2156_v35 = vshll.u32 %v2099_v18, 16  ;;  %v2160_v42 = vshrl.u32 %v2099_v18, 16  ;;  %v2673_v23 = vld [vmem:[%s16232_s13] sm:$0x7] }
 0x1cb   : > { %v2068_v36 = vmul.f32 %v16536_v50, %v2044_v28  ;;  %v2498_v46 = vrot.slane %v2099_v18, 1  ;;  %v2091_v43 = vadd.f32 %v16546_v61, %v2067_v27  ;;  %v2166_v38 = vrot.slane %v2164_v30, 1 }
 0x1cc   : > { %v2066_v44 = vmul.f32 %v16536_v50, %v2042_v34  ;;  %v2158_v45 = vrot.slane %v2156_v35, 1  ;;  %v2089_v11 = vadd.f32 %v16546_v61, %v2065_v31  ;;  %v2168_v59 = vshrl.u32 %v16646_v13, 16 }
 0x1cd   : > { %v2092_v12 = vadd.f32 %v16546_v61, %v2068_v36  ;;  %v2499_v52 = vsel %vm1814_vm3, %v2496_v62, %v2498_v46  ;;  %v2501_v55 = vsel %vm1814_vm3, %v2498_v46, %v2500_v8  ;;  %v16744_v29 = vrot.slane %v2673_v23, %v16525_v37 }
 0x1ce   : > { %v2090_v53 = vadd.f32 %v16546_v61, %v2066_v44  ;;  %v2159_v54 = vsel %vm1438_vm1, %v2154_v41, %v2158_v45  ;;  %v2162_v17 = vor.u32 %v2160_v42, %v2158_v45  ;;  %v2170_v61 = vor.u32 %v2168_v59, %v2166_v38 }
 0x1cf   : > { %v2102_v57 = vpack.c.bf16 %v2092_v12, %v2091_v43  ;;  %14094 = vmatmul.mubr.msk.bf16.gmra.mrb[8].mxu1 %vm2193_vm4, %v2159_v54  ;;  %v16748_v34 = vrot.slane %v2673_v23, %v16532_v47 }
 0x1d0   : > { %v2101_v50 = vpack.c.bf16 %v2090_v53, %v2089_v11  ;;  %v2167_v58 = vsel %vm1438_vm1, %v2162_v17, %v2166_v38  ;;  %v16755_v11 = vrot.slane %v2673_v23, %v16539_v51 }
 0x1d1   : > { %14097 = vmatprep.mubr.msk.bf16.mxu1 %vm2193_vm4, %v2167_v58  ;;  %v2504_v60 = vrot.slane %v2102_v57, 1  ;;  %v2180_v62 = vshll.u32 %v2102_v57, 16  ;;  %v2184_v15 = vshrl.u32 %v2102_v57, 16 }
 0x1d2   : > { %v2172_v63 = vshll.u32 %v2101_v50, 16  ;;  %v2502_v0 = vrot.slane %v2101_v50, 1  ;;  %v2176_v2 = vshrl.u32 %v2101_v50, 16 }
 0x1d3   : > { %v2182_v10 = vrot.slane %v2180_v62, 1 }
 0x1d4   : > { %v2174_v1 = vrot.slane %v2172_v63, 1  ;;  %v2503_v5 = vsel %vm1814_vm3, %v2500_v8, %v2502_v0  ;;  %v2505_v6 = vsel %vm1814_vm3, %v2502_v0, %v2504_v60 }
 0x1d5   : > { %v2186_v3 = vor.u32 %v2184_v15, %v2182_v10 }
 0x1d6   : > { %v2175_v7 = vsel %vm1438_vm1, %v2170_v61, %v2174_v1  ;;  %v2178_v9 = vor.u32 %v2176_v2, %v2174_v1 }
 0x1d7   : > { %14098 = vmatmul.mubr.msk.bf16.gmra.mrb[12].mxu1 %vm2193_vm4, %v2175_v7 }
 0x1d8   : > { %v2183_v14 = vsel %vm1438_vm1, %v2178_v9, %v2182_v10 }
 0x1d9   : > { %14101 = vmatprep.mubr.msk.bf16.mxu1 %vm2193_vm4, %v2183_v14 }
 0x1df   : > { %14102 = vmatmul.mubr.msk.bf16.gmra.mrb[16].mxu1 %vm2193_vm4, %v2186_v3 }
 0x1e0   : > { %14107 = vmatprep.mubr.msk.bf16.mxu1 %vm2193_vm4, %v16560_v21  ;;  %v16717_v21 = vand.u32 127, %v2001_v20 }
 0x1e7   : > { %14108 = vmatmul.mubr.msk.bf16.vlgmr.msra.gmra.mrb[0].mxu1 %vm2193_vm4, %v16557_v16  ;;  %v16066_v16 = vmov 0.0|0.0  }
 0x1e8   : > { %14111 = vmatprep.mubr.msk.bf16.mxu1 %vm2193_vm4, %v16585_v56  ;;  %14128 = vmatpush3.bf16.msra.mxu1 %v16605_v24  ;;  %v16067_v24 = vmov 0.0  }
 0x1e9   : > { %15163 = vmatprep.subr.bf16.mxu0 %v16066_v16  ;;  %15190 = vmatprep.subr.bf16.mxu1 %v16066_v16 }
 0x1ef   : > { %14112 = vmatmul.mubr.msk.bf16.gmra.mrb[4].mxu1 %vm2193_vm4, %v16581_v49  ;;  %v16723_v49 = vadd.s32 128, %v16717_v21 }
 0x1f0   : > { %14115 = vmatprep.mubr.msk.bf16.mxu1 %vm2193_vm4, %v16620_v40 }
 0x1f7   : > { %14116 = vmatmul.mubr.msk.bf16.gmra.mrb[8].mxu1 %vm2193_vm4, %v16613_v32 }
 0x1f8   : > { %14119 = vmatprep.mubr.msk.bf16.mxu1 %vm2193_vm4, %v2099_v18 }
 0x1ff   : > { %14120 = vmatmul.mubr.msk.bf16.gmra.mrb[12].mxu1 %vm2193_vm4, %v16646_v13 }
 0x200   : > { %14123 = vmatprep.mubr.msk.bf16.mxu1 %vm2193_vm4, %v2101_v50 }
 0x207   : > { %14124 = vmatmul.mubr.msk.bf16.gmra.mrb[20].mxu1 %vm2193_vm4, %v2102_v57 }
 0x208   : > { %14129 = vmatprep.mubr.msk.bf16.mxu1 %vm2193_vm4, %v16579_v48  ;;  %v16720_v48 = vmul.u32 2, %v16522_v33 }
 0x20a   : > { %v16726_v56 = vadd.s32 1, %v16720_v48  ;;  %vm2787_vm6 = vcmp.eq.s32.totalorder %v16723_v49, %v16720_v48  ;;  %vm2786_vm10 = vcmp.eq.s32.totalorder %v16717_v21, %v16720_v48 }
 0x20b   : > { %v12361_v20 = vsel %vm2787_vm6, 1.0, %v16067_v24 }
 0x20c   : > { %vm2857_vm7 = vcmp.eq.s32.totalorder %v16723_v49, %v16726_v56  ;;  %12400 = vmatprep.mubr.msk.f32.mxu0 %vm2916_vm5, %v12361_v20  ;;  %vm2856_vm11 = vcmp.eq.s32.totalorder %v16717_v21, %v16726_v56 }
 0x20f   : > { %14130 = vmatmul.mubr.msk.bf16.vlgmr.msra.gmra.mrb[0].mxu1 %vm2193_vm4, %v16608_v26  ;;  %v12381_v26 = vsel %vm2857_vm7, 1.0, %v16067_v24 }
 0x210   : > { %14133 = vmatprep.mubr.msk.bf16.mxu1 %vm2193_vm4, %v16618_v39 }
 0x217   : > { %14134 = vmatmul.mubr.msk.bf16.gmra.mrb[4].mxu1 %vm2193_vm4, %v16641_v4 }
 0x218   : > { %14137 = vmatprep.mubr.msk.bf16.mxu1 %vm2193_vm4, %v16651_v19 }
 0x21f   : > { %14138 = vmatmul.mubr.msk.bf16.gmra.mrb[8].mxu1 %vm2193_vm4, %v2499_v52 }
 0x220   : > { %14141 = vmatprep.mubr.msk.bf16.mxu1 %vm2193_vm4, %v2501_v55 }
 0x227   : > { %14142 = vmatmul.mubr.msk.bf16.gmra.mrb[12].mxu1 %vm2193_vm4, %v2503_v5 }
 0x228   : > { %14145 = vmatprep.mubr.msk.bf16.mxu1 %vm2193_vm4, %v2505_v6 }
 0x22f   : > { %14146 = vmatmul.mubr.msk.bf16.gmra.mrb[24].mxu1 %vm2193_vm4, %v2504_v60 }
 0x230   : > { %12420 = vmatprep.mubr.msk.f32.mxu1 %vm2916_vm5, %v12381_v26 }
 0x2b2   : > { %v14103_v32 = vpop.f32.mrb[16].mxu1 }
 0x2b3   : > { %v2322_v39 = vpop.f32.mrb[17].mxu1 }
 0x2b4   : > { %v14104_v40 = vpop.f32.mrb[18].mxu1 }
 0x2b5   : > { %v2325_v4 = vpop.f32.mrb[19].mxu1 }
 0x2da   : > { %v14125_v13 = vpop.f32.mrb[20].mxu1 }
 0x2db   : > { %v2460_v19 = vpop.f32.mrb[21].mxu1  ;;  %v16736_v18 = vadd.f32 %v14125_v13, %v14103_v32 }
 0x2dc   : > { %v14126_v22 = vpop.f32.mrb[22].mxu1  ;;  %v16739_v25 = vadd.f32 %v2460_v19, %v2322_v39 }
 0x2dd   : > { %v2463_v27 = vpop.f32.mrb[23].mxu1 }
 0x2de   : > { %v16741_v28 = vadd.f32 %v2463_v27, %v2325_v4 }
 0x2e2   : > { %v14131_v30 = vpop.f32.mrb[0].mxu1 }
 0x2e3   : > { %v2680_v31 = vadd.f32 %v14131_v30, %v16744_v29  ;;  %v2576_v35 = vpop.f32.mrb[1].mxu1 }
 0x2e4   : > { %v2678_v36 = vadd.f32 %v16744_v29, %v2576_v35  ;;  %v14132_v41 = vpop.f32.mrb[2].mxu1 }
 0x2e5   : > { %v2699_v42 = vmax.f32 %v2680_v31, 0.0  ;;  %v2681_v46 = vadd.f32 %v14132_v41, %v16744_v29  ;;  %v2579_v43 = vpop.f32.mrb[3].mxu1 }
 0x2e6   : > { %v2697_v44 = vmax.f32 %v2678_v36, 0.0  ;;  %v2679_v45 = vadd.f32 %v16744_v29, %v2579_v43 }
 0x2e7   : > { %v2722_v8 = vmul.f32 %v16748_v34, %v2699_v42  ;;  %v2700_v12 = vmax.f32 %v2681_v46, 0.0 }
 0x2e8   : > { %v2720_v38 = vmul.f32 %v16748_v34, %v2697_v44  ;;  %v2698_v52 = vmax.f32 %v2679_v45, 0.0 }
 0x2e9   : > { %v2723_v53 = vmul.f32 %v16748_v34, %v2700_v12  ;;  %v2745_v55 = vadd.f32 %v16755_v11, %v2722_v8 }
 0x2ea   : > { %v2721_v54 = vmul.f32 %v16748_v34, %v2698_v52  ;;  %v14135_v17 = vpop.f32.mrb[4].mxu1  ;;  %v2743_v59 = vadd.f32 %v16755_v11, %v2720_v38 }
 0x2eb   : > { %v2746_v57 = vadd.f32 %v16755_v11, %v2723_v53  ;;  %v2684_v50 = vadd.f32 %v14135_v17, %v16744_v29  ;;  %v2592_v58 = vpop.f32.mrb[5].mxu1 }
 0x2ec   : > { %v2744_v60 = vadd.f32 %v16755_v11, %v2721_v54  ;;  %v2682_v63 = vadd.f32 %v16744_v29, %v2592_v58  ;;  %v14136_v62 = vpop.f32.mrb[6].mxu1 }
 0x2ed   : > { %v15167_v0 = vpack.c.bf16 %v2746_v57, %v2745_v55  ;;  %v2703_v61 = vmax.f32 %v2684_v50, 0.0  ;;  %v2685_v1 = vadd.f32 %v14136_v62, %v16744_v29  ;;  %v2595_v2 = vpop.f32.mrb[7].mxu1 }
 0x2ee   : > { %v16767_v5 = vpack.c.bf16 %v2744_v60, %v2743_v59  ;;  %v2701_v6 = vmax.f32 %v2682_v63, 0.0  ;;  %v2683_v7 = vadd.f32 %v16744_v29, %v2595_v2 }
 0x2ef   : > { %v2726_v9 = vmul.f32 %v16748_v34, %v2703_v61  ;;  %v2704_v10 = vmax.f32 %v2685_v1, 0.0 }
 0x2f0   : > { %15165 = vmatpush1.bf16.msra.mxu0 %v16767_v5  ;;  %15192 = vmatpush1.bf16.msra.mxu1 %v16767_v5  ;;  %v2724_v14 = vmul.f32 %v16748_v34, %v2701_v6  ;;  %v2702_v3 = vmax.f32 %v2683_v7, 0.0 }
 0x2f1   : > { %v2727_v15 = vmul.f32 %v16748_v34, %v2704_v10  ;;  %15166 = vmatprep.subr.bf16.mxu0 %v16066_v16  ;;  %15193 = vmatprep.subr.bf16.mxu1 %v16066_v16  ;;  %v2749_v26 = vadd.f32 %v16755_v11, %v2726_v9 }
 0x2f2   : > { %v14139_v20 = vpop.f32.mrb[8].mxu1  ;;  %v2725_v39 = vmul.f32 %v16748_v34, %v2702_v3  ;;  %v2747_v13 = vadd.f32 %v16755_v11, %v2724_v14 }
 0x2f3   : > { %v2750_v32 = vadd.f32 %v16755_v11, %v2727_v15  ;;  %v2688_v40 = vadd.f32 %v14139_v20, %v16744_v29  ;;  %v2608_v4 = vpop.f32.mrb[9].mxu1 }
 0x2f4   : > { %v2686_v19 = vadd.f32 %v16744_v29, %v2608_v4  ;;  %v14140_v22 = vpop.f32.mrb[10].mxu1  ;;  %15168 = vmatpush1.bf16.msra.mxu0 %v15167_v0  ;;  %15195 = vmatpush1.bf16.msra.mxu1 %v15167_v0  ;;  %v2748_v27 = vadd.f32 %v16755_v11, %v2725_v39 }
 0x2f5   : > { %v15173_v23 = vpack.c.bf16 %v2750_v32, %v2749_v26  ;;  %v2707_v30 = vmax.f32 %v2688_v40, 0.0  ;;  %v2689_v31 = vadd.f32 %v14140_v22, %v16744_v29  ;;  %v2611_v35 = vpop.f32.mrb[11].mxu1  ;;  %15169 = vmatprep.subr.bf16.mxu0 %v16066_v16  ;;  %15196 = vmatprep.subr.bf16.mxu1 %v16066_v16 }
 0x2f6   : > { %v2705_v36 = vmax.f32 %v2686_v19, 0.0  ;;  %v2687_v41 = vadd.f32 %v16744_v29, %v2611_v35  ;;  %v15170_v42 = vpack.c.bf16 %v2748_v27, %v2747_v13 }
 0x2f7   : > { %v2730_v46 = vmul.f32 %v16748_v34, %v2707_v30  ;;  %v2708_v43 = vmax.f32 %v2689_v31, 0.0 }
 0x2f8   : > { %v2728_v44 = vmul.f32 %v16748_v34, %v2705_v36  ;;  %v2706_v45 = vmax.f32 %v2687_v41, 0.0  ;;  %15171 = vmatpush1.bf16.msra.mxu0 %v15170_v42  ;;  %15198 = vmatpush1.bf16.msra.mxu1 %v15170_v42 }
 0x2f9   : > { %v2731_v8 = vmul.f32 %v16748_v34, %v2708_v43  ;;  %15172 = vmatprep.subr.bf16.mxu0 %v16066_v16  ;;  %15199 = vmatprep.subr.bf16.mxu1 %v16066_v16  ;;  %v2753_v52 = vadd.f32 %v16755_v11, %v2730_v46 }
 0x2fa   : > { %v2729_v12 = vmul.f32 %v16748_v34, %v2706_v45  ;;  %v14143_v38 = vpop.f32.mrb[12].mxu1  ;;  %v2751_v55 = vadd.f32 %v16755_v11, %v2728_v44 }
 0x2fb   : > { %v2754_v53 = vadd.f32 %v16755_v11, %v2731_v8  ;;  %v2692_v54 = vadd.f32 %v14143_v38, %v16744_v29  ;;  %v2624_v17 = vpop.f32.mrb[13].mxu1 }
 0x2fc   : > { %v2752_v57 = vadd.f32 %v16755_v11, %v2729_v12  ;;  %v2690_v50 = vadd.f32 %v16744_v29, %v2624_v17  ;;  %v14144_v58 = vpop.f32.mrb[14].mxu1  ;;  %15174 = vmatpush1.bf16.msra.mxu0 %v15173_v23  ;;  %15201 = vmatpush1.bf16.msra.mxu1 %v15173_v23  ;;  %v2764_v23 = vadd.s32 8, %v16522_v33  ;;  %v2766_v12 = vadd.s32 24, %v16522_v33 }
 0x2fd   : > { %v15179_v59 = vpack.c.bf16 %v2754_v53, %v2753_v52  ;;  %v2711_v60 = vmax.f32 %v2692_v54, 0.0  ;;  %v2693_v63 = vadd.f32 %v14144_v58, %v16744_v29  ;;  %v2627_v62 = vpop.f32.mrb[15].mxu1  ;;  %15175 = vmatprep.subr.bf16.mxu0 %v16066_v16  ;;  %15202 = vmatprep.subr.bf16.mxu1 %v16066_v16  ;;  %v2767_v17 = vadd.s32 32, %v16522_v33 }
 0x2fe   : > { %v15176_v0 = vpack.c.bf16 %v2752_v57, %v2751_v55  ;;  %v2709_v61 = vmax.f32 %v2690_v50, 0.0  ;;  %v2691_v1 = vadd.f32 %v16744_v29, %v2627_v62  ;;  %v16823_v36 = vmul.u32 2, %v2764_v23 }
 0x2ff   : > { %v2734_v2 = vmul.f32 %v16748_v34, %v2711_v60  ;;  %v2712_v6 = vmax.f32 %v2693_v63, 0.0  ;;  %v16848_v54 = vmul.u32 2, %v2766_v12  ;;  %v16867_v50 = vmul.u32 2, %v2767_v17 }
 0x300   : > { %v2732_v7 = vmul.f32 %v16748_v34, %v2709_v61  ;;  %v2710_v9 = vmax.f32 %v2691_v1, 0.0  ;;  %15177 = vmatpush1.bf16.msra.mxu0 %v15176_v0  ;;  %15204 = vmatpush1.bf16.msra.mxu1 %v15176_v0  ;;  %vm2789_vm8 = vcmp.eq.s32.totalorder %v16723_v49, %v16823_v36  ;;  %v2768_v58 = vadd.s32 40, %v16522_v33 }
 0x301   : > { %v2735_v10 = vmul.f32 %v16748_v34, %v2712_v6  ;;  %15178 = vmatprep.subr.bf16.mxu0 %v16066_v16  ;;  %15205 = vmatprep.subr.bf16.mxu1 %v16066_v16  ;;  %v2757_v3 = vadd.f32 %v16755_v11, %v2734_v2  ;;  %v12363_v55 = vsel %vm2789_vm8, 1.0, %v16067_v24  ;;  %v16068_v60 = vmov 1.0  }
 0x302   : > { %v2733_v14 = vmul.f32 %v16748_v34, %v2710_v9  ;;  %v14147_v15 = vpop.f32.mrb[24].mxu1  ;;  %v2755_v39 = vadd.f32 %v16755_v11, %v2732_v7  ;;  %vm2788_vm14 = vcmp.eq.s32.totalorder %v16717_v21, %v16823_v36  ;;  %vm2793_vm2 = vcmp.eq.s32.totalorder %v16723_v49, %v16848_v54 }
 0x303   : > { %v2758_v20 = vadd.f32 %v16755_v11, %v2735_v10  ;;  %v2672_v26 = vadd.f32 %v14147_v15, %v16736_v18  ;;  %v2640_v32 = vpop.f32.mrb[25].mxu1  ;;  %v16894_v0 = vadd.s32 1, %v16867_v50  ;;  %v2781_v61 = vmul.u32 2, %v2768_v58 }
 0x304   : > { %v2756_v40 = vadd.f32 %v16755_v11, %v2733_v14  ;;  %v2670_v4 = vadd.f32 %v2640_v32, %v16739_v25  ;;  %v14148_v13 = vpop.f32.mrb[26].mxu1  ;;  %15180 = vmatpush1.bf16.msra.mxu0 %v15179_v59  ;;  %15207 = vmatpush1.bf16.msra.mxu1 %v15179_v59  ;;  %v15445_v59 = vld [vmem:[%s16237_s12 + $0x8] sm:$0xff]   ;;  %v2769_v1 = vadd.s32 48, %v16522_v33  ;;  %v12367_v2 = vsel %vm2793_vm2, 1.0, %v16067_v24 }
 0x305   : > { %v15185_v19 = vpack.c.bf16 %v2758_v20, %v2757_v3  ;;  %v2643_v22 = vpop.f32.mrb[27].mxu1  ;;  %15181 = vmatprep.subr.bf16.mxu0 %v16066_v16  ;;  %15208 = vmatprep.subr.bf16.mxu1 %v16066_v16  ;;  %v2696_v18 = vadd.f32 %v16744_v29, %v2672_v26  ;;  %v2851_v7 = vadd.s32 1, %v2781_v61  ;;  %v2770_v10 = vadd.s32 56, %v16522_v33 }
 0x306   : > { %v15182_v27 = vpack.c.bf16 %v2756_v40, %v2755_v39  ;;  %v2694_v30 = vadd.f32 %v16744_v29, %v2670_v4  ;;  %v2671_v31 = vadd.f32 %v2643_v22, %v16741_v28  ;;  %v2765_v28 = vadd.s32 16, %v16522_v33 }
 0x307   : > { %v2715_v46 = vmax.f32 %v2696_v18, 0.0  ;;  %v2782_v9 = vmul.u32 2, %v2769_v1  ;;  %vm2867_vm0 = vcmp.eq.s32.totalorder %v16723_v49, %v2851_v7  ;;  %v2783_v20 = vmul.u32 2, %v2770_v10 }
 0x308   : > { %v2713_v35 = vmax.f32 %v2694_v30, 0.0  ;;  %v2695_v25 = vadd.f32 %v16744_v29, %v2671_v31  ;;  %15183 = vmatpush1.bf16.msra.mxu0 %v15182_v27  ;;  %15210 = vmatpush1.bf16.msra.mxu1 %v15182_v27  ;;  %v16831_v29 = vadd.s32 1, %v16823_v36  ;;  %v16837_v8 = vmul.u32 2, %v2765_v28 }
 0x309   : > { %15184 = vmatprep.subr.bf16.mxu0 %v16066_v16  ;;  %15211 = vmatprep.subr.bf16.mxu1 %v16066_v16  ;;  %v2738_v38 = vmul.f32 %v16748_v34, %v2715_v46  ;;  %v2852_v3 = vadd.s32 1, %v2782_v9  ;;  %v2771_v26 = vadd.s32 64, %v16522_v33  ;;  %v12391_v39 = vsel %vm2867_vm0, 1.0, %v16067_v24 }
 0x30a   : > { %v2736_v41 = vmul.f32 %v16748_v34, %v2713_v35  ;;  %v2714_v42 = vmax.f32 %v2695_v25, 0.0  ;;  %vm2859_vm9 = vcmp.eq.s32.totalorder %v16723_v49, %v16831_v29  ;;  %v16846_v53 = vadd.s32 1, %v16837_v8 }
 0x30b   : > { %v12383_v57 = vsel %vm2859_vm9, 1.0, %v16067_v24  ;;  %vm2791_vm12 = vcmp.eq.s32.totalorder %v16723_v49, %v16837_v8  ;;  %vm2858_vm15 = vcmp.eq.s32.totalorder %v16717_v21, %v16831_v29  ;;  %vm18473_vm7 = vcmp.eq.s32.totalorder %v16717_v21, %v16837_v8 }
 0x30c   : > { %v2737_v43 = vmul.f32 %v16748_v34, %v2714_v42  ;;  %15186 = vmatpush1.bf16.msra.mxu0 %v15185_v19  ;;  %15213 = vmatpush1.bf16.msra.mxu1 %v15185_v19  ;;  %v2759_v44 = vadd.f32 %v16755_v11, %v2736_v41  ;;  %v2761_v34 = vadd.f32 %v16755_v11, %v2738_v38  ;;  %v12365_v63 = vsel %vm2791_vm12, 1.0, %v16067_v24 }
 0x30d   : > { %15187 = vmatprep.subr.bf16.mxu0 %v16066_v16  ;;  %15214 = vmatprep.subr.bf16.mxu1 %v16066_v16  ;;  %vm2861_vm13 = vcmp.eq.s32.totalorder %v16723_v49, %v16846_v53  ;;  %vm18469_vm8 = vcmp.eq.s32.totalorder %v16717_v21, %v16846_v53  ;;  %vm2795_vm9 = vcmp.eq.s32.totalorder %v16723_v49, %v16867_v50  ;;  %v2853_v40 = vadd.s32 1, %v2783_v20 }
 0x30e   : > { %v2760_v45 = vadd.f32 %v16755_v11, %v2737_v43  ;;  %v16865_v11 = vadd.s32 1, %v16848_v54  ;;  %v12385_v62 = vsel %vm2861_vm13, 1.0, %v16067_v24  ;;  %vm2865_vm12 = vcmp.eq.s32.totalorder %v16723_v49, %v16894_v0 }
 0x30f   : > { %vm18468_vm13 = vcmp.eq.s32.totalorder %v16717_v21, %v16848_v54  ;;  %v12369_v14 = vsel %vm2795_vm9, 1.0, %v16067_v24  ;;  %v12389_v15 = vsel %vm2865_vm12, 1.0, %v16067_v24  ;;  %vm18471_vm9 = vcmp.eq.s32.totalorder %v16717_v21, %v16867_v50 }
 0x310   : > { %v15188_v52 = vpack.c.bf16 %v2760_v45, %v2759_v44  ;;  %vm2863_vm6 = vcmp.eq.s32.totalorder %v16723_v49, %v16865_v11  ;;  %vm18470_vm2 = vcmp.eq.s32.totalorder %v16717_v21, %v16865_v11  ;;  %vm18472_vm12 = vcmp.eq.s32.totalorder %v16717_v21, %v16894_v0 }
 0x311   : > { %v12387_v6 = vsel %vm2863_vm6, 1.0, %v16067_v24  ;;  %vm2797_vm6 = vcmp.eq.s32.totalorder %v16723_v49, %v2781_v61  ;;  %v2784_v4 = vmul.u32 2, %v2771_v26  ;;  %v2772_v13 = vadd.s32 72, %v16522_v33 }
 0x312   : > { %15189 = vmatpush1.bf16.msra.mxu0 %v15188_v52  ;;  %15216 = vmatpush1.bf16.msra.mxu1 %v15188_v52  ;;  %v12371_v32 = vsel %vm2797_vm6, 1.0, %v16067_v24  ;;  %vm2796_vm0 = vcmp.eq.s32.totalorder %v16717_v21, %v2781_v61  ;;  %vm2866_vm6 = vcmp.eq.s32.totalorder %v16717_v21, %v2851_v7  ;;  %v17275_v48 = vsel %vm2788_vm14, 1.0, %v16067_v24 }
 0x313   : > { %2983 = vmatprep.subr.mxu0 %v16067_v24  ;;  %3128 = vmatprep.subr.mxu1 %v16067_v24  ;;  %v2854_v23 = vadd.s32 1, %v2784_v4  ;;  %v2785_v27 = vmul.u32 2, %v2772_v13  ;;  %v17281_v56 = vsel %vm2858_vm15, 1.0, %v16067_v24 }
 0x315   : > { %v2855_v18 = vadd.s32 1, %v2785_v27 }
 0x316   : > { %2984 = vmatpush1.msra.mxu0 %v2761_v34  ;;  %3129 = vmatpush1.msra.mxu1 %v2761_v34 }
 0x317   : > { %12401 = vmatmul.mubr.msk.f32.vlgmr.msra.gmra.mrb[20].mxu0 %vm2786_vm10, %v16068_v60  ;;  %12421 = vmatmul.mubr.msk.f32.vlgmr.msra.gmra.mrb[28].mxu1 %vm2856_vm11, %v16068_v60 }
 0x318   : > { %12402 = vmatprep.mubr.msk.f32.mxu0 %vm2916_vm5, %v12363_v55  ;;  %12422 = vmatprep.mubr.msk.f32.mxu1 %vm2916_vm5, %v12383_v57 }
 0x319   : > { %14149 = vmatprep.subr.bf16.mxu0 %v16067_v24  ;;  %14171 = vmatprep.subr.bf16.mxu1 %v16067_v24 }
 0x31a   : > { %14150 = vmatpush3.bf16.msra.mxu0 %v15445_v59 }
 0x31b   : > { %12403 = vmatmul.mubr.msk.f32.gmra.mrb[22].mxu0 %vm2788_vm14, %v16068_v60  ;;  %12423 = vmatmul.mubr.msk.f32.gmra.mrb[30].mxu1 %vm2858_vm15, %v16068_v60  ;;  %vm18534_vm14 = vcmp.eq.s32.totalorder %v16717_v21, %v16848_v54  ;;  %vm18535_vm15 = vcmp.eq.s32.totalorder %v16717_v21, %v16865_v11 }
 0x31c   : > { %12404 = vmatprep.mubr.msk.f32.mxu0 %vm2916_vm5, %v12365_v63  ;;  %12424 = vmatprep.mubr.msk.f32.mxu1 %vm2916_vm5, %v12385_v62 }
 0x31d   : > { %14193 = vmatprep.subr.bf16.mxu0 %v16067_v24 }
 0x31f   : > { %12405 = vmatmul.mubr.msk.f32.gmra.mrb[24].mxu0 %vm18473_vm7, %v16068_v60  ;;  %12425 = vmatmul.mubr.msk.f32.gmra.mrb[32].mxu1 %vm18469_vm8, %v16068_v60  ;;  %vm2869_vm8 = vcmp.eq.s32.totalorder %v16723_v49, %v2852_v3  ;;  %vm2873_vm7 = vcmp.eq.s32.totalorder %v16723_v49, %v2854_v23 }
 0x320   : > { %12406 = vmatprep.mubr.msk.f32.mxu0 %vm2916_vm5, %v12367_v2  ;;  %12426 = vmatprep.mubr.msk.f32.mxu1 %vm2916_vm5, %v12387_v6  ;;  %v12393_v22 = vsel %vm2869_vm8, 1.0, %v16067_v24  ;;  %vm2803_vm8 = vcmp.eq.s32.totalorder %v16723_v49, %v2784_v4  ;;  %v12397_v25 = vsel %vm2873_vm7, 1.0, %v16067_v24  ;;  %vm2804_vm7 = vcmp.eq.s32.totalorder %v16717_v21, %v2785_v27 }
 0x321   : > { %v12377_v35 = vsel %vm2803_vm8, 1.0, %v16067_v24  ;;  %vm2874_vm8 = vcmp.eq.s32.totalorder %v16717_v21, %v2855_v18 }
 0x323   : > { %12407 = vmatmul.mubr.msk.f32.gmra.mrb[26].mxu0 %vm18468_vm13, %v16068_v60  ;;  %12427 = vmatmul.mubr.msk.f32.gmra.mrb[34].mxu1 %vm18470_vm2, %v16068_v60  ;;  %vm2799_vm13 = vcmp.eq.s32.totalorder %v16723_v49, %v2782_v9  ;;  %vm2801_vm2 = vcmp.eq.s32.totalorder %v16723_v49, %v2783_v20 }
 0x324   : > { %12408 = vmatprep.mubr.msk.f32.mxu0 %vm2916_vm5, %v12369_v14  ;;  %12428 = vmatprep.mubr.msk.f32.mxu1 %vm2916_vm5, %v12389_v15  ;;  %v12373_v19 = vsel %vm2799_vm13, 1.0, %v16067_v24  ;;  %vm2868_vm13 = vcmp.eq.s32.totalorder %v16717_v21, %v2852_v3  ;;  %v12375_v30 = vsel %vm2801_vm2, 1.0, %v16067_v24  ;;  %vm2805_vm2 = vcmp.eq.s32.totalorder %v16723_v49, %v2785_v27 }
 0x325   : > { %v12379_v41 = vsel %vm2805_vm2, 1.0, %v16067_v24  ;;  %vm18536_vm2 = vcmp.eq.s32.totalorder %v16717_v21, %v16867_v50  ;;  %v15455_v50 = vld [vmem:[%s16257_s19 + $0x8] sm:$0xff]  }
 0x326   : > { %v12368_v54 = vsel %vm18536_vm2, 1.0, %v16067_v24 }
 0x327   : > { %12409 = vmatmul.mubr.msk.f32.gmra.mrb[28].mxu0 %vm18471_vm9, %v16068_v60  ;;  %12429 = vmatmul.mubr.msk.f32.gmra.mrb[36].mxu1 %vm18472_vm12, %v16068_v60  ;;  %vm2871_vm9 = vcmp.eq.s32.totalorder %v16723_v49, %v2853_v40  ;;  %vm2798_vm12 = vcmp.eq.s32.totalorder %v16717_v21, %v2782_v9 }
 0x328   : > { %12410 = vmatprep.mubr.msk.f32.mxu0 %vm2916_vm5, %v12371_v32  ;;  %12430 = vmatprep.mubr.msk.f32.mxu1 %vm2916_vm5, %v12391_v39  ;;  %v12395_v31 = vsel %vm2871_vm9, 1.0, %v16067_v24  ;;  %vm2875_vm9 = vcmp.eq.s32.totalorder %v16723_v49, %v2855_v18  ;;  %v15446_v49 = vld [vmem:[%s16237_s12] sm:$0xff]  }
 0x329   : > { %v12399_v42 = vsel %vm2875_vm9, 1.0, %v16067_v24  ;;  %14172 = vmatpush3.bf16.msra.mxu1 %v15446_v49  ;;  %vm18537_vm9 = vcmp.eq.s32.totalorder %v16717_v21, %v16894_v0  ;;  %v15457_v0 = vld [vmem:[%s16257_s19 + $0x18] sm:$0xff]  }
 0x32a   : > { %14215 = vmatprep.subr.bf16.mxu1 %v16067_v24  ;;  %v12388_v11 = vsel %vm18537_vm9, 1.0, %v16067_v24 }
 0x32b   : > { %12411 = vmatmul.mubr.msk.f32.gmra.mrb[30].mxu0 %vm2796_vm0, %v16068_v60  ;;  %12431 = vmatmul.mubr.msk.f32.gmra.mrb[38].mxu1 %vm2866_vm6, %v16068_v60  ;;  %vm2800_vm0 = vcmp.eq.s32.totalorder %v16717_v21, %v2783_v20  ;;  %vm2870_vm6 = vcmp.eq.s32.totalorder %v16717_v21, %v2853_v40 }
 0x32c   : > { %12412 = vmatprep.mubr.msk.f32.mxu0 %vm2916_vm5, %v12373_v19  ;;  %12432 = vmatprep.mubr.msk.f32.mxu1 %vm2916_vm5, %v12393_v22  ;;  %v15447_v22 = vld [vmem:[%s16237_s12 + $0x10] sm:$0xff]  }
 0x32f   : > { %12413 = vmatmul.mubr.msk.f32.gmra.mrb[32].mxu0 %vm2798_vm12, %v16068_v60  ;;  %12433 = vmatmul.mubr.msk.f32.gmra.mrb[40].mxu1 %vm2868_vm13, %v16068_v60  ;;  %vm2802_vm12 = vcmp.eq.s32.totalorder %v16717_v21, %v2784_v4  ;;  %vm2872_vm13 = vcmp.eq.s32.totalorder %v16717_v21, %v2854_v23 }
 0x330   : > { %12414 = vmatprep.mubr.msk.f32.mxu0 %vm2916_vm5, %v12375_v30  ;;  %12434 = vmatprep.mubr.msk.f32.mxu1 %vm2916_vm5, %v12395_v31 }
 0x333   : > { %12415 = vmatmul.mubr.msk.f32.gmra.mrb[34].mxu0 %vm2800_vm0, %v16068_v60  ;;  %12435 = vmatmul.mubr.msk.f32.gmra.mrb[42].mxu1 %vm2870_vm6, %v16068_v60  ;;  %vm16069_vm0 = vmmov 0   ;;  %vm4046_vm6 = vcmask 588800  }
 0x334   : > { %12416 = vmatprep.mubr.msk.f32.mxu0 %vm2916_vm5, %v12377_v35  ;;  %12436 = vmatprep.mubr.msk.f32.mxu1 %vm2916_vm5, %v12397_v25 }
 0x337   : > { %12417 = vmatmul.mubr.msk.f32.gmra.mrb[36].mxu0 %vm2802_vm12, %v16068_v60  ;;  %12437 = vmatmul.mubr.msk.f32.gmra.mrb[44].mxu1 %vm2872_vm13, %v16068_v60  ;;  %vm4640_vm12 = vcmask 523264  }
 0x338   : > { %12418 = vmatprep.mubr.msk.f32.mxu0 %vm2916_vm5, %v12379_v41  ;;  %12438 = vmatprep.mubr.msk.f32.mxu1 %vm2916_vm5, %v12399_v42  ;;  %vm3688_vm5 = vcmask 261120  }
 0x33b   : > { %12419 = vmatmul.mubr.msk.f32.gmra.mrb[38].mxu0 %vm2804_vm7, %v16068_v60  ;;  %12439 = vmatmul.mubr.msk.f32.gmra.mrb[46].mxu1 %vm2874_vm8, %v16068_v60  ;;  %vm5676_vm7 = vcmask 97280  }
 0x33c   : > { %14173 = vmatprep.mubr.msk.bf16.mxu1 %vm16069_vm0, %v16067_v24  ;;  %14151 = vmatprep.mubr.msk.bf16.mxu0 %vm16069_vm0, %v16067_v24 }
 0x3ea   : > { %v3013_v28 = vpop.f32.mrb[20].mxu0  ;;  %v3158_v46 = vpop.f32.mrb[28].mxu1 }
 0x3eb   : > { %v3207_v43 = vmax.f32 %v3013_v28, %v3158_v46  ;;  %v3015_v44 = vpop.f32.mrb[21].mxu0  ;;  %v3160_v45 = vpop.f32.mrb[29].mxu1 }
 0x3ee   : > { %v3018_v12 = vpop.f32.mrb[22].mxu0  ;;  %v3163_v38 = vpop.f32.mrb[30].mxu1 }
 0x3ef   : > { %v3208_v52 = vmax.f32 %v3018_v12, %v3163_v38  ;;  %v3020_v17 = vpop.f32.mrb[23].mxu0  ;;  %v3165_v34 = vpop.f32.mrb[31].mxu1 }
 0x3f1   : > { %v3217_v55 = vpack.c.bf16 %v3208_v52, %v3207_v43 }
 0x3f2   : > { %v3023_v57 = vpop.f32.mrb[24].mxu0  ;;  %v3168_v58 = vpop.f32.mrb[32].mxu1 }
 0x3f3   : > { %v3209_v59 = vmax.f32 %v3023_v57, %v3168_v58  ;;  %v3025_v60 = vpop.f32.mrb[25].mxu0  ;;  %v3170_v63 = vpop.f32.mrb[33].mxu1  ;;  %14174 = vmatmul.mubr.msk.bf16.vlgmr.msra.gmra.mrb[48].mxu1 %vm2193_vm4, %v3217_v55  ;;  %v3230_v62 = vshll.u32 %v3217_v55, 16  ;;  %v3228_v14 = vshrl.u32 %v3217_v55, 16  ;;  %v3457_v20 = vrot.slane %v3217_v55, 1 }
 0x3f4   : > { %14177 = vmatprep.mubr.msk.bf16.mxu1 %vm16069_vm0, %v16067_v24 }
 0x3f5   : > { %v3232_v9 = vrot.slane %v3230_v62, 1 }
 0x3f6   : > { %v3028_v61 = vpop.f32.mrb[26].mxu0  ;;  %v3173_v1 = vpop.f32.mrb[34].mxu1 }
 0x3f7   : > { %v3210_v2 = vmax.f32 %v3028_v61, %v3173_v1  ;;  %v3030_v6 = vpop.f32.mrb[27].mxu0  ;;  %v3175_v7 = vpop.f32.mrb[35].mxu1  ;;  %v3233_v13 = vor.u32 %v3232_v9, %v3228_v14 }
 0x3f9   : > { %v3218_v10 = vpack.c.bf16 %v3210_v2, %v3209_v59 }
 0x3fa   : > { %v3033_v15 = vpop.f32.mrb[28].mxu0  ;;  %v3178_v3 = vpop.f32.mrb[36].mxu1 }
 0x3fb   : > { %v3235_v26 = vshll.u32 %v3218_v10, 16  ;;  %v3458_v32 = vrot.slane %v3218_v10, 1  ;;  %v3211_v39 = vmax.f32 %v3033_v15, %v3178_v3  ;;  %v3035_v40 = vpop.f32.mrb[29].mxu0  ;;  %v3180_v4 = vpop.f32.mrb[37].mxu1  ;;  %14178 = vmatmul.mubr.msk.bf16.gmra.mrb[52].mxu1 %vm2193_vm4, %v3218_v10  ;;  %v3239_v44 = vshrl.u32 %v3218_v10, 16 }
 0x3fc   : > { %14181 = vmatprep.mubr.msk.bf16.mxu1 %vm16069_vm0, %v16067_v24 }
 0x3fd   : > { %v3237_v19 = vrot.slane %v3235_v26, 1  ;;  %v17023_v23 = vsel %vm1814_vm3, %v3457_v20, %v3458_v32 }
 0x3fe   : > { %v3038_v27 = vpop.f32.mrb[30].mxu0  ;;  %v3183_v30 = vpop.f32.mrb[38].mxu1 }
 0x3ff   : > { %v3212_v31 = vmax.f32 %v3038_v27, %v3183_v30  ;;  %v3040_v18 = vpop.f32.mrb[31].mxu0  ;;  %v3185_v35 = vpop.f32.mrb[39].mxu1  ;;  %v3238_v25 = vsel %vm1438_vm1, %v3233_v13, %v3237_v19  ;;  %v3241_v38 = vor.u32 %v3239_v44, %v3237_v19 }
 0x400   : > { %14152 = vmatmul.mubr.msk.bf16.vlgmr.msra.gmra.mrb[40].mxu0 %vm2193_vm4, %v3238_v25 }
 0x401   : > { %v3219_v41 = vpack.c.bf16 %v3212_v31, %v3211_v39  ;;  %14155 = vmatprep.mubr.msk.bf16.mxu0 %vm16069_vm0, %v16067_v24  ;;  %14194 = vmatpush3.bf16.msra.mxu0 %v15447_v22 }
 0x402   : > { %v3043_v42 = vpop.f32.mrb[32].mxu0  ;;  %v3188_v49 = vpop.f32.mrb[40].mxu1  ;;  %14239 = vmatprep.subr.bf16.mxu0 %v16067_v24 }
 0x403   : > { %v3213_v28 = vmax.f32 %v3043_v42, %v3188_v49  ;;  %v3045_v46 = vpop.f32.mrb[33].mxu0  ;;  %v3190_v43 = vpop.f32.mrb[41].mxu1  ;;  %14182 = vmatmul.mubr.msk.bf16.gmra.mrb[56].mxu1 %vm2193_vm4, %v3219_v41  ;;  %v3243_v45 = vshll.u32 %v3219_v41, 16  ;;  %v3460_v12 = vrot.slane %v3219_v41, 1  ;;  %v3247_v7 = vshrl.u32 %v3219_v41, 16  ;;  %v15448_v42 = vld [vmem:[%s16247_s30 + $0x10] sm:$0xff]  }
 0x404   : > { %14185 = vmatprep.mubr.msk.bf16.mxu1 %vm16069_vm0, %v16067_v24  ;;  %v15450_v49 = vld [vmem:[%s16247_s30 + $0x8] sm:$0xff]   ;;  %14216 = vmatpush3.bf16.msra.mxu1 %v15448_v42 }
 0x405   : > { %v3245_v52 = vrot.slane %v3243_v45, 1  ;;  %v3461_v17 = vsel %vm1814_vm3, %v3458_v32, %v3460_v12  ;;  %14217 = vmatprep.subr.bf16.mxu1 %v16067_v24 }
 0x406   : > { %v3048_v34 = vpop.f32.mrb[34].mxu0  ;;  %v3193_v55 = vpop.f32.mrb[42].mxu1 }
 0x407   : > { %v3214_v57 = vmax.f32 %v3048_v34, %v3193_v55  ;;  %v3050_v58 = vpop.f32.mrb[35].mxu0  ;;  %v3195_v59 = vpop.f32.mrb[43].mxu1  ;;  %v3246_v60 = vsel %vm1438_vm1, %v3241_v38, %v3245_v52  ;;  %v3249_v14 = vor.u32 %v3247_v7, %v3245_v52 }
 0x408   : > { %14156 = vmatmul.mubr.msk.bf16.gmra.mrb[44].mxu0 %vm2193_vm4, %v3246_v60 }
 0x409   : > { %v3220_v63 = vpack.c.bf16 %v3214_v57, %v3213_v28  ;;  %14159 = vmatprep.mubr.msk.bf16.mxu0 %vm16069_vm0, %v16067_v24  ;;  %v15451_v28 = vld [vmem:[%s16247_s30 + $0x18] sm:$0xff]  }
 0x40a   : > { %v3053_v62 = vpop.f32.mrb[36].mxu0  ;;  %v3198_v61 = vpop.f32.mrb[44].mxu1  ;;  %14218 = vmatpush3.bf16.msra.mxu1 %v15451_v28 }
 0x40b   : > { %v3215_v1 = vmax.f32 %v3053_v62, %v3198_v61  ;;  %v3055_v2 = vpop.f32.mrb[37].mxu0  ;;  %v3200_v6 = vpop.f32.mrb[45].mxu1  ;;  %14186 = vmatmul.mubr.msk.bf16.gmra.mrb[60].mxu1 %vm2193_vm4, %v3220_v63  ;;  %v3251_v9 = vshll.u32 %v3220_v63, 16  ;;  %v3462_v10 = vrot.slane %v3220_v63, 1  ;;  %v3255_v19 = vshrl.u32 %v3220_v63, 16  ;;  %14263 = vmatprep.subr.bf16.mxu1 %v16067_v24 }
 0x40c   : > { %14189 = vmatprep.mubr.msk.bf16.mxu1 %vm16069_vm0, %v16067_v24 }
 0x40d   : > { %v3253_v15 = vrot.slane %v3251_v9, 1  ;;  %v3463_v3 = vsel %vm1814_vm3, %v3460_v12, %v3462_v10 }
 0x40e   : > { %v3058_v20 = vpop.f32.mrb[38].mxu0  ;;  %v3203_v26 = vpop.f32.mrb[46].mxu1 }
 0x40f   : > { %v3216_v32 = vmax.f32 %v3058_v20, %v3203_v26  ;;  %v3060_v39 = vpop.f32.mrb[39].mxu0  ;;  %v3205_v40 = vpop.f32.mrb[47].mxu1  ;;  %v3254_v4 = vsel %vm1438_vm1, %v3249_v14, %v3253_v15  ;;  %v3257_v30 = vor.u32 %v3255_v19, %v3253_v15 }
 0x410   : > { %14160 = vmatmul.mubr.msk.bf16.gmra.mrb[48].mxu0 %vm2193_vm4, %v3254_v4 }
 0x411   : > { %v3221_v13 = vpack.c.bf16 %v3216_v32, %v3215_v1  ;;  %14163 = vmatprep.mubr.msk.bf16.mxu0 %vm16069_vm0, %v16067_v24 }
 0x413   : > { %14190 = vmatmul.mubr.msk.bf16.gmra.mrb[64].mxu1 %vm2193_vm4, %v3221_v13  ;;  %v3259_v22 = vshll.u32 %v3221_v13, 16  ;;  %v3464_v27 = vrot.slane %v3221_v13, 1  ;;  %v3263_v25 = vshrl.u32 %v3221_v13, 16 }
 0x414   : > { %14219 = vmatprep.mubr.msk.bf16.mxu1 %vm16069_vm0, %v16067_v24 }
 0x415   : > { %v3261_v31 = vrot.slane %v3259_v22, 1  ;;  %v3465_v18 = vsel %vm1814_vm3, %v3462_v10, %v3464_v27 }
 0x417   : > { %v3262_v35 = vsel %vm1438_vm1, %v3257_v30, %v3261_v31  ;;  %v3265_v41 = vor.u32 %v3263_v25, %v3261_v31 }
 0x418   : > { %14164 = vmatmul.mubr.msk.bf16.gmra.mrb[52].mxu0 %vm2193_vm4, %v3262_v35 }
 0x419   : > { %14167 = vmatprep.mubr.msk.bf16.mxu0 %vm16069_vm0, %v16067_v24 }
 0x420   : > { %14168 = vmatmul.mubr.msk.bf16.gmra.mrb[56].mxu0 %vm2193_vm4, %v3265_v41 }
 0x421   : > { %14195 = vmatprep.mubr.msk.bf16.mxu0 %vm16069_vm0, %v16067_v24 }
 0x428   : > { %14196 = vmatmul.mubr.msk.bf16.vlgmr.msra.gmra.mrb[60].mxu0 %vm2193_vm4, %v17023_v23  ;;  %v15449_v23 = vld [vmem:[%s16247_s30] sm:$0xff]  }
 0x429   : > { %14199 = vmatprep.mubr.msk.bf16.mxu0 %vm16069_vm0, %v16067_v24  ;;  %14240 = vmatpush3.bf16.msra.mxu0 %v15449_v23 }
 0x42a   : > { %14241 = vmatprep.subr.bf16.mxu0 %v16067_v24 }
 0x42d   : > { %14242 = vmatpush3.bf16.msra.mxu0 %v15450_v49 }
 0x42e   : > { %15217 = vmatprep.subr.bf16.mxu0 %v16066_v16 }
 0x430   : > { %14200 = vmatmul.mubr.msk.bf16.gmra.mrb[64].mxu0 %vm2193_vm4, %v3461_v17 }
 0x431   : > { %14203 = vmatprep.mubr.msk.bf16.mxu0 %vm16069_vm0, %v16067_v24 }
 0x438   : > { %14204 = vmatmul.mubr.msk.bf16.gmra.mrb[68].mxu0 %vm2193_vm4, %v3463_v3 }
 0x439   : > { %14207 = vmatprep.mubr.msk.bf16.mxu0 %vm16069_vm0, %v16067_v24 }
 0x440   : > { %14208 = vmatmul.mubr.msk.bf16.gmra.mrb[72].mxu0 %vm2193_vm4, %v3465_v18 }
 0x441   : > { %14211 = vmatprep.mubr.msk.bf16.mxu0 %vm16069_vm0, %v16067_v24 }
 0x448   : > { %14212 = vmatmul.mubr.msk.bf16.gmra.mrb[76].mxu0 %vm2193_vm4, %v3464_v27 }
 0x449   : > { %14243 = vmatprep.mubr.msk.bf16.mxu0 %vm16069_vm0, %v16067_v24 }
 0x4c6   : > { %v3410_v46 = vpop.f32.mrb[48].mxu1 }
 0x4c7   : > { %v14175_v43 = vpop.f32.mrb[49].mxu1 }
 0x4c8   : > { %v3413_v44 = vpop.f32.mrb[50].mxu1 }
 0x4c9   : > { %v14176_v45 = vpop.f32.mrb[51].mxu1 }
 0x4ce   : > { %v3418_v12 = vpop.f32.mrb[52].mxu1 }
 0x4cf   : > { %v14179_v38 = vpop.f32.mrb[53].mxu1 }
 0x4d0   : > { %v3421_v52 = vpop.f32.mrb[54].mxu1 }
 0x4d1   : > { %v14180_v17 = vpop.f32.mrb[55].mxu1 }
 0x4d3   : > { %v3321_v34 = vpop.f32.mrb[40].mxu0 }
 0x4d4   : > { %v3411_v55 = vadd.f32 %v3410_v46, %v3321_v34  ;;  %v14153_v57 = vpop.f32.mrb[41].mxu0 }
 0x4d5   : > { %v3324_v58 = vpop.f32.mrb[42].mxu0 }
 0x4d6   : > { %v3414_v59 = vadd.f32 %v3413_v44, %v3324_v58  ;;  %v14154_v60 = vpop.f32.mrb[43].mxu0  ;;  %v3426_v63 = vpop.f32.mrb[56].mxu1 }
 0x4d7   : > { %v14183_v62 = vpop.f32.mrb[57].mxu1 }
 0x4d8   : > { %v3429_v61 = vpop.f32.mrb[58].mxu1 }
 0x4d9   : > { %v14184_v1 = vpop.f32.mrb[59].mxu1 }
 0x4db   : > { %v3329_v2 = vpop.f32.mrb[44].mxu0 }
 0x4dc   : > { %v3419_v6 = vadd.f32 %v3418_v12, %v3329_v2  ;;  %v14157_v7 = vpop.f32.mrb[45].mxu0  ;;  %v3570_v12 = vld [vmem:[%s16242_s20] sm:$0x7] }
 0x4dd   : > { %v3332_v9 = vpop.f32.mrb[46].mxu0  ;;  %v17091_v38 = vrot.slane %v3570_v12, %v16525_v37  ;;  %v17095_v60 = vrot.slane %v3570_v12, %v16532_v47  ;;  %v17100_v7 = vrot.slane %v3570_v12, %v16539_v51 }
 0x4de   : > { %v3422_v10 = vadd.f32 %v3421_v52, %v3332_v9  ;;  %v14158_v14 = vpop.f32.mrb[47].mxu0  ;;  %v3434_v15 = vpop.f32.mrb[60].mxu1 }
 0x4df   : > { %v14187_v3 = vpop.f32.mrb[61].mxu1 }
 0x4e0   : > { %v3437_v20 = vpop.f32.mrb[62].mxu1 }
 0x4e1   : > { %v14188_v26 = vpop.f32.mrb[63].mxu1 }
 0x4e3   : > { %v3337_v32 = vpop.f32.mrb[48].mxu0 }
 0x4e4   : > { %v3427_v39 = vadd.f32 %v3426_v63, %v3337_v32  ;;  %v14161_v40 = vpop.f32.mrb[49].mxu0 }
 0x4e5   : > { %v3340_v4 = vpop.f32.mrb[50].mxu0 }
 0x4e6   : > { %v3430_v13 = vadd.f32 %v3429_v61, %v3340_v4  ;;  %v14162_v19 = vpop.f32.mrb[51].mxu0  ;;  %v3442_v22 = vpop.f32.mrb[64].mxu1 }
 0x4e7   : > { %v14191_v27 = vpop.f32.mrb[65].mxu1 }
 0x4e8   : > { %v3445_v30 = vpop.f32.mrb[66].mxu1 }
 0x4e9   : > { %v14192_v31 = vpop.f32.mrb[67].mxu1 }
 0x4eb   : > { %v3345_v18 = vpop.f32.mrb[52].mxu0 }
 0x4ec   : > { %v17081_v35 = vadd.f32 %v3434_v15, %v3345_v18  ;;  %v14165_v25 = vpop.f32.mrb[53].mxu0 }
 0x4ed   : > { %v3348_v41 = vpop.f32.mrb[54].mxu0 }
 0x4ee   : > { %v17083_v23 = vadd.f32 %v3437_v20, %v3348_v41  ;;  %v14166_v42 = vpop.f32.mrb[55].mxu0 }
 0x4f3   : > { %v3353_v49 = vpop.f32.mrb[56].mxu0 }
 0x4f4   : > { %v17085_v28 = vadd.f32 %v3442_v22, %v3353_v49  ;;  %v14169_v46 = vpop.f32.mrb[57].mxu0 }
 0x4f5   : > { %v3356_v43 = vpop.f32.mrb[58].mxu0 }
 0x4f6   : > { %v17087_v44 = vadd.f32 %v3445_v30, %v3356_v43  ;;  %v14170_v45 = vpop.f32.mrb[59].mxu0 }
 0x4fb   : > { %v3521_v52 = vpop.f32.mrb[60].mxu0 }
 0x4fc   : > { %v3560_v17 = vadd.f32 %v3521_v52, %v3411_v55  ;;  %v14197_v34 = vpop.f32.mrb[61].mxu0 }
 0x4fd   : > { %v3524_v57 = vpop.f32.mrb[62].mxu0 }
 0x4fe   : > { %v3575_v58 = vadd.f32 %v17091_v38, %v3560_v17  ;;  %v3561_v63 = vadd.f32 %v3524_v57, %v3414_v59  ;;  %v14198_v62 = vpop.f32.mrb[63].mxu0 }
 0x500   : > { %v3585_v61 = vmax.f32 %v3575_v58, 0.0  ;;  %v3576_v1 = vadd.f32 %v17091_v38, %v3561_v63 }
 0x502   : > { %v3599_v2 = vmul.f32 %v17095_v60, %v3585_v61  ;;  %v3586_v9 = vmax.f32 %v3576_v1, 0.0 }
 0x503   : > { %v3529_v14 = vpop.f32.mrb[64].mxu0 }
 0x504   : > { %v3600_v55 = vmul.f32 %v17095_v60, %v3586_v9  ;;  %v3562_v15 = vadd.f32 %v3529_v14, %v3419_v6  ;;  %v14201_v3 = vpop.f32.mrb[65].mxu0  ;;  %v3613_v26 = vadd.f32 %v17100_v7, %v3599_v2 }
 0x505   : > { %v3532_v20 = vpop.f32.mrb[66].mxu0  ;;  %v15452_v3 = vld [vmem:[%s16247_s30 + $0x20] sm:$0xff]  }
 0x506   : > { %v3614_v59 = vadd.f32 %v17100_v7, %v3600_v55  ;;  %v3577_v32 = vadd.f32 %v17091_v38, %v3562_v15  ;;  %v3563_v40 = vadd.f32 %v3532_v20, %v3422_v10  ;;  %v14202_v4 = vpop.f32.mrb[67].mxu0 }
 0x508   : > { %v3623_v19 = vpack.c.bf16 %v3614_v59, %v3613_v26  ;;  %v3587_v22 = vmax.f32 %v3577_v32, 0.0  ;;  %v3578_v27 = vadd.f32 %v17091_v38, %v3563_v40 }
 0x50a   : > { %v3601_v30 = vmul.f32 %v17095_v60, %v3587_v22  ;;  %v3588_v31 = vmax.f32 %v3578_v27, 0.0  ;;  %14244 = vmatmul.mubr.msk.bf16.vlgmr.msra.gmra.mrb[80].mxu0 %vm3688_vm5, %v3623_v19  ;;  %v3640_v10 = vshll.u32 %v3623_v19, 16  ;;  %v3638_v63 = vshrl.u32 %v3623_v19, 16 }
 0x50b   : > { %v3537_v6 = vpop.f32.mrb[68].mxu0  ;;  %14247 = vmatprep.mubr.msk.bf16.mxu0 %vm16069_vm0, %v16067_v24  ;;  %v3880_v1 = vrot.slane %v3623_v19, 1 }
 0x50c   : > { %v3602_v18 = vmul.f32 %v17095_v60, %v3588_v31  ;;  %v3564_v25 = vadd.f32 %v3537_v6, %v3427_v39  ;;  %v14205_v41 = vpop.f32.mrb[69].mxu0  ;;  %v3615_v49 = vadd.f32 %v17100_v7, %v3601_v30  ;;  %v3642_v57 = vrot.slane %v3640_v10, 1  ;;  %v15453_v31 = vld [vmem:[%s16247_s30 + $0x28] sm:$0xff]  }
 0x50d   : > { %v3540_v42 = vpop.f32.mrb[70].mxu0 }
 0x50e   : > { %v3616_v46 = vadd.f32 %v17100_v7, %v3602_v18  ;;  %v3579_v43 = vadd.f32 %v17091_v38, %v3564_v25  ;;  %v3565_v45 = vadd.f32 %v3540_v42, %v3430_v13  ;;  %v14206_v12 = vpop.f32.mrb[71].mxu0  ;;  %v3643_v55 = vor.u32 %v3642_v57, %v3638_v63 }
 0x510   : > { %v3589_v52 = vmax.f32 %v3579_v43, 0.0  ;;  %v3580_v17 = vadd.f32 %v17091_v38, %v3565_v45  ;;  %v3624_v34 = vpack.c.bf16 %v3616_v46, %v3615_v49 }
 0x512   : > { %v3603_v58 = vmul.f32 %v17095_v60, %v3589_v52  ;;  %v3590_v39 = vmax.f32 %v3580_v17, 0.0  ;;  %14248 = vmatmul.mubr.msk.bf16.gmra.mrb[84].mxu0 %vm3688_vm5, %v3624_v34  ;;  %v3645_v62 = vshll.u32 %v3624_v34, 16  ;;  %v3881_v13 = vrot.slane %v3624_v34, 1 }
 0x513   : > { %v3545_v61 = vpop.f32.mrb[72].mxu0  ;;  %14251 = vmatprep.mubr.msk.bf16.mxu0 %vm16069_vm0, %v16067_v24 }
 0x514   : > { %v3604_v2 = vmul.f32 %v17095_v60, %v3590_v39  ;;  %v3566_v9 = vadd.f32 %v3545_v61, %v17081_v35  ;;  %v14209_v14 = vpop.f32.mrb[73].mxu0  ;;  %v3647_v15 = vrot.slane %v3645_v62, 1  ;;  %v3617_v20 = vadd.f32 %v17100_v7, %v3603_v58 }
 0x515   : > { %v3548_v26 = vpop.f32.mrb[74].mxu0  ;;  %v17125_v59 = vsel %vm1814_vm3, %v3880_v1, %v3881_v13 }
 0x516   : > { %v3618_v32 = vadd.f32 %v17100_v7, %v3604_v2  ;;  %v3581_v40 = vadd.f32 %v17091_v38, %v3566_v9  ;;  %v3567_v4 = vadd.f32 %v3548_v26, %v17083_v23  ;;  %v14210_v19 = vpop.f32.mrb[75].mxu0  ;;  %v3648_v35 = vsel %vm1438_vm1, %v3643_v55, %v3647_v15 }
 0x517   : > { %14220 = vmatmul.mubr.msk.bf16.vlgmr.msra.gmra.mrb[68].mxu1 %vm3688_vm5, %v3648_v35  ;;  %v3649_v23 = vshrl.u32 %v3624_v34, 16 }
 0x518   : > { %v3591_v22 = vmax.f32 %v3581_v40, 0.0  ;;  %v3582_v27 = vadd.f32 %v17091_v38, %v3567_v4  ;;  %v3625_v30 = vpack.c.bf16 %v3618_v32, %v3617_v20  ;;  %14223 = vmatprep.mubr.msk.bf16.mxu1 %vm16069_vm0, %v16067_v24  ;;  %14264 = vmatpush3.bf16.msra.mxu1 %v15452_v3 }
 0x519   : > { %14265 = vmatprep.subr.bf16.mxu1 %v16067_v24  ;;  %v3651_v43 = vor.u32 %v3649_v23, %v3647_v15 }
 0x51a   : > { %v3605_v6 = vmul.f32 %v17095_v60, %v3591_v22  ;;  %v3592_v18 = vmax.f32 %v3582_v27, 0.0  ;;  %14252 = vmatmul.mubr.msk.bf16.gmra.mrb[88].mxu0 %vm3688_vm5, %v3625_v30  ;;  %v3653_v25 = vshll.u32 %v3625_v30, 16  ;;  %v3883_v10 = vrot.slane %v3625_v30, 1 }
 0x51b   : > { %v3553_v41 = vpop.f32.mrb[76].mxu0  ;;  %14255 = vmatprep.mubr.msk.bf16.mxu0 %vm16069_vm0, %v16067_v24  ;;  %v3657_v2 = vshrl.u32 %v3625_v30, 16 }
 0x51c   : > { %v3606_v42 = vmul.f32 %v17095_v60, %v3592_v18  ;;  %v3568_v49 = vadd.f32 %v3553_v41, %v17085_v28  ;;  %v14213_v46 = vpop.f32.mrb[77].mxu0  ;;  %v3655_v45 = vrot.slane %v3653_v25, 1  ;;  %14266 = vmatpush3.bf16.msra.mxu1 %v15453_v31  ;;  %v3619_v12 = vadd.f32 %v17100_v7, %v3605_v6 }
 0x51d   : > { %v3556_v52 = vpop.f32.mrb[78].mxu0  ;;  %v3884_v17 = vsel %vm1814_vm3, %v3881_v13, %v3883_v10  ;;  %15229 = vmatprep.subr.bf16.mxu1 %v16066_v16 }
 0x51e   : > { %v3620_v34 = vadd.f32 %v17100_v7, %v3606_v42  ;;  %v3583_v57 = vadd.f32 %v17091_v38, %v3568_v49  ;;  %v3569_v58 = vadd.f32 %v3556_v52, %v17087_v44  ;;  %v14214_v39 = vpop.f32.mrb[79].mxu0  ;;  %v3656_v28 = vsel %vm1438_vm1, %v3651_v43, %v3655_v45 }
 0x51f   : > { %14224 = vmatmul.mubr.msk.bf16.gmra.mrb[72].mxu1 %vm3688_vm5, %v3656_v28  ;;  %v3659_v55 = vor.u32 %v3657_v2, %v3655_v45 }
 0x520   : > { %v3593_v63 = vmax.f32 %v3583_v57, 0.0  ;;  %v3584_v62 = vadd.f32 %v17091_v38, %v3569_v58  ;;  %v3626_v61 = vpack.c.bf16 %v3620_v34, %v3619_v12  ;;  %14227 = vmatprep.mubr.msk.bf16.mxu1 %vm16069_vm0, %v16067_v24 }
 0x522   : > { %v3607_v1 = vmul.f32 %v17095_v60, %v3593_v63  ;;  %v3594_v13 = vmax.f32 %v3584_v62, 0.0  ;;  %14256 = vmatmul.mubr.msk.bf16.gmra.mrb[92].mxu0 %vm3688_vm5, %v3626_v61  ;;  %v3661_v9 = vshll.u32 %v3626_v61, 16  ;;  %v3885_v44 = vrot.slane %v3626_v61, 1 }
 0x523   : > { %14259 = vmatprep.mubr.msk.bf16.mxu0 %vm16069_vm0, %v16067_v24  ;;  %v3665_v40 = vshrl.u32 %v3626_v61, 16 }
 0x524   : > { %v3608_v14 = vmul.f32 %v17095_v60, %v3594_v13  ;;  %v3663_v15 = vrot.slane %v3661_v9, 1  ;;  %v3886_v38 = vsel %vm1814_vm3, %v3883_v10, %v3885_v44  ;;  %v3621_v3 = vadd.f32 %v17100_v7, %v3607_v1 }
 0x526   : > { %v3622_v20 = vadd.f32 %v17100_v7, %v3608_v14  ;;  %v3664_v26 = vsel %vm1438_vm1, %v3659_v55, %v3663_v15  ;;  %v3667_v19 = vor.u32 %v3665_v40, %v3663_v15 }
 0x527   : > { %14228 = vmatmul.mubr.msk.bf16.gmra.mrb[76].mxu1 %vm3688_vm5, %v3664_v26 }
 0x528   : > { %v3627_v32 = vpack.c.bf16 %v3622_v20, %v3621_v3  ;;  %14231 = vmatprep.mubr.msk.bf16.mxu1 %vm16069_vm0, %v16067_v24 }
 0x52a   : > { %14260 = vmatmul.mubr.msk.bf16.gmra.mrb[96].mxu0 %vm3688_vm5, %v3627_v32  ;;  %v3669_v60 = vshll.u32 %v3627_v32, 16  ;;  %v3887_v4 = vrot.slane %v3627_v32, 1  ;;  %v3673_v27 = vshrl.u32 %v3627_v32, 16 }
 0x52b   : > { %14305 = vmatprep.mubr.msk.f32.mxu0 %vm16069_vm0, %v16067_v24 }
 0x52c   : > { %v3671_v35 = vrot.slane %v3669_v60, 1  ;;  %v3888_v7 = vsel %vm1814_vm3, %v3885_v44, %v3887_v4 }
 0x52e   : > { %v3672_v22 = vsel %vm1438_vm1, %v3667_v19, %v3671_v35  ;;  %v3675_v30 = vor.u32 %v3673_v27, %v3671_v35 }
 0x52f   : > { %14232 = vmatmul.mubr.msk.bf16.gmra.mrb[80].mxu1 %vm3688_vm5, %v3672_v22 }
 0x530   : > { %14235 = vmatprep.mubr.msk.bf16.mxu1 %vm16069_vm0, %v16067_v24 }
 0x537   : > { %14236 = vmatmul.mubr.msk.bf16.gmra.mrb[84].mxu1 %vm3688_vm5, %v3675_v30 }
 0x538   : > { %14267 = vmatprep.mubr.msk.bf16.mxu1 %vm16069_vm0, %v16067_v24 }
 0x53f   : > { %14268 = vmatmul.mubr.msk.bf16.vlgmr.msra.gmra.mrb[88].mxu1 %vm3688_vm5, %v17125_v59 }
 0x540   : > { %14271 = vmatprep.mubr.msk.bf16.mxu1 %vm16069_vm0, %v16067_v24 }
 0x547   : > { %14272 = vmatmul.mubr.msk.bf16.gmra.mrb[92].mxu1 %vm3688_vm5, %v3884_v17 }
 0x548   : > { %14275 = vmatprep.mubr.msk.bf16.mxu1 %vm16069_vm0, %v16067_v24 }
 0x54f   : > { %14276 = vmatmul.mubr.msk.bf16.gmra.mrb[96].mxu1 %vm3688_vm5, %v3886_v38 }
 0x550   : > { %14279 = vmatprep.mubr.msk.bf16.mxu1 %vm16069_vm0, %v16067_v24 }
 0x557   : > { %14280 = vmatmul.mubr.msk.bf16.gmra.mrb[100].mxu1 %vm3688_vm5, %v3888_v7 }
 0x558   : > { %14283 = vmatprep.mubr.msk.bf16.mxu1 %vm16069_vm0, %v16067_v24 }
 0x55f   : > { %14284 = vmatmul.mubr.msk.bf16.gmra.mrb[104].mxu1 %vm3688_vm5, %v3887_v4 }
 0x560   : > { %14338 = vmatprep.mubr.msk.f32.mxu1 %vm16069_vm0, %v16067_v24 }
 0x5dd   : > { %v3832_v59 = vpop.f32.mrb[80].mxu0 }
 0x5de   : > { %v14245_v31 = vpop.f32.mrb[81].mxu0 }
 0x5df   : > { %v3835_v6 = vpop.f32.mrb[82].mxu0 }
 0x5e0   : > { %v14246_v18 = vpop.f32.mrb[83].mxu0 }
 0x5e1   : > { %v3997_v18 = vld [vmem:[%s18531_s6] sm:$0x7] }
 0x5e5   : > { %v3840_v23 = vpop.f32.mrb[84].mxu0 }
 0x5e6   : > { %v14249_v25 = vpop.f32.mrb[85].mxu0 }
 0x5e7   : > { %v3843_v41 = vpop.f32.mrb[86].mxu0 }
 0x5e8   : > { %v14250_v10 = vpop.f32.mrb[87].mxu0 }
 0x5ea   : > { %v3738_v42 = vpop.f32.mrb[68].mxu1 }
 0x5eb   : > { %v3833_v49 = vadd.f32 %v3832_v59, %v3738_v42  ;;  %v14221_v46 = vpop.f32.mrb[69].mxu1 }
 0x5ec   : > { %v3741_v43 = vpop.f32.mrb[70].mxu1 }
 0x5ed   : > { %v3836_v45 = vadd.f32 %v3835_v6, %v3741_v43  ;;  %v14222_v12 = vpop.f32.mrb[71].mxu1  ;;  %v3848_v52 = vpop.f32.mrb[88].mxu0  ;;  %v17205_v43 = vrot.slane %v3997_v18, %v16532_v47 }
 0x5ee   : > { %v14253_v17 = vpop.f32.mrb[89].mxu0 }
 0x5ef   : > { %v3851_v34 = vpop.f32.mrb[90].mxu0 }
 0x5f0   : > { %v14254_v57 = vpop.f32.mrb[91].mxu0 }
 0x5f2   : > { %v3746_v58 = vpop.f32.mrb[72].mxu1 }
 0x5f3   : > { %v3841_v39 = vadd.f32 %v3840_v23, %v3746_v58  ;;  %v14225_v28 = vpop.f32.mrb[73].mxu1  ;;  %v17201_v23 = vrot.slane %v3997_v18, %v16525_v37  ;;  %v17210_v58 = vrot.slane %v3997_v18, %v16539_v51 }
 0x5f4   : > { %v3749_v63 = vpop.f32.mrb[74].mxu1 }
 0x5f5   : > { %v3844_v62 = vadd.f32 %v3843_v41, %v3749_v63  ;;  %v14226_v61 = vpop.f32.mrb[75].mxu1  ;;  %v3856_v1 = vpop.f32.mrb[92].mxu0 }
 0x5f6   : > { %v14257_v13 = vpop.f32.mrb[93].mxu0 }
 0x5f7   : > { %v3859_v2 = vpop.f32.mrb[94].mxu0 }
 0x5f8   : > { %v14258_v9 = vpop.f32.mrb[95].mxu0 }
 0x5fa   : > { %v3754_v44 = vpop.f32.mrb[76].mxu1 }
 0x5fb   : > { %v3849_v14 = vadd.f32 %v3848_v52, %v3754_v44  ;;  %v14229_v55 = vpop.f32.mrb[77].mxu1 }
 0x5fc   : > { %v3757_v15 = vpop.f32.mrb[78].mxu1 }
 0x5fd   : > { %v3852_v38 = vadd.f32 %v3851_v34, %v3757_v15  ;;  %v14230_v3 = vpop.f32.mrb[79].mxu1  ;;  %v3864_v20 = vpop.f32.mrb[96].mxu0 }
 0x5fe   : > { %v14261_v26 = vpop.f32.mrb[97].mxu0 }
 0x5ff   : > { %v3867_v32 = vpop.f32.mrb[98].mxu0 }
 0x600   : > { %v14262_v40 = vpop.f32.mrb[99].mxu0 }
 0x602   : > { %v3762_v60 = vpop.f32.mrb[80].mxu1 }
 0x603   : > { %v17193_v4 = vadd.f32 %v3856_v1, %v3762_v60  ;;  %v14233_v19 = vpop.f32.mrb[81].mxu1 }
 0x604   : > { %v3765_v35 = vpop.f32.mrb[82].mxu1 }
 0x605   : > { %v17195_v7 = vadd.f32 %v3859_v2, %v3765_v35  ;;  %v14234_v22 = vpop.f32.mrb[83].mxu1 }
 0x60a   : > { %v3770_v27 = vpop.f32.mrb[84].mxu1 }
 0x60b   : > { %v17197_v30 = vadd.f32 %v3864_v20, %v3770_v27  ;;  %v14237_v59 = vpop.f32.mrb[85].mxu1 }
 0x60c   : > { %v3773_v31 = vpop.f32.mrb[86].mxu1 }
 0x60d   : > { %v14238_v6 = vpop.f32.mrb[87].mxu1 }
 0x612   : > { %v3950_v25 = vpop.f32.mrb[88].mxu1 }
 0x613   : > { %v3988_v41 = vadd.f32 %v3950_v25, %v3833_v49  ;;  %v14269_v10 = vpop.f32.mrb[89].mxu1 }
 0x614   : > { %v3953_v42 = vpop.f32.mrb[90].mxu1 }
 0x615   : > { %v4002_v46 = vadd.f32 %v17201_v23, %v3988_v41  ;;  %v3989_v12 = vadd.f32 %v3953_v42, %v3836_v45  ;;  %v14270_v52 = vpop.f32.mrb[91].mxu1 }
 0x617   : > { %v4011_v17 = vmax.f32 %v4002_v46, 0.0  ;;  %v4003_v34 = vadd.f32 %v17201_v23, %v3989_v12 }
 0x619   : > { %v4024_v57 = vmul.f32 %v17205_v43, %v4011_v17  ;;  %v4012_v28 = vmax.f32 %v4003_v34, 0.0 }
 0x61a   : > { %v3958_v63 = vpop.f32.mrb[92].mxu1 }
 0x61b   : > { %v4025_v49 = vmul.f32 %v17205_v43, %v4012_v28  ;;  %v3990_v61 = vadd.f32 %v3958_v63, %v3841_v39  ;;  %v14273_v1 = vpop.f32.mrb[93].mxu1  ;;  %v4037_v2 = vadd.f32 %v17210_v58, %v4024_v57 }
 0x61c   : > { %v3961_v13 = vpop.f32.mrb[94].mxu1 }
 0x61d   : > { %v4038_v45 = vadd.f32 %v17210_v58, %v4025_v49  ;;  %v4004_v9 = vadd.f32 %v17201_v23, %v3990_v61  ;;  %v3991_v44 = vadd.f32 %v3961_v13, %v3844_v62  ;;  %v14274_v55 = vpop.f32.mrb[95].mxu1 }
 0x61f   : > { %v17216_v15 = vpack.c.bf16 %v4038_v45, %v4037_v2  ;;  %v4013_v3 = vmax.f32 %v4004_v9, 0.0  ;;  %v4005_v20 = vadd.f32 %v17201_v23, %v3991_v44 }
 0x621   : > { %v4026_v26 = vmul.f32 %v17205_v43, %v4013_v3  ;;  %v4014_v32 = vmax.f32 %v4005_v20, 0.0  ;;  %15219 = vmatpush3.bf16.msra.mxu0 %v17216_v15  ;;  %15231 = vmatpush3.bf16.msra.mxu1 %v17216_v15 }
 0x622   : > { %v3966_v39 = vpop.f32.mrb[96].mxu1  ;;  %15220 = vmatprep.subr.bf16.mxu0 %v16066_v16  ;;  %15232 = vmatprep.subr.bf16.mxu1 %v16066_v16 }
 0x623   : > { %v4027_v62 = vmul.f32 %v17205_v43, %v4014_v32  ;;  %v3992_v40 = vadd.f32 %v3966_v39, %v3849_v14  ;;  %v14277_v60 = vpop.f32.mrb[97].mxu1  ;;  %v4039_v35 = vadd.f32 %v17210_v58, %v4026_v26 }
 0x624   : > { %v3969_v19 = vpop.f32.mrb[98].mxu1 }
 0x625   : > { %v4040_v22 = vadd.f32 %v17210_v58, %v4027_v62  ;;  %v4006_v27 = vadd.f32 %v17201_v23, %v3992_v40  ;;  %v3993_v59 = vadd.f32 %v3969_v19, %v3852_v38  ;;  %v14278_v31 = vpop.f32.mrb[99].mxu1  ;;  %v17255_v62 = vsel %vm2786_vm10, 1.0, %v16067_v24 }
 0x626   : > { %vm18532_vm10 = vcmp.eq.s32.totalorder %v16717_v21, %v16837_v8  ;;  %v12366_v8 = vsel %vm18534_vm14, 1.0, %v16067_v24 }
 0x627   : > { %v4015_v6 = vmax.f32 %v4006_v27, 0.0  ;;  %v4007_v18 = vadd.f32 %v17201_v23, %v3993_v59  ;;  %v15221_v25 = vpack.c.bf16 %v4040_v22, %v4039_v35  ;;  %v12364_v36 = vsel %vm18532_vm10, 1.0, %v16067_v24 }
 0x629   : > { %v4028_v41 = vmul.f32 %v17205_v43, %v4015_v6  ;;  %v4016_v10 = vmax.f32 %v4007_v18, 0.0  ;;  %15222 = vmatpush3.bf16.msra.mxu0 %v15221_v25  ;;  %15234 = vmatpush3.bf16.msra.mxu1 %v15221_v25 }
 0x62a   : > { %v3974_v14 = vpop.f32.mrb[100].mxu1  ;;  %15223 = vmatprep.subr.bf16.mxu0 %v16066_v16  ;;  %15235 = vmatprep.subr.bf16.mxu1 %v16066_v16 }
 0x62b   : > { %v4029_v42 = vmul.f32 %v17205_v43, %v4016_v10  ;;  %v3994_v46 = vadd.f32 %v3974_v14, %v17193_v4  ;;  %v14281_v38 = vpop.f32.mrb[101].mxu1  ;;  %v4041_v52 = vadd.f32 %v17210_v58, %v4028_v41 }
 0x62c   : > { %v3977_v12 = vpop.f32.mrb[102].mxu1 }
 0x62d   : > { %v4042_v17 = vadd.f32 %v17210_v58, %v4029_v42  ;;  %v4008_v34 = vadd.f32 %v17201_v23, %v3994_v46  ;;  %v3995_v57 = vadd.f32 %v3977_v12, %v17195_v7  ;;  %v14282_v28 = vpop.f32.mrb[103].mxu1 }
 0x62f   : > { %v4017_v63 = vmax.f32 %v4008_v34, 0.0  ;;  %v4009_v49 = vadd.f32 %v17201_v23, %v3995_v57  ;;  %v15224_v61 = vpack.c.bf16 %v4042_v17, %v4041_v52 }
 0x631   : > { %v4030_v1 = vmul.f32 %v17205_v43, %v4017_v63  ;;  %v4018_v13 = vmax.f32 %v4009_v49, 0.0  ;;  %15225 = vmatpush3.bf16.msra.mxu0 %v15224_v61  ;;  %15237 = vmatpush3.bf16.msra.mxu1 %v15224_v61 }
 0x632   : > { %v3982_v4 = vpop.f32.mrb[104].mxu1  ;;  %15226 = vmatprep.subr.bf16.mxu0 %v16066_v16  ;;  %15238 = vmatprep.subr.bf16.mxu1 %v16066_v16 }
 0x633   : > { %v4031_v2 = vmul.f32 %v17205_v43, %v4018_v13  ;;  %v3996_v45 = vadd.f32 %v3982_v4, %v17197_v30  ;;  %v14285_v7 = vpop.f32.mrb[105].mxu1  ;;  %v4043_v44 = vadd.f32 %v17210_v58, %v4030_v1 }
 0x634   : > { %v3985_v9 = vpop.f32.mrb[106].mxu1 }
 0x635   : > { %v4044_v55 = vadd.f32 %v17210_v58, %v4031_v2  ;;  %v4010_v3 = vadd.f32 %v17201_v23, %v3996_v45  ;;  %v14286_v20 = vpop.f32.mrb[107].mxu1  ;;  %v17261_v23 = vsel %vm2856_vm11, 1.0, %v16067_v24  ;;  %vm18533_vm11 = vcmp.eq.s32.totalorder %v16717_v21, %v16846_v53 }
 0x636   : > { %v12384_v29 = vsel %vm18533_vm11, 1.0, %v16067_v24  ;;  %v12386_v53 = vsel %vm18535_vm15, 1.0, %v16067_v24  ;;  %v15458_v20 = vld [vmem:[%s16257_s19 + $0x20] sm:$0xff]   ;;  %vm18544_vm11 = vcmask 1041408  }
 0x637   : > { %v4019_v26 = vmax.f32 %v4010_v3, 0.0  ;;  %v15227_v32 = vpack.c.bf16 %v4044_v55, %v4043_v44  ;;  %vm18545_vm14 = vmmov %vm18544_vm11 }
 0x638   : > { %vm18547_vm2 = vmmov %vm18544_vm11 }
 0x639   : > { %v4032_v39 = vmul.f32 %v17205_v43, %v4019_v26  ;;  %15228 = vmatpush3.bf16.msra.mxu0 %v15227_v32  ;;  %15240 = vmatpush3.bf16.msra.mxu1 %v15227_v32  ;;  %v15454_v43 = vld [vmem:[%s16257_s19] sm:$0xff]   ;;  %vm18553_vm9 = vmmov %vm18547_vm2 }
 0x63a   : > { %14303 = vmatprep.subr.mxu0 %v16067_v24  ;;  %14336 = vmatprep.subr.mxu1 %v16067_v24 }
 0x63b   : > { %v4045_v30 = vadd.f32 %v17210_v58, %v4032_v39  ;;  %v15456_v58 = vld [vmem:[%s16257_s19 + $0x10] sm:$0xff]  }
 0x63d   : > { %14304 = vmatpush3.msra.mxu0 %v4045_v30  ;;  %14337 = vmatpush3.msra.mxu1 %v4045_v30 }
 0x63e   : > { %14306 = vmatmul.mubr.msk.f32.vlgmr.msra.gmra.mrb[100].mxu0 %vm4046_vm6, %v17255_v62  ;;  %14339 = vmatmul.mubr.msk.f32.vlgmr.msra.gmra.mrb[108].mxu1 %vm4046_vm6, %v17261_v23 }
 0x63f   : > { %14308 = vmatprep.mubr.msk.f32.mxu0 %vm16069_vm0, %v16067_v24  ;;  %14341 = vmatprep.mubr.msk.f32.mxu1 %vm16069_vm0, %v16067_v24 }
 0x640   : > { %14369 = vmatprep.subr.bf16.mxu1 %v16067_v24  ;;  %14353 = vmatprep.subr.bf16.mxu0 %v16067_v24 }
 0x641   : > { %14370 = vmatpush3.bf16.msra.mxu1 %v15454_v43  ;;  %14354 = vmatpush3.bf16.msra.mxu0 %v15456_v58  ;;  %v15460_v58 = vld [vmem:[%s18526_s8 + $0x20] sm:$0xff]  }
 0x642   : > { %14309 = vmatmul.mubr.msk.f32.gmra.mrb[102].mxu0 %vm4046_vm6, %v17275_v48  ;;  %14342 = vmatmul.mubr.msk.f32.gmra.mrb[110].mxu1 %vm4046_vm6, %v17281_v56 }
 0x643   : > { %14311 = vmatprep.mubr.msk.f32.mxu0 %vm16069_vm0, %v16067_v24  ;;  %14344 = vmatprep.mubr.msk.f32.mxu1 %vm16069_vm0, %v16067_v24 }
 0x644   : > { %14371 = vmatprep.subr.bf16.mxu1 %v16067_v24  ;;  %14355 = vmatprep.subr.bf16.mxu0 %v16067_v24 }
 0x645   : > { %14372 = vmatpush3.bf16.msra.mxu1 %v15455_v50  ;;  %14356 = vmatpush3.bf16.msra.mxu0 %v15457_v0  ;;  %v15461_v0 = vld [vmem:[%s18526_s8 + $0x28] sm:$0xff]  }
 0x646   : > { %14312 = vmatmul.mubr.msk.f32.gmra.mrb[104].mxu0 %vm4046_vm6, %v12364_v36  ;;  %14345 = vmatmul.mubr.msk.f32.gmra.mrb[112].mxu1 %vm4046_vm6, %v12384_v29 }
 0x647   : > { %14314 = vmatprep.mubr.msk.f32.mxu0 %vm16069_vm0, %v16067_v24  ;;  %14347 = vmatprep.mubr.msk.f32.mxu1 %vm16069_vm0, %v16067_v24 }
 0x648   : > { %14385 = vmatprep.subr.bf16.mxu0 %v16067_v24  ;;  %14401 = vmatprep.subr.bf16.mxu1 %v15460_v58 }
 0x64a   : > { %14315 = vmatmul.mubr.msk.f32.gmra.mrb[106].mxu0 %vm4046_vm6, %v12366_v8  ;;  %14348 = vmatmul.mubr.msk.f32.gmra.mrb[114].mxu1 %vm4046_vm6, %v12386_v53  ;;  %v15459_v53 = vld [vmem:[%s16257_s19 + $0x28] sm:$0xff]  }
 0x64b   : > { %14317 = vmatprep.mubr.msk.f32.mxu0 %vm16069_vm0, %v16067_v24  ;;  %14350 = vmatprep.mubr.msk.f32.mxu1 %vm16069_vm0, %v16067_v24 }
 0x64e   : > { %14318 = vmatmul.mubr.msk.f32.gmra.mrb[108].mxu0 %vm4046_vm6, %v12368_v54  ;;  %14351 = vmatmul.mubr.msk.f32.gmra.mrb[116].mxu1 %vm4046_vm6, %v12388_v11  ;;  %vm7455_vm6 = vcmask 15360  }
 0x64f   : > { %14373 = vmatprep.mubr.msk.bf16.mxu1 %vm16069_vm0, %v16067_v24  ;;  %14357 = vmatprep.mubr.msk.bf16.mxu0 %vm16069_vm0, %v16067_v24 }
 0x711   : > { %v4128_v40 = vpop.f32.mrb[100].mxu0  ;;  %v4233_v60 = vpop.f32.mrb[108].mxu1 }
 0x712   : > { %v4257_v19 = vmax.f32 %v4128_v40, %v4233_v60  ;;  %v14307_v35 = vpop.f32.mrb[101].mxu0  ;;  %v14340_v22 = vpop.f32.mrb[109].mxu1  ;;  %v15462_v40 = vld [vmem:[%s18526_s8 + $0x30] sm:$0xff]   ;;  %v15463_v60 = vld [vmem:[%s18526_s8 + $0x38] sm:$0xff]  }
 0x715   : > { %v4133_v27 = vpop.f32.mrb[102].mxu0  ;;  %v4238_v59 = vpop.f32.mrb[110].mxu1 }
 0x716   : > { %v4258_v31 = vmax.f32 %v4133_v27, %v4238_v59  ;;  %v14310_v6 = vpop.f32.mrb[103].mxu0  ;;  %v14343_v18 = vpop.f32.mrb[111].mxu1 }
 0x718   : > { %v4262_v25 = vpack.c.bf16 %v4258_v31, %v4257_v19  ;;  %v17379_v19 = vld [vmem:[%s18526_s8] sm:$0xff]  }
 0x719   : > { %v4138_v41 = vpop.f32.mrb[104].mxu0  ;;  %v4243_v10 = vpop.f32.mrb[112].mxu1 }
 0x71a   : > { %v4259_v14 = vmax.f32 %v4138_v41, %v4243_v10  ;;  %v14313_v42 = vpop.f32.mrb[105].mxu0  ;;  %v14346_v46 = vpop.f32.mrb[113].mxu1  ;;  %14374 = vmatmul.mubr.msk.bf16.vlgmr.msra.gmra.mrb[120].mxu1 %vm3688_vm5, %v4262_v25  ;;  %v4277_v38 = vshll.u32 %v4262_v25, 16  ;;  %v4275_v49 = vshrl.u32 %v4262_v25, 16  ;;  %v4456_v13 = vrot.slane %v4262_v25, 1 }
 0x71b   : > { %14377 = vmatprep.mubr.msk.bf16.mxu1 %vm16069_vm0, %v16067_v24  ;;  %14402 = vmatpush3.bf16.msra.mxu1 %v15460_v58 }
 0x71c   : > { %v4279_v28 = vrot.slane %v4277_v38, 1  ;;  %14403 = vmatprep.subr.bf16.mxu1 %v15461_v0 }
 0x71d   : > { %v4143_v12 = vpop.f32.mrb[106].mxu0  ;;  %v4248_v52 = vpop.f32.mrb[114].mxu1 }
 0x71e   : > { %v4260_v17 = vmax.f32 %v4143_v12, %v4248_v52  ;;  %v14316_v34 = vpop.f32.mrb[107].mxu0  ;;  %v14349_v57 = vpop.f32.mrb[115].mxu1  ;;  %v4280_v44 = vor.u32 %v4279_v28, %v4275_v49 }
 0x71f   : > { %14404 = vmatpush3.bf16.msra.mxu1 %v15461_v0 }
 0x720   : > { %v4263_v63 = vpack.c.bf16 %v4260_v17, %v4259_v14  ;;  %14405 = vmatprep.subr.bf16.mxu1 %v15462_v40 }
 0x721   : > { %v4148_v61 = vpop.f32.mrb[108].mxu0  ;;  %v4253_v1 = vpop.f32.mrb[116].mxu1 }
 0x722   : > { %v4282_v4 = vshll.u32 %v4263_v63, 16  ;;  %v4457_v2 = vrot.slane %v4263_v63, 1  ;;  %v4261_v45 = vmax.f32 %v4148_v61, %v4253_v1  ;;  %14378 = vmatmul.mubr.msk.bf16.gmra.mrb[124].mxu1 %vm3688_vm5, %v4263_v63  ;;  %v14319_v7 = vpop.f32.mrb[109].mxu0  ;;  %v14352_v9 = vpop.f32.mrb[117].mxu1  ;;  %v4286_v39 = vshrl.u32 %v4263_v63, 16 }
 0x723   : > { %14381 = vmatprep.mubr.msk.bf16.mxu1 %vm16069_vm0, %v16067_v24  ;;  %14406 = vmatpush3.bf16.msra.mxu1 %v15462_v40  ;;  %v4543_v9 = vld [vmem:[%s16262_s24] sm:$0x7] }
 0x724   : > { %v4284_v55 = vrot.slane %v4282_v4, 1  ;;  %v4264_v3 = vpack.c.bf16 %v4261_v45, %v4261_v45  ;;  %v4458_v26 = vsel %vm1814_vm3, %v4456_v13, %v4457_v2  ;;  %14407 = vmatprep.subr.bf16.mxu1 %v15463_v60 }
 0x726   : > { %v4285_v32 = vsel %vm1438_vm1, %v4280_v44, %v4284_v55  ;;  %v4290_v30 = vshll.u32 %v4264_v3, 16  ;;  %v4459_v36 = vrot.slane %v4264_v3, 1  ;;  %v4288_v29 = vor.u32 %v4286_v39, %v4284_v55 }
 0x727   : > { %14358 = vmatmul.mubr.msk.bf16.vlgmr.msra.gmra.mrb[112].mxu0 %vm3688_vm5, %v4285_v32  ;;  %v4294_v43 = vshrl.u32 %v4264_v3, 16  ;;  %14408 = vmatpush3.bf16.msra.mxu1 %v15463_v60  ;;  %v4547_v44 = vrot.slane %v4543_v9, %v16525_v37  ;;  %v4561_v39 = vrot.slane %v4543_v9, %v16532_v47 }
 0x728   : > { %14361 = vmatprep.mubr.msk.bf16.mxu0 %vm16069_vm0, %v16067_v24  ;;  %v4292_v8 = vrot.slane %v4290_v30, 1  ;;  %14386 = vmatpush3.bf16.msra.mxu0 %v15458_v20  ;;  %v4460_v54 = vsel %vm1814_vm3, %v4457_v2, %v4459_v36 }
 0x729   : > { %14387 = vmatprep.subr.bf16.mxu0 %v16067_v24  ;;  %14413 = vmatprep.subr.bf16.mxu1 %v17379_v19 }
 0x72a   : > { %14382 = vmatmul.mubr.msk.bf16.gmra.mrb[128].mxu1 %vm3688_vm5, %v4264_v3  ;;  %v4293_v11 = vsel %vm1438_vm1, %v4288_v29, %v4292_v8  ;;  %v4296_v50 = vor.u32 %v4294_v43, %v4292_v8 }
 0x72c   : > { %14388 = vmatpush3.bf16.msra.mxu0 %v15459_v53 }
 0x72f   : > { %14362 = vmatmul.mubr.msk.bf16.gmra.mrb[116].mxu0 %vm3688_vm5, %v4293_v11 }
 0x730   : > { %14365 = vmatprep.mubr.msk.bf16.mxu0 %vm16069_vm0, %v16067_v24 }
 0x737   : > { %14366 = vmatmul.mubr.msk.bf16.gmra.mrb[120].mxu0 %vm3688_vm5, %v4296_v50 }
 0x738   : > { %14389 = vmatprep.mubr.msk.bf16.mxu0 %vm16069_vm0, %v16067_v24 }
 0x73f   : > { %14390 = vmatmul.mubr.msk.bf16.vlgmr.msra.gmra.mrb[124].mxu0 %vm3688_vm5, %v4458_v26 }
 0x740   : > { %14393 = vmatprep.mubr.msk.bf16.mxu0 %vm16069_vm0, %v16067_v24 }
 0x747   : > { %14394 = vmatmul.mubr.msk.bf16.gmra.mrb[128].mxu0 %vm3688_vm5, %v4460_v54  ;;  %v4570_v54 = vrot.slane %v4543_v9, %v16539_v51 }
 0x748   : > { %14397 = vmatprep.mubr.msk.bf16.mxu0 %vm16069_vm0, %v16067_v24 }
 0x74f   : > { %14398 = vmatmul.mubr.msk.bf16.gmra.mrb[132].mxu0 %vm3688_vm5, %v4459_v36 }
 0x750   : > { %14445 = vmatprep.mubr.msk.f32.mxu0 %vm3688_vm5, %v17255_v62 }
 0x7ed   : > { %v4426_v35 = vpop.f32.mrb[120].mxu1 }
 0x7ee   : > { %v14375_v22 = vpop.f32.mrb[121].mxu1 }
 0x7ef   : > { %v4429_v27 = vpop.f32.mrb[122].mxu1 }
 0x7f0   : > { %v14376_v59 = vpop.f32.mrb[123].mxu1 }
 0x7f5   : > { %v4434_v31 = vpop.f32.mrb[124].mxu1 }
 0x7f6   : > { %v14379_v6 = vpop.f32.mrb[125].mxu1 }
 0x7f7   : > { %v4437_v18 = vpop.f32.mrb[126].mxu1 }
 0x7f8   : > { %v14380_v25 = vpop.f32.mrb[127].mxu1 }
 0x7fa   : > { %v4352_v41 = vpop.f32.mrb[112].mxu0 }
 0x7fb   : > { %v4427_v10 = vadd.f32 %v4426_v35, %v4352_v41  ;;  %v14359_v14 = vpop.f32.mrb[113].mxu0 }
 0x7fc   : > { %v4355_v42 = vpop.f32.mrb[114].mxu0 }
 0x7fd   : > { %v4430_v46 = vadd.f32 %v4429_v27, %v4355_v42  ;;  %v14360_v38 = vpop.f32.mrb[115].mxu0  ;;  %v4442_v12 = vpop.f32.mrb[128].mxu1 }
 0x7fe   : > { %v14383_v52 = vpop.f32.mrb[129].mxu1 }
 0x7ff   : > { %v4445_v17 = vpop.f32.mrb[130].mxu1 }
 0x800   : > { %v14384_v34 = vpop.f32.mrb[131].mxu1 }
 0x802   : > { %v4360_v57 = vpop.f32.mrb[116].mxu0 }
 0x803   : > { %v4435_v28 = vadd.f32 %v4434_v31, %v4360_v57  ;;  %v14363_v63 = vpop.f32.mrb[117].mxu0 }
 0x804   : > { %v4363_v49 = vpop.f32.mrb[118].mxu0 }
 0x805   : > { %v4438_v61 = vadd.f32 %v4437_v18, %v4363_v49  ;;  %v14364_v1 = vpop.f32.mrb[119].mxu0 }
 0x80a   : > { %v4368_v13 = vpop.f32.mrb[120].mxu0 }
 0x80b   : > { %v4443_v4 = vadd.f32 %v4442_v12, %v4368_v13  ;;  %v14367_v2 = vpop.f32.mrb[121].mxu0 }
 0x80c   : > { %v4371_v45 = vpop.f32.mrb[122].mxu0 }
 0x80d   : > { %v14368_v7 = vpop.f32.mrb[123].mxu0 }
 0x812   : > { %v4516_v55 = vpop.f32.mrb[124].mxu0 }
 0x813   : > { %v4538_v3 = vadd.f32 %v4516_v55, %v4427_v10  ;;  %v14391_v20 = vpop.f32.mrb[125].mxu0 }
 0x814   : > { %v4519_v26 = vpop.f32.mrb[126].mxu0 }
 0x815   : > { %v4548_v32 = vadd.f32 %v4547_v44, %v4538_v3  ;;  %v4539_v30 = vadd.f32 %v4519_v26, %v4430_v46  ;;  %v14392_v36 = vpop.f32.mrb[127].mxu0 }
 0x817   : > { %v4553_v29 = vmax.f32 %v4548_v32, 0.0  ;;  %v4549_v8 = vadd.f32 %v4547_v44, %v4539_v30 }
 0x819   : > { %v4562_v53 = vmul.f32 %v4561_v39, %v4553_v29  ;;  %v4554_v11 = vmax.f32 %v4549_v8, 0.0  ;;  %v15465_v29 = vld [vmem:[%s18526_s8 + $0x8] sm:$0xff]  }
 0x81a   : > { %v4524_v43 = vpop.f32.mrb[128].mxu0 }
 0x81b   : > { %v4563_v50 = vmul.f32 %v4561_v39, %v4554_v11  ;;  %v4540_v58 = vadd.f32 %v4524_v43, %v4435_v28  ;;  %v14395_v0 = vpop.f32.mrb[129].mxu0  ;;  %v4571_v60 = vadd.f32 %v4570_v54, %v4562_v53  ;;  %v15466_v53 = vld [vmem:[%s18526_s8 + $0x10] sm:$0xff]   ;;  %v15468_v11 = vld [vmem:[%s18526_s8 + $0x40] sm:$0xff]   ;;  %v15469_v43 = vld [vmem:[%s18526_s8 + $0x48] sm:$0xff]  }
 0x81c   : > { %v4527_v40 = vpop.f32.mrb[130].mxu0  ;;  %v15473_v0 = vld [vmem:[%s16277_s29 + $0x8] sm:$0xff]  }
 0x81d   : > { %v4572_v35 = vadd.f32 %v4570_v54, %v4563_v50  ;;  %v4550_v22 = vadd.f32 %v4547_v44, %v4540_v58  ;;  %v4541_v27 = vadd.f32 %v4527_v40, %v4438_v61  ;;  %v14396_v59 = vpop.f32.mrb[131].mxu0  ;;  %v15471_v50 = vld [vmem:[%s18526_s8 + $0x58] sm:$0xff]   ;;  %v15472_v58 = vld [vmem:[%s16277_s29] sm:$0xff]  }
 0x81e   : > { %v4873_v40 = vld [vmem:[%s16272_s14] sm:$0x7] }
 0x81f   : > { %v4576_v31 = vpack.c.bf16 %v4572_v35, %v4571_v60  ;;  %v4555_v6 = vmax.f32 %v4550_v22, 0.0  ;;  %v4551_v18 = vadd.f32 %v4547_v44, %v4541_v27  ;;  %v4877_v60 = vrot.slane %v4873_v40, %v16525_v37 }
 0x820   : > { %v4889_v27 = vrot.slane %v4873_v40, %v16532_v47 }
 0x821   : > { %v4564_v25 = vmul.f32 %v4561_v39, %v4555_v6  ;;  %v4556_v41 = vmax.f32 %v4551_v18, 0.0  ;;  %v4599_v38 = vshll.u32 %v4576_v31, 16  ;;  %v4597_v61 = vshrl.u32 %v4576_v31, 16 }
 0x822   : > { %v4532_v10 = vpop.f32.mrb[132].mxu0  ;;  %v4785_v2 = vrot.slane %v4576_v31, 1 }
 0x823   : > { %v4565_v14 = vmul.f32 %v4561_v39, %v4556_v41  ;;  %v4542_v42 = vadd.f32 %v4532_v10, %v4443_v4  ;;  %v14399_v46 = vpop.f32.mrb[133].mxu0  ;;  %v4573_v52 = vadd.f32 %v4570_v54, %v4564_v25  ;;  %v4601_v49 = vrot.slane %v4599_v38, 1 }
 0x824   : > { %v4535_v12 = vpop.f32.mrb[134].mxu0  ;;  %v4897_v46 = vrot.slane %v4873_v40, %v16539_v51  ;;  %v15489_v40 = vld [vmem:[%s18538_s10 + $0x18] sm:$0xff]  }
 0x825   : > { %v4574_v17 = vadd.f32 %v4570_v54, %v4565_v14  ;;  %v4552_v34 = vadd.f32 %v4547_v44, %v4542_v42  ;;  %v14400_v57 = vpop.f32.mrb[135].mxu0  ;;  %v4602_v9 = vor.u32 %v4601_v49, %v4597_v61 }
 0x827   : > { %v4577_v28 = vpack.c.bf16 %v4574_v17, %v4573_v52  ;;  %v4557_v63 = vmax.f32 %v4552_v34, 0.0 }
 0x829   : > { %v4566_v1 = vmul.f32 %v4561_v39, %v4557_v63  ;;  %v4604_v13 = vshll.u32 %v4577_v28, 16  ;;  %v4786_v45 = vrot.slane %v4577_v28, 1  ;;  %v4608_v32 = vshrl.u32 %v4577_v28, 16 }
 0x82b   : > { %v4575_v7 = vadd.f32 %v4570_v54, %v4566_v1  ;;  %v4606_v4 = vrot.slane %v4604_v13, 1  ;;  %v4787_v55 = vsel %vm1814_vm3, %v4785_v2, %v4786_v45  ;;  %v15467_v54 = vld [vmem:[%s18526_s8 + $0x18] sm:$0xff]   ;;  %v15474_v13 = vld [vmem:[%s16277_s29 + $0x20] sm:$0xff]   ;;  %v15476_v2 = vld [vmem:[%s16277_s29 + $0x28] sm:$0xff]  }
 0x82d   : > { %v4578_v3 = vpack.c.bf16 %v4575_v7, %v4575_v7  ;;  %v4607_v44 = vsel %vm1438_vm1, %v4602_v9, %v4606_v4  ;;  %v4610_v30 = vor.u32 %v4608_v32, %v4606_v4  ;;  %v15478_v7 = vld [vmem:[%s16277_s29 + $0x30] sm:$0xff]  }
 0x82e   : > { %14409 = vmatprep.mubr.msk.bf16.mxu1 %vm4640_vm12, %v4607_v44 }
 0x82f   : > { %v4612_v20 = vshll.u32 %v4578_v3, 16  ;;  %v4788_v26 = vrot.slane %v4578_v3, 1 }
 0x831   : > { %v4614_v39 = vrot.slane %v4612_v20, 1  ;;  %v4789_v36 = vsel %vm1814_vm3, %v4786_v45, %v4788_v26  ;;  %v15477_v45 = vld [vmem:[%s16277_s29 + $0x18] sm:$0xff]   ;;  %vm16070_vm3 = vmmov 1  }
 0x833   : > { %v4615_v8 = vsel %vm1438_vm1, %v4610_v30, %v4614_v39  ;;  %vm5679_vm1 = vcmask 1043456  }
 0x834   : > { %14410 = vmatmul.mubr.msk.bf16.vlgmr.msra.gmra.mrb[132].mxu1 %vm4640_vm12, %v4615_v8  ;;  %v15481_v8 = vld [vmem:[%s16277_s29 + $0x48] sm:$0xff]   ;;  %vm15259_vm13 = vmpackc.low %vm5679_vm1, %vm16070_vm3 }
 0x835   : > { %14414 = vmatpush3.bf16.msra.mxu1 %v17379_v19  ;;  %14421 = vmatprep.mubr.msk.bf16.mxu1 %vm4640_vm12, %v4576_v31  ;;  %v15470_v19 = vld [vmem:[%s18526_s8 + $0x50] sm:$0xff]   ;;  %vm18554_vm1 = vmmov %vm18547_vm2 }
 0x836   : > { %14415 = vmatprep.subr.bf16.mxu1 %v15465_v29  ;;  %vm18556_vm3 = vmmov %vm18554_vm1 }
 0x839   : > { %14416 = vmatpush3.bf16.msra.mxu1 %v15465_v29 }
 0x83a   : > { %14417 = vmatprep.subr.bf16.mxu1 %v15466_v53 }
 0x83d   : > { %14418 = vmatpush3.bf16.msra.mxu1 %v15466_v53  ;;  %v15482_v53 = vld [vmem:[%s16277_s29 + $0x50] sm:$0xff]  }
 0x83e   : > { %14419 = vmatprep.subr.bf16.mxu1 %v15467_v54 }
 0x841   : > { %14420 = vmatpush3.bf16.msra.mxu1 %v15467_v54  ;;  %v15483_v54 = vld [vmem:[%s16277_s29 + $0x58] sm:$0xff]  }
 0x842   : > { %14425 = vmatprep.subr.bf16.mxu1 %v15468_v11 }
 0x844   : > { %14422 = vmatmul.mubr.msk.bf16.vlgmr.msra.gmra.mrb[132].mxu1 %vm4640_vm12, %v4577_v28 }
 0x845   : > { %14426 = vmatpush3.bf16.msra.mxu1 %v15468_v11  ;;  %14433 = vmatprep.mubr.msk.bf16.mxu1 %vm4640_vm12, %v4787_v55 }
 0x846   : > { %14427 = vmatprep.subr.bf16.mxu1 %v15469_v43 }
 0x849   : > { %14428 = vmatpush3.bf16.msra.mxu1 %v15469_v43  ;;  %v15484_v43 = vld [vmem:[%s18538_s10] sm:$0xff]  }
 0x84a   : > { %14429 = vmatprep.subr.bf16.mxu1 %v15470_v19 }
 0x84d   : > { %14430 = vmatpush3.bf16.msra.mxu1 %v15470_v19  ;;  %v15485_v19 = vld [vmem:[%s18538_s10 + $0x8] sm:$0xff]  }
 0x84e   : > { %14431 = vmatprep.subr.bf16.mxu1 %v15471_v50 }
 0x851   : > { %14432 = vmatpush3.bf16.msra.mxu1 %v15471_v50  ;;  %v15486_v50 = vld [vmem:[%s18538_s10 + $0x40] sm:$0xff]  }
 0x852   : > { %14471 = vmatprep.subr.bf16.mxu1 %v16067_v24 }
 0x854   : > { %14434 = vmatmul.mubr.msk.bf16.vlgmr.msra.gmra.mrb[132].mxu1 %vm4640_vm12, %v4789_v36  ;;  %v15480_v36 = vld [vmem:[%s16277_s29 + $0x40] sm:$0xff]  }
 0x855   : > { %14479 = vmatprep.mubr.msk.bf16.mxu1 %vm16069_vm0, %v16067_v24  ;;  %14472 = vmatpush3.bf16.msra.mxu1 %v15472_v58  ;;  %v15487_v58 = vld [vmem:[%s18538_s10 + $0x10] sm:$0xff]  }
 0x856   : > { %14473 = vmatprep.subr.bf16.mxu1 %v16067_v24 }
 0x859   : > { %14474 = vmatpush3.bf16.msra.mxu1 %v15473_v0  ;;  %v15488_v0 = vld [vmem:[%s18538_s10 + $0x48] sm:$0xff]  }
 0x85a   : > { %14475 = vmatprep.subr.bf16.mxu1 %v16067_v24 }
 0x927   : > { %v14435_v35 = vpop.f32.mrb[132].mxu1 }
 0x928   : > { %v4880_v22 = vadd.f32 %v14435_v35, %v4877_v60  ;;  %v4854_v59 = vpop.f32.mrb[133].mxu1  ;;  %v15491_v35 = vld [vmem:[%s18538_s10 + $0x20] sm:$0xff]  }
 0x929   : > { %v4878_v31 = vadd.f32 %v4877_v60, %v4854_v59  ;;  %v14436_v6 = vpop.f32.mrb[134].mxu1  ;;  %v15494_v59 = vld [vmem:[%s18538_s10 + $0x60] sm:$0xff]  }
 0x92a   : > { %v4884_v18 = vmax.f32 %v4880_v22, 0.0  ;;  %v4881_v25 = vadd.f32 %v14436_v6, %v4877_v60  ;;  %v4857_v41 = vpop.f32.mrb[135].mxu1  ;;  %v15492_v22 = vld [vmem:[%s18538_s10 + $0x58] sm:$0xff]   ;;  %v15496_v6 = vld [vmem:[%s18538_s10 + $0x68] sm:$0xff]  }
 0x92b   : > { %v4882_v10 = vmax.f32 %v4878_v31, 0.0  ;;  %v4879_v14 = vadd.f32 %v4877_v60, %v4857_v41  ;;  %v15490_v60 = vld [vmem:[%s18538_s10 + $0x50] sm:$0xff]   ;;  %v15499_v41 = vld [vmem:[%s18538_s10 + $0x78] sm:$0xff]  }
 0x92c   : > { %v4892_v42 = vmul.f32 %v4889_v27, %v4884_v18  ;;  %v4885_v38 = vmax.f32 %v4881_v25, 0.0  ;;  %v15495_v31 = vld [vmem:[%s18538_s10 + $0x30] sm:$0xff]   ;;  %v15497_v18 = vld [vmem:[%s18538_s10 + $0x38] sm:$0xff]  }
 0x92d   : > { %v4890_v12 = vmul.f32 %v4889_v27, %v4882_v10  ;;  %v4883_v52 = vmax.f32 %v4879_v14, 0.0  ;;  %v15498_v25 = vld [vmem:[%s18538_s10 + $0x70] sm:$0xff]  }
 0x92e   : > { %v4893_v17 = vmul.f32 %v4889_v27, %v4885_v38  ;;  %v4900_v57 = vadd.f32 %v4897_v46, %v4892_v42 }
 0x92f   : > { %v4891_v34 = vmul.f32 %v4889_v27, %v4883_v52  ;;  %v4898_v63 = vadd.f32 %v4897_v46, %v4890_v12  ;;  %v15493_v27 = vld [vmem:[%s18538_s10 + $0x28] sm:$0xff]  }
 0x930   : > { %v4901_v28 = vadd.f32 %v4897_v46, %v4893_v17 }
 0x931   : > { %v4899_v49 = vadd.f32 %v4897_v46, %v4891_v34 }
 0x932   : > { %v15245_v61 = vpack.c.bf16 %v4901_v28, %v4900_v57  ;;  %v5303_v28 = vld [vmem:[%s18539_s18] sm:$0x7]  ;;  %s18543_s18 = sld [smem:[#allocation8_spill]] }
 0x933   : > { %v17415_v1 = vpack.c.bf16 %v4899_v49, %v4898_v63  ;;  %v5307_v63 = vrot.slane %v5303_v28, %v16525_v37 }
 0x935   : > { %15242 = vmatprep.subr.bf16.mxu0 %v17415_v1 }
 0x936   : > { %15244 = vmatpush3.bf16.msra.mxu0 %v17415_v1 }
 0x937   : > { %15246 = vmatprep.subr.bf16.mxu0 %v15245_v61 }
 0x93a   : > { %15248 = vmatpush3.bf16.msra.mxu0 %v15245_v61 }
 0x93b   : > { %15250 = vmatprep.subr.bf16.mxu0 %v17415_v1 }
 0x93d   : > { %14446 = vmatmul.mubr.msk.f32.vlgmr.msra.gmra.mrb[110].mxu0 %vm3688_vm5, %v17275_v48  ;;  %v15475_v48 = vld [vmem:[%s16277_s29 + $0x10] sm:$0xff]  }
 0x93e   : > { %15252 = vmatpush3.bf16.msra.mxu0 %v17415_v1  ;;  %14456 = vmatprep.mubr.msk.f32.mxu0 %vm3688_vm5, %v17261_v23 }
 0x93f   : > { %15254 = vmatprep.subr.bf16.mxu0 %v15245_v61  ;;  %14476 = vmatpush3.bf16.msra.mxu1 %v15475_v48 }
 0x940   : > { %14477 = vmatprep.subr.bf16.mxu1 %v16067_v24 }
 0x942   : > { %15256 = vmatpush3.bf16.msra.mxu0 %v15245_v61 }
 0x943   : > { %14459 = vmatprep.subr.bf16.mxu0 %v16067_v24  ;;  %14478 = vmatpush3.bf16.msra.mxu1 %v15477_v45  ;;  %v5315_v45 = vrot.slane %v5303_v28, %v16532_v47 }
 0x944   : > { %14495 = vmatprep.subr.bf16.mxu1 %v16067_v24 }
 0x945   : > { %14457 = vmatmul.mubr.msk.f32.vlgmr.msra.gmra.mrb[136].mxu0 %vm3688_vm5, %v17281_v56  ;;  %v15479_v56 = vld [vmem:[%s16277_s29 + $0x38] sm:$0xff]  }
 0x946   : > { %14460 = vmatpush3.bf16.msra.mxu0 %v15474_v13  ;;  %14467 = vmatprep.mubr.msk.bf16.mxu0 %vm16069_vm0, %v16067_v24 }
 0x947   : > { %14461 = vmatprep.subr.bf16.mxu0 %v16067_v24 }
 0x94a   : > { %14462 = vmatpush3.bf16.msra.mxu0 %v15476_v2 }
 0x94b   : > { %14463 = vmatprep.subr.bf16.mxu0 %v16067_v24 }
 0x94e   : > { %14464 = vmatpush3.bf16.msra.mxu0 %v15478_v7 }
 0x94f   : > { %14465 = vmatprep.subr.bf16.mxu0 %v16067_v24 }
 0x952   : > { %14466 = vmatpush3.bf16.msra.mxu0 %v15479_v56 }
 0x953   : > { %14483 = vmatprep.subr.bf16.mxu0 %v16067_v24 }
 0xa10   : > { %v14447_v9 = vpop.f32.mrb[110].mxu0 }
 0xa11   : > { %v4972_v4 = vpop.f32.mrb[111].mxu0 }
 0xa18   : > { %v14458_v55 = vpop.f32.mrb[136].mxu0 }
 0xa19   : > { %v5061_v3 = vmax.f32 %v14447_v9, %v14458_v55  ;;  %v5051_v44 = vpop.f32.mrb[137].mxu0 }
 0xa1a   : > { %v5060_v20 = vmax.f32 %v4972_v4, %v5051_v44 }
 0xa1c   : > { %v5062_v26 = vpack.c.bf16 %v5061_v3, %v5060_v20  ;;  %v5321_v3 = vrot.slane %v5303_v28, %v16539_v51 }
 0xa1e   : > { %v5083_v32 = vshll.u32 %v5062_v26, 16  ;;  %14480 = vmatmul.mubr.msk.bf16.vlgmr.msra.gmra.mrb[136].mxu1 %vm4640_vm12, %v5062_v26  ;;  %v5081_v39 = vshrl.u32 %v5062_v26, 16  ;;  %v5232_v11 = vrot.slane %v5062_v26, 1 }
 0xa1f   : > { %14511 = vmatprep.mubr.msk.bf16.mxu1 %vm16069_vm0, %v16067_v24  ;;  %14496 = vmatpush3.bf16.msra.mxu1 %v15486_v50  ;;  %v15505_v50 = vld [vmem:[%s18538_s10 + $0xa8] sm:$0xff]  }
 0xa20   : > { %v5085_v30 = vrot.slane %v5083_v32, 1  ;;  %14497 = vmatprep.subr.bf16.mxu1 %v16067_v24 }
 0xa22   : > { %v5086_v29 = vor.u32 %v5085_v30, %v5081_v39 }
 0xa23   : > { %14498 = vmatpush3.bf16.msra.mxu1 %v15488_v0  ;;  %v15507_v0 = vld [vmem:[%s18538_s10 + $0xb8] sm:$0xff]  }
 0xa24   : > { %14468 = vmatmul.mubr.msk.bf16.vlgmr.msra.gmra.mrb[140].mxu0 %vm4640_vm12, %v5086_v29  ;;  %14499 = vmatprep.subr.bf16.mxu1 %v16067_v24 }
 0xa25   : > { %14484 = vmatpush3.bf16.msra.mxu0 %v15480_v36  ;;  %14491 = vmatprep.mubr.msk.bf16.mxu0 %vm16069_vm0, %v16067_v24 }
 0xa26   : > { %14485 = vmatprep.subr.bf16.mxu0 %v16067_v24 }
 0xa27   : > { %14500 = vmatpush3.bf16.msra.mxu1 %v15490_v60  ;;  %v15508_v60 = vld [vmem:[%s18540_s1] ss:$8 sps:$4 sm:$0xff]  }
 0xa28   : > { %14501 = vmatprep.subr.bf16.mxu1 %v16067_v24 }
 0xa29   : > { %14486 = vmatpush3.bf16.msra.mxu0 %v15481_v8  ;;  %v15500_v8 = vld [vmem:[%s18538_s10 + $0x80] sm:$0xff]  }
 0xa2a   : > { %14487 = vmatprep.subr.bf16.mxu0 %v16067_v24 }
 0xa2b   : > { %14502 = vmatpush3.bf16.msra.mxu1 %v15492_v22  ;;  %v15516_v22 = vld [vmem:[%s18540_s1 + $0x14] ss:$8 sps:$4 sm:$0xff]  }
 0xa2c   : > { %14503 = vmatprep.subr.bf16.mxu1 %v16067_v24 }
 0xa2d   : > { %14488 = vmatpush3.bf16.msra.mxu0 %v15482_v53 }
 0xa2e   : > { %14489 = vmatprep.subr.bf16.mxu0 %v16067_v24 }
 0xa2f   : > { %14504 = vmatpush3.bf16.msra.mxu1 %v15494_v59  ;;  %v15522_v59 = vld [vmem:[%s18540_s1 + $0x24] ss:$8 sps:$4 sm:$0xff]  }
 0xa30   : > { %14505 = vmatprep.subr.bf16.mxu1 %v16067_v24 }
 0xa31   : > { %14490 = vmatpush3.bf16.msra.mxu0 %v15483_v54  ;;  %v15501_v54 = vld [vmem:[%s18538_s10 + $0x88] sm:$0xff]  }
 0xa32   : > { %14515 = vmatprep.subr.bf16.mxu0 %v16067_v24 }
 0xa33   : > { %14506 = vmatpush3.bf16.msra.mxu1 %v15496_v6  ;;  %v15528_v6 = vld [vmem:[%s18540_s1 + $0x34] ss:$8 sps:$4 sm:$0xff]  }
 0xa34   : > { %14492 = vmatmul.mubr.msk.bf16.vlgmr.msra.gmra.mrb[144].mxu0 %vm4640_vm12, %v5232_v11  ;;  %14507 = vmatprep.subr.bf16.mxu1 %v16067_v24  ;;  %v15502_v11 = vld [vmem:[%s18538_s10 + $0x90] sm:$0xff]  }
 0xa35   : > { %14531 = vmatprep.mubr.msk.bf16.mxu0 %vm16069_vm0, %v16067_v24  ;;  %14516 = vmatpush3.bf16.msra.mxu0 %v15484_v43  ;;  %v15503_v43 = vld [vmem:[%s18538_s10 + $0x98] sm:$0xff]  }
 0xa36   : > { %14517 = vmatprep.subr.bf16.mxu0 %v16067_v24 }
 0xa37   : > { %14508 = vmatpush3.bf16.msra.mxu1 %v15498_v25  ;;  %v15534_v25 = vld [vmem:[%s18540_s1 + $0x44] ss:$8 sps:$4 sm:$0xff]  }
 0xa38   : > { %14509 = vmatprep.subr.bf16.mxu1 %v16067_v24 }
 0xa39   : > { %14518 = vmatpush3.bf16.msra.mxu0 %v15485_v19  ;;  %v15504_v19 = vld [vmem:[%s18538_s10 + $0xa0] sm:$0xff]  }
 0xa3a   : > { %14519 = vmatprep.subr.bf16.mxu0 %v16067_v24 }
 0xa3b   : > { %14510 = vmatpush3.bf16.msra.mxu1 %v15499_v41  ;;  %v15532_v41 = vld [vmem:[%s18540_s1 + $0x40] ss:$8 sps:$4 sm:$0xff]  }
 0xa3c   : > { %14535 = vmatprep.subr.bf16.mxu1 %v16067_v24 }
 0xa3d   : > { %14520 = vmatpush3.bf16.msra.mxu0 %v15487_v58  ;;  %v15506_v58 = vld [vmem:[%s18538_s10 + $0xb0] sm:$0xff]  }
 0xa3e   : > { %14521 = vmatprep.subr.bf16.mxu0 %v16067_v24 }
 0xa41   : > { %14522 = vmatpush3.bf16.msra.mxu0 %v15489_v40 }
 0xa42   : > { %14523 = vmatprep.subr.bf16.mxu0 %v16067_v24 }
 0xa45   : > { %14524 = vmatpush3.bf16.msra.mxu0 %v15491_v35  ;;  %v15510_v35 = vld [vmem:[%s18540_s1 + $0x4] ss:$8 sps:$4 sm:$0xff]  }
 0xa46   : > { %14525 = vmatprep.subr.bf16.mxu0 %v16067_v24 }
 0xa49   : > { %14526 = vmatpush3.bf16.msra.mxu0 %v15493_v27  ;;  %v15514_v27 = vld [vmem:[%s18540_s1 + $0x10] ss:$8 sps:$4 sm:$0xff]  }
 0xa4a   : > { %14527 = vmatprep.subr.bf16.mxu0 %v16067_v24 }
 0xa4d   : > { %14528 = vmatpush3.bf16.msra.mxu0 %v15495_v31  ;;  %v15520_v31 = vld [vmem:[%s18540_s1 + $0x20] ss:$8 sps:$4 sm:$0xff]  }
 0xa4e   : > { %14529 = vmatprep.subr.bf16.mxu0 %v16067_v24 }
 0xa51   : > { %14530 = vmatpush3.bf16.msra.mxu0 %v15497_v18  ;;  %v15526_v18 = vld [vmem:[%s18540_s1 + $0x30] ss:$8 sps:$4 sm:$0xff]  }
 0xa52   : > { %15257 = vmatprep.subr.bf16.mxu0 %v16066_v16 }
 0xaf1   : > { %v5215_v10 = vpop.f32.mrb[136].mxu1 }
 0xaf2   : > { %v14481_v14 = vpop.f32.mrb[137].mxu1 }
 0xaf3   : > { %v5218_v42 = vpop.f32.mrb[138].mxu1  ;;  %v15538_v14 = vld [vmem:[%s18540_s1 + $0x50] ss:$8 sps:$4 sm:$0xff]  }
 0xaf4   : > { %v14482_v46 = vpop.f32.mrb[139].mxu1 }
 0xaf7   : > { %v5148_v38 = vpop.f32.mrb[140].mxu0 }
 0xaf8   : > { %v5216_v12 = vadd.f32 %v5215_v10, %v5148_v38  ;;  %v14469_v52 = vpop.f32.mrb[141].mxu0  ;;  %v15540_v10 = vld [vmem:[%s18540_s1 + $0x54] ss:$8 sps:$4 sm:$0xff]  }
 0xaf9   : > { %v5151_v17 = vpop.f32.mrb[142].mxu0 }
 0xafa   : > { %v5219_v34 = vadd.f32 %v5218_v42, %v5151_v17  ;;  %v14470_v57 = vpop.f32.mrb[143].mxu0 }
 0xb07   : > { %v5294_v49 = vpop.f32.mrb[144].mxu0 }
 0xb08   : > { %v5301_v61 = vadd.f32 %v5294_v49, %v5216_v12  ;;  %v14493_v13 = vpop.f32.mrb[145].mxu0  ;;  %v5655_v49 = vld [vmem:[%s18541_s7] sm:$0x7]  ;;  %s18546_s7 = sld [smem:[#allocation10_spill]] }
 0xb09   : > { %v5297_v48 = vpop.f32.mrb[146].mxu0 }
 0xb0a   : > { %v5308_v2 = vadd.f32 %v5307_v63, %v5301_v61  ;;  %v5302_v7 = vadd.f32 %v5297_v48, %v5219_v34  ;;  %v14494_v56 = vpop.f32.mrb[147].mxu0  ;;  %v5659_v61 = vrot.slane %v5655_v49, %v16525_v37 }
 0xb0b   : > { %v5667_v56 = vrot.slane %v5655_v49, %v16532_v47 }
 0xb0c   : > { %v5310_v9 = vmax.f32 %v5308_v2, 0.0  ;;  %v5309_v4 = vadd.f32 %v5307_v63, %v5302_v7 }
 0xb0e   : > { %v5316_v55 = vmul.f32 %v5315_v45, %v5310_v9  ;;  %v5311_v44 = vmax.f32 %v5309_v4, 0.0 }
 0xb10   : > { %v5317_v20 = vmul.f32 %v5315_v45, %v5311_v44  ;;  %v5322_v26 = vadd.f32 %v5321_v3, %v5316_v55 }
 0xb12   : > { %v5323_v32 = vadd.f32 %v5321_v3, %v5317_v20  ;;  %v5673_v20 = vrot.slane %v5655_v49, %v16539_v51  ;;  %v15556_v49 = vld [vmem:[%s18540_s1 + $0x100] ss:$8 sps:$4 sm:$0xff]  }
 0xb14   : > { %v5324_v39 = vpack.c.bf16 %v5323_v32, %v5322_v26 }
 0xb16   : > { %14532 = vmatmul.mubr.bf16.vlgmr.msra.gmra.mrb[148].mxu0 %v5324_v39  ;;  %v5361_v30 = vshll.u32 %v5324_v39, 16  ;;  %v5359_v36 = vshrl.u32 %v5324_v39, 16  ;;  %v5562_v40 = vrot.slane %v5324_v39, 1 }
 0xb17   : > { %14559 = vmatprep.mubr.msk.f32.mxu0 %vm16069_vm0, %v16067_v24 }
 0xb18   : > { %v5363_v29 = vrot.slane %v5361_v30, 1 }
 0xb1a   : > { %v5364_v53 = vor.u32 %v5363_v29, %v5359_v36  ;;  %v15513_v29 = vld [vmem:[%s18540_s1 + $0x84] ss:$8 sps:$4 sm:$0xff]  }
 0xb1c   : > { %14512 = vmatmul.mubr.bf16.vlgmr.msra.gmra.mrb[140].mxu1 %v5364_v53  ;;  %v15519_v53 = vld [vmem:[%s18540_s1 + $0x94] ss:$8 sps:$4 sm:$0xff]  }
 0xb1d   : > { %14536 = vmatpush3.bf16.msra.mxu1 %v15500_v8  ;;  %14551 = vmatprep.mubr.msk.bf16.mxu1 %vm16069_vm0, %v16067_v24  ;;  %v15511_v8 = vld [vmem:[%s18540_s1 + $0x80] ss:$8 sps:$4 sm:$0xff]  }
 0xb1e   : > { %14537 = vmatprep.subr.bf16.mxu1 %v16067_v24 }
 0xb21   : > { %14538 = vmatpush3.bf16.msra.mxu1 %v15501_v54  ;;  %v15523_v54 = vld [vmem:[%s18540_s1 + $0xa0] ss:$8 sps:$4 sm:$0xff]  }
 0xb22   : > { %14539 = vmatprep.subr.bf16.mxu1 %v16067_v24 }
 0xb25   : > { %14540 = vmatpush3.bf16.msra.mxu1 %v15502_v11  ;;  %v15531_v11 = vld [vmem:[%s18540_s1 + $0xb4] ss:$8 sps:$4 sm:$0xff]  }
 0xb26   : > { %14541 = vmatprep.subr.bf16.mxu1 %v16067_v24 }
 0xb29   : > { %14542 = vmatpush3.bf16.msra.mxu1 %v15503_v43  ;;  %v15529_v43 = vld [vmem:[%s18540_s1 + $0xb0] ss:$8 sps:$4 sm:$0xff]  }
 0xb2a   : > { %14543 = vmatprep.subr.bf16.mxu1 %v16067_v24 }
 0xb2d   : > { %14544 = vmatpush3.bf16.msra.mxu1 %v15504_v19  ;;  %v15537_v19 = vld [vmem:[%s18540_s1 + $0xc4] ss:$8 sps:$4 sm:$0xff]  }
 0xb2e   : > { %14545 = vmatprep.subr.bf16.mxu1 %v16067_v24 }
 0xb31   : > { %14546 = vmatpush3.bf16.msra.mxu1 %v15505_v50  ;;  %v15546_v50 = vld [vmem:[%s18540_s1 + $0x64] ss:$8 sps:$4 sm:$0xff]  }
 0xb32   : > { %14547 = vmatprep.subr.bf16.mxu1 %v16067_v24 }
 0xb35   : > { %14548 = vmatpush3.bf16.msra.mxu1 %v15506_v58  ;;  %v15541_v58 = vld [vmem:[%s18540_s1 + $0xd0] ss:$8 sps:$4 sm:$0xff]  }
 0xb36   : > { %14549 = vmatprep.subr.bf16.mxu1 %v16067_v24 }
 0xb39   : > { %14550 = vmatpush3.bf16.msra.mxu1 %v15507_v0  ;;  %v15543_v0 = vld [vmem:[%s18540_s1 + $0xd4] ss:$8 sps:$4 sm:$0xff]  }
 0xb3a   : > { %6069 = vmatprep.subr.bf16.mxu1 %v15510_v35  ;;  %v15549_v35 = vld [vmem:[%s18540_s1 + $0xe4] ss:$8 sps:$4 sm:$0xff]  }
 0xb3c   : > { %14552 = vmatmul.mubr.bf16.vlgmr.msra.gmra.mrb[144].mxu1 %v5562_v40  ;;  %v15544_v40 = vld [vmem:[%s18540_s1 + $0x60] ss:$8 sps:$4 sm:$0xff]  }
 0xb3d   : > { %6070 = vmatpush1.bf16.msra.mxu1 %v15508_v60  ;;  %v15552_v60 = vld [vmem:[%s18540_s1 + $0x74] ss:$8 sps:$4 sm:$0xff]  }
 0xb3e   : > { %6071 = vmatprep.subr.bf16.mxu1 %v15516_v22  ;;  %v15550_v22 = vld [vmem:[%s18540_s1 + $0x70] ss:$8 sps:$4 sm:$0xff]  }
 0xb41   : > { %6072 = vmatpush1.bf16.msra.mxu1 %v15514_v27  ;;  %v15547_v27 = vld [vmem:[%s18540_s1 + $0xe0] ss:$8 sps:$4 sm:$0xff]  }
 0xb42   : > { %6073 = vmatprep.subr.bf16.mxu1 %v15522_v59  ;;  %v15555_v59 = vld [vmem:[%s18540_s1 + $0xf4] ss:$8 sps:$4 sm:$0xff]  }
 0xb45   : > { %6074 = vmatpush1.bf16.msra.mxu1 %v15520_v31  ;;  %v16071_v31 = vmov 0  }
 0xb46   : > { %6075 = vmatprep.subr.bf16.mxu1 %v15528_v6  ;;  %6101 = vmatprep.mubr.bf16.mxu1 %v16071_v31  ;;  %v15553_v6 = vld [vmem:[%s18540_s1 + $0xf0] ss:$8 sps:$4 sm:$0xff]  }
 0xb49   : > { %6076 = vmatpush1.bf16.msra.mxu1 %v15526_v18  ;;  %v15558_v18 = vld [vmem:[%s18540_s1 + $0x104] ss:$8 sps:$4 sm:$0xff]  }
 0xb4a   : > { %6077 = vmatprep.subr.bf16.mxu1 %v15534_v25  ;;  %v15588_v25 = vld [vmem:[%s16307_s21 + $0x104] ss:$8 sps:$4 sm:$0xff]  }
 0xb4d   : > { %6078 = vmatpush1.bf16.msra.mxu1 %v15532_v41 }
 0xb4e   : > { %6079 = vmatprep.subr.bf16.mxu1 %v15540_v10 }
 0xb51   : > { %6080 = vmatpush1.bf16.msra.mxu1 %v15538_v14 }
 0xb52   : > { %6081 = vmatprep.subr.bf16.mxu1 %v15546_v50  ;;  %v15604_v50 = vld [vmem:[%s16307_s21 + $0x130] ss:$8 sps:$4 sm:$0xff]  }
 0xb55   : > { %6082 = vmatpush1.bf16.msra.mxu1 %v15544_v40  ;;  %v15607_v40 = vld [vmem:[%s16307_s21 + $0x50] ss:$8 sps:$4 sm:$0xff]  }
 0xb56   : > { %6083 = vmatprep.subr.bf16.mxu1 %v15552_v60  ;;  %v15612_v60 = vld [vmem:[%s16307_s21 + $0x144] ss:$8 sps:$4 sm:$0xff]  }
 0xb59   : > { %6084 = vmatpush1.bf16.msra.mxu1 %v15550_v22  ;;  %v15615_v22 = vld [vmem:[%s16307_s21 + $0x64] ss:$8 sps:$4 sm:$0xff]  }
 0xb5a   : > { %6560 = vmatprep.subr.bf16.mxu1 %v15588_v25  ;;  %v15619_v25 = vld [vmem:[%s16307_s21 + $0x70] ss:$8 sps:$4 sm:$0xff]  }
 0xbe9   : > { %v5537_v42 = vpop.f32.mrb[148].mxu0 }
 0xbea   : > { %v14533_v46 = vpop.f32.mrb[149].mxu0 }
 0xbeb   : > { %v5540_v38 = vpop.f32.mrb[150].mxu0 }
 0xbec   : > { %v14534_v12 = vpop.f32.mrb[151].mxu0 }
 0xbef   : > { %v5448_v52 = vpop.f32.mrb[140].mxu1 }
 0xbf0   : > { %v5538_v17 = vadd.f32 %v5537_v42, %v5448_v52  ;;  %v14513_v34 = vpop.f32.mrb[141].mxu1  ;;  %v15594_v52 = vld [vmem:[%s16307_s21 + $0x114] ss:$8 sps:$4 sm:$0xff]  }
 0xbf1   : > { %v5451_v57 = vpop.f32.mrb[142].mxu1  ;;  %v15592_v34 = vld [vmem:[%s16307_s21 + $0x110] ss:$8 sps:$4 sm:$0xff]  }
 0xbf2   : > { %v5541_v28 = vadd.f32 %v5540_v38, %v5451_v57  ;;  %v14514_v63 = vpop.f32.mrb[143].mxu1  ;;  %v15586_v38 = vld [vmem:[%s16307_s21 + $0x100] ss:$8 sps:$4 sm:$0xff]  }
 0xbf3   : > { %v15600_v63 = vld [vmem:[%s16307_s21 + $0x124] ss:$8 sps:$4 sm:$0xff]  }
 0xc0f   : > { %v5646_v13 = vpop.f32.mrb[144].mxu1 }
 0xc10   : > { %v5653_v48 = vadd.f32 %v5646_v13, %v5538_v17  ;;  %v14553_v2 = vpop.f32.mrb[145].mxu1  ;;  %v15561_v13 = vld [vmem:[%s18540_s1 + $0x114] ss:$8 sps:$4 sm:$0xff]  }
 0xc11   : > { %v5649_v45 = vpop.f32.mrb[146].mxu1  ;;  %v15559_v2 = vld [vmem:[%s18540_s1 + $0x110] ss:$8 sps:$4 sm:$0xff]  }
 0xc12   : > { %v5660_v7 = vadd.f32 %v5659_v61, %v5653_v48  ;;  %v5654_v9 = vadd.f32 %v5649_v45, %v5541_v28  ;;  %v14554_v4 = vpop.f32.mrb[147].mxu1  ;;  %v15598_v48 = vld [vmem:[%s16307_s21 + $0x120] ss:$8 sps:$4 sm:$0xff]   ;;  %v15564_v45 = vld [vmem:[%s18540_s1 + $0x124] ss:$8 sps:$4 sm:$0xff]  }
 0xc13   : > { %v15570_v4 = vld [vmem:[%s18540_s1 + $0x144] ss:$8 sps:$4 sm:$0xff]  }
 0xc14   : > { %v5662_v55 = vmax.f32 %v5660_v7, 0.0  ;;  %v5661_v3 = vadd.f32 %v5659_v61, %v5654_v9  ;;  %v15562_v7 = vld [vmem:[%s18540_s1 + $0x120] ss:$8 sps:$4 sm:$0xff]   ;;  %v15565_v9 = vld [vmem:[%s18540_s1 + $0x130] ss:$8 sps:$4 sm:$0xff]  }
 0xc16   : > { %v5668_v44 = vmul.f32 %v5667_v56, %v5662_v55  ;;  %v5663_v26 = vmax.f32 %v5661_v3, 0.0  ;;  %v15568_v55 = vld [vmem:[%s18540_s1 + $0x140] ss:$8 sps:$4 sm:$0xff]   ;;  %v15573_v3 = vld [vmem:[%s18540_s1 + $0x154] ss:$8 sps:$4 sm:$0xff]  }
 0xc18   : > { %v5669_v32 = vmul.f32 %v5667_v56, %v5663_v26  ;;  %v5674_v39 = vadd.f32 %v5673_v20, %v5668_v44  ;;  %v15567_v56 = vld [vmem:[%s18540_s1 + $0x134] ss:$8 sps:$4 sm:$0xff]   ;;  %v15571_v44 = vld [vmem:[%s18540_s1 + $0x150] ss:$8 sps:$4 sm:$0xff]   ;;  %v15574_v26 = vld [vmem:[%s18540_s1 + $0x160] ss:$8 sps:$4 sm:$0xff]  }
 0xc1a   : > { %v5675_v30 = vadd.f32 %v5673_v20, %v5669_v32  ;;  %v15576_v20 = vld [vmem:[%s18540_s1 + $0x164] ss:$8 sps:$4 sm:$0xff]   ;;  %v15579_v32 = vld [vmem:[%s18540_s1 + $0x174] ss:$8 sps:$4 sm:$0xff]  }
 0xc1c   : > { %v17530_v36 = vpack.c.bf16 %v5675_v30, %v5674_v39  ;;  %v15577_v39 = vld [vmem:[%s18540_s1 + $0x170] ss:$8 sps:$4 sm:$0xff]   ;;  %v15582_v30 = vld [vmem:[%s16307_s21 + $0x4] ss:$8 sps:$4 sm:$0xff]  }
 0xc1e   : > { %15260 = vmatpush3.bf16.msk.msra.mxu0 %vm15259_vm13, %v17530_v36 }
 0xc1f   : > { %15261 = vmatprep.subr.bf16.mxu0 %v16066_v16  ;;  %v15517_v16 = vld [vmem:[%s18540_s1 + $0x90] ss:$8 sps:$4 sm:$0xff]  }
 0xc21   : > { %14560 = vmatmul.mubr.msk.f32.vlgmr.msra.gmra.mrb[138].mxu0 %vm5676_vm7, %v17255_v62  ;;  %v15525_v62 = vld [vmem:[%s18540_s1 + $0xa4] ss:$8 sps:$4 sm:$0xff]  }
 0xc22   : > { %15264 = vmatpush3.bf16.msk.msra.mxu0 %vm15259_vm13, %v17530_v36  ;;  %14566 = vmatprep.mubr.msk.f32.mxu0 %vm16069_vm0, %v16067_v24  ;;  %vm18562_vm13 = vmmov %vm18554_vm1 }
 0xc23   : > { %5948 = vmatprep.subr.bf16.mxu0 %v15513_v29  ;;  %v15580_v29 = vld [vmem:[%s16307_s21] ss:$8 sps:$4 sm:$0xff]  }
 0xc25   : > { %14567 = vmatmul.mubr.msk.f32.vlgmr.msra.gmra.mrb[152].mxu0 %vm5676_vm7, %v17261_v23  ;;  %v15535_v23 = vld [vmem:[%s18540_s1 + $0xc0] ss:$8 sps:$4 sm:$0xff]   ;;  %s18548_s1 = sld [smem:[#allocation9_spill]]  ;;  %vm18563_vm7 = vmmov %vm18554_vm1 }
 0xc26   : > { %5949 = vmatpush1.bf16.msra.mxu0 %v15511_v8  ;;  %5980 = vmatprep.mubr.bf16.mxu0 %v16071_v31 }
 0xc27   : > { %5950 = vmatprep.subr.bf16.mxu0 %v15519_v53  ;;  %v15585_v53 = vld [vmem:[%s16307_s21 + $0x14] ss:$8 sps:$4 sm:$0xff]  }
 0xc2a   : > { %5951 = vmatpush1.bf16.msra.mxu0 %v15517_v16  ;;  %v15583_v16 = vld [vmem:[%s16307_s21 + $0x10] ss:$8 sps:$4 sm:$0xff]  }
 0xc2b   : > { %5952 = vmatprep.subr.bf16.mxu0 %v15525_v62  ;;  %v15591_v62 = vld [vmem:[%s16307_s21 + $0x24] ss:$8 sps:$4 sm:$0xff]  }
 0xc2e   : > { %5953 = vmatpush1.bf16.msra.mxu0 %v15523_v54  ;;  %v15589_v54 = vld [vmem:[%s16307_s21 + $0x20] ss:$8 sps:$4 sm:$0xff]  }
 0xc2f   : > { %5954 = vmatprep.subr.bf16.mxu0 %v15531_v11  ;;  %v15597_v11 = vld [vmem:[%s16307_s21 + $0x34] ss:$8 sps:$4 sm:$0xff]  }
 0xc32   : > { %5955 = vmatpush1.bf16.msra.mxu0 %v15529_v43  ;;  %v15595_v43 = vld [vmem:[%s16307_s21 + $0x30] ss:$8 sps:$4 sm:$0xff]  }
 0xc33   : > { %5956 = vmatprep.subr.bf16.mxu0 %v15537_v19  ;;  %v15601_v19 = vld [vmem:[%s16307_s21 + $0x40] ss:$8 sps:$4 sm:$0xff]  }
 0xc36   : > { %5957 = vmatpush1.bf16.msra.mxu0 %v15535_v23  ;;  %v15603_v23 = vld [vmem:[%s16307_s21 + $0x44] ss:$8 sps:$4 sm:$0xff]  }
 0xc37   : > { %5958 = vmatprep.subr.bf16.mxu0 %v15543_v0  ;;  %v15609_v0 = vld [vmem:[%s16307_s21 + $0x54] ss:$8 sps:$4 sm:$0xff]  }
 0xc3a   : > { %5959 = vmatpush1.bf16.msra.mxu0 %v15541_v58  ;;  %v15606_v58 = vld [vmem:[%s16307_s21 + $0x134] ss:$8 sps:$4 sm:$0xff]  }
 0xc3b   : > { %5960 = vmatprep.subr.bf16.mxu0 %v15549_v35  ;;  %v15610_v35 = vld [vmem:[%s16307_s21 + $0x140] ss:$8 sps:$4 sm:$0xff]  }
 0xc3e   : > { %5961 = vmatpush1.bf16.msra.mxu0 %v15547_v27  ;;  %v15613_v27 = vld [vmem:[%s16307_s21 + $0x60] ss:$8 sps:$4 sm:$0xff]  }
 0xc3f   : > { %5962 = vmatprep.subr.bf16.mxu0 %v15555_v59  ;;  %v15618_v59 = vld [vmem:[%s16307_s21 + $0x154] ss:$8 sps:$4 sm:$0xff]  }
 0xc42   : > { %5963 = vmatpush1.bf16.msra.mxu0 %v15553_v6  ;;  %v15621_v6 = vld [vmem:[%s16307_s21 + $0x74] ss:$8 sps:$4 sm:$0xff]  }
 0xc43   : > { %6210 = vmatprep.subr.bf16.mxu0 %v15558_v18  ;;  %v15624_v18 = vld [vmem:[%s16307_s21 + $0x164] ss:$8 sps:$4 sm:$0xff]  }
 0xcf4   : > { %v5749_v41 = vpop.f32.mrb[138].mxu0 }
 0xcf5   : > { %v14561_v10 = vpop.f32.mrb[139].mxu0 }
 0xcf6   : > { %v15627_v10 = vld [vmem:[%s16307_s21 + $0x84] ss:$8 sps:$4 sm:$0xff]  }
 0xcf8   : > { %v5821_v14 = vpop.f32.mrb[152].mxu0 }
 0xcf9   : > { %v5825_v42 = vmax.f32 %v5749_v41, %v5821_v14  ;;  %v14568_v46 = vpop.f32.mrb[153].mxu0  ;;  %v15622_v41 = vld [vmem:[%s16307_s21 + $0x160] ss:$8 sps:$4 sm:$0xff]   ;;  %v15630_v14 = vld [vmem:[%s16307_s21 + $0x174] ss:$8 sps:$4 sm:$0xff]  }
 0xcfa   : > { %v15628_v46 = vld [vmem:[%s16307_s21 + $0x170] ss:$8 sps:$4 sm:$0xff]  }
 0xcfb   : > { %v5826_v12 = vpack.c.bf16 %v5825_v42, %v5825_v42  ;;  %v15625_v42 = vld [vmem:[%s16307_s21 + $0x80] ss:$8 sps:$4 sm:$0xff]  }
 0xcfd   : > { %v5863_v17 = vshll.u32 %v5826_v12, 16  ;;  %6102 = vmatmul.mubr.bf16.vlgmr.msra.gmra.mrb[148].mxu1 %v5826_v12  ;;  %v5861_v57 = vshrl.u32 %v5826_v12, 16  ;;  %v6128_v8 = vrot.slane %v5826_v12, 1  ;;  %v15636_v12 = vld [vmem:[%s16307_s21 + $0x184] ss:$8 sps:$4 sm:$0xff]  }
 0xcfe   : > { %6561 = vmatpush1.bf16.msra.mxu1 %v15586_v38  ;;  %v15633_v38 = vld [vmem:[%s16307_s21 + $0x94] ss:$8 sps:$4 sm:$0xff]  }
 0xcff   : > { %v5865_v28 = vrot.slane %v5863_v17, 1  ;;  %6562 = vmatprep.subr.bf16.mxu1 %v15594_v52  ;;  %v15631_v52 = vld [vmem:[%s16307_s21 + $0x90] ss:$8 sps:$4 sm:$0xff]   ;;  %v15634_v17 = vld [vmem:[%s16307_s21 + $0x180] ss:$8 sps:$4 sm:$0xff]  }
 0xd01   : > { %v5866_v61 = vor.u32 %v5865_v28, %v5861_v57  ;;  %v15642_v57 = vld [vmem:[%s16307_s21 + $0x194] ss:$8 sps:$4 sm:$0xff]   ;;  %v15637_v28 = vld [vmem:[%s16307_s21 + $0xa0] ss:$8 sps:$4 sm:$0xff]  }
 0xd02   : > { %6563 = vmatpush1.bf16.msra.mxu1 %v15592_v34  ;;  %v15639_v34 = vld [vmem:[%s16307_s21 + $0xa4] ss:$8 sps:$4 sm:$0xff]  }
 0xd03   : > { %5981 = vmatmul.mubr.bf16.vlgmr.msra.gmra.mrb[156].mxu0 %v5866_v61  ;;  %6564 = vmatprep.subr.bf16.mxu1 %v15600_v63  ;;  %v15640_v63 = vld [vmem:[%s16307_s21 + $0x190] ss:$8 sps:$4 sm:$0xff]   ;;  %v15648_v61 = vld [vmem:[%s16307_s21 + $0x1a4] ss:$8 sps:$4 sm:$0xff]  }
 0xd04   : > { %6211 = vmatpush1.bf16.msra.mxu0 %v15556_v49  ;;  %6242 = vmatprep.mubr.bf16.mxu0 %v16071_v31  ;;  %v15616_v31 = vld [vmem:[%s16307_s21 + $0x150] ss:$8 sps:$4 sm:$0xff]   ;;  %v15645_v49 = vld [vmem:[%s16307_s21 + $0xb4] ss:$8 sps:$4 sm:$0xff]  }
 0xd05   : > { %6212 = vmatprep.subr.bf16.mxu0 %v15561_v13  ;;  %v15643_v13 = vld [vmem:[%s16307_s21 + $0xb0] ss:$8 sps:$4 sm:$0xff]  }
 0xd06   : > { %6565 = vmatpush1.bf16.msra.mxu1 %v15598_v48  ;;  %v15646_v48 = vld [vmem:[%s16307_s21 + $0x1a0] ss:$8 sps:$4 sm:$0xff]  }
 0xd07   : > { %6566 = vmatprep.subr.bf16.mxu1 %v15606_v58 }
 0xd08   : > { %6213 = vmatpush1.bf16.msra.mxu0 %v15559_v2  ;;  %v15651_v2 = vld [vmem:[%s16307_s21 + $0xc4] ss:$8 sps:$4 sm:$0xff]  }
 0xd09   : > { %6214 = vmatprep.subr.bf16.mxu0 %v15564_v45  ;;  %v15649_v45 = vld [vmem:[%s16307_s21 + $0xc0] ss:$8 sps:$4 sm:$0xff]  }
 0xd0a   : > { %6567 = vmatpush1.bf16.msra.mxu1 %v15604_v50 }
 0xd0b   : > { %6568 = vmatprep.subr.bf16.mxu1 %v15612_v60 }
 0xd0c   : > { %6215 = vmatpush1.bf16.msra.mxu0 %v15562_v7  ;;  %v15654_v7 = vld [vmem:[%s16307_s21 + $0x1b4] ss:$8 sps:$4 sm:$0xff]  }
 0xd0d   : > { %6216 = vmatprep.subr.bf16.mxu0 %v15567_v56  ;;  %v15652_v56 = vld [vmem:[%s16307_s21 + $0x1b0] ss:$8 sps:$4 sm:$0xff]  }
 0xd0e   : > { %6569 = vmatpush1.bf16.msra.mxu1 %v15610_v35  ;;  %v6253_v35 = vld [vmem:[%s18542_s3] sm:$0x77]  ;;  %s18550_s3 = sld [smem:[#allocation11_spill]] }
 0xd0f   : > { %6570 = vmatprep.subr.bf16.mxu1 %v15618_v59 }
 0xd10   : > { %6217 = vmatpush1.bf16.msra.mxu0 %v15565_v9  ;;  %v15657_v9 = vld [vmem:[%s16307_s21 + $0xd4] ss:$8 sps:$4 sm:$0xff]  }
 0xd11   : > { %6218 = vmatprep.subr.bf16.mxu0 %v15570_v4  ;;  %v15655_v4 = vld [vmem:[%s16307_s21 + $0xd0] ss:$8 sps:$4 sm:$0xff]  }
 0xd12   : > { %6571 = vmatpush1.bf16.msra.mxu1 %v15616_v31  ;;  %v6283_v31 = vsub.s32 5, %v16522_v33 }
 0xd13   : > { %6572 = vmatprep.subr.bf16.mxu1 %v15624_v18 }
 0xd14   : > { %6219 = vmatpush1.bf16.msra.mxu0 %v15568_v55  ;;  %v15660_v55 = vld [vmem:[%s16307_s21 + $0x1c4] ss:$8 sps:$4 sm:$0xff]  }
 0xd15   : > { %6220 = vmatprep.subr.bf16.mxu0 %v15573_v3  ;;  %v15658_v3 = vld [vmem:[%s16307_s21 + $0x1c0] ss:$8 sps:$4 sm:$0xff]  }
 0xd16   : > { %6573 = vmatpush1.bf16.msra.mxu1 %v15622_v41 }
 0xd17   : > { %6574 = vmatprep.subr.bf16.mxu1 %v15630_v14  ;;  %v6284_v14 = vrot.slane %v6253_v35, %v6283_v31 }
 0xd18   : > { %6221 = vmatpush1.bf16.msra.mxu0 %v15571_v44  ;;  %v15663_v44 = vld [vmem:[%s16307_s21 + $0xe4] ss:$8 sps:$4 sm:$0xff]  }
 0xd19   : > { %6222 = vmatprep.subr.bf16.mxu0 %v15576_v20  ;;  %v15661_v20 = vld [vmem:[%s16307_s21 + $0xe0] ss:$8 sps:$4 sm:$0xff]  }
 0xd1a   : > { %6575 = vmatpush1.bf16.msra.mxu1 %v15628_v46  ;;  %v6300_v46 = vrot.slane %v6253_v35, %v16539_v51 }
 0xd1b   : > { %6576 = vmatprep.subr.bf16.mxu1 %v15636_v12 }
 0xd1c   : > { %6223 = vmatpush1.bf16.msra.mxu0 %v15574_v26  ;;  %v15666_v26 = vld [vmem:[%s16307_s21 + $0x1d4] ss:$8 sps:$4 sm:$0xff]  }
 0xd1d   : > { %6224 = vmatprep.subr.bf16.mxu0 %v15579_v32  ;;  %v15664_v32 = vld [vmem:[%s16307_s21 + $0x1d0] ss:$8 sps:$4 sm:$0xff]  }
 0xd1e   : > { %6577 = vmatpush1.bf16.msra.mxu1 %v15634_v17 }
 0xd1f   : > { %6578 = vmatprep.subr.bf16.mxu1 %v15642_v57 }
 0xd20   : > { %6225 = vmatpush1.bf16.msra.mxu0 %v15577_v39  ;;  %v15669_v39 = vld [vmem:[%s16307_s21 + $0xf4] ss:$8 sps:$4 sm:$0xff]  }
 0xd21   : > { %6761 = vmatprep.subr.bf16.mxu0 %v15582_v30  ;;  %v15667_v30 = vld [vmem:[%s16307_s21 + $0xf0] ss:$8 sps:$4 sm:$0xff]  }
 0xd22   : > { %6579 = vmatpush1.bf16.msra.mxu1 %v15640_v63 }
 0xd23   : > { %6243 = vmatmul.mubr.bf16.vlgmr.msra.gmra.mrb[160].mxu0 %v6128_v8  ;;  %6580 = vmatprep.subr.bf16.mxu1 %v15648_v61  ;;  %v15672_v8 = vld [vmem:[%s16307_s21 + $0x1e4] ss:$8 sps:$4 sm:$0xff]  }
 0xd24   : > { %6762 = vmatpush1.bf16.msra.mxu0 %v15580_v29  ;;  %v15670_v29 = vld [vmem:[%s16307_s21 + $0x1e0] ss:$8 sps:$4 sm:$0xff]  }
 0xd25   : > { %6763 = vmatprep.subr.bf16.mxu0 %v15585_v53  ;;  %v15675_v53 = vld [vmem:[%s16307_s21 + $0x1f4] ss:$8 sps:$4 sm:$0xff]  }
 0xd26   : > { %6581 = vmatpush1.bf16.msra.mxu1 %v15646_v48 }
 0xd27   : > { %6582 = vmatprep.subr.bf16.mxu1 %v15654_v7 }
 0xd28   : > { %6764 = vmatpush1.bf16.msra.mxu0 %v15583_v16  ;;  %v15673_v16 = vld [vmem:[%s16307_s21 + $0x1f0] ss:$8 sps:$4 sm:$0xff]  }
 0xd29   : > { %6765 = vmatprep.subr.bf16.mxu0 %v15591_v62  ;;  %v15678_v62 = vld [vmem:[%s16307_s21 + $0x204] ss:$8 sps:$4 sm:$0xff]  }
 0xd2a   : > { %6583 = vmatpush1.bf16.msra.mxu1 %v15652_v56 }
 0xd2b   : > { %6584 = vmatprep.subr.bf16.mxu1 %v15660_v55 }
 0xd2c   : > { %6766 = vmatpush1.bf16.msra.mxu0 %v15589_v54 }
 0xd2d   : > { %6767 = vmatprep.subr.bf16.mxu0 %v15597_v11 }
 0xd2e   : > { %6585 = vmatpush1.bf16.msra.mxu1 %v15658_v3 }
 0xd2f   : > { %6586 = vmatprep.subr.bf16.mxu1 %v15666_v26 }
 0xd30   : > { %6768 = vmatpush1.bf16.msra.mxu0 %v15595_v43 }
 0xd31   : > { %6769 = vmatprep.subr.bf16.mxu0 %v15603_v23 }
 0xd32   : > { %6587 = vmatpush1.bf16.msra.mxu1 %v15664_v32 }
 0xd33   : > { %6588 = vmatprep.subr.bf16.mxu1 %v15672_v8 }
 0xd34   : > { %6770 = vmatpush1.bf16.msra.mxu0 %v15601_v19 }
 0xd35   : > { %6771 = vmatprep.subr.bf16.mxu0 %v15609_v0 }
 0xd36   : > { %6589 = vmatpush1.bf16.msra.mxu1 %v15670_v29  ;;  %v15676_v29 = vld [vmem:[%s16307_s21 + $0x200] ss:$8 sps:$4 sm:$0xff]  }
 0xd37   : > { %6590 = vmatprep.subr.bf16.mxu1 %v15675_v53  ;;  %v15681_v53 = vld [vmem:[%s16307_s21 + $0x214] ss:$8 sps:$4 sm:$0xff]  }
 0xd38   : > { %6772 = vmatpush1.bf16.msra.mxu0 %v15607_v40 }
 0xd39   : > { %6773 = vmatprep.subr.bf16.mxu0 %v15615_v22  ;;  %v6261_v22 = vsub.s32 4, %v16522_v33 }
 0xd3a   : > { %6591 = vmatpush1.bf16.msra.mxu1 %v15673_v16 }
 0xd3b   : > { %7001 = vmatprep.subr.bf16.mxu1 %v15678_v62  ;;  %v6262_v59 = vrot.slane %v6253_v35, %v6261_v22  ;;  %v15679_v62 = vld [vmem:[%s16307_s21 + $0x210] ss:$8 sps:$4 sm:$0xff]  }
 0xd3c   : > { %6774 = vmatpush1.bf16.msra.mxu0 %v15613_v27  ;;  %v6258_v27 = vrot.slane %v6253_v35, %v16525_v37 }
 0xd3d   : > { %6775 = vmatprep.subr.bf16.mxu0 %v15621_v6  ;;  %v6303_v6 = vsub.s32 6, %v16522_v33 }
 0xd3e   : > { %v6268_v18 = vrot.slane %v6258_v27, %v16525_v37  ;;  %v15697_v27 = vld [vmem:[%s16307_s21 + $0x270] ss:$8 sps:$4 sm:$0xff]  }
 0xd40   : > { %6776 = vmatpush1.bf16.msra.mxu0 %v15619_v25  ;;  %v6280_v25 = vrot.slane %v6253_v35, %v16532_v47 }
 0xd41   : > { %6777 = vmatprep.subr.bf16.mxu0 %v15627_v10  ;;  %v6272_v10 = vrot.slane %v6262_v59, %v16525_v37  ;;  %v15702_v59 = vld [vmem:[%s16307_s21 + $0x284] ss:$8 sps:$4 sm:$0xff]  }
 0xd42   : > { %v6290_v57 = vrot.slane %v6280_v25, %v16532_v47  ;;  %v15705_v25 = vld [vmem:[%s16307_s21 + $0x294] ss:$8 sps:$4 sm:$0xff]  }
 0xd44   : > { %6778 = vmatpush1.bf16.msra.mxu0 %v15625_v42 }
 0xd45   : > { %6779 = vmatprep.subr.bf16.mxu0 %v15633_v38 }
 0xd48   : > { %6780 = vmatpush1.bf16.msra.mxu0 %v15631_v52  ;;  %v6304_v52 = vrot.slane %v6253_v35, %v6303_v6  ;;  %v15699_v35 = vld [vmem:[%s16307_s21 + $0x274] ss:$8 sps:$4 sm:$0xff]  }
 0xd49   : > { %6781 = vmatprep.subr.bf16.mxu0 %v15639_v34 }
 0xd4c   : > { %6782 = vmatpush1.bf16.msra.mxu0 %v15637_v28 }
 0xd4d   : > { %6783 = vmatprep.subr.bf16.mxu0 %v15645_v49  ;;  %v6294_v49 = vrot.slane %v6284_v14, %v16532_v47  ;;  %v15706_v14 = vld [vmem:[%s16307_s21 + $0x2a0] ss:$8 sps:$4 sm:$0xff]  }
 0xd50   : > { %6784 = vmatpush1.bf16.msra.mxu0 %v15643_v13  ;;  %v6310_v13 = vrot.slane %v6300_v46, %v16539_v51  ;;  %v15709_v46 = vld [vmem:[%s16307_s21 + $0x2b0] ss:$8 sps:$4 sm:$0xff]  }
 0xd51   : > { %6785 = vmatprep.subr.bf16.mxu0 %v15651_v2  ;;  %v6314_v2 = vrot.slane %v6304_v52, %v16539_v51  ;;  %v15717_v52 = vld [vmem:[%s16307_s21 + $0x2d4] ss:$8 sps:$4 sm:$0xff]  }
 0xd54   : > { %6786 = vmatpush1.bf16.msra.mxu0 %v15649_v45 }
 0xd55   : > { %6787 = vmatprep.subr.bf16.mxu0 %v15657_v9 }
 0xd58   : > { %6788 = vmatpush1.bf16.msra.mxu0 %v15655_v4 }
 0xd59   : > { %6789 = vmatprep.subr.bf16.mxu0 %v15663_v44 }
 0xd5c   : > { %6790 = vmatpush1.bf16.msra.mxu0 %v15661_v20 }
 0xd5d   : > { %6791 = vmatprep.subr.bf16.mxu0 %v15669_v39 }
 0xd60   : > { %6792 = vmatpush1.bf16.msra.mxu0 %v15667_v30 }
 0xdd0   : > { %v6103_v54 = vpop.f32.mrb[148].mxu1 }
 0xdd1   : > { %v6105_v11 = vpop.f32.mrb[149].mxu1 }
 0xdd2   : > { %v6107_v43 = vpop.f32.mrb[150].mxu1 }
 0xdd3   : > { %v6108_v19 = vpop.f32.mrb[151].mxu1  ;;  %v15687_v43 = vld [vmem:[%s16307_s21 + $0x234] ss:$8 sps:$4 sm:$0xff]  }
 0xdd4   : > { %v15685_v19 = vld [vmem:[%s16307_s21 + $0x230] ss:$8 sps:$4 sm:$0xff]  }
 0xdd6   : > { %v5982_v23 = vpop.f32.mrb[156].mxu0 }
 0xdd7   : > { %v6104_v50 = vadd.f32 %v6103_v54, %v5982_v23  ;;  %v5984_v58 = vpop.f32.mrb[157].mxu0  ;;  %v15684_v54 = vld [vmem:[%s16307_s21 + $0x224] ss:$8 sps:$4 sm:$0xff]  }
 0xdd8   : > { %v6106_v0 = vadd.f32 %v6105_v11, %v5984_v58  ;;  %v5986_v40 = vpop.f32.mrb[158].mxu0  ;;  %v15682_v11 = vld [vmem:[%s16307_s21 + $0x220] ss:$8 sps:$4 sm:$0xff]   ;;  %v15690_v23 = vld [vmem:[%s16307_s21 + $0x244] ss:$8 sps:$4 sm:$0xff]  }
 0xdd9   : > { %v5987_v60 = vpop.f32.mrb[159].mxu0  ;;  %v15693_v58 = vld [vmem:[%s16307_s21 + $0x254] ss:$8 sps:$4 sm:$0xff]   ;;  %v15696_v40 = vld [vmem:[%s16307_s21 + $0x264] ss:$8 sps:$4 sm:$0xff]  }
 0xdda   : > { %v15694_v60 = vld [vmem:[%s16307_s21 + $0x260] ss:$8 sps:$4 sm:$0xff]  }
 0xdf6   : > { %v6244_v41 = vpop.f32.mrb[160].mxu0 }
 0xdf7   : > { %v6251_v42 = vadd.f32 %v6244_v41, %v6104_v50  ;;  %v6246_v38 = vpop.f32.mrb[161].mxu0  ;;  %v15688_v50 = vld [vmem:[%s16307_s21 + $0x240] ss:$8 sps:$4 sm:$0xff]   ;;  %v15703_v41 = vld [vmem:[%s16307_s21 + $0x290] ss:$8 sps:$4 sm:$0xff]  }
 0xdf8   : > { %v6252_v12 = vadd.f32 %v6246_v38, %v6106_v0  ;;  %v6248_v17 = vpop.f32.mrb[162].mxu0  ;;  %v15691_v0 = vld [vmem:[%s16307_s21 + $0x250] ss:$8 sps:$4 sm:$0xff]   ;;  %v15714_v38 = vld [vmem:[%s16307_s21 + $0x2c4] ss:$8 sps:$4 sm:$0xff]  }
 0xdf9   : > { %v6273_v34 = vadd.f32 %v6268_v18, %v6251_v42  ;;  %v6249_v28 = vpop.f32.mrb[163].mxu0  ;;  %v15700_v18 = vld [vmem:[%s16307_s21 + $0x280] ss:$8 sps:$4 sm:$0xff]   ;;  %v15711_v42 = vld [vmem:[%s16307_s21 + $0x2b4] ss:$8 sps:$4 sm:$0xff]  }
 0xdfa   : > { %v6274_v63 = vadd.f32 %v6272_v10, %v6252_v12  ;;  %v15708_v10 = vld [vmem:[%s16307_s21 + $0x2a4] ss:$8 sps:$4 sm:$0xff]   ;;  %v15712_v12 = vld [vmem:[%s16307_s21 + $0x2c0] ss:$8 sps:$4 sm:$0xff]   ;;  %v15715_v17 = vld [vmem:[%s16307_s21 + $0x2d0] ss:$8 sps:$4 sm:$0xff]  }
 0xdfb   : > { %v6275_v61 = vmax.f32 %v6273_v34, 0.0  ;;  %v15720_v34 = vld [vmem:[%s16307_s21 + $0x2e4] ss:$8 sps:$4 sm:$0xff]   ;;  %v15723_v28 = vld [vmem:[%s16307_s21 + $0x2f4] ss:$8 sps:$4 sm:$0xff]  }
 0xdfc   : > { %v6276_v48 = vmax.f32 %v6274_v63, 0.0  ;;  %v15721_v63 = vld [vmem:[%s16307_s21 + $0x2f0] ss:$8 sps:$4 sm:$0xff]  }
 0xdfd   : > { %v6295_v45 = vmul.f32 %v6290_v57, %v6275_v61  ;;  %v15718_v57 = vld [vmem:[%s16307_s21 + $0x2e0] ss:$8 sps:$4 sm:$0xff]  }
 0xdfe   : > { %v6296_v7 = vmul.f32 %v6294_v49, %v6276_v48  ;;  %v15724_v61 = vld [vmem:[%s18543_s18 + $0x40] sm:$0xff]   ;;  %v15726_v48 = vld [vmem:[%s18543_s18 + $0x48] sm:$0xff]  }
 0xdff   : > { %v6315_v56 = vadd.f32 %v6310_v13, %v6295_v45  ;;  %v15725_v13 = vld [vmem:[%s18543_s18] sm:$0xff]   ;;  %13705 = vmatprep.subr.bf16.mxu0 %v15724_v61  ;;  %v15728_v45 = vld [vmem:[%s18543_s18 + $0x50] sm:$0xff]  }
 0xe00   : > { %v6316_v9 = vadd.f32 %v6314_v2, %v6296_v7  ;;  %v15727_v2 = vld [vmem:[%s18543_s18 + $0x8] sm:$0xff]   ;;  %v15729_v7 = vld [vmem:[%s18543_s18 + $0x10] sm:$0xff]  }
 0xe01   : > { %v17659_v4 = vpack.c.bf16 %v6315_v56, %v6315_v56  ;;  %v15730_v56 = vld [vmem:[%s18543_s18 + $0x58] sm:$0xff]  }
 0xe02   : > { %v6318_v55 = vpack.c.bf16 %v6316_v9, %v6316_v9  ;;  %v15731_v9 = vld [vmem:[%s18543_s18 + $0x18] sm:$0xff]  }
 0xe03   : > { %v6387_v3 = vshll.u32 %v17659_v4, 16  ;;  %v6385_v39 = vshrl.u32 %v17659_v4, 16  ;;  %v6837_v49 = vrot.slane %v17659_v4, 1 }
 0xe04   : > { %6793 = vmatprep.mubr.bf16.mxu0 %v6318_v55  ;;  %v6394_v44 = vshll.u32 %v6318_v55, 16  ;;  %v6392_v26 = vshrl.u32 %v6318_v55, 16  ;;  %v6838_v16 = vrot.slane %v6318_v55, 1  ;;  %v15733_v55 = vld [vmem:[%s18543_s18 + $0x20] sm:$0xff]  }
 0xe05   : > { %6794 = vmatmul.mubr.bf16.vlgmr.msra.gmra.mrb[164].mxu0 %v17659_v4  ;;  %v6389_v20 = vrot.slane %v6387_v3, 1  ;;  %v15732_v4 = vld [vmem:[%s18543_s18 + $0x60] sm:$0xff]   ;;  %v15734_v3 = vld [vmem:[%s18543_s18 + $0x68] sm:$0xff]  }
 0xe06   : > { %v6396_v32 = vrot.slane %v6394_v44, 1  ;;  %13706 = vmatpush3.bf16.msra.mxu0 %v15725_v13  ;;  %v15735_v44 = vld [vmem:[%s18543_s18 + $0x28] sm:$0xff]   ;;  %v15741_v13 = vld [vmem:[%s18543_s18 + $0x80] sm:$0xff]  }
 0xe07   : > { %v6390_v8 = vor.u32 %v6389_v20, %v6385_v39  ;;  %13707 = vmatprep.subr.bf16.mxu0 %v15726_v48  ;;  %v15736_v20 = vld [vmem:[%s18543_s18 + $0x70] sm:$0xff]   ;;  %v15739_v39 = vld [vmem:[%s18543_s18 + $0x38] sm:$0xff]  }
 0xe08   : > { %v6397_v30 = vor.u32 %v6396_v32, %v6392_v26  ;;  %v15737_v26 = vld [vmem:[%s18543_s18 + $0x30] sm:$0xff]   ;;  %v15738_v32 = vld [vmem:[%s18543_s18 + $0x78] sm:$0xff]  }
 0xe0a   : > { %6592 = vmatprep.mubr.bf16.mxu1 %v6397_v30  ;;  %13708 = vmatpush3.bf16.msra.mxu0 %v15727_v2  ;;  %v15740_v30 = vld [vmem:[%s18543_s18 + $0xc0] sm:$0xff]   ;;  %v15742_v2 = vld [vmem:[%s18543_s18 + $0xc8] sm:$0xff]  }
 0xe0b   : > { %6593 = vmatmul.mubr.bf16.vlgmr.msra.gmra.mrb[152].mxu1 %v6390_v8  ;;  %13709 = vmatprep.subr.bf16.mxu0 %v15728_v45  ;;  %v15743_v45 = vld [vmem:[%s18543_s18 + $0x88] sm:$0xff]  }
 0xe0c   : > { %7002 = vmatpush1.bf16.msra.mxu1 %v15676_v29  ;;  %7033 = vmatprep.mubr.bf16.mxu1 %v6838_v16 }
 0xe0d   : > { %7003 = vmatprep.subr.bf16.mxu1 %v15681_v53 }
 0xe0e   : > { %13710 = vmatpush3.bf16.msra.mxu0 %v15729_v7  ;;  %v15744_v7 = vld [vmem:[%s18543_s18 + $0xd0] sm:$0xff]  }
 0xe0f   : > { %13711 = vmatprep.subr.bf16.mxu0 %v15730_v56  ;;  %v15745_v56 = vld [vmem:[%s18543_s18 + $0x90] sm:$0xff]  }
 0xe10   : > { %7004 = vmatpush1.bf16.msra.mxu1 %v15679_v62 }
 0xe11   : > { %7005 = vmatprep.subr.bf16.mxu1 %v15684_v54 }
 0xe12   : > { %13712 = vmatpush3.bf16.msra.mxu0 %v15731_v9  ;;  %v15746_v9 = vld [vmem:[%s18543_s18 + $0xd8] sm:$0xff]  }
 0xe13   : > { %13713 = vmatprep.subr.bf16.mxu0 %v15732_v4  ;;  %v15747_v4 = vld [vmem:[%s18543_s18 + $0x98] sm:$0xff]  }
 0xe14   : > { %7006 = vmatpush1.bf16.msra.mxu1 %v15682_v11 }
 0xe15   : > { %7007 = vmatprep.subr.bf16.mxu1 %v15687_v43 }
 0xe16   : > { %13714 = vmatpush3.bf16.msra.mxu0 %v15733_v55  ;;  %v15748_v55 = vld [vmem:[%s18543_s18 + $0xe0] sm:$0xff]  }
 0xe17   : > { %13715 = vmatprep.subr.bf16.mxu0 %v15734_v3  ;;  %v15749_v3 = vld [vmem:[%s18543_s18 + $0xa0] sm:$0xff]  }
 0xe18   : > { %7008 = vmatpush1.bf16.msra.mxu1 %v15685_v19 }
 0xe19   : > { %7009 = vmatprep.subr.bf16.mxu1 %v15690_v23 }
 0xe1a   : > { %13716 = vmatpush3.bf16.msra.mxu0 %v15735_v44  ;;  %v15750_v44 = vld [vmem:[%s18543_s18 + $0xe8] sm:$0xff]  }
 0xe1b   : > { %13717 = vmatprep.subr.bf16.mxu0 %v15736_v20  ;;  %v15751_v20 = vld [vmem:[%s18543_s18 + $0xa8] sm:$0xff]  }
 0xe1c   : > { %7010 = vmatpush1.bf16.msra.mxu1 %v15688_v50  ;;  %v7044_v50 = vld [vmem:[%s16312_s25] sm:$0x77] }
 0xe1d   : > { %7011 = vmatprep.subr.bf16.mxu1 %v15693_v58  ;;  %v7049_v58 = vrot.slane %v7044_v50, %v16525_v37 }
 0xe1e   : > { %13718 = vmatpush3.bf16.msra.mxu0 %v15737_v26  ;;  %v15752_v26 = vld [vmem:[%s18543_s18 + $0xf0] sm:$0xff]  }
 0xe1f   : > { %13719 = vmatprep.subr.bf16.mxu0 %v15738_v32  ;;  %v15753_v32 = vld [vmem:[%s18543_s18 + $0xb0] sm:$0xff]  }
 0xe20   : > { %7012 = vmatpush1.bf16.msra.mxu1 %v15691_v0  ;;  %v7053_v0 = vrot.slane %v7044_v50, %v6261_v22  ;;  %v7095_v22 = vrot.slane %v7044_v50, %v6303_v6 }
 0xe21   : > { %7013 = vmatprep.subr.bf16.mxu1 %v15696_v40  ;;  %v7059_v40 = vrot.slane %v7049_v58, %v16525_v37 }
 0xe22   : > { %13720 = vmatpush3.bf16.msra.mxu0 %v15739_v39  ;;  %v15754_v39 = vld [vmem:[%s18543_s18 + $0xf8] sm:$0xff]  }
 0xe23   : > { %13727 = vmatprep.subr.bf16.mxu0 %v15740_v30  ;;  %v15755_v30 = vld [vmem:[%s18543_s18 + $0xb8] sm:$0xff]  }
 0xe24   : > { %7014 = vmatpush1.bf16.msra.mxu1 %v15694_v60  ;;  %v7071_v60 = vrot.slane %v7044_v50, %v16532_v47 }
 0xe25   : > { %7015 = vmatprep.subr.bf16.mxu1 %v15699_v35 }
 0xe28   : > { %7016 = vmatpush1.bf16.msra.mxu1 %v15697_v27  ;;  %v7063_v27 = vrot.slane %v7053_v0, %v16525_v37 }
 0xe29   : > { %7017 = vmatprep.subr.bf16.mxu1 %v15702_v59  ;;  %v7075_v59 = vrot.slane %v7044_v50, %v6283_v31 }
 0xe2c   : > { %7018 = vmatpush1.bf16.msra.mxu1 %v15700_v18 }
 0xe2d   : > { %7019 = vmatprep.subr.bf16.mxu1 %v15705_v25  ;;  %v7091_v25 = vrot.slane %v7044_v50, %v16539_v51 }
 0xe2f   : > { %v7101_v31 = vrot.slane %v7091_v25, %v16539_v51  ;;  %v15762_v25 = vld [vmem:[%s18543_s18 + $0x158] sm:$0xff]  }
 0xe30   : > { %7020 = vmatpush1.bf16.msra.mxu1 %v15703_v41 }
 0xe31   : > { %7021 = vmatprep.subr.bf16.mxu1 %v15708_v10 }
 0xe34   : > { %7022 = vmatpush1.bf16.msra.mxu1 %v15706_v14 }
 0xe35   : > { %7023 = vmatprep.subr.bf16.mxu1 %v15711_v42 }
 0xe38   : > { %7024 = vmatpush1.bf16.msra.mxu1 %v15709_v46  ;;  %v7081_v46 = vrot.slane %v7071_v60, %v16532_v47  ;;  %v15757_v60 = vld [vmem:[%s18543_s18 + $0x100] sm:$0xff]  }
 0xe39   : > { %7025 = vmatprep.subr.bf16.mxu1 %v15714_v38 }
 0xe3c   : > { %7026 = vmatpush1.bf16.msra.mxu1 %v15712_v12 }
 0xe3d   : > { %7027 = vmatprep.subr.bf16.mxu1 %v15717_v52  ;;  %v7085_v52 = vrot.slane %v7075_v59, %v16532_v47  ;;  %v15760_v59 = vld [vmem:[%s18543_s18 + $0x150] sm:$0xff]  }
 0xe40   : > { %7028 = vmatpush1.bf16.msra.mxu1 %v15715_v17 }
 0xe41   : > { %7029 = vmatprep.subr.bf16.mxu1 %v15720_v34 }
 0xe44   : > { %7030 = vmatpush1.bf16.msra.mxu1 %v15718_v57  ;;  %v7105_v57 = vrot.slane %v7095_v22, %v16539_v51  ;;  %v15766_v22 = vld [vmem:[%s18543_s18 + $0x168] sm:$0xff]  }
 0xe45   : > { %7031 = vmatprep.subr.bf16.mxu1 %v15723_v28 }
 0xe48   : > { %7032 = vmatpush1.bf16.msra.mxu1 %v15721_v63 }
 0xe49   : > { %14569 = vmatprep.subr.mxu1 %v16067_v24 }
 0xe4b   : > { %7034 = vmatmul.mubr.bf16.vlgmr.msra.gmra.mrb[156].mxu1 %v6837_v49 }
 0xe4c   : > { %14571 = vmatprep.mubr.msk.f32.mxu1 %vm16069_vm0, %v16067_v24 }
 0xed8   : > { %v6795_v29 = vpop.f32.mrb[164].mxu0 }
 0xed9   : > { %v6797_v8 = vpop.f32.mrb[165].mxu0 }
 0xeda   : > { %v6799_v53 = vpop.f32.mrb[166].mxu0 }
 0xedb   : > { %v6800_v16 = vpop.f32.mrb[167].mxu0 }
 0xede   : > { %v6594_v62 = vpop.f32.mrb[152].mxu1 }
 0xedf   : > { %v6796_v54 = vadd.f32 %v6795_v29, %v6594_v62  ;;  %v6596_v11 = vpop.f32.mrb[153].mxu1 }
 0xee0   : > { %v6798_v43 = vadd.f32 %v6797_v8, %v6596_v11  ;;  %v6598_v19 = vpop.f32.mrb[154].mxu1 }
 0xee1   : > { %v6599_v23 = vpop.f32.mrb[155].mxu1 }
 0xf1e   : > { %v7035_v35 = vpop.f32.mrb[156].mxu1 }
 0xf1f   : > { %v7042_v18 = vadd.f32 %v7035_v35, %v6796_v54  ;;  %v7037_v41 = vpop.f32.mrb[157].mxu1  ;;  %v17759_v54 = vmul.u32 3, %v16717_v21  ;;  %v15758_v35 = vld [vmem:[%s18543_s18 + $0x148] sm:$0xff]  }
 0xf20   : > { %v7043_v10 = vadd.f32 %v7037_v41, %v6798_v43  ;;  %v7039_v14 = vpop.f32.mrb[158].mxu1  ;;  %v15763_v41 = vld [vmem:[%s18543_s18 + $0x118] sm:$0xff]  }
 0xf21   : > { %v7064_v42 = vadd.f32 %v7059_v40, %v7042_v18  ;;  %v7040_v38 = vpop.f32.mrb[159].mxu1  ;;  %v7451_v11 = vadd.s32 1, %v17759_v54  ;;  %v15756_v40 = vld [vmem:[%s18543_s18 + $0x140] sm:$0xff]   ;;  %vm7279_vm10 = vcmp.eq.s32.totalorder %v16522_v33, %v17759_v54  ;;  %v15761_v18 = vld [vmem:[%s18543_s18 + $0x110] sm:$0xff]  }
 0xf22   : > { %v7065_v12 = vadd.f32 %v7063_v27, %v7043_v10  ;;  %v17777_v21 = vsel %vm7279_vm10, 1.0, %v16067_v24  ;;  %v15759_v27 = vld [vmem:[%s18543_s18 + $0x108] sm:$0xff]   ;;  %v15764_v10 = vld [vmem:[%s18543_s18 + $0x160] sm:$0xff]   ;;  %v15769_v38 = vld [vmem:[%s18543_s18 + $0x130] sm:$0xff]  }
 0xf23   : > { %v7066_v17 = vmax.f32 %v7064_v42, 0.0  ;;  %vm7452_vm8 = vcmp.eq.s32.totalorder %v16522_v33, %v7451_v11  ;;  %v15765_v14 = vld [vmem:[%s18543_s18 + $0x120] sm:$0xff]   ;;  %v15767_v42 = vld [vmem:[%s18543_s18 + $0x128] sm:$0xff]   ;;  %v8430_v11 = vrot.slane %v17530_v36, 3  ;;  %vm18572_vm10 = vmmov %vm18554_vm1 }
 0xf24   : > { %v7067_v34 = vmax.f32 %v7065_v12, 0.0  ;;  %v17764_v58 = vsel %vm7452_vm8, 1.0, %v16067_v24  ;;  %v15770_v12 = vld [vmem:[%s18543_s18 + $0x178] sm:$0xff]   ;;  %vm18565_vm8 = vmmov %vm18554_vm1 }
 0xf25   : > { %v7086_v28 = vmul.f32 %v7081_v46, %v7066_v17  ;;  %v15768_v46 = vld [vmem:[%s18543_s18 + $0x170] sm:$0xff]   ;;  %v15772_v17 = vld [vmem:[%s18546_s7] sm:$0xff]  }
 0xf26   : > { %v7087_v63 = vmul.f32 %v7085_v52, %v7067_v34  ;;  %v15771_v52 = vld [vmem:[%s18543_s18 + $0x138] sm:$0xff]   ;;  %v15774_v34 = vld [vmem:[%s18546_s7 + $0x10] sm:$0xff]  }
 0xf27   : > { %v7106_v6 = vadd.f32 %v7101_v31, %v7086_v28  ;;  %v15773_v31 = vld [vmem:[%s18546_s7 + $0x8] sm:$0xff]   ;;  %v15776_v28 = vld [vmem:[%s18546_s7 + $0x20] sm:$0xff]  }
 0xf28   : > { %v7107_v49 = vadd.f32 %v7105_v57, %v7087_v63  ;;  %v15775_v57 = vld [vmem:[%s18546_s7 + $0x18] sm:$0xff]   ;;  %v15777_v63 = vld [vmem:[%s18546_s7 + $0x28] sm:$0xff]  }
 0xf29   : > { %v17735_v48 = vpack.c.bf16 %v7106_v6, %v7106_v6  ;;  %v15778_v6 = vld [vmem:[%s18546_s7 + $0x30] sm:$0xff]  }
 0xf2a   : > { %v17732_v61 = vpack.c.bf16 %v7107_v49, %v7107_v49  ;;  %v15779_v49 = vld [vmem:[%s18546_s7 + $0x38] sm:$0xff]  }
 0xf2c   : > { %7270 = vmatprep.mubr.bf16.mxu0 %v17732_v61 }
 0xf2d   : > { %7271 = vmatmul.mubr.bf16.vlgmr.msra.gmra.mrb[168].mxu0 %v17735_v48 }
 0xf2e   : > { %13728 = vmatpush3.bf16.msra.mxu0 %v15741_v13  ;;  %7443 = vmatprep.mubr.bf16.mxu0 %v17732_v61  ;;  %v7989_v13 = vrot.slane %v17530_v36, 2 }
 0xf2f   : > { %13729 = vmatprep.subr.bf16.mxu0 %v15742_v2  ;;  %v15782_v2 = vld [vmem:[%s18546_s7 + $0x90] sm:$0xff]  }
 0xf32   : > { %13730 = vmatpush3.bf16.msra.mxu0 %v15743_v45  ;;  %v15783_v45 = vld [vmem:[%s18546_s7 + $0x98] sm:$0xff]  }
 0xf33   : > { %13731 = vmatprep.subr.bf16.mxu0 %v15744_v7  ;;  %v15784_v7 = vld [vmem:[%s18546_s7 + $0xa0] sm:$0xff]  }
 0xf36   : > { %13732 = vmatpush3.bf16.msra.mxu0 %v15745_v56  ;;  %v15785_v56 = vld [vmem:[%s18546_s7 + $0xa8] sm:$0xff]  }
 0xf37   : > { %13733 = vmatprep.subr.bf16.mxu0 %v15746_v9  ;;  %v15786_v9 = vld [vmem:[%s18546_s7 + $0xb0] sm:$0xff]  }
 0xf3a   : > { %13734 = vmatpush3.bf16.msra.mxu0 %v15747_v4  ;;  %v8209_v4 = vshrl.u32 %v17530_v36, 16 }
 0xf3b   : > { %13735 = vmatprep.subr.bf16.mxu0 %v15748_v55  ;;  %v8212_v55 = vshll.u32 %v17530_v36, 16 }
 0xf3e   : > { %13736 = vmatpush3.bf16.msra.mxu0 %v15749_v3  ;;  %v15787_v3 = vld [vmem:[%s18546_s7 + $0xb8] sm:$0xff]  }
 0xf3f   : > { %13737 = vmatprep.subr.bf16.mxu0 %v15750_v44  ;;  %v8211_v44 = vrot.slane %v8209_v4, 2  ;;  %v15806_v4 = vld [vmem:[%s18546_s7 + $0xd0] sm:$0xff]  }
 0xf42   : > { %13738 = vmatpush3.bf16.msra.mxu0 %v15751_v20  ;;  %v8214_v20 = vrot.slane %v8212_v55, 3  ;;  %v15807_v55 = vld [vmem:[%s18546_s7 + $0xd8] sm:$0xff]  }
 0xf43   : > { %13739 = vmatprep.subr.bf16.mxu0 %v15752_v26  ;;  %v15788_v26 = vld [vmem:[%s18546_s7 + $0x100] sm:$0xff]  }
 0xf46   : > { %13740 = vmatpush3.bf16.msra.mxu0 %v15753_v32  ;;  %v8215_v32 = vor.u32 %v8214_v20, %v8211_v44  ;;  %v15809_v44 = vld [vmem:[%s18546_s7 + $0xe8] sm:$0xff]   ;;  %v15810_v20 = vld [vmem:[%s18546_s7 + $0xf0] sm:$0xff]  }
 0xf47   : > { %13741 = vmatprep.subr.bf16.mxu0 %v15754_v39  ;;  %v15789_v39 = vld [vmem:[%s18546_s7 + $0x108] sm:$0xff]  }
 0xf4a   : > { %13742 = vmatpush3.bf16.msra.mxu0 %v15755_v30  ;;  %v15790_v30 = vld [vmem:[%s18546_s7 + $0x110] sm:$0xff]  }
 0xf4b   : > { %14579 = vmatprep.subr.mxu0 %v16067_v24 }
 0xf4d   : > { %7444 = vmatmul.mubr.bf16.vlgmr.msra.gmra.mrb[172].mxu0 %v17735_v48 }
 0xf4e   : > { %14581 = vmatprep.mubr.msk.f32.mxu0 %vm16069_vm0, %v16067_v24 }
0x1000   : > { %v13721_v29 = vpop.f32.mrb[168].mxu0 }
0x1001   : > { %v13722_v8 = vpop.f32.mrb[169].mxu0 }
0x1002   : > { %v13723_v53 = vadd.f32 %v13722_v8, %v13721_v29  ;;  %v13724_v16 = vpop.f32.mrb[170].mxu0  ;;  %v15791_v29 = vld [vmem:[%s18546_s7 + $0x118] sm:$0xff]   ;;  %v15792_v8 = vld [vmem:[%s18546_s7 + $0x120] sm:$0xff]  }
0x1003   : > { %v13725_v62 = vpop.f32.mrb[171].mxu0  ;;  %v15794_v16 = vld [vmem:[%s18546_s7 + $0x130] sm:$0xff]  }
0x1004   : > { %v15795_v62 = vld [vmem:[%s18546_s7 + $0x138] sm:$0xff]  }
0x1020   : > { %v13743_v43 = vpop.f32.mrb[172].mxu0 }
0x1021   : > { %v13744_v19 = vpop.f32.mrb[173].mxu0 }
0x1022   : > { %v13745_v23 = vadd.f32 %v13744_v19, %v13743_v43  ;;  %v13746_v50 = vpop.f32.mrb[174].mxu0 }
0x1023   : > { %v13747_v0 = vpop.f32.mrb[175].mxu0 }
0x1024   : > { %14570 = vmatpush3.msk.msra.mxu1 %vm18544_vm11, %v13745_v23  ;;  %vm18580_vm11 = vmmov %vm18554_vm1 }
0x1025   : > { %14572 = vmatmul.mubr.msk.f32.vlgmr.msra.gmra.mrb[118].mxu1 %vm7455_vm6, %v17764_v58  ;;  %14574 = vmatprep.subr.mxu1 %v16067_v24 }
0x1026   : > { %14575 = vmatpush3.msk.msra.mxu1 %vm18545_vm14, %v13723_v53  ;;  %14576 = vmatprep.mubr.msk.f32.mxu1 %vm16069_vm0, %v16067_v24  ;;  %v15793_v53 = vld [vmem:[%s18546_s7 + $0x128] sm:$0xff]   ;;  %vm12158_vm14 = vcmask 32768  }
0x1027   : > { %13753 = vmatprep.subr.bf16.mxu1 %v15756_v40  ;;  %v7777_v40 = vadd.s32 2, %v17759_v54  ;;  %v15798_v54 = vld [vmem:[%s18546_s7 + $0x50] sm:$0xff]  }
0x1029   : > { %14577 = vmatmul.mubr.msk.f32.vlgmr.msra.gmra.mrb[160].mxu1 %vm7455_vm6, %v17777_v21  ;;  %vm7778_vm15 = vcmp.eq.s32.totalorder %v16522_v33, %v7777_v40  ;;  %v15797_v33 = vld [vmem:[%s18546_s7 + $0x48] sm:$0xff]  }
0x102a   : > { %13754 = vmatpush3.bf16.msra.mxu1 %v15757_v60  ;;  %7769 = vmatprep.mubr.bf16.mxu1 %v17732_v61  ;;  %v15780_v61 = vld [vmem:[%s18546_s7 + $0x80] sm:$0xff]  }
0x102b   : > { %13755 = vmatprep.subr.bf16.mxu1 %v15758_v35 }
0x102e   : > { %13756 = vmatpush3.bf16.msra.mxu1 %v15759_v27 }
0x102f   : > { %13757 = vmatprep.subr.bf16.mxu1 %v15760_v59  ;;  %v17862_v59 = vsel %vm7778_vm15, 1.0, %v16067_v24 }
0x1032   : > { %13758 = vmatpush3.bf16.msra.mxu1 %v15761_v18  ;;  %v15796_v18 = vld [vmem:[%s18546_s7 + $0x40] sm:$0xff]  }
0x1033   : > { %13759 = vmatprep.subr.bf16.mxu1 %v15762_v25 }
0x1036   : > { %13760 = vmatpush3.bf16.msra.mxu1 %v15763_v41  ;;  %v15799_v41 = vld [vmem:[%s18546_s7 + $0x58] sm:$0xff]  }
0x1037   : > { %13761 = vmatprep.subr.bf16.mxu1 %v15764_v10  ;;  %v15800_v10 = vld [vmem:[%s18546_s7 + $0x60] sm:$0xff]  }
0x103a   : > { %13762 = vmatpush3.bf16.msra.mxu1 %v15765_v14  ;;  %v15801_v14 = vld [vmem:[%s18546_s7 + $0x68] sm:$0xff]  }
0x103b   : > { %13763 = vmatprep.subr.bf16.mxu1 %v15766_v22  ;;  %v15802_v22 = vld [vmem:[%s18546_s7 + $0x70] sm:$0xff]  }
0x103e   : > { %13764 = vmatpush3.bf16.msra.mxu1 %v15767_v42 }
0x103f   : > { %13765 = vmatprep.subr.bf16.mxu1 %v15768_v46 }
0x1042   : > { %13766 = vmatpush3.bf16.msra.mxu1 %v15769_v38 }
0x1043   : > { %13767 = vmatprep.subr.bf16.mxu1 %v15770_v12 }
0x1046   : > { %13768 = vmatpush3.bf16.msra.mxu1 %v15771_v52 }
0x1047   : > { %14604 = vmatprep.subr.bf16.mxu1 %v16067_v24 }
0x1049   : > { %7770 = vmatmul.mubr.bf16.vlgmr.msra.gmra.mrb[164].mxu1 %v17735_v48  ;;  %v15781_v48 = vld [vmem:[%s18546_s7 + $0x88] sm:$0xff]  }
0x104a   : > { %14605 = vmatpush3.bf16.msra.mxu1 %v15772_v17  ;;  %14620 = vmatprep.mubr.msk.bf16.mxu1 %vm16069_vm0, %v16067_v24 }
0x104b   : > { %14606 = vmatprep.subr.bf16.mxu1 %v16067_v24 }
0x104e   : > { %14607 = vmatpush3.bf16.msra.mxu1 %v15773_v31 }
0x104f   : > { %14608 = vmatprep.subr.bf16.mxu1 %v16067_v24 }
0x1052   : > { %14609 = vmatpush3.bf16.msra.mxu1 %v15774_v34 }
0x1053   : > { %14610 = vmatprep.subr.bf16.mxu1 %v16067_v24 }
0x1056   : > { %14611 = vmatpush3.bf16.msra.mxu1 %v15775_v57  ;;  %v15803_v57 = vld [vmem:[%s18546_s7 + $0x78] sm:$0xff]  }
0x1057   : > { %14612 = vmatprep.subr.bf16.mxu1 %v16067_v24 }
0x105a   : > { %14613 = vmatpush3.bf16.msra.mxu1 %v15776_v28 }
0x105b   : > { %14614 = vmatprep.subr.bf16.mxu1 %v16067_v24 }
0x105e   : > { %14615 = vmatpush3.bf16.msra.mxu1 %v15777_v63 }
0x105f   : > { %14616 = vmatprep.subr.bf16.mxu1 %v16067_v24 }
0x1062   : > { %14617 = vmatpush3.bf16.msra.mxu1 %v15778_v6 }
0x1063   : > { %14618 = vmatprep.subr.bf16.mxu1 %v16067_v24 }
0x1066   : > { %14619 = vmatpush3.bf16.msra.mxu1 %v15779_v49 }
0x1067   : > { %14644 = vmatprep.subr.bf16.mxu1 %v16067_v24 }
0x1069   : > { %14621 = vmatmul.mubr.bf16.vlgmr.msra.gmra.mrb[168].mxu1 %v7989_v13  ;;  %v13014_v13 = vld [vmem:[%s18548_s1] ss:$0 sm:$0xff]  ;;  %s18549_s1 = sld [smem:[#allocation12_spill]] }
0x106a   : > { %14645 = vmatpush3.bf16.msra.mxu1 %v15780_v61  ;;  %14660 = vmatprep.mubr.msk.bf16.mxu1 %vm16069_vm0, %v16067_v24 }
0x106b   : > { %14646 = vmatprep.subr.bf16.mxu1 %v16067_v24 }
0x106e   : > { %14647 = vmatpush3.bf16.msra.mxu1 %v15781_v48 }
0x106f   : > { %14648 = vmatprep.subr.bf16.mxu1 %v16067_v24  ;;  %v15822_v40 = vld [vmem:[%s18549_s1 + $0x40] sm:$0xff]  }
0x1072   : > { %14649 = vmatpush3.bf16.msra.mxu1 %v15782_v2 }
0x1073   : > { %14650 = vmatprep.subr.bf16.mxu1 %v16067_v24 }
0x1076   : > { %14651 = vmatpush3.bf16.msra.mxu1 %v15783_v45 }
0x1077   : > { %14652 = vmatprep.subr.bf16.mxu1 %v16067_v24 }
0x107a   : > { %14653 = vmatpush3.bf16.msra.mxu1 %v15784_v7  ;;  %v15804_v7 = vld [vmem:[%s18546_s7 + $0xc0] sm:$0xff]  }
0x107b   : > { %14654 = vmatprep.subr.bf16.mxu1 %v16067_v24 }
0x107e   : > { %14655 = vmatpush3.bf16.msra.mxu1 %v15785_v56 }
0x107f   : > { %14656 = vmatprep.subr.bf16.mxu1 %v16067_v24 }
0x1082   : > { %14657 = vmatpush3.bf16.msra.mxu1 %v15786_v9  ;;  %v15805_v9 = vld [vmem:[%s18546_s7 + $0xc8] sm:$0xff]  }
0x1083   : > { %14658 = vmatprep.subr.bf16.mxu1 %v16067_v24 }
0x1086   : > { %14659 = vmatpush3.bf16.msra.mxu1 %v15787_v3  ;;  %v15808_v3 = vld [vmem:[%s18546_s7 + $0xe0] sm:$0xff]  }
0x1087   : > { %14684 = vmatprep.subr.bf16.mxu1 %v16067_v24 }
0x1089   : > { %14661 = vmatmul.mubr.bf16.vlgmr.msra.gmra.mrb[172].mxu1 %v8215_v32  ;;  %v15811_v32 = vld [vmem:[%s18546_s7 + $0xf8] sm:$0xff]  }
0x108a   : > { %14685 = vmatpush3.bf16.msra.mxu1 %v15788_v26  ;;  %14700 = vmatprep.mubr.msk.bf16.mxu1 %vm16069_vm0, %v16067_v24 }
0x108b   : > { %14686 = vmatprep.subr.bf16.mxu1 %v16067_v24 }
0x108e   : > { %14687 = vmatpush3.bf16.msra.mxu1 %v15789_v39 }
0x108f   : > { %14688 = vmatprep.subr.bf16.mxu1 %v16067_v24 }
0x1092   : > { %14689 = vmatpush3.bf16.msra.mxu1 %v15790_v30 }
0x1093   : > { %14690 = vmatprep.subr.bf16.mxu1 %v16067_v24 }
0x1096   : > { %14691 = vmatpush3.bf16.msra.mxu1 %v15791_v29  ;;  %v15812_v29 = vld [vmem:[%s18546_s7 + $0x140] sm:$0xff]  }
0x1097   : > { %14692 = vmatprep.subr.bf16.mxu1 %v16067_v24 }
0x109a   : > { %14693 = vmatpush3.bf16.msra.mxu1 %v15792_v8 }
0x109b   : > { %14694 = vmatprep.subr.bf16.mxu1 %v16067_v24 }
0x109e   : > { %14695 = vmatpush3.bf16.msra.mxu1 %v15793_v53  ;;  %v15813_v53 = vld [vmem:[%s18546_s7 + $0x148] sm:$0xff]  }
0x109f   : > { %14696 = vmatprep.subr.bf16.mxu1 %v16067_v24 }
0x10a2   : > { %14697 = vmatpush3.bf16.msra.mxu1 %v15794_v16  ;;  %v15814_v16 = vld [vmem:[%s18546_s7 + $0x150] sm:$0xff]  }
0x10a3   : > { %14698 = vmatprep.subr.bf16.mxu1 %v16067_v24 }
0x10a6   : > { %14699 = vmatpush3.bf16.msra.mxu1 %v15795_v62  ;;  %v15815_v62 = vld [vmem:[%s18546_s7 + $0x158] sm:$0xff]  }
0x10a7   : > { %14724 = vmatprep.subr.bf16.mxu1 %v16067_v24 }
0x10a9   : > { %14701 = vmatmul.mubr.bf16.vlgmr.msra.gmra.mrb[176].mxu1 %v8430_v11  ;;  %v15816_v11 = vld [vmem:[%s18546_s7 + $0x160] sm:$0xff]  }
0x10aa   : > { %14740 = vmatprep.mubr.msk.bf16.mxu1 %vm16069_vm0, %v16067_v24 }
0x10f8   : > { %v7528_v43 = vpop.f32.mrb[118].mxu1 }
0x10f9   : > { %v14573_v19 = vpop.f32.mrb[119].mxu1 }
0x10fa   : > { %v15818_v19 = vld [vmem:[%s18546_s7 + $0x170] sm:$0xff]  }
0x10fc   : > { %v7604_v23 = vpop.f32.mrb[160].mxu1 }
0x10fd   : > { %v7605_v50 = vadd.f32 %v7604_v23, %v7528_v43  ;;  %v14578_v0 = vpop.f32.mrb[161].mxu1  ;;  %v15817_v43 = vld [vmem:[%s18546_s7 + $0x168] sm:$0xff]   ;;  %v15819_v23 = vld [vmem:[%s18546_s7 + $0x178] sm:$0xff]  }
0x10fe   : > { %v15820_v0 = vld [vmem:[%s18549_s1] sm:$0xff]  }
0x10ff   : > { %14725 = vmatpush3.bf16.msra.mxu1 %v15820_v0 }
0x1100   : > { %14726 = vmatprep.subr.bf16.mxu1 %v16067_v24 }
0x111c   : > { %v13769_v60 = vpop.f32.mrb[164].mxu1 }
0x111d   : > { %v13770_v36 = vpop.f32.mrb[165].mxu1 }
0x111e   : > { %v13771_v35 = vadd.f32 %v13770_v36, %v13769_v60  ;;  %v13772_v27 = vpop.f32.mrb[166].mxu1  ;;  %v15821_v60 = vld [vmem:[%s18549_s1 + $0x8] sm:$0xff]  }
0x111f   : > { %v13773_v25 = vpop.f32.mrb[167].mxu1  ;;  %v15824_v36 = vld [vmem:[%s18549_s1 + $0x48] sm:$0xff]   ;;  %14727 = vmatpush3.bf16.msra.mxu1 %v15821_v60  ;;  %v15826_v27 = vld [vmem:[%s18549_s1 + $0x50] sm:$0xff]  }
0x1120   : > { %14580 = vmatpush3.msk.msra.mxu0 %vm18547_vm2, %v13771_v35  ;;  %v15823_v35 = vld [vmem:[%s18549_s1 + $0x10] sm:$0xff]   ;;  %14728 = vmatprep.subr.bf16.mxu1 %v16067_v24  ;;  %v15827_v25 = vld [vmem:[%s18549_s1 + $0x20] sm:$0xff]  }
0x1121   : > { %14582 = vmatmul.mubr.msk.f32.vlgmr.msra.gmra.mrb[154].mxu0 %vm7455_vm6, %v17862_v59  ;;  %14584 = vmatprep.subr.bf16.mxu0 %v16067_v24 }
0x1122   : > { %14585 = vmatpush3.bf16.msra.mxu0 %v15796_v18  ;;  %14600 = vmatprep.mubr.msk.bf16.mxu0 %vm16069_vm0, %v16067_v24  ;;  %v15825_v18 = vld [vmem:[%s18549_s1 + $0x18] sm:$0xff]  }
0x1123   : > { %14586 = vmatprep.subr.bf16.mxu0 %v16067_v24  ;;  %14729 = vmatpush3.bf16.msra.mxu1 %v15823_v35 }
0x1124   : > { %14730 = vmatprep.subr.bf16.mxu1 %v16067_v24 }
0x1126   : > { %14587 = vmatpush3.bf16.msra.mxu0 %v15797_v33  ;;  %v15828_v33 = vld [vmem:[%s18549_s1 + $0x58] sm:$0xff]  }
0x1127   : > { %14588 = vmatprep.subr.bf16.mxu0 %v16067_v24  ;;  %14731 = vmatpush3.bf16.msra.mxu1 %v15825_v18 }
0x1128   : > { %14732 = vmatprep.subr.bf16.mxu1 %v16067_v24 }
0x112a   : > { %14589 = vmatpush3.bf16.msra.mxu0 %v15798_v54  ;;  %v15829_v54 = vld [vmem:[%s18549_s1 + $0x28] sm:$0xff]  }
0x112b   : > { %14590 = vmatprep.subr.bf16.mxu0 %v16067_v24  ;;  %14733 = vmatpush3.bf16.msra.mxu1 %v15827_v25 }
0x112c   : > { %14734 = vmatprep.subr.bf16.mxu1 %v16067_v24 }
0x112e   : > { %14591 = vmatpush3.bf16.msra.mxu0 %v15799_v41  ;;  %v15830_v41 = vld [vmem:[%s18549_s1 + $0x60] sm:$0xff]  }
0x112f   : > { %14592 = vmatprep.subr.bf16.mxu0 %v16067_v24  ;;  %14735 = vmatpush3.bf16.msra.mxu1 %v15829_v54 }
0x1130   : > { %14736 = vmatprep.subr.bf16.mxu1 %v16067_v24 }
0x1132   : > { %14593 = vmatpush3.bf16.msra.mxu0 %v15800_v10  ;;  %v15831_v10 = vld [vmem:[%s18549_s1 + $0x30] sm:$0xff]  }
0x1133   : > { %14594 = vmatprep.subr.bf16.mxu0 %v16067_v24  ;;  %14737 = vmatpush3.bf16.msra.mxu1 %v15831_v10 }
0x1134   : > { %14738 = vmatprep.subr.bf16.mxu1 %v16067_v24 }
0x1136   : > { %14595 = vmatpush3.bf16.msra.mxu0 %v15801_v14  ;;  %v15832_v14 = vld [vmem:[%s18549_s1 + $0x68] sm:$0xff]  }
0x1137   : > { %14596 = vmatprep.subr.bf16.mxu0 %v16067_v24 }
0x113a   : > { %14597 = vmatpush3.bf16.msra.mxu0 %v15802_v22  ;;  %v15833_v22 = vld [vmem:[%s18549_s1 + $0x38] sm:$0xff]  }
0x113b   : > { %14598 = vmatprep.subr.bf16.mxu0 %v16067_v24  ;;  %14739 = vmatpush3.bf16.msra.mxu1 %v15833_v22 }
0x113c   : > { %v17884_v42 = vpop.f32.mrb[168].mxu1  ;;  %14764 = vmatprep.subr.bf16.mxu1 %v16067_v24 }
0x113d   : > { %v14622_v46 = vpop.f32.mrb[169].mxu1 }
0x113e   : > { %v8076_v38 = vpop.f32.mrb[170].mxu1  ;;  %14599 = vmatpush3.bf16.msra.mxu0 %v15803_v57  ;;  %v15834_v46 = vld [vmem:[%s18549_s1 + $0x70] sm:$0xff]  }
0x113f   : > { %v14623_v12 = vpop.f32.mrb[171].mxu1  ;;  %14624 = vmatprep.subr.bf16.mxu0 %v16067_v24  ;;  %v15835_v38 = vld [vmem:[%s18549_s1 + $0x78] sm:$0xff]  }
0x115c   : > { %v17886_v52 = vpop.f32.mrb[172].mxu1 }
0x115d   : > { %v14662_v17 = vpop.f32.mrb[173].mxu1 }
0x115e   : > { %v8302_v31 = vpop.f32.mrb[174].mxu1 }
0x115f   : > { %v14663_v34 = vpop.f32.mrb[175].mxu1 }
0x117c   : > { %v17890_v28 = vpop.f32.mrb[176].mxu1 }
0x117d   : > { %v14702_v63 = vpop.f32.mrb[177].mxu1 }
0x117e   : > { %v8517_v6 = vpop.f32.mrb[178].mxu1 }
0x117f   : > { %v14703_v49 = vpop.f32.mrb[179].mxu1 }
0x11f4   : > { %v7853_v61 = vpop.f32.mrb[154].mxu0 }
0x11f5   : > { %v7857_v48 = vadd.f32 %v7853_v61, %v7605_v50  ;;  %v14583_v2 = vpop.f32.mrb[155].mxu0 }
0x11f6   : > { %v8521_v2 = vld [vmem:[%s18550_s3] sm:$0x7]  ;;  %s18551_s3 = sld [smem:[#allocation14_spill]] }
0x11f7   : > { %v7865_v45 = vadd.f32 %v13014_v13, %v7857_v48 }
0x11f9   : > { %v7867_v56 = vpack.c.bf16 %v7865_v45, %v7865_v45 }
0x11fb   : > { %14601 = vmatmul.mubr.bf16.vlgmr.msra.gmra.mrb[176].mxu0 %v7867_v56  ;;  %v8115_v26 = vshll.u32 %v7867_v56, 16  ;;  %v8113_v30 = vshrl.u32 %v7867_v56, 16  ;;  %v8340_v50 = vrot.slane %v7867_v56, 1  ;;  %v8525_v56 = vrot.slane %v8521_v2, %v16525_v37 }
0x11fc   : > { %14625 = vmatpush3.bf16.msra.mxu0 %v15804_v7  ;;  %14640 = vmatprep.mubr.msk.bf16.mxu0 %vm16069_vm0, %v16067_v24  ;;  %v15845_v60 = vld [vmem:[%s18551_s3 + $0x40] sm:$0xff]   ;;  %v15847_v35 = vld [vmem:[%s18551_s3 + $0x48] sm:$0xff]   ;;  %v15849_v18 = vld [vmem:[%s18551_s3 + $0x50] sm:$0xff]  }
0x11fd   : > { %14626 = vmatprep.subr.bf16.mxu0 %v16067_v24  ;;  %v8117_v39 = vrot.slane %v8115_v26, 1  ;;  %v15850_v25 = vld [vmem:[%s18551_s3 + $0x18] sm:$0xff]   ;;  %v15852_v54 = vld [vmem:[%s18551_s3 + $0x20] sm:$0xff]   ;;  %v15854_v10 = vld [vmem:[%s18551_s3 + $0x28] sm:$0xff]  }
0x11fe   : > { %v15856_v22 = vld [vmem:[%s18551_s3 + $0x30] sm:$0xff]  }
0x11ff   : > { %v8118_v8 = vor.u32 %v8117_v39, %v8113_v30 }
0x1200   : > { %14627 = vmatpush3.bf16.msra.mxu0 %v15805_v9 }
0x1201   : > { %14628 = vmatprep.subr.bf16.mxu0 %v16067_v24 }
0x1204   : > { %14629 = vmatpush3.bf16.msra.mxu0 %v15806_v4 }
0x1205   : > { %14630 = vmatprep.subr.bf16.mxu0 %v16067_v24 }
0x1208   : > { %14631 = vmatpush3.bf16.msra.mxu0 %v15807_v55 }
0x1209   : > { %14632 = vmatprep.subr.bf16.mxu0 %v16067_v24 }
0x120c   : > { %14633 = vmatpush3.bf16.msra.mxu0 %v15808_v3 }
0x120d   : > { %14634 = vmatprep.subr.bf16.mxu0 %v16067_v24 }
0x1210   : > { %14635 = vmatpush3.bf16.msra.mxu0 %v15809_v44  ;;  %v8531_v44 = vrot.slane %v8521_v2, %v16532_v47 }
0x1211   : > { %14636 = vmatprep.subr.bf16.mxu0 %v16067_v24 }
0x1214   : > { %14637 = vmatpush3.bf16.msra.mxu0 %v15810_v20  ;;  %v8536_v20 = vrot.slane %v8521_v2, %v16539_v51 }
0x1215   : > { %14638 = vmatprep.subr.bf16.mxu0 %v16067_v24 }
0x1218   : > { %14639 = vmatpush3.bf16.msra.mxu0 %v15811_v32 }
0x1219   : > { %14664 = vmatprep.subr.bf16.mxu0 %v16067_v24 }
0x121b   : > { %14641 = vmatmul.mubr.bf16.vlgmr.msra.gmra.mrb[180].mxu0 %v8118_v8  ;;  %v15836_v8 = vld [vmem:[%s18549_s1 + $0x80] sm:$0xff]  }
0x121c   : > { %14665 = vmatpush3.bf16.msra.mxu0 %v15812_v29  ;;  %14680 = vmatprep.mubr.msk.bf16.mxu0 %vm16069_vm0, %v16067_v24 }
0x121d   : > { %14666 = vmatprep.subr.bf16.mxu0 %v16067_v24 }
0x1220   : > { %14667 = vmatpush3.bf16.msra.mxu0 %v15813_v53 }
0x1221   : > { %14668 = vmatprep.subr.bf16.mxu0 %v16067_v24 }
0x1224   : > { %14669 = vmatpush3.bf16.msra.mxu0 %v15814_v16  ;;  %v15837_v16 = vld [vmem:[%s18549_s1 + $0x88] sm:$0xff]  }
0x1225   : > { %14670 = vmatprep.subr.bf16.mxu0 %v16067_v24 }
0x1228   : > { %14671 = vmatpush3.bf16.msra.mxu0 %v15815_v62  ;;  %v15838_v62 = vld [vmem:[%s18549_s1 + $0x90] sm:$0xff]  }
0x1229   : > { %14672 = vmatprep.subr.bf16.mxu0 %v16067_v24 }
0x122c   : > { %14673 = vmatpush3.bf16.msra.mxu0 %v15816_v11  ;;  %v15839_v11 = vld [vmem:[%s18549_s1 + $0x98] sm:$0xff]  }
0x122d   : > { %14674 = vmatprep.subr.bf16.mxu0 %v16067_v24 }
0x1230   : > { %14675 = vmatpush3.bf16.msra.mxu0 %v15817_v43  ;;  %v15840_v43 = vld [vmem:[%s18549_s1 + $0xa0] sm:$0xff]  }
0x1231   : > { %14676 = vmatprep.subr.bf16.mxu0 %v16067_v24 }
0x1234   : > { %14677 = vmatpush3.bf16.msra.mxu0 %v15818_v19  ;;  %v15841_v19 = vld [vmem:[%s18549_s1 + $0xa8] sm:$0xff]  }
0x1235   : > { %14678 = vmatprep.subr.bf16.mxu0 %v16067_v24 }
0x1238   : > { %14679 = vmatpush3.bf16.msra.mxu0 %v15819_v23  ;;  %v15842_v23 = vld [vmem:[%s18549_s1 + $0xb0] sm:$0xff]  }
0x1239   : > { %14704 = vmatprep.subr.bf16.mxu0 %v16067_v24 }
0x123b   : > { %14681 = vmatmul.mubr.bf16.vlgmr.msra.gmra.mrb[184].mxu0 %v8340_v50  ;;  %v15843_v50 = vld [vmem:[%s18549_s1 + $0xb8] sm:$0xff]   ;;  %s18552_s1 = sld [smem:[#allocation13_spill]] }
0x123c   : > { %14720 = vmatprep.mubr.msk.bf16.mxu0 %vm16069_vm0, %v16067_v24  ;;  %14705 = vmatpush3.bf16.msra.mxu0 %v15822_v40  ;;  %v15844_v40 = vld [vmem:[%s18551_s3] sm:$0xff]  }
0x123d   : > { %14706 = vmatprep.subr.bf16.mxu0 %v16067_v24 }
0x1240   : > { %14707 = vmatpush3.bf16.msra.mxu0 %v15824_v36  ;;  %v15846_v36 = vld [vmem:[%s18551_s3 + $0x8] sm:$0xff]  }
0x1241   : > { %14708 = vmatprep.subr.bf16.mxu0 %v16067_v24 }
0x1244   : > { %14709 = vmatpush3.bf16.msra.mxu0 %v15826_v27  ;;  %v15848_v27 = vld [vmem:[%s18551_s3 + $0x10] sm:$0xff]  }
0x1245   : > { %14710 = vmatprep.subr.bf16.mxu0 %v16067_v24 }
0x1248   : > { %14711 = vmatpush3.bf16.msra.mxu0 %v15828_v33  ;;  %v15851_v33 = vld [vmem:[%s18551_s3 + $0x58] sm:$0xff]  }
0x1249   : > { %14712 = vmatprep.subr.bf16.mxu0 %v16067_v24 }
0x124c   : > { %14713 = vmatpush3.bf16.msra.mxu0 %v15830_v41  ;;  %v15853_v41 = vld [vmem:[%s18551_s3 + $0x60] sm:$0xff]  }
0x124d   : > { %14714 = vmatprep.subr.bf16.mxu0 %v16067_v24 }
0x1250   : > { %14715 = vmatpush3.bf16.msra.mxu0 %v15832_v14  ;;  %v15855_v14 = vld [vmem:[%s18551_s3 + $0x68] sm:$0xff]  }
0x1251   : > { %14716 = vmatprep.subr.bf16.mxu0 %v16067_v24 }
0x1254   : > { %14717 = vmatpush3.bf16.msra.mxu0 %v15834_v46  ;;  %v15857_v46 = vld [vmem:[%s18551_s3 + $0x70] sm:$0xff]  }
0x1255   : > { %14718 = vmatprep.subr.bf16.mxu0 %v16067_v24 }
0x1258   : > { %14719 = vmatpush3.bf16.msra.mxu0 %v15835_v38  ;;  %v15858_v38 = vld [vmem:[%s18551_s3 + $0x38] sm:$0xff]  }
0x1259   : > { %14744 = vmatprep.subr.bf16.mxu0 %v16067_v24 }
0x12ce   : > { %v7982_v12 = vpop.f32.mrb[176].mxu0 }
0x12cf   : > { %v8074_v17 = vadd.f32 %v17884_v42, %v7982_v12  ;;  %v14602_v31 = vpop.f32.mrb[177].mxu0  ;;  %v15859_v12 = vld [vmem:[%s18551_s3 + $0x78] sm:$0xff]  }
0x12d0   : > { %v7985_v34 = vpop.f32.mrb[178].mxu0 }
0x12d1   : > { %v14603_v57 = vpop.f32.mrb[179].mxu0 }
0x12ee   : > { %v8202_v63 = vpop.f32.mrb[180].mxu0 }
0x12ef   : > { %v8300_v6 = vadd.f32 %v17886_v52, %v8202_v63  ;;  %v14642_v49 = vpop.f32.mrb[181].mxu0 }
0x12f0   : > { %v8205_v61 = vpop.f32.mrb[182].mxu0 }
0x12f1   : > { %v8305_v13 = vadd.f32 %v8300_v6, %v8074_v17  ;;  %v14643_v48 = vpop.f32.mrb[183].mxu0 }
0x12f2   : > { %v8865_v48 = vld [vmem:[%s18552_s1] sm:$0x7]  ;;  %s18555_s1 = sld [smem:[#allocation16_spill]] }
0x12f3   : > { %v8869_v2 = vrot.slane %v8865_v48, %v16525_v37 }
0x130e   : > { %v8424_v45 = vpop.f32.mrb[184].mxu0 }
0x130f   : > { %v8515_v7 = vadd.f32 %v17890_v28, %v8424_v45  ;;  %v14682_v9 = vpop.f32.mrb[185].mxu0 }
0x1310   : > { %v8427_v4 = vpop.f32.mrb[186].mxu0 }
0x1311   : > { %v8520_v42 = vadd.f32 %v8515_v7, %v8305_v13  ;;  %v14683_v55 = vpop.f32.mrb[187].mxu0 }
0x1313   : > { %v8526_v3 = vadd.f32 %v8525_v56, %v8520_v42  ;;  %v8875_v42 = vrot.slane %v8865_v48, %v16532_v47 }
0x1315   : > { %v8527_v52 = vmax.f32 %v8526_v3, 0.0 }
0x1317   : > { %v8532_v26 = vmul.f32 %v8531_v44, %v8527_v52  ;;  %v8880_v44 = vrot.slane %v8865_v48, %v16539_v51  ;;  %v15880_v48 = vld [vmem:[%s18555_s1 + $0x20] sm:$0xff]  }
0x1319   : > { %v8537_v32 = vadd.f32 %v8536_v20, %v8532_v26 }
0x131b   : > { %v8538_v39 = vpack.c.bf16 %v8537_v32, %v8537_v32 }
0x131d   : > { %14741 = vmatmul.mubr.bf16.vlgmr.msra.gmra.mrb[180].mxu1 %v8538_v39  ;;  %v8575_v28 = vshll.u32 %v8538_v39, 16  ;;  %v8573_v30 = vshrl.u32 %v8538_v39, 16  ;;  %v8774_v0 = vrot.slane %v8538_v39, 1 }
0x131e   : > { %14780 = vmatprep.mubr.msk.bf16.mxu1 %vm16069_vm0, %v16067_v24  ;;  %14765 = vmatpush3.bf16.msra.mxu1 %v15844_v40  ;;  %v15867_v40 = vld [vmem:[%s18551_s3 + $0xb8] sm:$0xff]  }
0x131f   : > { %v8577_v29 = vrot.slane %v8575_v28, 1  ;;  %14766 = vmatprep.subr.bf16.mxu1 %v16067_v24 }
0x1321   : > { %v8578_v53 = vor.u32 %v8577_v29, %v8573_v30 }
0x1322   : > { %14767 = vmatpush3.bf16.msra.mxu1 %v15846_v36  ;;  %v15869_v36 = vld [vmem:[%s18555_s1 + $0x8] sm:$0xff]  }
0x1323   : > { %14721 = vmatmul.mubr.bf16.vlgmr.msra.gmra.mrb[188].mxu0 %v8578_v53  ;;  %14768 = vmatprep.subr.bf16.mxu1 %v16067_v24 }
0x1324   : > { %14745 = vmatpush3.bf16.msra.mxu0 %v15836_v8  ;;  %14760 = vmatprep.mubr.msk.bf16.mxu0 %vm16069_vm0, %v16067_v24 }
0x1325   : > { %14746 = vmatprep.subr.bf16.mxu0 %v16067_v24 }
0x1326   : > { %14769 = vmatpush3.bf16.msra.mxu1 %v15848_v27  ;;  %v15871_v27 = vld [vmem:[%s18555_s1 + $0x18] sm:$0xff]  }
0x1327   : > { %14770 = vmatprep.subr.bf16.mxu1 %v16067_v24 }
0x1328   : > { %14747 = vmatpush3.bf16.msra.mxu0 %v15837_v16 }
0x1329   : > { %14748 = vmatprep.subr.bf16.mxu0 %v16067_v24 }
0x132a   : > { %14771 = vmatpush3.bf16.msra.mxu1 %v15850_v25  ;;  %v9511_v25 = vrot.slane %v17415_v1, 2 }
0x132b   : > { %14772 = vmatprep.subr.bf16.mxu1 %v16067_v24 }
0x132c   : > { %14749 = vmatpush3.bf16.msra.mxu0 %v15838_v62  ;;  %v15860_v62 = vld [vmem:[%s18551_s3 + $0x80] sm:$0xff]  }
0x132d   : > { %14750 = vmatprep.subr.bf16.mxu0 %v16067_v24 }
0x132e   : > { %14773 = vmatpush3.bf16.msra.mxu1 %v15852_v54  ;;  %v15874_v54 = vld [vmem:[%s18555_s1 + $0x50] sm:$0xff]  }
0x132f   : > { %14774 = vmatprep.subr.bf16.mxu1 %v16067_v24 }
0x1330   : > { %14751 = vmatpush3.bf16.msra.mxu0 %v15839_v11  ;;  %v15861_v11 = vld [vmem:[%s18551_s3 + $0x88] sm:$0xff]  }
0x1331   : > { %14752 = vmatprep.subr.bf16.mxu0 %v16067_v24 }
0x1332   : > { %14775 = vmatpush3.bf16.msra.mxu1 %v15854_v10  ;;  %v9673_v10 = vshll.u32 %v17415_v1, 16 }
0x1333   : > { %14776 = vmatprep.subr.bf16.mxu1 %v16067_v24 }
0x1334   : > { %14753 = vmatpush3.bf16.msra.mxu0 %v15840_v43  ;;  %v15862_v43 = vld [vmem:[%s18551_s3 + $0x90] sm:$0xff]  }
0x1335   : > { %14754 = vmatprep.subr.bf16.mxu0 %v16067_v24 }
0x1336   : > { %14777 = vmatpush3.bf16.msra.mxu1 %v15856_v22 }
0x1337   : > { %14778 = vmatprep.subr.bf16.mxu1 %v16067_v24 }
0x1338   : > { %14755 = vmatpush3.bf16.msra.mxu0 %v15841_v19  ;;  %v15863_v19 = vld [vmem:[%s18551_s3 + $0x98] sm:$0xff]  }
0x1339   : > { %14756 = vmatprep.subr.bf16.mxu0 %v16067_v24 }
0x133a   : > { %14779 = vmatpush3.bf16.msra.mxu1 %v15858_v38  ;;  %v15876_v38 = vld [vmem:[%s18555_s1 + $0x80] sm:$0xff]  }
0x133b   : > { %14804 = vmatprep.subr.mxu1 %v16067_v24 }
0x133c   : > { %14757 = vmatpush3.bf16.msra.mxu0 %v15842_v23  ;;  %v15864_v23 = vld [vmem:[%s18551_s3 + $0xa0] sm:$0xff]  }
0x133d   : > { %14758 = vmatprep.subr.bf16.mxu0 %v16067_v24 }
0x1340   : > { %14759 = vmatpush3.bf16.msra.mxu0 %v15843_v50  ;;  %v15865_v50 = vld [vmem:[%s18551_s3 + $0xa8] sm:$0xff]  }
0x1341   : > { %14784 = vmatprep.subr.bf16.mxu0 %v16067_v24 }
0x1343   : > { %14761 = vmatmul.mubr.bf16.vlgmr.msra.gmra.mrb[192].mxu0 %v8774_v0  ;;  %v15866_v0 = vld [vmem:[%s18551_s3 + $0xb0] sm:$0xff]   ;;  %s18557_s3 = sld [smem:[#allocation15_spill]] }
0x1344   : > { %14800 = vmatprep.mubr.msk.bf16.mxu0 %vm16069_vm0, %v16067_v24  ;;  %14785 = vmatpush3.bf16.msra.mxu0 %v15845_v60  ;;  %v15868_v60 = vld [vmem:[%s18555_s1] sm:$0xff]  }
0x1345   : > { %14786 = vmatprep.subr.bf16.mxu0 %v16067_v24 }
0x1348   : > { %14787 = vmatpush3.bf16.msra.mxu0 %v15847_v35  ;;  %v15870_v35 = vld [vmem:[%s18555_s1 + $0x10] sm:$0xff]  }
0x1349   : > { %14788 = vmatprep.subr.bf16.mxu0 %v16067_v24 }
0x134c   : > { %14789 = vmatpush3.bf16.msra.mxu0 %v15849_v18  ;;  %v15872_v18 = vld [vmem:[%s18555_s1 + $0x40] sm:$0xff]  }
0x134d   : > { %14790 = vmatprep.subr.bf16.mxu0 %v16067_v24 }
0x1350   : > { %14791 = vmatpush3.bf16.msra.mxu0 %v15851_v33  ;;  %v15873_v33 = vld [vmem:[%s18555_s1 + $0x48] sm:$0xff]  }
0x1351   : > { %14792 = vmatprep.subr.bf16.mxu0 %v16067_v24 }
0x1354   : > { %14793 = vmatpush3.bf16.msra.mxu0 %v15853_v41  ;;  %v9670_v41 = vshrl.u32 %v17415_v1, 16 }
0x1355   : > { %14794 = vmatprep.subr.bf16.mxu0 %v16067_v24 }
0x1356   : > { %v9672_v22 = vrot.slane %v9670_v41, 2 }
0x1358   : > { %14795 = vmatpush3.bf16.msra.mxu0 %v15855_v14  ;;  %v15875_v14 = vld [vmem:[%s18555_s1 + $0x58] sm:$0xff]  }
0x1359   : > { %14796 = vmatprep.subr.bf16.mxu0 %v16067_v24 }
0x135c   : > { %14797 = vmatpush3.bf16.msra.mxu0 %v15857_v46  ;;  %v9675_v46 = vrot.slane %v9673_v10, 3 }
0x135d   : > { %14798 = vmatprep.subr.bf16.mxu0 %v16067_v24 }
0x1360   : > { %14799 = vmatpush3.bf16.msra.mxu0 %v15859_v12  ;;  %v9676_v12 = vor.u32 %v9675_v46, %v9672_v22 }
0x1361   : > { %14834 = vmatprep.subr.mxu0 %v16067_v24 }
0x13f0   : > { %v8750_v17 = vpop.f32.mrb[180].mxu1 }
0x13f1   : > { %v14742_v31 = vpop.f32.mrb[181].mxu1 }
0x13f2   : > { %v8753_v34 = vpop.f32.mrb[182].mxu1  ;;  %v15878_v31 = vld [vmem:[%s18555_s1 + $0x90] sm:$0xff]  }
0x13f3   : > { %v14743_v57 = vpop.f32.mrb[183].mxu1  ;;  %v15879_v34 = vld [vmem:[%s18555_s1 + $0x98] sm:$0xff]  }
0x13f4   : > { %v9831_v57 = vrot.slane %v17415_v1, 3 }
0x13f6   : > { %v8662_v63 = vpop.f32.mrb[188].mxu0 }
0x13f7   : > { %v8751_v6 = vadd.f32 %v8750_v17, %v8662_v63  ;;  %v14722_v49 = vpop.f32.mrb[189].mxu0  ;;  %v15877_v17 = vld [vmem:[%s18555_s1 + $0x88] sm:$0xff]  }
0x13f8   : > { %v8665_v61 = vpop.f32.mrb[190].mxu0 }
0x13f9   : > { %v14723_v13 = vpop.f32.mrb[191].mxu0 }
0x1416   : > { %v8858_v45 = vpop.f32.mrb[192].mxu0 }
0x1417   : > { %v8864_v7 = vadd.f32 %v8858_v45, %v8751_v6  ;;  %v14762_v56 = vpop.f32.mrb[193].mxu0 }
0x1418   : > { %v8861_v9 = vpop.f32.mrb[194].mxu0  ;;  %v15881_v56 = vld [vmem:[%s18555_s1 + $0x28] sm:$0xff]  }
0x1419   : > { %v8870_v4 = vadd.f32 %v8869_v2, %v8864_v7  ;;  %v14763_v55 = vpop.f32.mrb[195].mxu0  ;;  %v15882_v9 = vld [vmem:[%s18555_s1 + $0x30] sm:$0xff]  }
0x141b   : > { %v8871_v3 = vmax.f32 %v8870_v4, 0.0 }
0x141d   : > { %v8876_v52 = vmul.f32 %v8875_v42, %v8871_v3 }
0x141f   : > { %v8881_v20 = vadd.f32 %v8880_v44, %v8876_v52 }
0x1421   : > { %v8882_v26 = vpack.c.bf16 %v8881_v20, %v8881_v20 }
0x1423   : > { %14781 = vmatmul.mubr.bf16.vlgmr.msra.gmra.mrb[184].mxu1 %v8882_v26  ;;  %14801 = vmatmul.mubr.bf16.vlgmr.msra.gmra.mrb[196].mxu0 %v8882_v26 }
0x1424   : > { %14806 = vmatprep.mubr.msk.f32.mxu1 %vm16069_vm0, %v16067_v24  ;;  %14836 = vmatprep.mubr.msk.f32.mxu0 %vm16069_vm0, %v16067_v24 }
0x14f6   : > { %v8981_v32 = vpop.f32.mrb[184].mxu1  ;;  %v9086_v39 = vpop.f32.mrb[196].mxu0 }
0x14f7   : > { %v14782_v28 = vpop.f32.mrb[185].mxu1  ;;  %v14802_v30 = vpop.f32.mrb[197].mxu0  ;;  %14805 = vmatpush3.msk.msra.mxu1 %vm18553_vm9, %v9086_v39 }
0x14f8   : > { %v8984_v29 = vpop.f32.mrb[186].mxu1  ;;  %v9089_v8 = vpop.f32.mrb[198].mxu0  ;;  %14807 = vmatmul.mubr.msk.f32.vlgmr.msra.gmra.mrb[162].mxu1 %vm7455_vm6, %v17764_v58  ;;  %14809 = vmatprep.subr.mxu1 %v16067_v24 }
0x14f9   : > { %v14783_v53 = vpop.f32.mrb[187].mxu1  ;;  %v14803_v16 = vpop.f32.mrb[199].mxu0  ;;  %14810 = vmatpush3.msk.msra.mxu1 %vm18554_vm1, %v8981_v32  ;;  %14811 = vmatprep.mubr.msk.f32.mxu1 %vm16069_vm0, %v16067_v24  ;;  %v15883_v29 = vld [vmem:[%s18555_s1 + $0x38] sm:$0xff]  }
0x14fa   : > { %14814 = vmatprep.subr.bf16.mxu1 %v16067_v24  ;;  %v13245_v53 = vld [vmem:[%s18557_s3] ss:$0 sm:$0xff]  ;;  %s18558_s3 = sld [smem:[#allocation18_spill]] }
0x14fc   : > { %14812 = vmatmul.mubr.msk.f32.vlgmr.msra.gmra.mrb[188].mxu1 %vm7455_vm6, %v17777_v21 }
0x14fd   : > { %14815 = vmatpush3.bf16.msra.mxu1 %v15860_v62  ;;  %14830 = vmatprep.mubr.msk.bf16.mxu1 %vm16069_vm0, %v16067_v24 }
0x14fe   : > { %14816 = vmatprep.subr.bf16.mxu1 %v16067_v24 }
0x1500   : > { %v15892_v41 = vld [vmem:[%s18558_s3] sm:$0xff]   ;;  %v15893_v10 = vld [vmem:[%s18558_s3 + $0x8] sm:$0xff]   ;;  %v15895_v22 = vld [vmem:[%s18558_s3 + $0x10] sm:$0xff]  }
0x1501   : > { %14817 = vmatpush3.bf16.msra.mxu1 %v15861_v11  ;;  %v15896_v46 = vld [vmem:[%s18558_s3 + $0x28] sm:$0xff]  }
0x1502   : > { %14818 = vmatprep.subr.bf16.mxu1 %v16067_v24 }
0x1505   : > { %14819 = vmatpush3.bf16.msra.mxu1 %v15862_v43  ;;  %v15884_v43 = vld [vmem:[%s18555_s1 + $0x60] sm:$0xff]  }
0x1506   : > { %14820 = vmatprep.subr.bf16.mxu1 %v16067_v24 }
0x1509   : > { %14821 = vmatpush3.bf16.msra.mxu1 %v15863_v19 }
0x150a   : > { %14822 = vmatprep.subr.bf16.mxu1 %v16067_v24 }
0x150d   : > { %14823 = vmatpush3.bf16.msra.mxu1 %v15864_v23  ;;  %v15885_v23 = vld [vmem:[%s18555_s1 + $0x68] sm:$0xff]  }
0x150e   : > { %14824 = vmatprep.subr.bf16.mxu1 %v16067_v24 }
0x1511   : > { %14825 = vmatpush3.bf16.msra.mxu1 %v15865_v50  ;;  %v15886_v50 = vld [vmem:[%s18555_s1 + $0x70] sm:$0xff]  }
0x1512   : > { %14826 = vmatprep.subr.bf16.mxu1 %v16067_v24 }
0x1515   : > { %14827 = vmatpush3.bf16.msra.mxu1 %v15866_v0 }
0x1516   : > { %14828 = vmatprep.subr.bf16.mxu1 %v16067_v24 }
0x1519   : > { %14829 = vmatpush3.bf16.msra.mxu1 %v15867_v40  ;;  %v15887_v40 = vld [vmem:[%s18555_s1 + $0x78] sm:$0xff]  }
0x151a   : > { %14851 = vmatprep.subr.bf16.mxu1 %v16067_v24 }
0x151c   : > { %14831 = vmatmul.mubr.bf16.vlgmr.msra.gmra.mrb[192].mxu1 %v8882_v26 }
0x151d   : > { %14852 = vmatpush3.bf16.msra.mxu1 %v15868_v60  ;;  %14859 = vmatprep.mubr.msk.bf16.mxu1 %vm16069_vm0, %v16067_v24 }
0x151e   : > { %14853 = vmatprep.subr.bf16.mxu1 %v16067_v24 }
0x1521   : > { %14854 = vmatpush3.bf16.msra.mxu1 %v15869_v36 }
0x1522   : > { %14855 = vmatprep.subr.bf16.mxu1 %v16067_v24 }
0x1525   : > { %14856 = vmatpush3.bf16.msra.mxu1 %v15870_v35  ;;  %v15888_v35 = vld [vmem:[%s18555_s1 + $0xa0] sm:$0xff]  }
0x1526   : > { %14857 = vmatprep.subr.bf16.mxu1 %v16067_v24 }
0x1529   : > { %14858 = vmatpush3.bf16.msra.mxu1 %v15871_v27 }
0x152a   : > { %14875 = vmatprep.subr.bf16.mxu1 %v16067_v24 }
0x152c   : > { %14860 = vmatmul.mubr.msk.bf16.vlgmr.msra.gmra.mrb[196].mxu1 %vm4640_vm12, %v9511_v25  ;;  %v15890_v25 = vld [vmem:[%s18555_s1 + $0xb0] sm:$0xff]  }
0x152d   : > { %14876 = vmatpush3.bf16.msra.mxu1 %v15872_v18  ;;  %14883 = vmatprep.mubr.msk.bf16.mxu1 %vm16069_vm0, %v16067_v24  ;;  %v15889_v18 = vld [vmem:[%s18555_s1 + $0xa8] sm:$0xff]  }
0x152e   : > { %14877 = vmatprep.subr.bf16.mxu1 %v16067_v24 }
0x1531   : > { %14878 = vmatpush3.bf16.msra.mxu1 %v15873_v33  ;;  %v15891_v33 = vld [vmem:[%s18555_s1 + $0xb8] sm:$0xff]   ;;  %s18559_s1 = sld [smem:[#allocation17_spill]] }
0x1532   : > { %14879 = vmatprep.subr.bf16.mxu1 %v16067_v24 }
0x1535   : > { %14880 = vmatpush3.bf16.msra.mxu1 %v15874_v54 }
0x1536   : > { %14881 = vmatprep.subr.bf16.mxu1 %v16067_v24 }
0x1539   : > { %14882 = vmatpush3.bf16.msra.mxu1 %v15875_v14  ;;  %v15894_v14 = vld [vmem:[%s18558_s3 + $0x20] sm:$0xff]  }
0x153a   : > { %14899 = vmatprep.subr.bf16.mxu1 %v16067_v24 }
0x153c   : > { %14884 = vmatmul.mubr.msk.bf16.vlgmr.msra.gmra.mrb[200].mxu1 %vm4640_vm12, %v9676_v12  ;;  %v15898_v12 = vld [vmem:[%s18558_s3 + $0x30] sm:$0xff]  }
0x153d   : > { %14900 = vmatpush3.bf16.msra.mxu1 %v15876_v38  ;;  %14907 = vmatprep.mubr.msk.bf16.mxu1 %vm16069_vm0, %v16067_v24  ;;  %v15897_v38 = vld [vmem:[%s18558_s3 + $0x18] sm:$0xff]  }
0x153e   : > { %14901 = vmatprep.subr.bf16.mxu1 %v16067_v24 }
0x1541   : > { %14902 = vmatpush3.bf16.msra.mxu1 %v15877_v17  ;;  %v15899_v17 = vld [vmem:[%s18558_s3 + $0x38] sm:$0xff]  }
0x1542   : > { %14903 = vmatprep.subr.bf16.mxu1 %v16067_v24 }
0x1545   : > { %14904 = vmatpush3.bf16.msra.mxu1 %v15878_v31 }
0x1546   : > { %14905 = vmatprep.subr.bf16.mxu1 %v16067_v24 }
0x1549   : > { %14906 = vmatpush3.bf16.msra.mxu1 %v15879_v34 }
0x154a   : > { %14923 = vmatprep.subr.bf16.mxu1 %v16067_v24 }
0x154c   : > { %14908 = vmatmul.mubr.msk.bf16.vlgmr.msra.gmra.mrb[204].mxu1 %vm4640_vm12, %v9831_v57 }
0x154d   : > { %14931 = vmatprep.mubr.msk.bf16.mxu1 %vm16069_vm0, %v16067_v24  ;;  %14924 = vmatpush3.bf16.msra.mxu1 %v15892_v41 }
0x154e   : > { %14925 = vmatprep.subr.bf16.mxu1 %v16067_v24 }
0x1551   : > { %14926 = vmatpush3.bf16.msra.mxu1 %v15893_v10 }
0x1552   : > { %14927 = vmatprep.subr.bf16.mxu1 %v16067_v24 }
0x1555   : > { %14928 = vmatpush3.bf16.msra.mxu1 %v15895_v22 }
0x1556   : > { %14929 = vmatprep.subr.bf16.mxu1 %v16067_v24 }
0x1559   : > { %14930 = vmatpush3.bf16.msra.mxu1 %v15897_v38 }
0x155a   : > { %14947 = vmatprep.subr.bf16.mxu1 %v16067_v24 }
0x15cb   : > { %v9161_v63 = vpop.f32.mrb[162].mxu1 }
0x15cc   : > { %v14808_v6 = vpop.f32.mrb[163].mxu1 }
0x15cf   : > { %v9234_v49 = vpop.f32.mrb[188].mxu1 }
0x15d0   : > { %v9235_v61 = vadd.f32 %v9234_v49, %v9161_v63  ;;  %v14813_v13 = vpop.f32.mrb[189].mxu1 }
0x15ef   : > { %v9337_v2 = vpop.f32.mrb[192].mxu1 }
0x15f0   : > { %v14832_v45 = vpop.f32.mrb[193].mxu1  ;;  %14835 = vmatpush3.msk.msra.mxu0 %vm18556_vm3, %v9337_v2 }
0x15f1   : > { %v9340_v1 = vpop.f32.mrb[194].mxu1  ;;  %14837 = vmatmul.mubr.msk.f32.vlgmr.msra.gmra.mrb[200].mxu0 %vm7455_vm6, %v17862_v59  ;;  %14839 = vmatprep.subr.bf16.mxu0 %v16067_v24 }
0x15f2   : > { %v14833_v7 = vpop.f32.mrb[195].mxu1  ;;  %14840 = vmatpush3.bf16.msra.mxu0 %v15880_v48  ;;  %14847 = vmatprep.mubr.msk.bf16.mxu0 %vm16069_vm0, %v16067_v24  ;;  %v9900_v1 = vld [vmem:[%s18559_s1] sm:$0x7]  ;;  %s18560_s1 = sld [smem:[#allocation20_spill]] }
0x15f3   : > { %14841 = vmatprep.subr.bf16.mxu0 %v16067_v24 }
0x15f6   : > { %14842 = vmatpush3.bf16.msra.mxu0 %v15881_v56 }
0x15f7   : > { %14843 = vmatprep.subr.bf16.mxu0 %v16067_v24 }
0x15fa   : > { %14844 = vmatpush3.bf16.msra.mxu0 %v15882_v9  ;;  %v9904_v9 = vrot.slane %v9900_v1, %v16525_v37 }
0x15fb   : > { %14845 = vmatprep.subr.bf16.mxu0 %v16067_v24 }
0x15fe   : > { %14846 = vmatpush3.bf16.msra.mxu0 %v15883_v29 }
0x15ff   : > { %v18111_v4 = vpop.f32.mrb[196].mxu1  ;;  %14863 = vmatprep.subr.bf16.mxu0 %v16067_v24 }
0x1600   : > { %v14861_v42 = vpop.f32.mrb[197].mxu1 }
0x1601   : > { %v9576_v55 = vpop.f32.mrb[198].mxu1 }
0x1602   : > { %v14862_v3 = vpop.f32.mrb[199].mxu1 }
0x160f   : > { %v18113_v44 = vpop.f32.mrb[200].mxu1 }
0x1610   : > { %v14885_v52 = vpop.f32.mrb[201].mxu1 }
0x1611   : > { %v9741_v20 = vpop.f32.mrb[202].mxu1 }
0x1612   : > { %v14886_v26 = vpop.f32.mrb[203].mxu1  ;;  %v9910_v20 = vrot.slane %v9900_v1, %v16532_v47 }
0x1613   : > { %v9915_v26 = vrot.slane %v9900_v1, %v16539_v51  ;;  %v15912_v1 = vld [vmem:[%s18560_s1 + $0x40] sm:$0xff]  }
0x161f   : > { %v18115_v32 = vpop.f32.mrb[204].mxu1 }
0x1620   : > { %v14909_v39 = vpop.f32.mrb[205].mxu1 }
0x1621   : > { %v9896_v28 = vpop.f32.mrb[206].mxu1 }
0x1622   : > { %v14910_v30 = vpop.f32.mrb[207].mxu1 }
0x16c4   : > { %v9412_v8 = vpop.f32.mrb[200].mxu0 }
0x16c5   : > { %v9416_v16 = vadd.f32 %v9412_v8, %v9235_v61  ;;  %v14838_v62 = vpop.f32.mrb[201].mxu0 }
0x16c6   : > { %v15901_v62 = vld [vmem:[%s18558_s3 + $0x48] sm:$0xff]  }
0x16c7   : > { %v9424_v11 = vadd.f32 %v13245_v53, %v9416_v16  ;;  %v15900_v53 = vld [vmem:[%s18558_s3 + $0x40] sm:$0xff]  }
0x16c9   : > { %v9426_v19 = vpack.c.bf16 %v9424_v11, %v9424_v11  ;;  %v15902_v11 = vld [vmem:[%s18558_s3 + $0x50] sm:$0xff]  }
0x16cb   : > { %14848 = vmatmul.mubr.msk.bf16.vlgmr.msra.gmra.mrb[204].mxu0 %vm4640_vm12, %v9426_v19  ;;  %v9598_v0 = vshll.u32 %v9426_v19, 16  ;;  %v9596_v36 = vshrl.u32 %v9426_v19, 16  ;;  %v9763_v54 = vrot.slane %v9426_v19, 1 }
0x16cc   : > { %14864 = vmatpush3.bf16.msra.mxu0 %v15884_v43  ;;  %14871 = vmatprep.mubr.msk.bf16.mxu0 %vm16069_vm0, %v16067_v24  ;;  %v15903_v43 = vld [vmem:[%s18558_s3 + $0x58] sm:$0xff]   ;;  %s18561_s3 = sld [smem:[#allocation19_spill]] }
0x16cd   : > { %14865 = vmatprep.subr.bf16.mxu0 %v16067_v24  ;;  %v9600_v60 = vrot.slane %v9598_v0, 1  ;;  %v15906_v0 = vld [vmem:[%s18560_s1 + $0x8] sm:$0xff]  }
0x16cf   : > { %v9601_v27 = vor.u32 %v9600_v60, %v9596_v36  ;;  %v15908_v60 = vld [vmem:[%s18560_s1 + $0x10] sm:$0xff]  }
0x16d0   : > { %14866 = vmatpush3.bf16.msra.mxu0 %v15885_v23  ;;  %v15904_v23 = vld [vmem:[%s18560_s1] sm:$0xff]   ;;  %v15909_v36 = vld [vmem:[%s18560_s1 + $0x30] sm:$0xff]  }
0x16d1   : > { %14867 = vmatprep.subr.bf16.mxu0 %v16067_v24 }
0x16d2   : > { %v10154_v38 = vld [vmem:[%s18561_s3] sm:$0x7]  ;;  %s18564_s3 = sld [smem:[#allocation22_spill]] }
0x16d4   : > { %14868 = vmatpush3.bf16.msra.mxu0 %v15886_v50  ;;  %v15905_v50 = vld [vmem:[%s18560_s1 + $0x20] sm:$0xff]  }
0x16d5   : > { %14869 = vmatprep.subr.bf16.mxu0 %v16067_v24 }
0x16d8   : > { %14870 = vmatpush3.bf16.msra.mxu0 %v15887_v40  ;;  %v15907_v40 = vld [vmem:[%s18560_s1 + $0x28] sm:$0xff]  }
0x16d9   : > { %14887 = vmatprep.subr.bf16.mxu0 %v16067_v24 }
0x16db   : > { %14872 = vmatmul.mubr.msk.bf16.vlgmr.msra.gmra.mrb[208].mxu0 %vm4640_vm12, %v9601_v27  ;;  %v15911_v27 = vld [vmem:[%s18560_s1 + $0x38] sm:$0xff]  }
0x16dc   : > { %14888 = vmatpush3.bf16.msra.mxu0 %v15888_v35  ;;  %14895 = vmatprep.mubr.msk.bf16.mxu0 %vm16069_vm0, %v16067_v24  ;;  %v15910_v35 = vld [vmem:[%s18560_s1 + $0x18] sm:$0xff]  }
0x16dd   : > { %14889 = vmatprep.subr.bf16.mxu0 %v16067_v24 }
0x16e0   : > { %14890 = vmatpush3.bf16.msra.mxu0 %v15889_v18 }
0x16e1   : > { %14891 = vmatprep.subr.bf16.mxu0 %v16067_v24 }
0x16e4   : > { %14892 = vmatpush3.bf16.msra.mxu0 %v15890_v25 }
0x16e5   : > { %14893 = vmatprep.subr.bf16.mxu0 %v16067_v24 }
0x16e8   : > { %14894 = vmatpush3.bf16.msra.mxu0 %v15891_v33 }
0x16e9   : > { %14911 = vmatprep.subr.bf16.mxu0 %v16067_v24 }
0x16eb   : > { %14896 = vmatmul.mubr.msk.bf16.vlgmr.msra.gmra.mrb[212].mxu0 %vm4640_vm12, %v9763_v54 }
0x16ec   : > { %14919 = vmatprep.mubr.msk.bf16.mxu0 %vm16069_vm0, %v16067_v24  ;;  %14912 = vmatpush3.bf16.msra.mxu0 %v15894_v14 }
0x16ed   : > { %14913 = vmatprep.subr.bf16.mxu0 %v16067_v24 }
0x16f0   : > { %14914 = vmatpush3.bf16.msra.mxu0 %v15896_v46 }
0x16f1   : > { %14915 = vmatprep.subr.bf16.mxu0 %v16067_v24 }
0x16f4   : > { %14916 = vmatpush3.bf16.msra.mxu0 %v15898_v12  ;;  %v10158_v12 = vrot.slane %v10154_v38, %v16525_v37 }
0x16f5   : > { %14917 = vmatprep.subr.bf16.mxu0 %v16067_v24 }
0x16f8   : > { %14918 = vmatpush3.bf16.msra.mxu0 %v15899_v17 }
0x16f9   : > { %14935 = vmatprep.subr.bf16.mxu0 %v16067_v24 }
0x179e   : > { %v9504_v31 = vpop.f32.mrb[204].mxu0 }
0x179f   : > { %v9574_v34 = vadd.f32 %v18111_v4, %v9504_v31  ;;  %v14849_v57 = vpop.f32.mrb[205].mxu0 }
0x17a0   : > { %v9507_v63 = vpop.f32.mrb[206].mxu0 }
0x17a1   : > { %v14850_v6 = vpop.f32.mrb[207].mxu0 }
0x17a2   : > { %v10164_v6 = vrot.slane %v10154_v38, %v16532_v47 }
0x17ae   : > { %v9663_v49 = vpop.f32.mrb[208].mxu0 }
0x17af   : > { %v9739_v61 = vadd.f32 %v18113_v44, %v9663_v49  ;;  %v14873_v13 = vpop.f32.mrb[209].mxu0 }
0x17b0   : > { %v9666_v48 = vpop.f32.mrb[210].mxu0  ;;  %v10169_v13 = vrot.slane %v10154_v38, %v16539_v51  ;;  %v10817_v38 = vshll.u32 %v17216_v15, 16 }
0x17b1   : > { %v9744_v2 = vadd.f32 %v9739_v61, %v9574_v34  ;;  %v14874_v45 = vpop.f32.mrb[211].mxu0 }
0x17be   : > { %v9825_v7 = vpop.f32.mrb[212].mxu0 }
0x17bf   : > { %v9894_v56 = vadd.f32 %v18115_v32, %v9825_v7  ;;  %v14897_v42 = vpop.f32.mrb[213].mxu0 }
0x17c0   : > { %v9828_v55 = vpop.f32.mrb[214].mxu0 }
0x17c1   : > { %v9899_v4 = vadd.f32 %v9894_v56, %v9744_v2  ;;  %v14898_v3 = vpop.f32.mrb[215].mxu0 }
0x17c3   : > { %v9905_v52 = vadd.f32 %v9904_v9, %v9899_v4 }
0x17c5   : > { %v9906_v44 = vmax.f32 %v9905_v52, 0.0 }
0x17c7   : > { %v9911_v39 = vmul.f32 %v9910_v20, %v9906_v44  ;;  %v15913_v20 = vld [vmem:[%s18560_s1 + $0x48] sm:$0xff]   ;;  %v15914_v44 = vld [vmem:[%s18560_s1 + $0x50] sm:$0xff]  }
0x17c9   : > { %v9916_v28 = vadd.f32 %v9915_v26, %v9911_v39  ;;  %v15915_v26 = vld [vmem:[%s18560_s1 + $0x58] sm:$0xff]   ;;  %s18566_s1 = sld [smem:[#allocation21_spill]] }
0x17cb   : > { %v9917_v30 = vpack.c.bf16 %v9916_v28, %v9916_v28 }
0x17cd   : > { %14932 = vmatmul.mubr.msk.bf16.vlgmr.msra.gmra.mrb[208].mxu1 %vm4640_vm12, %v9917_v30  ;;  %v9938_v32 = vshll.u32 %v9917_v30, 16  ;;  %v9936_v29 = vshrl.u32 %v9917_v30, 16  ;;  %v10085_v19 = vrot.slane %v9917_v30, 1 }
0x17ce   : > { %14955 = vmatprep.mubr.msk.bf16.mxu1 %vm16069_vm0, %v16067_v24  ;;  %14948 = vmatpush3.bf16.msra.mxu1 %v15904_v23  ;;  %v15920_v23 = vld [vmem:[%s18564_s3 + $0x38] sm:$0xff]  }
0x17cf   : > { %v9940_v8 = vrot.slane %v9938_v32, 1  ;;  %14949 = vmatprep.subr.bf16.mxu1 %v16067_v24 }
0x17d1   : > { %v9941_v16 = vor.u32 %v9940_v8, %v9936_v29 }
0x17d2   : > { %14950 = vmatpush3.bf16.msra.mxu1 %v15906_v0  ;;  %v13376_v0 = vld [vmem:[%s18566_s1] ss:$0 sm:$0xff]  ;;  %s18567_s1 = sld [smem:[#allocation24_spill]] }
0x17d3   : > { %14920 = vmatmul.mubr.msk.bf16.vlgmr.msra.gmra.mrb[216].mxu0 %vm4640_vm12, %v9941_v16  ;;  %14951 = vmatprep.subr.bf16.mxu1 %v16067_v24 }
0x17d4   : > { %14936 = vmatpush3.bf16.msra.mxu0 %v15900_v53  ;;  %14943 = vmatprep.mubr.msk.bf16.mxu0 %vm16069_vm0, %v16067_v24 }
0x17d5   : > { %14937 = vmatprep.subr.bf16.mxu0 %v16067_v24 }
0x17d6   : > { %14952 = vmatpush3.bf16.msra.mxu1 %v15908_v60 }
0x17d7   : > { %14953 = vmatprep.subr.bf16.mxu1 %v16067_v24 }
0x17d8   : > { %14938 = vmatpush3.bf16.msra.mxu0 %v15901_v62 }
0x17d9   : > { %14939 = vmatprep.subr.bf16.mxu0 %v16067_v24 }
0x17da   : > { %14954 = vmatpush3.bf16.msra.mxu1 %v15910_v35  ;;  %v15919_v35 = vld [vmem:[%s18564_s3] sm:$0xff]  }
0x17db   : > { %14971 = vmatprep.subr.mxu1 %v16067_v24 }
0x17dc   : > { %14940 = vmatpush3.bf16.msra.mxu0 %v15902_v11  ;;  %v15916_v11 = vld [vmem:[%s18564_s3 + $0x10] sm:$0xff]  }
0x17dd   : > { %14941 = vmatprep.subr.bf16.mxu0 %v16067_v24 }
0x17e0   : > { %14942 = vmatpush3.bf16.msra.mxu0 %v15903_v43  ;;  %v15917_v43 = vld [vmem:[%s18564_s3 + $0x18] sm:$0xff]  }
0x17e1   : > { %14959 = vmatprep.subr.bf16.mxu0 %v16067_v24 }
0x17e3   : > { %14944 = vmatmul.mubr.msk.bf16.vlgmr.msra.gmra.mrb[220].mxu0 %vm4640_vm12, %v10085_v19  ;;  %v15918_v19 = vld [vmem:[%s18564_s3 + $0x30] sm:$0xff]  }
0x17e4   : > { %14967 = vmatprep.mubr.msk.bf16.mxu0 %vm16069_vm0, %v16067_v24  ;;  %14960 = vmatpush3.bf16.msra.mxu0 %v15905_v50 }
0x17e5   : > { %14961 = vmatprep.subr.bf16.mxu0 %v16067_v24 }
0x17e8   : > { %14962 = vmatpush3.bf16.msra.mxu0 %v15907_v40 }
0x17e9   : > { %14963 = vmatprep.subr.bf16.mxu0 %v16067_v24 }
0x17ec   : > { %14964 = vmatpush3.bf16.msra.mxu0 %v15909_v36 }
0x17ed   : > { %14965 = vmatprep.subr.bf16.mxu0 %v16067_v24 }
0x17f0   : > { %14966 = vmatpush3.bf16.msra.mxu0 %v15911_v27 }
0x17f1   : > { %14976 = vmatprep.subr.mxu0 %v16067_v24 }
0x18a0   : > { %v10069_v18 = vpop.f32.mrb[208].mxu1 }
0x18a1   : > { %v14933_v25 = vpop.f32.mrb[209].mxu1 }
0x18a2   : > { %v10072_v33 = vpop.f32.mrb[210].mxu1  ;;  %v15921_v25 = vld [vmem:[%s18564_s3 + $0x8] sm:$0xff]  }
0x18a3   : > { %v14934_v54 = vpop.f32.mrb[211].mxu1 }
0x18a6   : > { %v10003_v41 = vpop.f32.mrb[216].mxu0 }
0x18a7   : > { %v10070_v10 = vadd.f32 %v10069_v18, %v10003_v41  ;;  %v14921_v14 = vpop.f32.mrb[217].mxu0  ;;  %v15922_v41 = vld [vmem:[%s18564_s3 + $0x50] sm:$0xff]  }
0x18a8   : > { %v10006_v22 = vpop.f32.mrb[218].mxu0  ;;  %v15923_v14 = vld [vmem:[%s18564_s3 + $0x20] sm:$0xff]  }
0x18a9   : > { %v14922_v46 = vpop.f32.mrb[219].mxu0  ;;  %v10687_v22 = vrot.slane %v17216_v15, 2 }
0x18aa   : > { %v10814_v46 = vshrl.u32 %v17216_v15, 16 }
0x18b6   : > { %v10147_v17 = vpop.f32.mrb[220].mxu0 }
0x18b7   : > { %v10153_v31 = vadd.f32 %v10147_v17, %v10070_v10  ;;  %v14945_v34 = vpop.f32.mrb[221].mxu0  ;;  %v15925_v17 = vld [vmem:[%s18564_s3 + $0x28] sm:$0xff]  }
0x18b8   : > { %v10150_v57 = vpop.f32.mrb[222].mxu0  ;;  %v10819_v34 = vrot.slane %v10817_v38, 3 }
0x18b9   : > { %v10159_v63 = vadd.f32 %v10158_v12, %v10153_v31  ;;  %v14946_v49 = vpop.f32.mrb[223].mxu0  ;;  %v15924_v12 = vld [vmem:[%s18564_s3 + $0x58] sm:$0xff]   ;;  %v10816_v31 = vrot.slane %v10814_v46, 2  ;;  %v15932_v46 = vld [vmem:[%s18567_s1 + $0x20] sm:$0xff]  }
0x18ba   : > { %v15927_v49 = vld [vmem:[%s18564_s3 + $0x48] sm:$0xff]  }
0x18bb   : > { %v10160_v61 = vmax.f32 %v10159_v63, 0.0  ;;  %v15926_v63 = vld [vmem:[%s18564_s3 + $0x40] sm:$0xff]   ;;  %s18568_s3 = sld [smem:[#allocation23_spill]] }
0x18bd   : > { %v10165_v48 = vmul.f32 %v10164_v6, %v10160_v61  ;;  %v10820_v6 = vor.u32 %v10819_v34, %v10816_v31  ;;  %v10943_v61 = vrot.slane %v17216_v15, 3  ;;  %v15931_v15 = vld [vmem:[%s18567_s1 + $0x18] sm:$0xff]  }
0x18bf   : > { %v10170_v2 = vadd.f32 %v10169_v13, %v10165_v48  ;;  %v15928_v13 = vld [vmem:[%s18567_s1] sm:$0xff]   ;;  %v15929_v48 = vld [vmem:[%s18567_s1 + $0x8] sm:$0xff]  }
0x18c1   : > { %v10171_v45 = vpack.c.bf16 %v10170_v2, %v10170_v2  ;;  %v15930_v2 = vld [vmem:[%s18567_s1 + $0x10] sm:$0xff]  }
0x18c3   : > { %14956 = vmatmul.mubr.msk.bf16.vlgmr.msra.gmra.mrb[212].mxu1 %vm4640_vm12, %v10171_v45  ;;  %14968 = vmatmul.mubr.msk.bf16.vlgmr.msra.gmra.mrb[224].mxu0 %vm4640_vm12, %v10171_v45 }
0x18c4   : > { %14973 = vmatprep.mubr.msk.f32.mxu1 %vm16069_vm0, %v16067_v24  ;;  %14978 = vmatprep.mubr.msk.f32.mxu0 %vm16069_vm0, %v16067_v24 }
0x1996   : > { %v10241_v7 = vpop.f32.mrb[212].mxu1  ;;  %v10314_v56 = vpop.f32.mrb[224].mxu0 }
0x1997   : > { %v14957_v9 = vpop.f32.mrb[213].mxu1  ;;  %v14969_v42 = vpop.f32.mrb[225].mxu0  ;;  %14972 = vmatpush3.msk.msra.mxu1 %vm18562_vm13, %v10314_v56  ;;  %14977 = vmatpush3.msk.msra.mxu0 %vm18563_vm7, %v10241_v7 }
0x1998   : > { %v10244_v55 = vpop.f32.mrb[214].mxu1  ;;  %v10317_v4 = vpop.f32.mrb[226].mxu0  ;;  %14981 = vmatprep.subr.bf16.mxu1 %v16067_v24  ;;  %14974 = vmatmul.mubr.msk.f32.vlgmr.msra.gmra.mrb[190].mxu1 %vm7455_vm6, %v17764_v58 }
0x1999   : > { %v14958_v3 = vpop.f32.mrb[215].mxu1  ;;  %v14970_v52 = vpop.f32.mrb[227].mxu0  ;;  %14982 = vmatpush3.bf16.msra.mxu1 %v15912_v1  ;;  %14979 = vmatmul.mubr.msk.f32.vlgmr.msra.gmra.mrb[202].mxu0 %vm7455_vm6, %v17777_v21 }
0x199a   : > { %14983 = vmatprep.subr.bf16.mxu1 %v16067_v24  ;;  %14989 = vmatprep.mubr.msk.bf16.mxu1 %vm16069_vm0, %v16067_v24 }
0x199b   : > { %14993 = vmatprep.subr.mxu0 %v16067_v24  ;;  %14995 = vmatprep.mubr.msk.f32.mxu0 %vm16069_vm0, %v16067_v24 }
0x199d   : > { %14984 = vmatpush3.bf16.msra.mxu1 %v15913_v20 }
0x199e   : > { %14985 = vmatprep.subr.bf16.mxu1 %v16067_v24 }
0x19a1   : > { %14986 = vmatpush3.bf16.msra.mxu1 %v15914_v44 }
0x19a2   : > { %14987 = vmatprep.subr.bf16.mxu1 %v16067_v24 }
0x19a5   : > { %14988 = vmatpush3.bf16.msra.mxu1 %v15915_v26 }
0x19a6   : > { %15014 = vmatprep.subr.bf16.mxu1 %v16067_v24 }
0x19a8   : > { %14990 = vmatmul.mubr.msk.bf16.vlgmr.msra.gmra.mrb[216].mxu1 %vm4640_vm12, %v10171_v45  ;;  %vm18571_vm12 = vmmov %vm18554_vm1 }
0x19a9   : > { %15018 = vmatprep.mubr.msk.bf16.mxu1 %vm16069_vm0, %v16067_v24  ;;  %15015 = vmatpush3.bf16.msra.mxu1 %v15918_v19 }
0x19aa   : > { %15016 = vmatprep.subr.bf16.mxu1 %v16067_v24 }
0x19ad   : > { %15017 = vmatpush3.bf16.msra.mxu1 %v15920_v23 }
0x19ae   : > { %15030 = vmatprep.subr.bf16.mxu1 %v16067_v24 }
0x1a6b   : > { %v10389_v39 = vpop.f32.mrb[190].mxu1 }
0x1a6c   : > { %v14975_v28 = vpop.f32.mrb[191].mxu1  ;;  %v10462_v30 = vpop.f32.mrb[202].mxu0 }
0x1a6d   : > { %v10463_v32 = vadd.f32 %v10462_v30, %v10389_v39  ;;  %v14980_v29 = vpop.f32.mrb[203].mxu0 }
0x1a7b   : > { %v10533_v8 = vpop.f32.mrb[216].mxu1 }
0x1a7c   : > { %v14991_v53 = vpop.f32.mrb[217].mxu1  ;;  %14994 = vmatpush3.msk.msra.mxu0 %vm18565_vm8, %v10533_v8 }
0x1a7d   : > { %v10536_v16 = vpop.f32.mrb[218].mxu1  ;;  %14996 = vmatmul.mubr.msk.f32.vlgmr.msra.gmra.mrb[228].mxu0 %vm7455_vm6, %v17862_v59  ;;  %14998 = vmatprep.subr.bf16.mxu0 %v16067_v24 }
0x1a7e   : > { %v14992_v62 = vpop.f32.mrb[219].mxu1  ;;  %15002 = vmatprep.mubr.msk.bf16.mxu0 %vm16069_vm0, %v16067_v24  ;;  %14999 = vmatpush3.bf16.msra.mxu0 %v15916_v11 }
0x1a7f   : > { %15000 = vmatprep.subr.bf16.mxu0 %v16067_v24 }
0x1a82   : > { %15001 = vmatpush3.bf16.msra.mxu0 %v15917_v43  ;;  %v11000_v43 = vld [vmem:[%s18568_s3] sm:$0x7]  ;;  %s18569_s3 = sld [smem:[#allocation26_spill]] }
0x1a83   : > { %15006 = vmatprep.subr.bf16.mxu0 %v16067_v24 }
0x1a88   : > { %v15934_v31 = vld [vmem:[%s18569_s3] sm:$0xff]   ;;  %v15935_v34 = vld [vmem:[%s18569_s3 + $0x10] sm:$0xff]  }
0x1b50   : > { %v10608_v50 = vpop.f32.mrb[228].mxu0 }
0x1b51   : > { %v10612_v40 = vadd.f32 %v10608_v50, %v10463_v32  ;;  %v14997_v60 = vpop.f32.mrb[229].mxu0  ;;  %v11004_v50 = vrot.slane %v11000_v43, %v16525_v37 }
0x1b53   : > { %v10620_v36 = vadd.f32 %v13376_v0, %v10612_v40 }
0x1b55   : > { %v10622_v27 = vpack.c.bf16 %v10620_v36, %v10620_v36 }
0x1b57   : > { %v10754_v18 = vshll.u32 %v10622_v27, 16  ;;  %15003 = vmatmul.mubr.msk.bf16.vlgmr.msra.gmra.mrb[232].mxu0 %vm3688_vm5, %v10622_v27  ;;  %v10752_v33 = vshrl.u32 %v10622_v27, 16  ;;  %v10887_v57 = vrot.slane %v10622_v27, 1  ;;  %v11010_v27 = vrot.slane %v11000_v43, %v16532_v47 }
0x1b58   : > { %15007 = vmatpush3.bf16.msra.mxu0 %v15919_v35  ;;  %15010 = vmatprep.mubr.msk.bf16.mxu0 %vm16069_vm0, %v16067_v24 }
0x1b59   : > { %v10756_v54 = vrot.slane %v10754_v18, 1  ;;  %15008 = vmatprep.subr.bf16.mxu0 %v16067_v24 }
0x1b5b   : > { %v10757_v10 = vor.u32 %v10756_v54, %v10752_v33 }
0x1b5c   : > { %15009 = vmatpush3.bf16.msra.mxu0 %v15921_v25  ;;  %v11015_v25 = vrot.slane %v11000_v43, %v16539_v51 }
0x1b5d   : > { %15019 = vmatmul.mubr.msk.bf16.vlgmr.msra.gmra.mrb[220].mxu1 %vm3688_vm5, %v10757_v10  ;;  %15022 = vmatprep.subr.bf16.mxu0 %v16067_v24 }
0x1b5e   : > { %15031 = vmatpush3.bf16.msra.mxu1 %v15922_v41  ;;  %15034 = vmatprep.mubr.msk.bf16.mxu1 %vm16069_vm0, %v16067_v24 }
0x1b5f   : > { %15011 = vmatmul.mubr.msk.bf16.vlgmr.msra.gmra.mrb[236].mxu0 %vm3688_vm5, %v10687_v22  ;;  %15032 = vmatprep.subr.bf16.mxu1 %v16067_v24 }
0x1b60   : > { %15023 = vmatpush3.bf16.msra.mxu0 %v15923_v14  ;;  %15026 = vmatprep.mubr.msk.bf16.mxu0 %vm16069_vm0, %v16067_v24 }
0x1b61   : > { %15024 = vmatprep.subr.bf16.mxu0 %v16067_v24 }
0x1b62   : > { %15033 = vmatpush3.bf16.msra.mxu1 %v15924_v12  ;;  %v15933_v12 = vld [vmem:[%s18567_s1 + $0x28] sm:$0xff]   ;;  %s18570_s1 = sld [smem:[#allocation25_spill]] }
0x1b63   : > { %15046 = vmatprep.subr.bf16.mxu1 %v16067_v24 }
0x1b64   : > { %15025 = vmatpush3.bf16.msra.mxu0 %v15925_v17 }
0x1b65   : > { %15035 = vmatmul.mubr.msk.bf16.vlgmr.msra.gmra.mrb[224].mxu1 %vm3688_vm5, %v10887_v57  ;;  %15038 = vmatprep.subr.bf16.mxu0 %v16067_v24  ;;  %v15936_v57 = vld [vmem:[%s18569_s3 + $0x8] sm:$0xff]  }
0x1b66   : > { %15050 = vmatprep.mubr.msk.bf16.mxu1 %vm16069_vm0, %v16067_v24  ;;  %15047 = vmatpush3.bf16.msra.mxu1 %v15930_v2 }
0x1b67   : > { %15027 = vmatmul.mubr.msk.bf16.vlgmr.msra.gmra.mrb[240].mxu0 %vm3688_vm5, %v10820_v6  ;;  %15048 = vmatprep.subr.bf16.mxu1 %v16067_v24 }
0x1b68   : > { %15039 = vmatpush3.bf16.msra.mxu0 %v15926_v63  ;;  %15042 = vmatprep.mubr.msk.bf16.mxu0 %vm16069_vm0, %v16067_v24  ;;  %v15937_v63 = vld [vmem:[%s18569_s3 + $0x18] sm:$0xff]  }
0x1b69   : > { %15040 = vmatprep.subr.bf16.mxu0 %v16067_v24 }
0x1b6a   : > { %15049 = vmatpush3.bf16.msra.mxu1 %v15931_v15 }
0x1b6b   : > { %15062 = vmatprep.subr.bf16.mxu1 %v16067_v24 }
0x1b6c   : > { %15041 = vmatpush3.bf16.msra.mxu0 %v15927_v49 }
0x1b6d   : > { %15054 = vmatprep.subr.bf16.mxu0 %v16067_v24 }
0x1b6f   : > { %15043 = vmatmul.mubr.msk.bf16.vlgmr.msra.gmra.mrb[244].mxu0 %vm3688_vm5, %v10943_v61 }
0x1b70   : > { %15058 = vmatprep.mubr.msk.bf16.mxu0 %vm16069_vm0, %v16067_v24  ;;  %15055 = vmatpush3.bf16.msra.mxu0 %v15928_v13 }
0x1b71   : > { %15056 = vmatprep.subr.bf16.mxu0 %v16067_v24 }
0x1b74   : > { %15057 = vmatpush3.bf16.msra.mxu0 %v15929_v48 }
0x1b75   : > { %15070 = vmatprep.subr.bf16.mxu0 %v16067_v24 }
0x1c2a   : > { %v10680_v45 = vpop.f32.mrb[232].mxu0 }
0x1c2b   : > { %v15004_v1 = vpop.f32.mrb[233].mxu0 }
0x1c2c   : > { %v10683_v7 = vpop.f32.mrb[234].mxu0 }
0x1c2d   : > { %v15005_v56 = vpop.f32.mrb[235].mxu0  ;;  %v11206_v7 = vld [vmem:[%s18570_s1] sm:$0x7]  ;;  %s18573_s1 = sld [smem:[#allocation28_spill]] }
0x1c2e   : > { %v11210_v56 = vrot.slane %v11206_v7, %v16525_v37 }
0x1c30   : > { %v10807_v9 = vpop.f32.mrb[220].mxu1 }
0x1c31   : > { %v15020_v42 = vpop.f32.mrb[221].mxu1 }
0x1c32   : > { %v10737_v55 = vpop.f32.mrb[236].mxu0  ;;  %v10810_v4 = vpop.f32.mrb[222].mxu1 }
0x1c33   : > { %v10738_v3 = vadd.f32 %v10737_v55, %v10680_v45  ;;  %v15012_v52 = vpop.f32.mrb[237].mxu0  ;;  %v15021_v20 = vpop.f32.mrb[223].mxu1 }
0x1c34   : > { %v10740_v44 = vpop.f32.mrb[238].mxu0  ;;  %v11216_v52 = vrot.slane %v11206_v7, %v16532_v47 }
0x1c35   : > { %v15013_v26 = vpop.f32.mrb[239].mxu0 }
0x1c36   : > { %v11221_v26 = vrot.slane %v11206_v7, %v16539_v51 }
0x1c38   : > { %v10937_v39 = vpop.f32.mrb[224].mxu1 }
0x1c39   : > { %v15036_v28 = vpop.f32.mrb[225].mxu1 }
0x1c3a   : > { %v10870_v30 = vpop.f32.mrb[240].mxu0  ;;  %v10940_v32 = vpop.f32.mrb[226].mxu1 }
0x1c3b   : > { %v10871_v29 = vadd.f32 %v10870_v30, %v10807_v9  ;;  %v15028_v8 = vpop.f32.mrb[241].mxu0  ;;  %v15037_v53 = vpop.f32.mrb[227].mxu1  ;;  %v15938_v32 = vld [vmem:[%s18569_s3 + $0x20] sm:$0xff]  }
0x1c3c   : > { %v10873_v16 = vpop.f32.mrb[242].mxu0 }
0x1c3d   : > { %v10876_v62 = vadd.f32 %v10871_v29, %v10738_v3  ;;  %v15029_v11 = vpop.f32.mrb[243].mxu0 }
0x1c42   : > { %v10993_v19 = vpop.f32.mrb[244].mxu0 }
0x1c43   : > { %v10994_v23 = vadd.f32 %v10993_v19, %v10937_v39  ;;  %v15044_v0 = vpop.f32.mrb[245].mxu0 }
0x1c44   : > { %v10996_v40 = vpop.f32.mrb[246].mxu0  ;;  %v11792_v0 = vshrl.u32 %v16767_v5, 16 }
0x1c45   : > { %v10999_v60 = vadd.f32 %v10994_v23, %v10876_v62  ;;  %v15045_v36 = vpop.f32.mrb[247].mxu0  ;;  %v15939_v23 = vld [vmem:[%s18569_s3 + $0x28] sm:$0xff]   ;;  %v11795_v40 = vshll.u32 %v16767_v5, 16  ;;  %s18575_s3 = sld [smem:[#allocation27_spill]] }
0x1c47   : > { %v11005_v35 = vadd.f32 %v11004_v50, %v10999_v60  ;;  %v15941_v50 = vld [vmem:[%s18573_s1 + $0x10] sm:$0xff]   ;;  %v11794_v60 = vrot.slane %v11792_v0, 2  ;;  %v11797_v36 = vrot.slane %v11795_v40, 3 }
0x1c49   : > { %v11006_v18 = vmax.f32 %v11005_v35, 0.0  ;;  %v15942_v35 = vld [vmem:[%s18573_s1 + $0x20] sm:$0xff]  }
0x1c4b   : > { %v11011_v33 = vmul.f32 %v11010_v27, %v11006_v18  ;;  %v11798_v27 = vor.u32 %v11797_v36, %v11794_v60  ;;  %v11905_v18 = vrot.slane %v16767_v5, 3 }
0x1c4d   : > { %v11016_v54 = vadd.f32 %v11015_v25, %v11011_v33 }
0x1c4f   : > { %v11017_v41 = vpack.c.bf16 %v11016_v54, %v11016_v54 }
0x1c51   : > { %15059 = vmatmul.mubr.msk.bf16.vlgmr.msra.gmra.mrb[248].mxu0 %vm3688_vm5, %v11017_v41  ;;  %v11030_v10 = vshll.u32 %v11017_v41, 16  ;;  %v11028_v14 = vshrl.u32 %v11017_v41, 16  ;;  %v11149_v17 = vrot.slane %v11017_v41, 1 }
0x1c52   : > { %15074 = vmatprep.mubr.msk.bf16.mxu0 %vm16069_vm0, %v16067_v24  ;;  %15071 = vmatpush3.bf16.msra.mxu0 %v15934_v31 }
0x1c53   : > { %v11032_v22 = vrot.slane %v11030_v10, 1  ;;  %15072 = vmatprep.subr.bf16.mxu0 %v16067_v24 }
0x1c55   : > { %v11033_v38 = vor.u32 %v11032_v22, %v11028_v14 }
0x1c56   : > { %15073 = vmatpush3.bf16.msra.mxu0 %v15936_v57 }
0x1c57   : > { %15051 = vmatmul.mubr.msk.bf16.vlgmr.msra.gmra.mrb[228].mxu1 %vm3688_vm5, %v11033_v38  ;;  %15086 = vmatprep.subr.mxu0 %v16067_v24 }
0x1c58   : > { %15063 = vmatpush3.bf16.msra.mxu1 %v15932_v46  ;;  %15066 = vmatprep.mubr.msk.bf16.mxu1 %vm16069_vm0, %v16067_v24 }
0x1c59   : > { %15064 = vmatprep.subr.bf16.mxu1 %v16067_v24 }
0x1c5c   : > { %15065 = vmatpush3.bf16.msra.mxu1 %v15933_v12 }
0x1c5d   : > { %15078 = vmatprep.subr.bf16.mxu1 %v16067_v24 }
0x1c5f   : > { %15067 = vmatmul.mubr.msk.bf16.vlgmr.msra.gmra.mrb[232].mxu1 %vm3688_vm5, %v11149_v17 }
0x1c60   : > { %15082 = vmatprep.mubr.msk.bf16.mxu1 %vm16069_vm0, %v16067_v24  ;;  %15079 = vmatpush3.bf16.msra.mxu1 %v15935_v34 }
0x1c61   : > { %15080 = vmatprep.subr.bf16.mxu1 %v16067_v24 }
0x1c64   : > { %15081 = vmatpush3.bf16.msra.mxu1 %v15937_v63 }
0x1c65   : > { %15091 = vmatprep.subr.mxu1 %v16067_v24 }
0x1d24   : > { %v11137_v6 = vpop.f32.mrb[248].mxu0 }
0x1d25   : > { %v15060_v49 = vpop.f32.mrb[249].mxu0 }
0x1d26   : > { %v11140_v61 = vpop.f32.mrb[250].mxu0 }
0x1d27   : > { %v15061_v13 = vpop.f32.mrb[251].mxu0 }
0x1d2a   : > { %v11083_v48 = vpop.f32.mrb[228].mxu1 }
0x1d2b   : > { %v11138_v2 = vadd.f32 %v11137_v6, %v11083_v48  ;;  %v15052_v15 = vpop.f32.mrb[229].mxu1  ;;  %v15943_v48 = vld [vmem:[%s18573_s1 + $0x8] sm:$0xff]  }
0x1d2c   : > { %v11086_v45 = vpop.f32.mrb[230].mxu1  ;;  %v13451_v15 = vld [vmem:[%s18575_s3] ss:$0 sm:$0xff]  ;;  %s18577_s3 = sld [smem:[#allocation29_spill]] }
0x1d2d   : > { %v15053_v1 = vpop.f32.mrb[231].mxu1 }
0x1d32   : > { %v11199_v9 = vpop.f32.mrb[232].mxu1 }
0x1d33   : > { %v11205_v42 = vadd.f32 %v11199_v9, %v11138_v2  ;;  %v15068_v55 = vpop.f32.mrb[233].mxu1 }
0x1d34   : > { %v11202_v4 = vpop.f32.mrb[234].mxu1 }
0x1d35   : > { %v11211_v3 = vadd.f32 %v11210_v56, %v11205_v42  ;;  %v15069_v20 = vpop.f32.mrb[235].mxu1  ;;  %v15944_v56 = vld [vmem:[%s18573_s1 + $0x18] sm:$0xff]  }
0x1d37   : > { %v11212_v44 = vmax.f32 %v11211_v3, 0.0  ;;  %v15945_v3 = vld [vmem:[%s18573_s1 + $0x28] sm:$0xff]  }
0x1d39   : > { %v11217_v39 = vmul.f32 %v11216_v52, %v11212_v44  ;;  %v15946_v44 = vld [vmem:[%s18576_s4] sm:$0xff]   ;;  %s18578_s4 = sld [smem:[#allocation6_spill]] }
0x1d3b   : > { %v11222_v28 = vadd.f32 %v11221_v26, %v11217_v39 }
0x1d3d   : > { %v11223_v30 = vpack.c.bf16 %v11222_v28, %v11222_v28 }
0x1d3f   : > { %15075 = vmatmul.mubr.msk.bf16.vlgmr.msra.gmra.mrb[252].mxu0 %vm3688_vm5, %v11223_v30  ;;  %15083 = vmatmul.mubr.msk.bf16.vlgmr.msra.gmra.mrb[236].mxu1 %vm3688_vm5, %v11223_v30 }
0x1d40   : > { %15088 = vmatprep.mubr.msk.f32.mxu0 %vm16069_vm0, %v16067_v24  ;;  %15093 = vmatprep.mubr.msk.f32.mxu1 %vm16069_vm0, %v16067_v24 }
0x1e12   : > { %v11277_v29 = vpop.f32.mrb[252].mxu0  ;;  %v11334_v8 = vpop.f32.mrb[236].mxu1 }
0x1e13   : > { %v15076_v53 = vpop.f32.mrb[253].mxu0  ;;  %v15084_v16 = vpop.f32.mrb[237].mxu1  ;;  %15087 = vmatpush3.msk.msra.mxu0 %vm18571_vm12, %v11334_v8  ;;  %15092 = vmatpush3.msk.msra.mxu1 %vm18572_vm10, %v11277_v29 }
0x1e14   : > { %v11280_v62 = vpop.f32.mrb[254].mxu0  ;;  %v11337_v11 = vpop.f32.mrb[238].mxu1  ;;  %15096 = vmatprep.subr.bf16.mxu0 %v16067_v24  ;;  %15089 = vmatmul.mubr.msk.f32.vlgmr.msra.gmra.mrb[230].mxu0 %vm7455_vm6, %v17764_v58  ;;  %v15940_v58 = vld [vmem:[%s18573_s1] sm:$0xff]   ;;  %s18579_s1 = sld [smem:[#allocation31_spill]] }
0x1e15   : > { %v15077_v43 = vpop.f32.mrb[255].mxu0  ;;  %v15085_v19 = vpop.f32.mrb[239].mxu1  ;;  %15097 = vmatpush3.bf16.msra.mxu0 %v15938_v32  ;;  %15100 = vmatprep.mubr.msk.bf16.mxu0 %vm16069_vm0, %v16067_v24 }
0x1e16   : > { %15098 = vmatprep.subr.bf16.mxu0 %v16067_v24  ;;  %15094 = vmatmul.mubr.msk.f32.vlgmr.msra.gmra.mrb[240].mxu1 %vm7455_vm6, %v17777_v21  ;;  %v11681_v21 = vrot.slane %v16767_v5, 2  ;;  %v11956_v43 = vld [vmem:[%s18577_s3] sm:$0x7]  ;;  %s18581_s3 = sld [smem:[#allocation7_spill]] }
0x1e17   : > { %15104 = vmatprep.subr.mxu1 %v16067_v24  ;;  %15106 = vmatprep.mubr.msk.f32.mxu1 %vm16069_vm0, %v16067_v24  ;;  %v11966_v36 = vrot.slane %v11956_v43, %v16532_v47 }
0x1e19   : > { %15099 = vmatpush3.bf16.msra.mxu0 %v15939_v23 }
0x1e1a   : > { %15115 = vmatprep.subr.bf16.mxu0 %v16067_v24 }
0x1e1c   : > { %15101 = vmatmul.mubr.msk.bf16.vlgmr.msra.gmra.mrb[0].mxu0 %vm3688_vm5, %v11223_v30  ;;  %vm18574_vm5 = vmmov %vm18554_vm1 }
0x1e1d   : > { %15116 = vmatpush3.bf16.msra.mxu0 %v15940_v58  ;;  %15117 = vmatprep.mubr.msk.bf16.mxu0 %vm16069_vm0, %v16067_v24  ;;  %v11960_v58 = vrot.slane %v11956_v43, %v16525_v37 }
0x1e1e   : > { %15127 = vmatprep.subr.bf16.mxu0 %v16067_v24 }
0x1e24   : > { %15118 = vmatmul.mubr.msk.bf16.vlgmr.msra.gmra.mrb[4].mxu0 %vm2193_vm4, %v11681_v21 }
0x1e25   : > { %15128 = vmatpush3.bf16.msra.mxu0 %v15941_v50  ;;  %15129 = vmatprep.mubr.msk.bf16.mxu0 %vm16069_vm0, %v16067_v24 }
0x1e26   : > { %15139 = vmatprep.subr.bf16.mxu0 %v16067_v24 }
0x1e2c   : > { %15130 = vmatmul.mubr.msk.bf16.vlgmr.msra.gmra.mrb[8].mxu0 %vm2193_vm4, %v11798_v27  ;;  %v11971_v27 = vrot.slane %v11956_v43, %v16539_v51 }
0x1e2d   : > { %15140 = vmatpush3.bf16.msra.mxu0 %v15942_v35  ;;  %15141 = vmatprep.mubr.msk.bf16.mxu0 %vm16069_vm0, %v16067_v24 }
0x1e2e   : > { %15151 = vmatprep.subr.bf16.mxu0 %v16067_v24 }
0x1e34   : > { %15142 = vmatmul.mubr.msk.bf16.vlgmr.msra.gmra.mrb[12].mxu0 %vm2193_vm4, %v11905_v18 }
0x1e35   : > { %15153 = vmatprep.mubr.msk.bf16.mxu0 %vm16069_vm0, %v16067_v24 }
0x1ee7   : > { %v11409_v25 = vpop.f32.mrb[230].mxu0 }
0x1ee8   : > { %v15090_v33 = vpop.f32.mrb[231].mxu0 }
0x1ee9   : > { %v11482_v54 = vpop.f32.mrb[240].mxu1 }
0x1eea   : > { %v11483_v41 = vadd.f32 %v11482_v54, %v11409_v25  ;;  %v15095_v10 = vpop.f32.mrb[241].mxu1  ;;  %v16072_v54 = vmov 65535  }
0x1eeb   : > { %v12041_v10 = vld [vmem:[%s18578_s4] sm:$0x7]  ;;  %s13476_s4 = sshll.u32 %s16340_s0, 4  ;;  %s16073_s0 = smov [#allocation2]  }
0x1eec   : > { %s18414_s6 = scalar_lea.hbm %s16317_s17, %s13476_s4  ;;  %s15959_s9 = sshll.u32 %s16073_s0, 4  ;;  %s15960_s9 = int_to_ptr.vmem [resolvable:$false] %s15959_s9 }
0x1eed   : > { %s15961_s10 = scalar_lea.vmem %s15960_s9, 32 }
0x1eef   : > { %v11537_v14 = vpop.f32.mrb[0].mxu0 }
0x1ef0   : > { %v15102_v22 = vpop.f32.mrb[1].mxu0  ;;  %15105 = vmatpush3.msk.msra.mxu1 %vm18574_vm5, %v11537_v14 }
0x1ef1   : > { %v11540_v46 = vpop.f32.mrb[2].mxu0  ;;  %15107 = vmatmul.mubr.msk.f32.vlgmr.msra.gmra.mrb[242].mxu1 %vm7455_vm6, %v17862_v59  ;;  %15109 = vmatprep.subr.bf16.mxu1 %v16067_v24  ;;  %vm12054_vm6 = vcmask 1042432  }
0x1ef2   : > { %v15103_v5 = vpop.f32.mrb[3].mxu0  ;;  %15111 = vmatprep.mubr.msk.bf16.mxu1 %vm16069_vm0, %v16067_v24  ;;  %15110 = vmatpush3.bf16.msra.mxu1 %v15943_v48  ;;  %v11976_v46 = vld [vmem:[%s18579_s1] sm:$0x7]  ;;  %s1397_s1 = sand.u32 1, %s16009_s23  }
0x1ef3   : > { %15121 = vmatprep.subr.bf16.mxu1 %v16067_v24  ;;  %v11980_v5 = vrot.slane %v11976_v46, %v16525_v37  ;;  %s12172_s7 = scalar_lea.sflag [#allocation3], %s1397_s1 }
0x1ef7   : > { %v11725_v38 = vpop.f32.mrb[4].mxu0 }
0x1ef8   : > { %v15119_v12 = vpop.f32.mrb[5].mxu0 }
0x1ef9   : > { %v11728_v17 = vpop.f32.mrb[6].mxu0 }
0x1efa   : > { %v15120_v31 = vpop.f32.mrb[7].mxu0  ;;  %v12034_v17 = vrot.slane %v11976_v46, %v16532_v47 }
0x1eff   : > { %v11842_v34 = vpop.f32.mrb[8].mxu0 }
0x1f00   : > { %v15131_v57 = vpop.f32.mrb[9].mxu0 }
0x1f01   : > { %v11845_v63 = vpop.f32.mrb[10].mxu0  ;;  %v12039_v57 = vrot.slane %v11976_v46, %v16539_v51 }
0x1f02   : > { %v15132_v6 = vpop.f32.mrb[11].mxu0 }
0x1f07   : > { %v11949_v49 = vpop.f32.mrb[12].mxu0 }
0x1f08   : > { %v15143_v61 = vpop.f32.mrb[13].mxu0 }
0x1f09   : > { %v11952_v59 = vpop.f32.mrb[14].mxu0 }
0x1f0a   : > { %v15144_v13 = vpop.f32.mrb[15].mxu0  ;;  %v12042_v59 = vld [vmem:[%s18581_s3] sm:$0x1]  ;;  %s1398_s3 = scalar_lea.vmem [#allocation2], %s1397_s1 }
0x1f0b   : > { %v12048_v13 = vrot.slane %v12042_v59, %v16525_v37  ;;  %s12184_s5 = sshll.u32 %s1398_s3, 4  ;;  %s18416_s5 = int_to_ptr.vmem [resolvable:$true] %s12184_s5 }
0x1f0c   : > { %s15955_s8 = scalar_lea.vmem %s18416_s5, 16  ;;  %p15962_p0 = scmp.lt.s32.totalorder %s18416_s5, %s15960_s9 }
0x1f0d   : > { %p15956_p11 = scmp.ne.s32.totalorder %s18416_s5, %s15955_s8  ;;  %p15963_p1 = scmp.lt.s32.totalorder %s15961_s10, %s15955_s8 }
0x1f0f   : > { %p15957_p12 = pnand %p15956_p11, %p16357_p5  ;;  %p15964_p2 = por %p15963_p1, %p15962_p0 }
0x1f11   : > { %p15958_p13 = pneg %p15957_p12 }
0x1f13   : > { %p15965_p3 = pnand %p15964_p2, %p15958_p13 }
0x1fc4   : > { %v11612_v2 = vpop.f32.mrb[242].mxu1 }
0x1fc5   : > { %v11616_v45 = vadd.f32 %v11612_v2, %v11483_v41  ;;  %v15108_v1 = vpop.f32.mrb[243].mxu1  ;;  %v12055_v41 = vsel %vm18580_vm11, 4294967295, %v16072_v54 }
0x1fc6   : > { %v12056_v14 = vsel %vm12054_vm6, %v12055_v41, 0 }
0x1fc7   : > { %v11624_v7 = vadd.f32 %v13451_v15, %v11616_v45  ;;  %v12058_v22 = vand.u32 %v12056_v14, %v12041_v10 }
0x1fc9   : > { %v11626_v9 = vpack.c.bf16 %v11624_v7, %v11624_v7  ;;  %15152 = vmatpush3.bf16.msra.mxu0 %v12058_v22 }
0x1fcb   : > { %v11738_v42 = vshll.u32 %v11626_v9, 16  ;;  %15112 = vmatmul.mubr.msk.bf16.vlgmr.msra.gmra.mrb[244].mxu1 %vm2193_vm4, %v11626_v9  ;;  %v11736_v4 = vshrl.u32 %v11626_v9, 16  ;;  %v11855_v20 = vrot.slane %v11626_v9, 1 }
0x1fcc   : > { %15122 = vmatpush3.bf16.msra.mxu1 %v15944_v56  ;;  %15123 = vmatprep.mubr.msk.bf16.mxu1 %vm16069_vm0, %v16067_v24 }
0x1fcd   : > { %v11740_v55 = vrot.slane %v11738_v42, 1  ;;  %15133 = vmatprep.subr.bf16.mxu1 %v16067_v24 }
0x1fcf   : > { %v11741_v52 = vor.u32 %v11740_v55, %v11736_v4 }
0x1fd3   : > { %15124 = vmatmul.mubr.msk.bf16.vlgmr.msra.gmra.mrb[248].mxu1 %vm2193_vm4, %v11741_v52 }
0x1fd4   : > { %15134 = vmatpush3.bf16.msra.mxu1 %v15945_v3  ;;  %15135 = vmatprep.mubr.msk.bf16.mxu1 %vm16069_vm0, %v16067_v24 }
0x1fd5   : > { %15145 = vmatprep.subr.bf16.mxu1 %v16067_v24 }
0x1fdb   : > { %15136 = vmatmul.mubr.msk.bf16.vlgmr.msra.gmra.mrb[252].mxu1 %vm2193_vm4, %v11855_v20 }
0x1fdc   : > { %15147 = vmatprep.mubr.msk.bf16.mxu1 %vm16069_vm0, %v16067_v24  ;;  %15146 = vmatpush3.bf16.msra.mxu1 %v15946_v44 }
0x1fdd   : > { %15157 = vmatprep.subr.bf16.mxu1 %v16067_v24 }
0x209e   : > { %v11674_v26 = vpop.f32.mrb[244].mxu1 }
0x209f   : > { %v11726_v39 = vadd.f32 %v11725_v38, %v11674_v26  ;;  %v15113_v28 = vpop.f32.mrb[245].mxu1 }
0x20a0   : > { %v11677_v30 = vpop.f32.mrb[246].mxu1 }
0x20a1   : > { %v15114_v32 = vpop.f32.mrb[247].mxu1 }
0x20a6   : > { %v11785_v29 = vpop.f32.mrb[248].mxu1 }
0x20a7   : > { %v11843_v8 = vadd.f32 %v11842_v34, %v11785_v29  ;;  %v15125_v53 = vpop.f32.mrb[249].mxu1 }
0x20a8   : > { %v11788_v16 = vpop.f32.mrb[250].mxu1 }
0x20a9   : > { %v11848_v62 = vadd.f32 %v11843_v8, %v11726_v39  ;;  %v15126_v11 = vpop.f32.mrb[251].mxu1 }
0x20ae   : > { %v11899_v19 = vpop.f32.mrb[252].mxu1 }
0x20af   : > { %v11950_v23 = vadd.f32 %v11949_v49, %v11899_v19  ;;  %v15137_v50 = vpop.f32.mrb[253].mxu1 }
0x20b0   : > { %v11902_v21 = vpop.f32.mrb[254].mxu1 }
0x20b1   : > { %v11955_v0 = vadd.f32 %v11950_v23, %v11848_v62  ;;  %v15138_v40 = vpop.f32.mrb[255].mxu1 }
0x20b3   : > { %v11961_v60 = vadd.f32 %v11960_v58, %v11955_v0 }
0x20b5   : > { %v11962_v35 = vmax.f32 %v11961_v60, 0.0 }
0x20b7   : > { %v11967_v18 = vmul.f32 %v11966_v36, %v11962_v35 }
0x20b9   : > { %v11972_v25 = vadd.f32 %v11971_v27, %v11967_v18 }
0x20bb   : > { %v11973_v33 = vpack.c.bf16 %v11972_v25, %v11972_v25 }
0x20bd   : > { %15148 = vmatmul.mubr.msk.bf16.vlgmr.msra.gmra.mrb[16].mxu1 %vm2193_vm4, %v11973_v33  ;;  %vm12050_vm4 = vcmask 39936  }
0x20be   : > { %15159 = vmatprep.mubr.msk.bf16.mxu1 %vm16069_vm0, %v16067_v24  ;;  %15158 = vmatpush3.bf16.msra.mxu1 %v12058_v22  ;;  %vm12101_vm0 = vcmask 35840  }
0x2190   : > { %v12024_v38 = vpop.f32.mrb[16].mxu1 }
0x2191   : > { %v12025_v12 = vadd.f32 %v12024_v38, %v11980_v5  ;;  %v15149_v31 = vpop.f32.mrb[17].mxu1 }
0x2192   : > { %v12027_v34 = vpop.f32.mrb[18].mxu1 }
0x2193   : > { %v12030_v24 = vmax.f32 %v12025_v12, 0.0  ;;  %v15150_v63 = vpop.f32.mrb[19].mxu1 }
0x2195   : > { %v12035_v6 = vmul.f32 %v12034_v17, %v12030_v24 }
0x2197   : > { %v12040_v49 = vadd.f32 %v12039_v57, %v12035_v6 }
0x2199   : > { %v12043_v61 = vpack.c.bf16 %v12040_v49, %v12040_v49 }
0x219b   : > { %15154 = vmatmul.mubr.msk.bf16.vlgmr.msra.gmra.mrb[16].mxu0 %vm12050_vm4, %v12043_v61 }
0x226e   : > { %v12094_v48 = vpop.f32.mrb[16].mxu0 }
0x226f   : > { %v12095_v2 = vadd.f32 %v12094_v48, %v12048_v13  ;;  %v15155_v15 = vpop.f32.mrb[17].mxu0 }
0x2270   : > { %v12097_v45 = vpop.f32.mrb[18].mxu0 }
0x2271   : > { %15947 = vtanh.f32 %v12095_v2  ;;  %v15156_v47 = vpop.f32.mrb[19].mxu0 }
0x2272   : > { %15949 = vtanh.f32 %v12042_v59 }
0x227b   : > { %v15948_v1 = vpop.eup %15947 }
0x227c   : > { %v12102_v51 = vsel %vm12101_vm0, %v15948_v1, 0.0  ;;  %v15950_v42 = vpop.eup %15949 }
0x227d   : > { %v12103_v7 = vrot.slane %v12102_v51, 4  ;;  %v12110_v3 = vmul.f32 152.0, %v15950_v42 }
0x227f   : > { %v12104_v56 = vadd.f32 %v12103_v7, %v12102_v51 }
0x2281   : > { %v12105_v9 = vrot.slane %v12104_v56, 2 }
0x2283   : > { %v12106_v55 = vadd.f32 %v12105_v9, %v12104_v56 }
0x2285   : > { %v12107_v4 = vrot.slane %v12106_v55, 1 }
0x2287   : > { %v12108_v52 = vadd.f32 %v12107_v4, %v12106_v55 }
0x2289   : > { %v12111_v20 = vadd.f32 %v12110_v3, %v12108_v52 }
0x228b   : > { %v12113_v37 = vmul.f32 0.0064102565, %v12111_v20 }
0x228d   : > { %v12114_v44 = vpack.c.bf16 %v12113_v37, %v12113_v37 }
0x228f   : > { %15160 = vmatmul.mubr.msk.bf16.vlgmr.msra.gmra.mrb[20].mxu1 %vm12050_vm4, %v12114_v44 }
0x2362   : > { %v12152_v26 = vpop.f32.mrb[20].mxu1 }
0x2363   : > { %v12153_v39 = vadd.f32 %v12152_v26, %v12042_v59  ;;  %v15161_v28 = vpop.f32.mrb[21].mxu1 }
0x2364   : > { %v12155_v30 = vpop.f32.mrb[22].mxu1 }
0x2365   : > { %v15162_v32 = vpop.f32.mrb[23].mxu1  ;;  %v12159_v29 = vsel %vm12158_vm14, %v12153_v39, -inf }
0x2366   : > { %12160 = vmax.xlane.f32.xlu0 %v12159_v29 }
0x23f3   : > { %v12161_v8 = vpop.xlane.xlu0 %12160 }
0x23f4   : > { %v12162_v53 = vsub.f32 %v12153_v39, %v12161_v8 }
0x23f6   : > { %v12163_v16 = vmul.f32 1.442695, %v12162_v53 }
0x23f8   : > { %15951 = vpow2.f32 %v12163_v16 }
0x2402   : > { %v15952_v62 = vpop.eup %15951 }
0x2403   : > { %v12165_v11 = vsel %vm12158_vm14, %v15952_v62, 0.0 }
0x2404   : > { %12166 = vadd.xlane.f32.xlu0 %v12165_v11 }
0x2491   : > { %v12167_v43 = vpop.xlane.xlu0 %12166 }
0x2492   : > { %15953 = vrcp.f32 %v12167_v43 }
0x249c   : > { %v15954_v19 = vpop.eup %15953 }
0x249d   : > { %v12169_v23 = vmul.f32 %v15954_v19, %v15952_v62 }
0x249f   : > { %12170 = vst.msk [vmem:[%s1398_s3] sm:$0x1] %vm12158_vm14, %v12169_v23 }
0x24a0   : > { %15968 = shalt.err (!%p15965_p3)
}
0x24a1   : > { %s15969_s1 = scalar_lea.hbm %s18414_s6, 16  ;;  %s15973_s4 = scalar_lea.hbm %s16317_s17, 32 }
0x24a2   : > { %p15970_p4 = scmp.ne.s32.totalorder %s18414_s6, %s15969_s1  ;;  %p15974_p9 = scmp.lt.u32.totalorder %s18414_s6, %s16317_s17 }
0x24a3   : > { %p15975_p10 = scmp.lt.u32.totalorder %s15973_s4, %s15969_s1  ;;  %p15977_p12 = scmp.lt.u32.totalorder %s15969_s1, %s18414_s6 }
0x24a4   : > { %p15971_p7 = pnand %p15970_p4, %p16357_p5 }
0x24a5   : > { %p15976_p11 = por %p15975_p10, %p15974_p9 }
0x24a6   : > { %p15972_p8 = pneg %p15971_p7 }
0x24a7   : > { %p15978_p0 = por %p15977_p12, %p15976_p11 }
0x24a9   : > { %p15979_p13 = pnand %p15978_p0, %p15972_p8 }
0x24ab   : > { %15982 = shalt.err (!%p15979_p13)
}
0x24ac   : > { %15349 = dma.vmem_to_hbm [thread:$0]  (%p16357_p5), %s18416_s5, 16, %s18414_s6, %s12172_s7  }
0x24ad PF: > { %p15355_p1 = scmp.ge.s32.totalorder %s16017_s28, 2  ;;  %s12196_s9 = sand.u32 1, %s16005_s22  }
0x24ae   : > { %s12197_s8 = scalar_lea.sflag [#allocation3], %s12196_s9 }
0x24af   : > { %p15352_p2 = pnand %p15355_p1, %p16361_p6 }
0x24b1   : > { %16000 = dma.done.wait (!%p15352_p2), %s12197_s8, 16  }
0x24b2   : > { %16002 = vsyncadd (!%p15352_p2), %s12197_s8, 4294967280  ;;  %p105_p3 = scmp.ge.s32.totalorder %s16344_s2, 4   ;;  %s18582_s22 = smov %s16009_s23 }
0x24b3   : > { %s18583_s23 = smov %s16013_s26  ;;  %s18584_s26 = smov %s16355_s11 }
0x24b4   : > { %s18585_s28 = smov %s16344_s2  ;;  %107 = sbr.rel (!%p105_p3) target bundleno = 93 (0x5d), region = 332 }
0x24bb   :  { %12201 = vsyncpa [#allocation3], 1 }
0x24bc   :  { %12203 = vsyncpa [#allocation3 + $0x1], 1 }

</bundles_post_ra>
